<compile_context>
chip_gen: v6e
topology: v6e:2x2x1
jax: 0.10.0
libtpu: 0.0.40
codegen_flags: <defaults>
</compile_context>

<pallas_src>
import functools
import math

import jax
import jax.numpy as jnp
from jax.experimental import pallas as pl
from jax.experimental.pallas import tpu as pltpu


_INV_SQRT2 = 0.7071067811865476

# Weight order as passed to the kernel (expa weights pre-split top/bottom).
_W_ORDER = (
    "comp0_0", "comp1_0", "comp2_0", "comp3_0", "comp4_0",
    "expa3_1:top", "expa3_1:bot",
    "expa2_2:top", "expa2_2:bot",
    "expa1_3:top", "expa1_3:bot",
    "expa0_4:top", "expa0_4:bot",
    "reve1", "reve2", "reve3", "reve4", "reve5",
)
_B_ORDER = (
    "comp0_0", "comp1_0", "comp2_0", "comp3_0", "comp4_0",
    "expa3_1", "expa2_2", "expa1_3", "expa0_4",
    "reve1", "reve2", "reve3", "reve4", "reve5",
)
_NW = len(_W_ORDER)   # 18
_NB = len(_B_ORDER)   # 14


def _gelu(z):
    # Exact (erf-based) GELU in f32 — matches ACT2FN['gelu'] / nn.GELU().
    # TODO(synk): tanh-approx GELU would move the transcendental to the EUP
    # slot but deviates from the module's exact-erf semantics; kept exact.
    return 0.5 * z * (1.0 + jax.lax.erf(z * jnp.float32(_INV_SQRT2)))


# ---------------------------------------------------------------------------
# Fused whole-U kernel: one row-tile of x in, five row-tiles of output out.
# refs = (x_ref, w_0..w_17, b_0..b_13, out_0..out_4)
# ---------------------------------------------------------------------------
def _fused_u_kernel(*refs):
    x_ref = refs[0]
    w = refs[1:1 + _NW]
    b = refs[1 + _NW:1 + _NW + _NB]
    o = refs[1 + _NW + _NB:]

    def lin(wi, bi, a):
        # gelu(a @ W + b): bf16 operands, f32 MXU accumulation, bf16 result.
        z = jnp.dot(a, w[wi][...], preferred_element_type=jnp.float32)
        return _gelu(z + b[bi][...]).astype(jnp.bfloat16)

    def lin2(wt, wb, bi, a1, a2):
        # gelu(concat([a1, a2], -1) @ W + b) with the concat eliminated:
        # the weight was pre-split in the wrapper into contiguous top/bottom
        # blocks, so both matmul operands are full VMEM blocks (no slicing).
        z = jnp.dot(a1, w[wt][...], preferred_element_type=jnp.float32)
        z = z + jnp.dot(a2, w[wb][...], preferred_element_type=jnp.float32)
        return _gelu(z + b[bi][...]).astype(jnp.bfloat16)

    def head(wi, bi, a, out_ref):
        z = jnp.dot(a, w[wi][...], preferred_element_type=jnp.float32)
        out_ref[...] = _gelu(z + b[bi][...]).astype(out_ref.dtype)

    x = x_ref[...].astype(jnp.bfloat16)

    # contracting path
    x0_0 = lin(0, 0, x)
    x1_0 = lin(1, 1, x0_0)
    x2_0 = lin(2, 2, x1_0)
    x3_0 = lin(3, 3, x2_0)
    x4_0 = lin(4, 4, x3_0)
    head(17, 13, x4_0, o[4])          # result[4] = reve5(x4_0)

    # expanding path with skip "concats"; heads interleaved so activations
    # retire as soon as their last consumer has run.
    x3_1 = lin2(5, 6, 5, x3_0, x4_0)
    head(16, 12, x3_1, o[3])          # result[3] = reve4(x3_1)
    x2_2 = lin2(7, 8, 6, x2_0, x3_1)
    head(15, 11, x2_2, o[2])          # result[2] = reve3(x2_2)
    x1_3 = lin2(9, 10, 7, x1_0, x2_2)
    head(14, 10, x1_3, o[1])          # result[1] = reve2(x1_3)
    x0_4 = lin2(11, 12, 8, x0_0, x1_3)
    head(13, 9, x0_4, o[0])           # result[0] = reve1(x0_4)


# ---------------------------------------------------------------------------
# Wrapper
# ---------------------------------------------------------------------------
def _round_up(a, b):
    return (a + b - 1) // b * b


@functools.lru_cache(maxsize=1)
def _vmem_capacity_bytes():
    try:
        return int(pltpu.get_tpu_info().vmem_capacity_bytes)
    except Exception:
        return 64 * 1024 * 1024   # conservative fallback (v7x per-TensorCore)


def _pick_tile_and_limit(M):
    vmem_cap = _vmem_capacity_bytes()
    if vmem_cap >= 100 * 1024 * 1024:        # v5e / v6e: 128 MiB physical VMEM
        tm_max, vmem_limit = 512, 96 * 1024 * 1024
    else:                                    # v7x: 64 MiB per TensorCore
        tm_max, vmem_limit = 256, 48 * 1024 * 1024
    # Aim for >= 2 grid steps (lets the "parallel" row axis shard across two
    # TensorCores on v7x) while keeping row tiles a multiple of 8 sublanes.
    tm = min(tm_max, _round_up(max((M + 1) // 2, 8), 8))
    return tm, vmem_limit


def _flatten_params(params):
    """-> (18 bf16 weights in _W_ORDER, 14 f32 (1,N) biases in _B_ORDER)."""
    weights = []
    for name in _W_ORDER:
        if ":" in name:
            base, part = name.split(":")
            wfull = params[base][0]
            # Split point = width of the first concat operand, which for every
            # expa layer equals its own output width (wfull.shape[1]).
            k1 = wfull.shape[1]
            wmat = wfull[:k1] if part == "top" else wfull[k1:]
        else:
            wmat = params[name][0]
        weights.append(wmat.astype(jnp.bfloat16))
    biases = [params[name][1].reshape(1, -1).astype(jnp.float32)
              for name in _B_ORDER]
    return weights, biases


def fused_u_forward(x, params, *, tm=None, vmem_limit_bytes=None):
    """x: [M, size1] f32 -> tuple of 5 arrays, each [M, size2] f32."""
    M, size1 = x.shape
    size2 = params["reve1"][0].shape[1]

    auto_tm, auto_limit = _pick_tile_and_limit(M)
    tm = auto_tm if tm is None else tm
    vmem_limit_bytes = auto_limit if vmem_limit_bytes is None else vmem_limit_bytes

    M_pad = _round_up(M, tm)
    x_p = x if M_pad == M else jnp.pad(x, ((0, M_pad - M), (0, 0)))

    weights, biases = _flatten_params(params)

    # x is tiled over rows; weights/biases are grid-invariant (VMEM-resident).
    in_specs = [pl.BlockSpec((tm, size1), lambda i: (i, 0))]
    for arr in (*weights, *biases):
        in_specs.append(pl.BlockSpec(arr.shape, lambda i: (0, 0)))

    out_shape = tuple(
        jax.ShapeDtypeStruct((M_pad, size2), x.dtype) for _ in range(5))
    out_specs = tuple(
        pl.BlockSpec((tm, size2), lambda i: (i, 0)) for _ in range(5))

    w_elems = sum(a.size for a in weights)              # ~4.16e6
    gelu_elems = sum(a.size for a in biases)            # 7552 per row
    bytes_accessed = (
        x_p.size * x_p.dtype.itemsize
        + sum(a.size * a.dtype.itemsize for a in weights)
        + sum(a.size * a.dtype.itemsize for a in biases)
        + 5 * M_pad * size2 * jnp.dtype(x.dtype).itemsize)
    cost = pl.CostEstimate(
        flops=2 * M_pad * w_elems,
        transcendentals=M_pad * gelu_elems,
        bytes_accessed=bytes_accessed)

    outs = pl.pallas_call(
        _fused_u_kernel,
        out_shape=out_shape,
        grid_spec=pltpu.PrefetchScalarGridSpec(
            num_scalar_prefetch=0,
            grid=(M_pad // tm,),
            in_specs=in_specs,
            out_specs=out_specs,
        ),
        compiler_params=pltpu.CompilerParams(
            dimension_semantics=("parallel",),
            vmem_limit_bytes=vmem_limit_bytes,
        ),
        cost_estimate=cost,
    )(x_p, *weights, *biases)

    if M_pad != M:
        outs = tuple(o[:M] for o in outs)
    return outs


# ---------------------------------------------------------------------------
# Parameter construction (deterministic, PyTorch-Linear-style uniform init)
# ---------------------------------------------------------------------------
def _init_linear(key, in_dim, out_dim):
    kw, kb = jax.random.split(key)
    bound = 1.0 / math.sqrt(in_dim)
    # Stored directly as [in, out] (i.e. W^T of torch's [out, in]) for x @ W.
    w = jax.random.uniform(kw, (in_dim, out_dim), jnp.float32, -bound, bound)
    b = jax.random.uniform(kb, (out_dim,), jnp.float32, -bound, bound)
    return w, b


def make_params(size1=768, size2=768, num=6, seed=0):
    size_sp = [size1 - 128 * (i + 1) for i in range(num - 1)]
    layer_dims = {
        "comp0_0": (size1, size_sp[0]),
        "comp1_0": (size_sp[0], size_sp[1]),
        "comp2_0": (size_sp[1], size_sp[2]),
        "comp3_0": (size_sp[2], size_sp[3]),
        "comp4_0": (size_sp[3], size_sp[4]),
        "expa3_1": (size_sp[3] + size_sp[4], size_sp[3]),
        "expa2_2": (size_sp[2] + size_sp[3], size_sp[2]),
        "expa1_3": (size_sp[1] + size_sp[2], size_sp[1]),
        "expa0_4": (size_sp[0] + size_sp[1], size_sp[0]),
        "reve1": (size_sp[0], size2),
        "reve2": (size_sp[1], size2),
        "reve3": (size_sp[2], size2),
        "reve4": (size_sp[3], size2),
        "reve5": (size_sp[4], size2),
    }
    base = jax.random.PRNGKey(seed)
    params = {}
    for idx, (name, (din, dout)) in enumerate(layer_dims.items()):
        params[name] = _init_linear(jax.random.fold_in(base, idx), din, dout)
    return params


# ---------------------------------------------------------------------------
# Forward pass (mirrors model_U_split.forward exactly)
# ---------------------------------------------------------------------------
@jax.jit
def model_u_split_forward(params, x1):
    """x1: [batch, seq, size1] -> tuple of 5 arrays, each [batch, seq, size2]."""
    batch, seq, size1 = x1.shape
    x = x1.reshape(batch * seq, size1)
    outs = fused_u_forward(x, params)
    return tuple(o.reshape(batch, seq, -1) for o in outs)


# ---------------------------------------------------------------------------
# Reference (pure JAX, f32) for a sanity check
# ---------------------------------------------------------------------------
def _ref_forward(params, x1):
    def lyr(name, inp):
        w, b = params[name]
        z = inp @ w + b
        return 0.5 * z * (1.0 + jax.lax.erf(z / jnp.sqrt(2.0)))

    b_, s_, d_ = x1.shape
    x = x1.reshape(b_ * s_, d_)
    x0_0 = lyr("comp0_0", x)
    x1_0 = lyr("comp1_0", x0_0)
    x2_0 = lyr("comp2_0", x1_0)
    x3_0 = lyr("comp3_0", x2_0)
    x4_0 = lyr("comp4_0", x3_0)
    x3_1 = lyr("expa3_1", jnp.concatenate([x3_0, x4_0], -1))
    x2_2 = lyr("expa2_2", jnp.concatenate([x2_0, x3_1], -1))
    x1_3 = lyr("expa1_3", jnp.concatenate([x1_0, x2_2], -1))
    x0_4 = lyr("expa0_4", jnp.concatenate([x0_0, x1_3], -1))
    outs = (
        lyr("reve1", x0_4), lyr("reve2", x1_3), lyr("reve3", x2_2),
        lyr("reve4", x3_1), lyr("reve5", x4_0),
    )
    return tuple(o.reshape(b_, s_, -1) for o in outs)


if __name__ == "__main__":
    SIZE1, SIZE2, NUM = 768, 768, 6   # feature dims fixed by the module's __init__
    BATCH, SEQ = 2, 4                 # small leading dims -> M = 8 rows

    params = make_params(SIZE1, SIZE2, NUM, seed=0)
    x1 = jax.random.normal(jax.random.PRNGKey(0), (BATCH, SEQ, SIZE1), jnp.float32)

    outs = model_u_split_forward(params, x1)
    outs = jax.block_until_ready(outs)

    refs = _ref_forward(params, x1)
    for o, r in zip(outs, refs):
        assert o.shape == (BATCH, SEQ, SIZE2)
        # bf16 MXU operands with f32 accumulation -> tolerance relaxed vs the
        # pure-f32 reference (intentional trade; see perf notes at top).
        assert jnp.max(jnp.abs(o - r)) < 5e-2

    print("KERNEL_OK")
</pallas_src>

<mosaic_0001>
module attributes {stable_mosaic.version = 11 : i64} {
  func.func @_fused_u_kernel(%arg0: i32, %arg1: memref<8x768xf32, #tpu.memory_space<vmem>>, %arg2: memref<768x640xbf16, #tpu.memory_space<vmem>>, %arg3: memref<640x512xbf16, #tpu.memory_space<vmem>>, %arg4: memref<512x384xbf16, #tpu.memory_space<vmem>>, %arg5: memref<384x256xbf16, #tpu.memory_space<vmem>>, %arg6: memref<256x128xbf16, #tpu.memory_space<vmem>>, %arg7: memref<256x256xbf16, #tpu.memory_space<vmem>>, %arg8: memref<128x256xbf16, #tpu.memory_space<vmem>>, %arg9: memref<384x384xbf16, #tpu.memory_space<vmem>>, %arg10: memref<256x384xbf16, #tpu.memory_space<vmem>>, %arg11: memref<512x512xbf16, #tpu.memory_space<vmem>>, %arg12: memref<384x512xbf16, #tpu.memory_space<vmem>>, %arg13: memref<640x640xbf16, #tpu.memory_space<vmem>>, %arg14: memref<512x640xbf16, #tpu.memory_space<vmem>>, %arg15: memref<640x768xbf16, #tpu.memory_space<vmem>>, %arg16: memref<512x768xbf16, #tpu.memory_space<vmem>>, %arg17: memref<384x768xbf16, #tpu.memory_space<vmem>>, %arg18: memref<256x768xbf16, #tpu.memory_space<vmem>>, %arg19: memref<128x768xbf16, #tpu.memory_space<vmem>>, %arg20: memref<1x640xf32, #tpu.memory_space<vmem>>, %arg21: memref<1x512xf32, #tpu.memory_space<vmem>>, %arg22: memref<1x384xf32, #tpu.memory_space<vmem>>, %arg23: memref<1x256xf32, #tpu.memory_space<vmem>>, %arg24: memref<1x128xf32, #tpu.memory_space<vmem>>, %arg25: memref<1x256xf32, #tpu.memory_space<vmem>>, %arg26: memref<1x384xf32, #tpu.memory_space<vmem>>, %arg27: memref<1x512xf32, #tpu.memory_space<vmem>>, %arg28: memref<1x640xf32, #tpu.memory_space<vmem>>, %arg29: memref<1x768xf32, #tpu.memory_space<vmem>>, %arg30: memref<1x768xf32, #tpu.memory_space<vmem>>, %arg31: memref<1x768xf32, #tpu.memory_space<vmem>>, %arg32: memref<1x768xf32, #tpu.memory_space<vmem>>, %arg33: memref<1x768xf32, #tpu.memory_space<vmem>>, %arg34: memref<8x768xf32, #tpu.memory_space<vmem>>, %arg35: memref<8x768xf32, #tpu.memory_space<vmem>>, %arg36: memref<8x768xf32, #tpu.memory_space<vmem>>, %arg37: memref<8x768xf32, #tpu.memory_space<vmem>>, %arg38: memref<8x768xf32, #tpu.memory_space<vmem>>) attributes {dimension_semantics = [#tpu.dimension_semantics<parallel>], iteration_bounds = array<i64: 1>, scalar_prefetch = 0 : i64, scratch_operands = 0 : i64, tpu.core_type = #tpu.core_type<tc>, window_params = [{transform_indices = @transform_0, window_bounds = array<i64: 8, 768>}, {pipeline_mode = #tpu.pipeline_mode<synchronous>, transform_indices = @transform_1, window_bounds = array<i64: 768, 640>}, {pipeline_mode = #tpu.pipeline_mode<synchronous>, transform_indices = @transform_2, window_bounds = array<i64: 640, 512>}, {pipeline_mode = #tpu.pipeline_mode<synchronous>, transform_indices = @transform_3, window_bounds = array<i64: 512, 384>}, {pipeline_mode = #tpu.pipeline_mode<synchronous>, transform_indices = @transform_4, window_bounds = array<i64: 384, 256>}, {pipeline_mode = #tpu.pipeline_mode<synchronous>, transform_indices = @transform_5, window_bounds = array<i64: 256, 128>}, {pipeline_mode = #tpu.pipeline_mode<synchronous>, transform_indices = @transform_6, window_bounds = array<i64: 256, 256>}, {pipeline_mode = #tpu.pipeline_mode<synchronous>, transform_indices = @transform_7, window_bounds = array<i64: 128, 256>}, {pipeline_mode = #tpu.pipeline_mode<synchronous>, transform_indices = @transform_8, window_bounds = array<i64: 384, 384>}, {pipeline_mode = #tpu.pipeline_mode<synchronous>, transform_indices = @transform_9, window_bounds = array<i64: 256, 384>}, {pipeline_mode = #tpu.pipeline_mode<synchronous>, transform_indices = @transform_10, window_bounds = array<i64: 512, 512>}, {pipeline_mode = #tpu.pipeline_mode<synchronous>, transform_indices = @transform_11, window_bounds = array<i64: 384, 512>}, {pipeline_mode = #tpu.pipeline_mode<synchronous>, transform_indices = @transform_12, window_bounds = array<i64: 640, 640>}, {pipeline_mode = #tpu.pipeline_mode<synchronous>, transform_indices = @transform_13, window_bounds = array<i64: 512, 640>}, {pipeline_mode = #tpu.pipeline_mode<synchronous>, transform_indices = @transform_14, window_bounds = array<i64: 640, 768>}, {pipeline_mode = #tpu.pipeline_mode<synchronous>, transform_indices = @transform_15, window_bounds = array<i64: 512, 768>}, {pipeline_mode = #tpu.pipeline_mode<synchronous>, transform_indices = @transform_16, window_bounds = array<i64: 384, 768>}, {pipeline_mode = #tpu.pipeline_mode<synchronous>, transform_indices = @transform_17, window_bounds = array<i64: 256, 768>}, {pipeline_mode = #tpu.pipeline_mode<synchronous>, transform_indices = @transform_18, window_bounds = array<i64: 128, 768>}, {pipeline_mode = #tpu.pipeline_mode<synchronous>, transform_indices = @transform_19, window_bounds = array<i64: 1, 640>}, {pipeline_mode = #tpu.pipeline_mode<synchronous>, transform_indices = @transform_20, window_bounds = array<i64: 1, 512>}, {pipeline_mode = #tpu.pipeline_mode<synchronous>, transform_indices = @transform_21, window_bounds = array<i64: 1, 384>}, {pipeline_mode = #tpu.pipeline_mode<synchronous>, transform_indices = @transform_22, window_bounds = array<i64: 1, 256>}, {pipeline_mode = #tpu.pipeline_mode<synchronous>, transform_indices = @transform_23, window_bounds = array<i64: 1, 128>}, {pipeline_mode = #tpu.pipeline_mode<synchronous>, transform_indices = @transform_24, window_bounds = array<i64: 1, 256>}, {pipeline_mode = #tpu.pipeline_mode<synchronous>, transform_indices = @transform_25, window_bounds = array<i64: 1, 384>}, {pipeline_mode = #tpu.pipeline_mode<synchronous>, transform_indices = @transform_26, window_bounds = array<i64: 1, 512>}, {pipeline_mode = #tpu.pipeline_mode<synchronous>, transform_indices = @transform_27, window_bounds = array<i64: 1, 640>}, {pipeline_mode = #tpu.pipeline_mode<synchronous>, transform_indices = @transform_28, window_bounds = array<i64: 1, 768>}, {pipeline_mode = #tpu.pipeline_mode<synchronous>, transform_indices = @transform_29, window_bounds = array<i64: 1, 768>}, {pipeline_mode = #tpu.pipeline_mode<synchronous>, transform_indices = @transform_30, window_bounds = array<i64: 1, 768>}, {pipeline_mode = #tpu.pipeline_mode<synchronous>, transform_indices = @transform_31, window_bounds = array<i64: 1, 768>}, {pipeline_mode = #tpu.pipeline_mode<synchronous>, transform_indices = @transform_32, window_bounds = array<i64: 1, 768>}, {transform_indices = @transform_33, window_bounds = array<i64: 8, 768>}, {transform_indices = @transform_34, window_bounds = array<i64: 8, 768>}, {transform_indices = @transform_35, window_bounds = array<i64: 8, 768>}, {transform_indices = @transform_36, window_bounds = array<i64: 8, 768>}, {transform_indices = @transform_37, window_bounds = array<i64: 8, 768>}]} {
    %c0 = arith.constant 0 : index
    %c0_0 = arith.constant 0 : index
    %0 = vector.load %arg1[%c0, %c0_0] : memref<8x768xf32, #tpu.memory_space<vmem>>, vector<8x768xf32>
    %1 = arith.truncf %0 : vector<8x768xf32> to vector<8x768xbf16>
    %c0_1 = arith.constant 0 : index
    %c0_2 = arith.constant 0 : index
    %2 = vector.load %arg2[%c0_1, %c0_2] : memref<768x640xbf16, #tpu.memory_space<vmem>>, vector<768x640xbf16>
    %cst = arith.constant dense<0.000000e+00> : vector<8x640xf32>
    %3 = tpu.matmul %1, %2, %cst {dimension_numbers = #tpu.dot_dimension_numbers<[1], [0], [0], [1], [0, 0, 1, 1], [], []>} : vector<8x768xbf16>, vector<768x640xbf16>, vector<8x640xf32> -> vector<8x640xf32>
    %c0_3 = arith.constant 0 : index
    %c0_4 = arith.constant 0 : index
    %4 = vector.load %arg20[%c0_3, %c0_4] : memref<1x640xf32, #tpu.memory_space<vmem>>, vector<1x640xf32>
    %5 = vector.broadcast %4 : vector<1x640xf32> to vector<8x640xf32>
    %6 = arith.addf %3, %5 : vector<8x640xf32>
    %cst_5 = arith.constant 5.000000e-01 : f32
    %7 = vector.broadcast %cst_5 : f32 to vector<8x640xf32>
    %8 = arith.mulf %7, %6 : vector<8x640xf32>
    %cst_6 = arith.constant 0.707106769 : f32
    %9 = vector.broadcast %cst_6 : f32 to vector<8x640xf32>
    %10 = arith.mulf %6, %9 : vector<8x640xf32>
    %11 = math.erf %10 : vector<8x640xf32>
    %cst_7 = arith.constant 1.000000e+00 : f32
    %12 = vector.broadcast %cst_7 : f32 to vector<8x640xf32>
    %13 = arith.addf %12, %11 : vector<8x640xf32>
    %14 = arith.mulf %8, %13 : vector<8x640xf32>
    %15 = arith.truncf %14 : vector<8x640xf32> to vector<8x640xbf16>
    %c0_8 = arith.constant 0 : index
    %c0_9 = arith.constant 0 : index
    %16 = vector.load %arg3[%c0_8, %c0_9] : memref<640x512xbf16, #tpu.memory_space<vmem>>, vector<640x512xbf16>
    %cst_10 = arith.constant dense<0.000000e+00> : vector<8x512xf32>
    %17 = tpu.matmul %15, %16, %cst_10 {dimension_numbers = #tpu.dot_dimension_numbers<[1], [0], [0], [1], [0, 0, 1, 1], [], []>} : vector<8x640xbf16>, vector<640x512xbf16>, vector<8x512xf32> -> vector<8x512xf32>
    %c0_11 = arith.constant 0 : index
    %c0_12 = arith.constant 0 : index
    %18 = vector.load %arg21[%c0_11, %c0_12] : memref<1x512xf32, #tpu.memory_space<vmem>>, vector<1x512xf32>
    %19 = vector.broadcast %18 : vector<1x512xf32> to vector<8x512xf32>
    %20 = arith.addf %17, %19 : vector<8x512xf32>
    %cst_13 = arith.constant 5.000000e-01 : f32
    %21 = vector.broadcast %cst_13 : f32 to vector<8x512xf32>
    %22 = arith.mulf %21, %20 : vector<8x512xf32>
    %cst_14 = arith.constant 0.707106769 : f32
    %23 = vector.broadcast %cst_14 : f32 to vector<8x512xf32>
    %24 = arith.mulf %20, %23 : vector<8x512xf32>
    %25 = math.erf %24 : vector<8x512xf32>
    %cst_15 = arith.constant 1.000000e+00 : f32
    %26 = vector.broadcast %cst_15 : f32 to vector<8x512xf32>
    %27 = arith.addf %26, %25 : vector<8x512xf32>
    %28 = arith.mulf %22, %27 : vector<8x512xf32>
    %29 = arith.truncf %28 : vector<8x512xf32> to vector<8x512xbf16>
    %c0_16 = arith.constant 0 : index
    %c0_17 = arith.constant 0 : index
    %30 = vector.load %arg4[%c0_16, %c0_17] : memref<512x384xbf16, #tpu.memory_space<vmem>>, vector<512x384xbf16>
    %cst_18 = arith.constant dense<0.000000e+00> : vector<8x384xf32>
    %31 = tpu.matmul %29, %30, %cst_18 {dimension_numbers = #tpu.dot_dimension_numbers<[1], [0], [0], [1], [0, 0, 1, 1], [], []>} : vector<8x512xbf16>, vector<512x384xbf16>, vector<8x384xf32> -> vector<8x384xf32>
    %c0_19 = arith.constant 0 : index
    %c0_20 = arith.constant 0 : index
    %32 = vector.load %arg22[%c0_19, %c0_20] : memref<1x384xf32, #tpu.memory_space<vmem>>, vector<1x384xf32>
    %33 = vector.broadcast %32 : vector<1x384xf32> to vector<8x384xf32>
    %34 = arith.addf %31, %33 : vector<8x384xf32>
    %cst_21 = arith.constant 5.000000e-01 : f32
    %35 = vector.broadcast %cst_21 : f32 to vector<8x384xf32>
    %36 = arith.mulf %35, %34 : vector<8x384xf32>
    %cst_22 = arith.constant 0.707106769 : f32
    %37 = vector.broadcast %cst_22 : f32 to vector<8x384xf32>
    %38 = arith.mulf %34, %37 : vector<8x384xf32>
    %39 = math.erf %38 : vector<8x384xf32>
    %cst_23 = arith.constant 1.000000e+00 : f32
    %40 = vector.broadcast %cst_23 : f32 to vector<8x384xf32>
    %41 = arith.addf %40, %39 : vector<8x384xf32>
    %42 = arith.mulf %36, %41 : vector<8x384xf32>
    %43 = arith.truncf %42 : vector<8x384xf32> to vector<8x384xbf16>
    %c0_24 = arith.constant 0 : index
    %c0_25 = arith.constant 0 : index
    %44 = vector.load %arg5[%c0_24, %c0_25] : memref<384x256xbf16, #tpu.memory_space<vmem>>, vector<384x256xbf16>
    %cst_26 = arith.constant dense<0.000000e+00> : vector<8x256xf32>
    %45 = tpu.matmul %43, %44, %cst_26 {dimension_numbers = #tpu.dot_dimension_numbers<[1], [0], [0], [1], [0, 0, 1, 1], [], []>} : vector<8x384xbf16>, vector<384x256xbf16>, vector<8x256xf32> -> vector<8x256xf32>
    %c0_27 = arith.constant 0 : index
    %c0_28 = arith.constant 0 : index
    %46 = vector.load %arg23[%c0_27, %c0_28] : memref<1x256xf32, #tpu.memory_space<vmem>>, vector<1x256xf32>
    %47 = vector.broadcast %46 : vector<1x256xf32> to vector<8x256xf32>
    %48 = arith.addf %45, %47 : vector<8x256xf32>
    %cst_29 = arith.constant 5.000000e-01 : f32
    %49 = vector.broadcast %cst_29 : f32 to vector<8x256xf32>
    %50 = arith.mulf %49, %48 : vector<8x256xf32>
    %cst_30 = arith.constant 0.707106769 : f32
    %51 = vector.broadcast %cst_30 : f32 to vector<8x256xf32>
    %52 = arith.mulf %48, %51 : vector<8x256xf32>
    %53 = math.erf %52 : vector<8x256xf32>
    %cst_31 = arith.constant 1.000000e+00 : f32
    %54 = vector.broadcast %cst_31 : f32 to vector<8x256xf32>
    %55 = arith.addf %54, %53 : vector<8x256xf32>
    %56 = arith.mulf %50, %55 : vector<8x256xf32>
    %57 = arith.truncf %56 : vector<8x256xf32> to vector<8x256xbf16>
    %c0_32 = arith.constant 0 : index
    %c0_33 = arith.constant 0 : index
    %58 = vector.load %arg6[%c0_32, %c0_33] : memref<256x128xbf16, #tpu.memory_space<vmem>>, vector<256x128xbf16>
    %cst_34 = arith.constant dense<0.000000e+00> : vector<8x128xf32>
    %59 = tpu.matmul %57, %58, %cst_34 {dimension_numbers = #tpu.dot_dimension_numbers<[1], [0], [0], [1], [0, 0, 1, 1], [], []>} : vector<8x256xbf16>, vector<256x128xbf16>, vector<8x128xf32> -> vector<8x128xf32>
    %c0_35 = arith.constant 0 : index
    %c0_36 = arith.constant 0 : index
    %60 = vector.load %arg24[%c0_35, %c0_36] : memref<1x128xf32, #tpu.memory_space<vmem>>, vector<1x128xf32>
    %61 = vector.broadcast %60 : vector<1x128xf32> to vector<8x128xf32>
    %62 = arith.addf %59, %61 : vector<8x128xf32>
    %cst_37 = arith.constant 5.000000e-01 : f32
    %63 = vector.broadcast %cst_37 : f32 to vector<8x128xf32>
    %64 = arith.mulf %63, %62 : vector<8x128xf32>
    %cst_38 = arith.constant 0.707106769 : f32
    %65 = vector.broadcast %cst_38 : f32 to vector<8x128xf32>
    %66 = arith.mulf %62, %65 : vector<8x128xf32>
    %67 = math.erf %66 : vector<8x128xf32>
    %cst_39 = arith.constant 1.000000e+00 : f32
    %68 = vector.broadcast %cst_39 : f32 to vector<8x128xf32>
    %69 = arith.addf %68, %67 : vector<8x128xf32>
    %70 = arith.mulf %64, %69 : vector<8x128xf32>
    %71 = arith.truncf %70 : vector<8x128xf32> to vector<8x128xbf16>
    %c0_40 = arith.constant 0 : index
    %c0_41 = arith.constant 0 : index
    %72 = vector.load %arg19[%c0_40, %c0_41] : memref<128x768xbf16, #tpu.memory_space<vmem>>, vector<128x768xbf16>
    %cst_42 = arith.constant dense<0.000000e+00> : vector<8x768xf32>
    %73 = tpu.matmul %71, %72, %cst_42 {dimension_numbers = #tpu.dot_dimension_numbers<[1], [0], [0], [1], [0, 0, 1, 1], [], []>} : vector<8x128xbf16>, vector<128x768xbf16>, vector<8x768xf32> -> vector<8x768xf32>
    %c0_43 = arith.constant 0 : index
    %c0_44 = arith.constant 0 : index
    %74 = vector.load %arg33[%c0_43, %c0_44] : memref<1x768xf32, #tpu.memory_space<vmem>>, vector<1x768xf32>
    %75 = vector.broadcast %74 : vector<1x768xf32> to vector<8x768xf32>
    %76 = arith.addf %73, %75 : vector<8x768xf32>
    %cst_45 = arith.constant 5.000000e-01 : f32
    %77 = vector.broadcast %cst_45 : f32 to vector<8x768xf32>
    %78 = arith.mulf %77, %76 : vector<8x768xf32>
    %cst_46 = arith.constant 0.707106769 : f32
    %79 = vector.broadcast %cst_46 : f32 to vector<8x768xf32>
    %80 = arith.mulf %76, %79 : vector<8x768xf32>
    %81 = math.erf %80 : vector<8x768xf32>
    %cst_47 = arith.constant 1.000000e+00 : f32
    %82 = vector.broadcast %cst_47 : f32 to vector<8x768xf32>
    %83 = arith.addf %82, %81 : vector<8x768xf32>
    %84 = arith.mulf %78, %83 : vector<8x768xf32>
    %c0_48 = arith.constant 0 : index
    %c0_49 = arith.constant 0 : index
    %85 = vector.load %arg38[%c0_48, %c0_49] : memref<8x768xf32, #tpu.memory_space<vmem>>, vector<8x768xf32>
    tpu.vector_store %arg38[%c0_48, %c0_49], %84 {strides = array<i32>} : memref<8x768xf32, #tpu.memory_space<vmem>>, vector<8x768xf32>,
    %c0_50 = arith.constant 0 : index
    %c0_51 = arith.constant 0 : index
    %86 = vector.load %arg7[%c0_50, %c0_51] : memref<256x256xbf16, #tpu.memory_space<vmem>>, vector<256x256xbf16>
    %cst_52 = arith.constant dense<0.000000e+00> : vector<8x256xf32>
    %87 = tpu.matmul %57, %86, %cst_52 {dimension_numbers = #tpu.dot_dimension_numbers<[1], [0], [0], [1], [0, 0, 1, 1], [], []>} : vector<8x256xbf16>, vector<256x256xbf16>, vector<8x256xf32> -> vector<8x256xf32>
    %c0_53 = arith.constant 0 : index
    %c0_54 = arith.constant 0 : index
    %88 = vector.load %arg8[%c0_53, %c0_54] : memref<128x256xbf16, #tpu.memory_space<vmem>>, vector<128x256xbf16>
    %cst_55 = arith.constant dense<0.000000e+00> : vector<8x256xf32>
    %89 = tpu.matmul %71, %88, %cst_55 {dimension_numbers = #tpu.dot_dimension_numbers<[1], [0], [0], [1], [0, 0, 1, 1], [], []>} : vector<8x128xbf16>, vector<128x256xbf16>, vector<8x256xf32> -> vector<8x256xf32>
    %90 = arith.addf %87, %89 : vector<8x256xf32>
    %c0_56 = arith.constant 0 : index
    %c0_57 = arith.constant 0 : index
    %91 = vector.load %arg25[%c0_56, %c0_57] : memref<1x256xf32, #tpu.memory_space<vmem>>, vector<1x256xf32>
    %92 = vector.broadcast %91 : vector<1x256xf32> to vector<8x256xf32>
    %93 = arith.addf %90, %92 : vector<8x256xf32>
    %cst_58 = arith.constant 5.000000e-01 : f32
    %94 = vector.broadcast %cst_58 : f32 to vector<8x256xf32>
    %95 = arith.mulf %94, %93 : vector<8x256xf32>
    %cst_59 = arith.constant 0.707106769 : f32
    %96 = vector.broadcast %cst_59 : f32 to vector<8x256xf32>
    %97 = arith.mulf %93, %96 : vector<8x256xf32>
    %98 = math.erf %97 : vector<8x256xf32>
    %cst_60 = arith.constant 1.000000e+00 : f32
    %99 = vector.broadcast %cst_60 : f32 to vector<8x256xf32>
    %100 = arith.addf %99, %98 : vector<8x256xf32>
    %101 = arith.mulf %95, %100 : vector<8x256xf32>
    %102 = arith.truncf %101 : vector<8x256xf32> to vector<8x256xbf16>
    %c0_61 = arith.constant 0 : index
    %c0_62 = arith.constant 0 : index
    %103 = vector.load %arg18[%c0_61, %c0_62] : memref<256x768xbf16, #tpu.memory_space<vmem>>, vector<256x768xbf16>
    %cst_63 = arith.constant dense<0.000000e+00> : vector<8x768xf32>
    %104 = tpu.matmul %102, %103, %cst_63 {dimension_numbers = #tpu.dot_dimension_numbers<[1], [0], [0], [1], [0, 0, 1, 1], [], []>} : vector<8x256xbf16>, vector<256x768xbf16>, vector<8x768xf32> -> vector<8x768xf32>
    %c0_64 = arith.constant 0 : index
    %c0_65 = arith.constant 0 : index
    %105 = vector.load %arg32[%c0_64, %c0_65] : memref<1x768xf32, #tpu.memory_space<vmem>>, vector<1x768xf32>
    %106 = vector.broadcast %105 : vector<1x768xf32> to vector<8x768xf32>
    %107 = arith.addf %104, %106 : vector<8x768xf32>
    %cst_66 = arith.constant 5.000000e-01 : f32
    %108 = vector.broadcast %cst_66 : f32 to vector<8x768xf32>
    %109 = arith.mulf %108, %107 : vector<8x768xf32>
    %cst_67 = arith.constant 0.707106769 : f32
    %110 = vector.broadcast %cst_67 : f32 to vector<8x768xf32>
    %111 = arith.mulf %107, %110 : vector<8x768xf32>
    %112 = math.erf %111 : vector<8x768xf32>
    %cst_68 = arith.constant 1.000000e+00 : f32
    %113 = vector.broadcast %cst_68 : f32 to vector<8x768xf32>
    %114 = arith.addf %113, %112 : vector<8x768xf32>
    %115 = arith.mulf %109, %114 : vector<8x768xf32>
    %c0_69 = arith.constant 0 : index
    %c0_70 = arith.constant 0 : index
    %116 = vector.load %arg37[%c0_69, %c0_70] : memref<8x768xf32, #tpu.memory_space<vmem>>, vector<8x768xf32>
    tpu.vector_store %arg37[%c0_69, %c0_70], %115 {strides = array<i32>} : memref<8x768xf32, #tpu.memory_space<vmem>>, vector<8x768xf32>,
    %c0_71 = arith.constant 0 : index
    %c0_72 = arith.constant 0 : index
    %117 = vector.load %arg9[%c0_71, %c0_72] : memref<384x384xbf16, #tpu.memory_space<vmem>>, vector<384x384xbf16>
    %cst_73 = arith.constant dense<0.000000e+00> : vector<8x384xf32>
    %118 = tpu.matmul %43, %117, %cst_73 {dimension_numbers = #tpu.dot_dimension_numbers<[1], [0], [0], [1], [0, 0, 1, 1], [], []>} : vector<8x384xbf16>, vector<384x384xbf16>, vector<8x384xf32> -> vector<8x384xf32>
    %c0_74 = arith.constant 0 : index
    %c0_75 = arith.constant 0 : index
    %119 = vector.load %arg10[%c0_74, %c0_75] : memref<256x384xbf16, #tpu.memory_space<vmem>>, vector<256x384xbf16>
    %cst_76 = arith.constant dense<0.000000e+00> : vector<8x384xf32>
    %120 = tpu.matmul %102, %119, %cst_76 {dimension_numbers = #tpu.dot_dimension_numbers<[1], [0], [0], [1], [0, 0, 1, 1], [], []>} : vector<8x256xbf16>, vector<256x384xbf16>, vector<8x384xf32> -> vector<8x384xf32>
    %121 = arith.addf %118, %120 : vector<8x384xf32>
    %c0_77 = arith.constant 0 : index
    %c0_78 = arith.constant 0 : index
    %122 = vector.load %arg26[%c0_77, %c0_78] : memref<1x384xf32, #tpu.memory_space<vmem>>, vector<1x384xf32>
    %123 = vector.broadcast %122 : vector<1x384xf32> to vector<8x384xf32>
    %124 = arith.addf %121, %123 : vector<8x384xf32>
    %cst_79 = arith.constant 5.000000e-01 : f32
    %125 = vector.broadcast %cst_79 : f32 to vector<8x384xf32>
    %126 = arith.mulf %125, %124 : vector<8x384xf32>
    %cst_80 = arith.constant 0.707106769 : f32
    %127 = vector.broadcast %cst_80 : f32 to vector<8x384xf32>
    %128 = arith.mulf %124, %127 : vector<8x384xf32>
    %129 = math.erf %128 : vector<8x384xf32>
    %cst_81 = arith.constant 1.000000e+00 : f32
    %130 = vector.broadcast %cst_81 : f32 to vector<8x384xf32>
    %131 = arith.addf %130, %129 : vector<8x384xf32>
    %132 = arith.mulf %126, %131 : vector<8x384xf32>
    %133 = arith.truncf %132 : vector<8x384xf32> to vector<8x384xbf16>
    %c0_82 = arith.constant 0 : index
    %c0_83 = arith.constant 0 : index
    %134 = vector.load %arg17[%c0_82, %c0_83] : memref<384x768xbf16, #tpu.memory_space<vmem>>, vector<384x768xbf16>
    %cst_84 = arith.constant dense<0.000000e+00> : vector<8x768xf32>
    %135 = tpu.matmul %133, %134, %cst_84 {dimension_numbers = #tpu.dot_dimension_numbers<[1], [0], [0], [1], [0, 0, 1, 1], [], []>} : vector<8x384xbf16>, vector<384x768xbf16>, vector<8x768xf32> -> vector<8x768xf32>
    %c0_85 = arith.constant 0 : index
    %c0_86 = arith.constant 0 : index
    %136 = vector.load %arg31[%c0_85, %c0_86] : memref<1x768xf32, #tpu.memory_space<vmem>>, vector<1x768xf32>
    %137 = vector.broadcast %136 : vector<1x768xf32> to vector<8x768xf32>
    %138 = arith.addf %135, %137 : vector<8x768xf32>
    %cst_87 = arith.constant 5.000000e-01 : f32
    %139 = vector.broadcast %cst_87 : f32 to vector<8x768xf32>
    %140 = arith.mulf %139, %138 : vector<8x768xf32>
    %cst_88 = arith.constant 0.707106769 : f32
    %141 = vector.broadcast %cst_88 : f32 to vector<8x768xf32>
    %142 = arith.mulf %138, %141 : vector<8x768xf32>
    %143 = math.erf %142 : vector<8x768xf32>
    %cst_89 = arith.constant 1.000000e+00 : f32
    %144 = vector.broadcast %cst_89 : f32 to vector<8x768xf32>
    %145 = arith.addf %144, %143 : vector<8x768xf32>
    %146 = arith.mulf %140, %145 : vector<8x768xf32>
    %c0_90 = arith.constant 0 : index
    %c0_91 = arith.constant 0 : index
    %147 = vector.load %arg36[%c0_90, %c0_91] : memref<8x768xf32, #tpu.memory_space<vmem>>, vector<8x768xf32>
    tpu.vector_store %arg36[%c0_90, %c0_91], %146 {strides = array<i32>} : memref<8x768xf32, #tpu.memory_space<vmem>>, vector<8x768xf32>,
    %c0_92 = arith.constant 0 : index
    %c0_93 = arith.constant 0 : index
    %148 = vector.load %arg11[%c0_92, %c0_93] : memref<512x512xbf16, #tpu.memory_space<vmem>>, vector<512x512xbf16>
    %cst_94 = arith.constant dense<0.000000e+00> : vector<8x512xf32>
    %149 = tpu.matmul %29, %148, %cst_94 {dimension_numbers = #tpu.dot_dimension_numbers<[1], [0], [0], [1], [0, 0, 1, 1], [], []>} : vector<8x512xbf16>, vector<512x512xbf16>, vector<8x512xf32> -> vector<8x512xf32>
    %c0_95 = arith.constant 0 : index
    %c0_96 = arith.constant 0 : index
    %150 = vector.load %arg12[%c0_95, %c0_96] : memref<384x512xbf16, #tpu.memory_space<vmem>>, vector<384x512xbf16>
    %cst_97 = arith.constant dense<0.000000e+00> : vector<8x512xf32>
    %151 = tpu.matmul %133, %150, %cst_97 {dimension_numbers = #tpu.dot_dimension_numbers<[1], [0], [0], [1], [0, 0, 1, 1], [], []>} : vector<8x384xbf16>, vector<384x512xbf16>, vector<8x512xf32> -> vector<8x512xf32>
    %152 = arith.addf %149, %151 : vector<8x512xf32>
    %c0_98 = arith.constant 0 : index
    %c0_99 = arith.constant 0 : index
    %153 = vector.load %arg27[%c0_98, %c0_99] : memref<1x512xf32, #tpu.memory_space<vmem>>, vector<1x512xf32>
    %154 = vector.broadcast %153 : vector<1x512xf32> to vector<8x512xf32>
    %155 = arith.addf %152, %154 : vector<8x512xf32>
    %cst_100 = arith.constant 5.000000e-01 : f32
    %156 = vector.broadcast %cst_100 : f32 to vector<8x512xf32>
    %157 = arith.mulf %156, %155 : vector<8x512xf32>
    %cst_101 = arith.constant 0.707106769 : f32
    %158 = vector.broadcast %cst_101 : f32 to vector<8x512xf32>
    %159 = arith.mulf %155, %158 : vector<8x512xf32>
    %160 = math.erf %159 : vector<8x512xf32>
    %cst_102 = arith.constant 1.000000e+00 : f32
    %161 = vector.broadcast %cst_102 : f32 to vector<8x512xf32>
    %162 = arith.addf %161, %160 : vector<8x512xf32>
    %163 = arith.mulf %157, %162 : vector<8x512xf32>
    %164 = arith.truncf %163 : vector<8x512xf32> to vector<8x512xbf16>
    %c0_103 = arith.constant 0 : index
    %c0_104 = arith.constant 0 : index
    %165 = vector.load %arg16[%c0_103, %c0_104] : memref<512x768xbf16, #tpu.memory_space<vmem>>, vector<512x768xbf16>
    %cst_105 = arith.constant dense<0.000000e+00> : vector<8x768xf32>
    %166 = tpu.matmul %164, %165, %cst_105 {dimension_numbers = #tpu.dot_dimension_numbers<[1], [0], [0], [1], [0, 0, 1, 1], [], []>} : vector<8x512xbf16>, vector<512x768xbf16>, vector<8x768xf32> -> vector<8x768xf32>
    %c0_106 = arith.constant 0 : index
    %c0_107 = arith.constant 0 : index
    %167 = vector.load %arg30[%c0_106, %c0_107] : memref<1x768xf32, #tpu.memory_space<vmem>>, vector<1x768xf32>
    %168 = vector.broadcast %167 : vector<1x768xf32> to vector<8x768xf32>
    %169 = arith.addf %166, %168 : vector<8x768xf32>
    %cst_108 = arith.constant 5.000000e-01 : f32
    %170 = vector.broadcast %cst_108 : f32 to vector<8x768xf32>
    %171 = arith.mulf %170, %169 : vector<8x768xf32>
    %cst_109 = arith.constant 0.707106769 : f32
    %172 = vector.broadcast %cst_109 : f32 to vector<8x768xf32>
    %173 = arith.mulf %169, %172 : vector<8x768xf32>
    %174 = math.erf %173 : vector<8x768xf32>
    %cst_110 = arith.constant 1.000000e+00 : f32
    %175 = vector.broadcast %cst_110 : f32 to vector<8x768xf32>
    %176 = arith.addf %175, %174 : vector<8x768xf32>
    %177 = arith.mulf %171, %176 : vector<8x768xf32>
    %c0_111 = arith.constant 0 : index
    %c0_112 = arith.constant 0 : index
    %178 = vector.load %arg35[%c0_111, %c0_112] : memref<8x768xf32, #tpu.memory_space<vmem>>, vector<8x768xf32>
    tpu.vector_store %arg35[%c0_111, %c0_112], %177 {strides = array<i32>} : memref<8x768xf32, #tpu.memory_space<vmem>>, vector<8x768xf32>,
    %c0_113 = arith.constant 0 : index
    %c0_114 = arith.constant 0 : index
    %179 = vector.load %arg13[%c0_113, %c0_114] : memref<640x640xbf16, #tpu.memory_space<vmem>>, vector<640x640xbf16>
    %cst_115 = arith.constant dense<0.000000e+00> : vector<8x640xf32>
    %180 = tpu.matmul %15, %179, %cst_115 {dimension_numbers = #tpu.dot_dimension_numbers<[1], [0], [0], [1], [0, 0, 1, 1], [], []>} : vector<8x640xbf16>, vector<640x640xbf16>, vector<8x640xf32> -> vector<8x640xf32>
    %c0_116 = arith.constant 0 : index
    %c0_117 = arith.constant 0 : index
    %181 = vector.load %arg14[%c0_116, %c0_117] : memref<512x640xbf16, #tpu.memory_space<vmem>>, vector<512x640xbf16>
    %cst_118 = arith.constant dense<0.000000e+00> : vector<8x640xf32>
    %182 = tpu.matmul %164, %181, %cst_118 {dimension_numbers = #tpu.dot_dimension_numbers<[1], [0], [0], [1], [0, 0, 1, 1], [], []>} : vector<8x512xbf16>, vector<512x640xbf16>, vector<8x640xf32> -> vector<8x640xf32>
    %183 = arith.addf %180, %182 : vector<8x640xf32>
    %c0_119 = arith.constant 0 : index
    %c0_120 = arith.constant 0 : index
    %184 = vector.load %arg28[%c0_119, %c0_120] : memref<1x640xf32, #tpu.memory_space<vmem>>, vector<1x640xf32>
    %185 = vector.broadcast %184 : vector<1x640xf32> to vector<8x640xf32>
    %186 = arith.addf %183, %185 : vector<8x640xf32>
    %cst_121 = arith.constant 5.000000e-01 : f32
    %187 = vector.broadcast %cst_121 : f32 to vector<8x640xf32>
    %188 = arith.mulf %187, %186 : vector<8x640xf32>
    %cst_122 = arith.constant 0.707106769 : f32
    %189 = vector.broadcast %cst_122 : f32 to vector<8x640xf32>
    %190 = arith.mulf %186, %189 : vector<8x640xf32>
    %191 = math.erf %190 : vector<8x640xf32>
    %cst_123 = arith.constant 1.000000e+00 : f32
    %192 = vector.broadcast %cst_123 : f32 to vector<8x640xf32>
    %193 = arith.addf %192, %191 : vector<8x640xf32>
    %194 = arith.mulf %188, %193 : vector<8x640xf32>
    %195 = arith.truncf %194 : vector<8x640xf32> to vector<8x640xbf16>
    %c0_124 = arith.constant 0 : index
    %c0_125 = arith.constant 0 : index
    %196 = vector.load %arg15[%c0_124, %c0_125] : memref<640x768xbf16, #tpu.memory_space<vmem>>, vector<640x768xbf16>
    %cst_126 = arith.constant dense<0.000000e+00> : vector<8x768xf32>
    %197 = tpu.matmul %195, %196, %cst_126 {dimension_numbers = #tpu.dot_dimension_numbers<[1], [0], [0], [1], [0, 0, 1, 1], [], []>} : vector<8x640xbf16>, vector<640x768xbf16>, vector<8x768xf32> -> vector<8x768xf32>
    %c0_127 = arith.constant 0 : index
    %c0_128 = arith.constant 0 : index
    %198 = vector.load %arg29[%c0_127, %c0_128] : memref<1x768xf32, #tpu.memory_space<vmem>>, vector<1x768xf32>
    %199 = vector.broadcast %198 : vector<1x768xf32> to vector<8x768xf32>
    %200 = arith.addf %197, %199 : vector<8x768xf32>
    %cst_129 = arith.constant 5.000000e-01 : f32
    %201 = vector.broadcast %cst_129 : f32 to vector<8x768xf32>
    %202 = arith.mulf %201, %200 : vector<8x768xf32>
    %cst_130 = arith.constant 0.707106769 : f32
    %203 = vector.broadcast %cst_130 : f32 to vector<8x768xf32>
    %204 = arith.mulf %200, %203 : vector<8x768xf32>
    %205 = math.erf %204 : vector<8x768xf32>
    %cst_131 = arith.constant 1.000000e+00 : f32
    %206 = vector.broadcast %cst_131 : f32 to vector<8x768xf32>
    %207 = arith.addf %206, %205 : vector<8x768xf32>
    %208 = arith.mulf %202, %207 : vector<8x768xf32>
    %c0_132 = arith.constant 0 : index
    %c0_133 = arith.constant 0 : index
    %209 = vector.load %arg34[%c0_132, %c0_133] : memref<8x768xf32, #tpu.memory_space<vmem>>, vector<8x768xf32>
    tpu.vector_store %arg34[%c0_132, %c0_133], %208 {strides = array<i32>} : memref<8x768xf32, #tpu.memory_space<vmem>>, vector<8x768xf32>,
    return
  }
  func.func @transform_0(%arg0: i32) -> (i32, i32) {
    %c0_i32 = arith.constant 0 : i32
    %c0_i32_0 = arith.constant 0 : i32
    return %arg0, %c0_i32 : i32, i32
  }
  func.func @transform_1(%arg0: i32) -> (i32, i32) {
    %c0_i32 = arith.constant 0 : i32
    %c0_i32_0 = arith.constant 0 : i32
    %c0_i32_1 = arith.constant 0 : i32
    return %c0_i32, %c0_i32_0 : i32, i32
  }
  func.func @transform_2(%arg0: i32) -> (i32, i32) {
    %c0_i32 = arith.constant 0 : i32
    %c0_i32_0 = arith.constant 0 : i32
    %c0_i32_1 = arith.constant 0 : i32
    return %c0_i32, %c0_i32_0 : i32, i32
  }
  func.func @transform_3(%arg0: i32) -> (i32, i32) {
    %c0_i32 = arith.constant 0 : i32
    %c0_i32_0 = arith.constant 0 : i32
    %c0_i32_1 = arith.constant 0 : i32
    return %c0_i32, %c0_i32_0 : i32, i32
  }
  func.func @transform_4(%arg0: i32) -> (i32, i32) {
    %c0_i32 = arith.constant 0 : i32
    %c0_i32_0 = arith.constant 0 : i32
    %c0_i32_1 = arith.constant 0 : i32
    return %c0_i32, %c0_i32_0 : i32, i32
  }
  func.func @transform_5(%arg0: i32) -> (i32, i32) {
    %c0_i32 = arith.constant 0 : i32
    %c0_i32_0 = arith.constant 0 : i32
    %c0_i32_1 = arith.constant 0 : i32
    return %c0_i32, %c0_i32_0 : i32, i32
  }
  func.func @transform_6(%arg0: i32) -> (i32, i32) {
    %c0_i32 = arith.constant 0 : i32
    %c0_i32_0 = arith.constant 0 : i32
    %c0_i32_1 = arith.constant 0 : i32
    return %c0_i32, %c0_i32_0 : i32, i32
  }
  func.func @transform_7(%arg0: i32) -> (i32, i32) {
    %c0_i32 = arith.constant 0 : i32
    %c0_i32_0 = arith.constant 0 : i32
    %c0_i32_1 = arith.constant 0 : i32
    return %c0_i32, %c0_i32_0 : i32, i32
  }
  func.func @transform_8(%arg0: i32) -> (i32, i32) {
    %c0_i32 = arith.constant 0 : i32
    %c0_i32_0 = arith.constant 0 : i32
    %c0_i32_1 = arith.constant 0 : i32
    return %c0_i32, %c0_i32_0 : i32, i32
  }
  func.func @transform_9(%arg0: i32) -> (i32, i32) {
    %c0_i32 = arith.constant 0 : i32
    %c0_i32_0 = arith.constant 0 : i32
    %c0_i32_1 = arith.constant 0 : i32
    return %c0_i32, %c0_i32_0 : i32, i32
  }
  func.func @transform_10(%arg0: i32) -> (i32, i32) {
    %c0_i32 = arith.constant 0 : i32
    %c0_i32_0 = arith.constant 0 : i32
    %c0_i32_1 = arith.constant 0 : i32
    return %c0_i32, %c0_i32_0 : i32, i32
  }
  func.func @transform_11(%arg0: i32) -> (i32, i32) {
    %c0_i32 = arith.constant 0 : i32
    %c0_i32_0 = arith.constant 0 : i32
    %c0_i32_1 = arith.constant 0 : i32
    return %c0_i32, %c0_i32_0 : i32, i32
  }
  func.func @transform_12(%arg0: i32) -> (i32, i32) {
    %c0_i32 = arith.constant 0 : i32
    %c0_i32_0 = arith.constant 0 : i32
    %c0_i32_1 = arith.constant 0 : i32
    return %c0_i32, %c0_i32_0 : i32, i32
  }
  func.func @transform_13(%arg0: i32) -> (i32, i32) {
    %c0_i32 = arith.constant 0 : i32
    %c0_i32_0 = arith.constant 0 : i32
    %c0_i32_1 = arith.constant 0 : i32
    return %c0_i32, %c0_i32_0 : i32, i32
  }
  func.func @transform_14(%arg0: i32) -> (i32, i32) {
    %c0_i32 = arith.constant 0 : i32
    %c0_i32_0 = arith.constant 0 : i32
    %c0_i32_1 = arith.constant 0 : i32
    return %c0_i32, %c0_i32_0 : i32, i32
  }
  func.func @transform_15(%arg0: i32) -> (i32, i32) {
    %c0_i32 = arith.constant 0 : i32
    %c0_i32_0 = arith.constant 0 : i32
    %c0_i32_1 = arith.constant 0 : i32
    return %c0_i32, %c0_i32_0 : i32, i32
  }
  func.func @transform_16(%arg0: i32) -> (i32, i32) {
    %c0_i32 = arith.constant 0 : i32
    %c0_i32_0 = arith.constant 0 : i32
    %c0_i32_1 = arith.constant 0 : i32
    return %c0_i32, %c0_i32_0 : i32, i32
  }
  func.func @transform_17(%arg0: i32) -> (i32, i32) {
    %c0_i32 = arith.constant 0 : i32
    %c0_i32_0 = arith.constant 0 : i32
    %c0_i32_1 = arith.constant 0 : i32
    return %c0_i32, %c0_i32_0 : i32, i32
  }
  func.func @transform_18(%arg0: i32) -> (i32, i32) {
    %c0_i32 = arith.constant 0 : i32
    %c0_i32_0 = arith.constant 0 : i32
    %c0_i32_1 = arith.constant 0 : i32
    return %c0_i32, %c0_i32_0 : i32, i32
  }
  func.func @transform_19(%arg0: i32) -> (i32, i32) {
    %c0_i32 = arith.constant 0 : i32
    %c0_i32_0 = arith.constant 0 : i32
    %c0_i32_1 = arith.constant 0 : i32
    return %c0_i32, %c0_i32_0 : i32, i32
  }
  func.func @transform_20(%arg0: i32) -> (i32, i32) {
    %c0_i32 = arith.constant 0 : i32
    %c0_i32_0 = arith.constant 0 : i32
    %c0_i32_1 = arith.constant 0 : i32
    return %c0_i32, %c0_i32_0 : i32, i32
  }
  func.func @transform_21(%arg0: i32) -> (i32, i32) {
    %c0_i32 = arith.constant 0 : i32
    %c0_i32_0 = arith.constant 0 : i32
    %c0_i32_1 = arith.constant 0 : i32
    return %c0_i32, %c0_i32_0 : i32, i32
  }
  func.func @transform_22(%arg0: i32) -> (i32, i32) {
    %c0_i32 = arith.constant 0 : i32
    %c0_i32_0 = arith.constant 0 : i32
    %c0_i32_1 = arith.constant 0 : i32
    return %c0_i32, %c0_i32_0 : i32, i32
  }
  func.func @transform_23(%arg0: i32) -> (i32, i32) {
    %c0_i32 = arith.constant 0 : i32
    %c0_i32_0 = arith.constant 0 : i32
    %c0_i32_1 = arith.constant 0 : i32
    return %c0_i32, %c0_i32_0 : i32, i32
  }
  func.func @transform_24(%arg0: i32) -> (i32, i32) {
    %c0_i32 = arith.constant 0 : i32
    %c0_i32_0 = arith.constant 0 : i32
    %c0_i32_1 = arith.constant 0 : i32
    return %c0_i32, %c0_i32_0 : i32, i32
  }
  func.func @transform_25(%arg0: i32) -> (i32, i32) {
    %c0_i32 = arith.constant 0 : i32
    %c0_i32_0 = arith.constant 0 : i32
    %c0_i32_1 = arith.constant 0 : i32
    return %c0_i32, %c0_i32_0 : i32, i32
  }
  func.func @transform_26(%arg0: i32) -> (i32, i32) {
    %c0_i32 = arith.constant 0 : i32
    %c0_i32_0 = arith.constant 0 : i32
    %c0_i32_1 = arith.constant 0 : i32
    return %c0_i32, %c0_i32_0 : i32, i32
  }
  func.func @transform_27(%arg0: i32) -> (i32, i32) {
    %c0_i32 = arith.constant 0 : i32
    %c0_i32_0 = arith.constant 0 : i32
    %c0_i32_1 = arith.constant 0 : i32
    return %c0_i32, %c0_i32_0 : i32, i32
  }
  func.func @transform_28(%arg0: i32) -> (i32, i32) {
    %c0_i32 = arith.constant 0 : i32
    %c0_i32_0 = arith.constant 0 : i32
    %c0_i32_1 = arith.constant 0 : i32
    return %c0_i32, %c0_i32_0 : i32, i32
  }
  func.func @transform_29(%arg0: i32) -> (i32, i32) {
    %c0_i32 = arith.constant 0 : i32
    %c0_i32_0 = arith.constant 0 : i32
    %c0_i32_1 = arith.constant 0 : i32
    return %c0_i32, %c0_i32_0 : i32, i32
  }
  func.func @transform_30(%arg0: i32) -> (i32, i32) {
    %c0_i32 = arith.constant 0 : i32
    %c0_i32_0 = arith.constant 0 : i32
    %c0_i32_1 = arith.constant 0 : i32
    return %c0_i32, %c0_i32_0 : i32, i32
  }
  func.func @transform_31(%arg0: i32) -> (i32, i32) {
    %c0_i32 = arith.constant 0 : i32
    %c0_i32_0 = arith.constant 0 : i32
    %c0_i32_1 = arith.constant 0 : i32
    return %c0_i32, %c0_i32_0 : i32, i32
  }
  func.func @transform_32(%arg0: i32) -> (i32, i32) {
    %c0_i32 = arith.constant 0 : i32
    %c0_i32_0 = arith.constant 0 : i32
    %c0_i32_1 = arith.constant 0 : i32
    return %c0_i32, %c0_i32_0 : i32, i32
  }
  func.func @transform_33(%arg0: i32) -> (i32, i32) {
    %c0_i32 = arith.constant 0 : i32
    %c0_i32_0 = arith.constant 0 : i32
    return %arg0, %c0_i32 : i32, i32
  }
  func.func @transform_34(%arg0: i32) -> (i32, i32) {
    %c0_i32 = arith.constant 0 : i32
    %c0_i32_0 = arith.constant 0 : i32
    return %arg0, %c0_i32 : i32, i32
  }
  func.func @transform_35(%arg0: i32) -> (i32, i32) {
    %c0_i32 = arith.constant 0 : i32
    %c0_i32_0 = arith.constant 0 : i32
    return %arg0, %c0_i32 : i32, i32
  }
  func.func @transform_36(%arg0: i32) -> (i32, i32) {
    %c0_i32 = arith.constant 0 : i32
    %c0_i32_0 = arith.constant 0 : i32
    return %arg0, %c0_i32 : i32, i32
  }
  func.func @transform_37(%arg0: i32) -> (i32, i32) {
    %c0_i32 = arith.constant 0 : i32
    %c0_i32_0 = arith.constant 0 : i32
    return %arg0, %c0_i32 : i32, i32
  }
}

</mosaic_0001>

<bundles_post_ra>
// kernel: model_u_split_forward.1
= control target key start
LH: loop header
LB: loop body
LE: loop exit
PB: predicated region body
PF: predicated region fallthrough
CT: control target
= control target key end

     0   :  { %s22239_s3 = smov 1   ;;  %s22240_s10 = smov 2   ;;  %vm22260_vm0 = vmmov 0   ;;  %s25011_s0 = inlined_call_operand.smem [shape: u32[38], index: -1, kind: input, shape index: {}] }
   0x1   :  { %s22287_s6 = sld [smem:[%s25011_s0 + %s22239_s3]]   ;;  %s22241_s14 = smov 19  }
   0x2   :  { %s22330_s9 = sld [smem:[%s25011_s0]]   ;;  %s22243_s18 = smov 3  }
   0x3   :  { %s22508_s13 = sld [smem:[%s25011_s0 + %s22240_s10]]   ;;  %s22244_s22 = smov 20  }
   0x4   :  { %s16763_s17 = sld [smem:[%s25011_s0 + %s22241_s14]]   ;;  %s22245_s26 = smov 4  }
   0x5   :  { %s22768_s21 = sld [smem:[%s25011_s0 + %s22243_s18]]   ;;  %s22246_s30 = smov 21  }
   0x6   :  { %s16764_s25 = sld [smem:[%s25011_s0 + %s22244_s22]]   ;;  %s22247_s4 = smov 5  }
   0x7   :  { %v19177_v0 = vld [vmem:[%s22287_s6 + $0x11c] ss:$20 sps:$4 sm:$0xff]   ;;  %v19179_v1 = vld [vmem:[%s22287_s6 + $0x118] ss:$20 sps:$4 sm:$0xff]   ;;  %v19183_v4 = vld [vmem:[%s22287_s6 + $0xf4] ss:$20 sps:$4 sm:$0xff]   ;;  %s22929_s29 = sld [smem:[%s25011_s0 + %s22245_s26]]  }
   0x8   :  { %1723 = vmatprep.subr.bf16.mxu0 %v19177_v0  ;;  %v19180_v2 = vld [vmem:[%s22287_s6 + $0x39c] ss:$20 sps:$4 sm:$0xff]   ;;  %v19182_v3 = vld [vmem:[%s22287_s6 + $0x398] ss:$20 sps:$4 sm:$0xff]   ;;  %v19186_v6 = vld [vmem:[%s22287_s6 + $0x374] ss:$20 sps:$4 sm:$0xff]   ;;  %s16765_s3 = sld [smem:[%s25011_s0 + %s22246_s30]]  }
   0x9   :  { %1724 = vmatpush1.bf16.msra.mxu0 %v19179_v1  ;;  %v19185_v5 = vld [vmem:[%s22287_s6 + $0xf0] ss:$20 sps:$4 sm:$0xff]   ;;  %1764 = vmatprep.subr.bf16.mxu1 %v19180_v2  ;;  %v19189_v8 = vld [vmem:[%s22287_s6 + $0xcc] ss:$20 sps:$4 sm:$0xff]   ;;  %v19191_v9 = vld [vmem:[%s22287_s6 + $0xc8] ss:$20 sps:$4 sm:$0xff]   ;;  %s16749_s7 = sld [smem:[%s25011_s0 + %s22247_s4]]  }
   0xa   :  { %1765 = vmatpush1.bf16.msra.mxu1 %v19182_v3  ;;  %1725 = vmatprep.subr.bf16.mxu0 %v19183_v4  ;;  %v19188_v7 = vld [vmem:[%s22287_s6 + $0x370] ss:$20 sps:$4 sm:$0xff]   ;;  %v19192_v10 = vld [vmem:[%s22287_s6 + $0x34c] ss:$20 sps:$4 sm:$0xff]   ;;  %v19194_v12 = vld [vmem:[%s22287_s6 + $0x348] ss:$20 sps:$4 sm:$0xff]  }
   0xb   :  { %1766 = vmatprep.subr.bf16.mxu1 %v19186_v6  ;;  %v19195_v11 = vld [vmem:[%s22287_s6 + $0xa4] ss:$20 sps:$4 sm:$0xff]   ;;  %v19197_v14 = vld [vmem:[%s22287_s6 + $0xa0] ss:$20 sps:$4 sm:$0xff]   ;;  %v19201_v15 = vld [vmem:[%s22287_s6 + $0x7c] ss:$20 sps:$4 sm:$0xff]  }
   0xc   :  { %v19198_v13 = vld [vmem:[%s22287_s6 + $0x324] ss:$20 sps:$4 sm:$0xff]   ;;  %v19200_v16 = vld [vmem:[%s22287_s6 + $0x320] ss:$20 sps:$4 sm:$0xff]   ;;  %v19204_v17 = vld [vmem:[%s22287_s6 + $0x2fc] ss:$20 sps:$4 sm:$0xff]  }
   0xd   :  { %1726 = vmatpush1.bf16.msra.mxu0 %v19185_v5  ;;  %v19203_v18 = vld [vmem:[%s22287_s6 + $0x78] ss:$20 sps:$4 sm:$0xff]   ;;  %v19207_v19 = vld [vmem:[%s22287_s6 + $0x54] ss:$20 sps:$4 sm:$0xff]   ;;  %v19209_v22 = vld [vmem:[%s22287_s6 + $0x50] ss:$20 sps:$4 sm:$0xff]  }
   0xe   :  { %1727 = vmatprep.subr.bf16.mxu0 %v19189_v8  ;;  %1767 = vmatpush1.bf16.msra.mxu1 %v19188_v7  ;;  %v19206_v20 = vld [vmem:[%s22287_s6 + $0x2f8] ss:$20 sps:$4 sm:$0xff]   ;;  %v19210_v21 = vld [vmem:[%s22287_s6 + $0x2d4] ss:$20 sps:$4 sm:$0xff]   ;;  %v19212_v24 = vld [vmem:[%s22287_s6 + $0x2d0] ss:$20 sps:$4 sm:$0xff]  }
   0xf   :  { %1768 = vmatprep.subr.bf16.mxu1 %v19192_v10  ;;  %v19213_v23 = vld [vmem:[%s22287_s6 + $0x2c] ss:$20 sps:$4 sm:$0xff]   ;;  %v19215_v26 = vld [vmem:[%s22287_s6 + $0x28] ss:$20 sps:$4 sm:$0xff]   ;;  %v19219_v27 = vld [vmem:[%s22287_s6 + $0x4] ss:$20 sps:$4 sm:$0xff]  }
  0x10   :  { %v19216_v25 = vld [vmem:[%s22287_s6 + $0x2ac] ss:$20 sps:$4 sm:$0xff]   ;;  %v19218_v28 = vld [vmem:[%s22287_s6 + $0x2a8] ss:$20 sps:$4 sm:$0xff]   ;;  %v19222_v29 = vld [vmem:[%s22287_s6 + $0x284] ss:$20 sps:$4 sm:$0xff]  }
  0x11   :  { %1728 = vmatpush1.bf16.msra.mxu0 %v19191_v9  ;;  %v19221_v30 = vld [vmem:[%s22287_s6] ss:$20 sps:$4 sm:$0xff]   ;;  %v19225_v31 = vld [vmem:[%s22287_s6 + $0x25c] ss:$20 sps:$4 sm:$0xff]   ;;  %v19227_v34 = vld [vmem:[%s22287_s6 + $0x258] ss:$20 sps:$4 sm:$0xff]  }
  0x12   :  { %1729 = vmatprep.subr.bf16.mxu0 %v19195_v11  ;;  %1769 = vmatpush1.bf16.msra.mxu1 %v19194_v12  ;;  %v19224_v32 = vld [vmem:[%s22287_s6 + $0x280] ss:$20 sps:$4 sm:$0xff]   ;;  %v19228_v33 = vld [vmem:[%s22287_s6 + $0x4dc] ss:$20 sps:$4 sm:$0xff]   ;;  %v19230_v36 = vld [vmem:[%s22287_s6 + $0x4d8] ss:$20 sps:$4 sm:$0xff]  }
  0x13   :  { %1770 = vmatprep.subr.bf16.mxu1 %v19198_v13  ;;  %v19231_v35 = vld [vmem:[%s22287_s6 + $0x234] ss:$20 sps:$4 sm:$0xff]   ;;  %v19233_v38 = vld [vmem:[%s22287_s6 + $0x230] ss:$20 sps:$4 sm:$0xff]   ;;  %v19237_v39 = vld [vmem:[%s22287_s6 + $0x20c] ss:$20 sps:$4 sm:$0xff]  }
  0x14   :  { %v19234_v37 = vld [vmem:[%s22287_s6 + $0x4b4] ss:$20 sps:$4 sm:$0xff]   ;;  %v19236_v40 = vld [vmem:[%s22287_s6 + $0x4b0] ss:$20 sps:$4 sm:$0xff]   ;;  %v19240_v41 = vld [vmem:[%s22287_s6 + $0x48c] ss:$20 sps:$4 sm:$0xff]  }
  0x15   :  { %1730 = vmatpush1.bf16.msra.mxu0 %v19197_v14  ;;  %v19239_v42 = vld [vmem:[%s22287_s6 + $0x208] ss:$20 sps:$4 sm:$0xff]   ;;  %v19243_v43 = vld [vmem:[%s22287_s6 + $0x1e4] ss:$20 sps:$4 sm:$0xff]   ;;  %v19245_v47 = vld [vmem:[%s22287_s6 + $0x1e0] ss:$20 sps:$4 sm:$0xff]  }
  0x16   :  { %1731 = vmatprep.subr.bf16.mxu0 %v19201_v15  ;;  %1771 = vmatpush1.bf16.msra.mxu1 %v19200_v16  ;;  %v19242_v44 = vld [vmem:[%s22287_s6 + $0x488] ss:$20 sps:$4 sm:$0xff]   ;;  %v19246_v45 = vld [vmem:[%s22287_s6 + $0x464] ss:$20 sps:$4 sm:$0xff]   ;;  %v19248_v51 = vld [vmem:[%s22287_s6 + $0x460] ss:$20 sps:$4 sm:$0xff]  }
  0x17   :  { %1772 = vmatprep.subr.bf16.mxu1 %v19204_v17  ;;  %v149_v46 = vld [vmem:[%s22330_s9 + $0x8] sm:$0xff]  ;;  %v19249_v49 = vld [vmem:[%s22287_s6 + $0x1bc] ss:$20 sps:$4 sm:$0xff]   ;;  %v19267_v63 = vld [vmem:[%s22287_s6 + $0x144] ss:$20 sps:$4 sm:$0xff]   ;;  %s22248_s8 = smov 18  }
  0x18   :  { %v22342_v48 = vpack.c.bf16 %v149_v46, %v149_v46  ;;  %v151_v50 = vld [vmem:[%s22330_s9 + $0x18] sm:$0xff]  ;;  %v19255_v55 = vld [vmem:[%s22287_s6 + $0x194] ss:$20 sps:$4 sm:$0xff]   ;;  %v19257_v58 = vld [vmem:[%s22287_s6 + $0x190] ss:$20 sps:$4 sm:$0xff]   ;;  %s23013_s11 = sld [smem:[%s25011_s0 + %s22248_s8]]   ;;  %s22249_s12 = smov 22  }
  0x19   :  { %1732 = vmatpush1.bf16.msra.mxu0 %v19203_v18  ;;  %v22348_v52 = vpack.c.bf16 %v151_v50, %v151_v50  ;;  %v19252_v53 = vld [vmem:[%s22287_s6 + $0x43c] ss:$20 sps:$4 sm:$0xff]   ;;  %v19251_v54 = vld [vmem:[%s22287_s6 + $0x1b8] ss:$20 sps:$4 sm:$0xff]   ;;  %v19258_v57 = vld [vmem:[%s22287_s6 + $0x414] ss:$20 sps:$4 sm:$0xff]   ;;  %s16766_s15 = sld [smem:[%s25011_s0 + %s22249_s12]]  }
  0x1a   :  { %1733 = vmatprep.subr.bf16.mxu0 %v19207_v19  ;;  %1773 = vmatpush1.bf16.msra.mxu1 %v19206_v20  ;;  %v19254_v56 = vld [vmem:[%s22287_s6 + $0x438] ss:$20 sps:$4 sm:$0xff]   ;;  %v19260_v60 = vld [vmem:[%s22287_s6 + $0x410] ss:$20 sps:$4 sm:$0xff]   ;;  %v19263_v62 = vld [vmem:[%s22287_s6 + $0x168] ss:$20 sps:$4 sm:$0xff]  }
  0x1b   :  { %1774 = vmatprep.subr.bf16.mxu1 %v19210_v21  ;;  %1755 = vmatprep.mubr.bf16.mxu0 %v22342_v48  ;;  %v19261_v59 = vld [vmem:[%s22287_s6 + $0x16c] ss:$20 sps:$4 sm:$0xff]   ;;  %v19266_v0 = vld [vmem:[%s22287_s6 + $0x3e8] ss:$20 sps:$4 sm:$0xff]   ;;  %v19270_v2 = vld [vmem:[%s22287_s6 + $0x3c4] ss:$20 sps:$4 sm:$0xff]  }
  0x1c   :  { %1796 = vmatprep.mubr.bf16.mxu1 %v22348_v52  ;;  %v19264_v61 = vld [vmem:[%s22287_s6 + $0x3ec] ss:$20 sps:$4 sm:$0xff]   ;;  %v19275_v5 = vld [vmem:[%s22287_s6 + $0x61c] ss:$20 sps:$4 sm:$0xff]   ;;  %v19278_v8 = vld [vmem:[%s22287_s6 + $0x124] ss:$20 sps:$4 sm:$0xff]  }
  0x1d   :  { %1734 = vmatpush1.bf16.msra.mxu0 %v19209_v22  ;;  %v19269_v1 = vld [vmem:[%s22287_s6 + $0x140] ss:$20 sps:$4 sm:$0xff]   ;;  %v19273_v9 = vld [vmem:[%s22287_s6 + $0x618] ss:$20 sps:$4 sm:$0xff]   ;;  %v19284_v13 = vld [vmem:[%s22287_s6 + $0xfc] ss:$20 sps:$4 sm:$0xff]  }
  0x1e   :  { %1735 = vmatprep.subr.bf16.mxu0 %v19213_v23  ;;  %1775 = vmatpush1.bf16.msra.mxu1 %v19212_v24  ;;  %v19272_v3 = vld [vmem:[%s22287_s6 + $0x3c0] ss:$20 sps:$4 sm:$0xff]   ;;  %v19279_v14 = vld [vmem:[%s22287_s6 + $0x5f0] ss:$20 sps:$4 sm:$0xff]   ;;  %v19282_v16 = vld [vmem:[%s22287_s6 + $0xf8] ss:$20 sps:$4 sm:$0xff]  }
  0x1f   :  { %1776 = vmatprep.subr.bf16.mxu1 %v19216_v25  ;;  %v148_v4 = vld [vmem:[%s22330_s9] sm:$0xff]  ;;  %v150_v6 = vld [vmem:[%s22330_s9 + $0x10] sm:$0xff]  ;;  %v19285_v18 = vld [vmem:[%s22287_s6 + $0x5c8] ss:$20 sps:$4 sm:$0xff]   ;;  %s22250_s16 = smov 7   ;;  %s22251_s20 = smov 6  }
  0x20   :  { %v22369_v7 = vpack.c.bf16 %v148_v4, %v148_v4  ;;  %v22373_v10 = vpack.c.bf16 %v150_v6, %v150_v6  ;;  %v19281_v11 = vld [vmem:[%s22287_s6 + $0x5f4] ss:$20 sps:$4 sm:$0xff]   ;;  %v19287_v15 = vld [vmem:[%s22287_s6 + $0x5cc] ss:$20 sps:$4 sm:$0xff]   ;;  %v19293_v19 = vld [vmem:[%s22287_s6 + $0x5a4] ss:$20 sps:$4 sm:$0xff]   ;;  %s23058_s19 = sld [smem:[%s25011_s0 + %s22250_s16]]  }
  0x21   :  { %1736 = vmatpush1.bf16.msra.mxu0 %v19215_v26  ;;  %v19276_v12 = vld [vmem:[%s22287_s6 + $0x120] ss:$20 sps:$4 sm:$0xff]   ;;  %v19288_v20 = vld [vmem:[%s22287_s6 + $0xd0] ss:$20 sps:$4 sm:$0xff]   ;;  %v19294_v24 = vld [vmem:[%s22287_s6 + $0xa8] ss:$20 sps:$4 sm:$0xff]   ;;  %s23069_s23 = sld [smem:[%s25011_s0 + %s22251_s20]]  }
  0x22   :  { %1737 = vmatprep.subr.bf16.mxu0 %v19219_v27  ;;  %1777 = vmatpush1.bf16.msra.mxu1 %v19218_v28  ;;  %v19290_v17 = vld [vmem:[%s22287_s6 + $0xd4] ss:$20 sps:$4 sm:$0xff]   ;;  %v19296_v21 = vld [vmem:[%s22287_s6 + $0xac] ss:$20 sps:$4 sm:$0xff]   ;;  %v19299_v23 = vld [vmem:[%s22287_s6 + $0x57c] ss:$20 sps:$4 sm:$0xff]  }
  0x23   :  { %1778 = vmatprep.subr.bf16.mxu1 %v19222_v29  ;;  %v19291_v22 = vld [vmem:[%s22287_s6 + $0x5a0] ss:$20 sps:$4 sm:$0xff]   ;;  %v19302_v25 = vld [vmem:[%s22287_s6 + $0x84] ss:$20 sps:$4 sm:$0xff]   ;;  %v19308_v29 = vld [vmem:[%s22287_s6 + $0x5c] ss:$20 sps:$4 sm:$0xff]  }
  0x24   :  { %v19297_v26 = vld [vmem:[%s22287_s6 + $0x578] ss:$20 sps:$4 sm:$0xff]   ;;  %v19305_v27 = vld [vmem:[%s22287_s6 + $0x554] ss:$20 sps:$4 sm:$0xff]   ;;  %s22252_s24 = smov 23   ;;  %s22253_s28 = smov 17  }
  0x25   :  { %1738 = vmatpush1.bf16.msra.mxu0 %v19221_v30  ;;  %v19300_v28 = vld [vmem:[%s22287_s6 + $0x80] ss:$20 sps:$4 sm:$0xff]   ;;  %v19303_v30 = vld [vmem:[%s22287_s6 + $0x550] ss:$20 sps:$4 sm:$0xff]   ;;  %v19354_v4 = vld [vmem:[%s22287_s6 + $0x198] ss:$20 sps:$4 sm:$0xff]   ;;  %s16767_s27 = sld [smem:[%s25011_s0 + %s22252_s24]]  }
  0x26   :  { %1739 = vmatprep.subr.bf16.mxu0 %v19225_v31  ;;  %1779 = vmatpush1.bf16.msra.mxu1 %v19224_v32  ;;  %v19311_v31 = vld [vmem:[%s22287_s6 + $0x52c] ss:$20 sps:$4 sm:$0xff]   ;;  %v19357_v6 = vld [vmem:[%s22287_s6 + $0x668] ss:$20 sps:$4 sm:$0xff]   ;;  %s23149_s1 = sld [smem:[%s25011_s0 + %s22253_s28]]   ;;  %s22254_s2 = smov 32  }
  0x27   :  { %1780 = vmatprep.subr.bf16.mxu1 %v19228_v33  ;;  %v19306_v32 = vld [vmem:[%s22287_s6 + $0x58] ss:$20 sps:$4 sm:$0xff]   ;;  %v19314_v33 = vld [vmem:[%s22287_s6 + $0x34] ss:$20 sps:$4 sm:$0xff]   ;;  %s16776_s5 = sld [smem:[%s25011_s0 + %s22254_s2]]   ;;  %s22256_s10 = smov 37  }
  0x28   :  { %v19324_v46 = vld [vmem:[%s22287_s6 + $0x260] ss:$20 sps:$4 sm:$0xff]   ;;  %s22257_s14 = smov 8   ;;  %s22258_s18 = smov 24  }
  0x29   :  { %1740 = vmatpush2.bf16.msra.mxu0 %v19227_v34  ;;  %v153_v34 = vld [vmem:[%s22330_s9 + $0x28] sm:$0xff]  ;;  %s22261_s22 = smov 16   ;;  %s22262_s26 = smov 31  }
  0x2a   :  { %1741 = vmatprep.subr.bf16.mxu0 %v19231_v35  ;;  %1781 = vmatpush2.bf16.msra.mxu1 %v19230_v36  ;;  %v19309_v35 = vld [vmem:[%s22287_s6 + $0x528] ss:$20 sps:$4 sm:$0xff]   ;;  %v22403_v36 = vpack.c.bf16 %v153_v34, %v153_v34  ;;  %v19335_v50 = vld [vmem:[%s22287_s6 + $0x70c] ss:$20 sps:$4 sm:$0xff]   ;;  %s22263_s30 = smov 36   ;;  %s22264_s4 = smov 25  }
  0x2b   :  { %1782 = vmatprep.subr.bf16.mxu1 %v19234_v37  ;;  %v19317_v37 = vld [vmem:[%s22287_s6 + $0x504] ss:$20 sps:$4 sm:$0xff]   ;;  %v19393_v34 = vld [vmem:[%s22287_s6 + $0x300] ss:$20 sps:$4 sm:$0xff]   ;;  %s22265_s8 = smov 11   ;;  %s22266_s12 = smov 10  }
  0x2c   :  { %s22267_s16 = smov 30   ;;  %s22268_s20 = smov 35  }
  0x2d   :  { %1742 = vmatpush2.bf16.msra.mxu0 %v19233_v38  ;;  %v19312_v38 = vld [vmem:[%s22287_s6 + $0x30] ss:$20 sps:$4 sm:$0xff]   ;;  %s22269_s24 = smov 15   ;;  %s22270_s28 = smov 26  }
  0x2e   :  { %1743 = vmatprep.subr.bf16.mxu0 %v19237_v39  ;;  %1783 = vmatpush2.bf16.msra.mxu1 %v19236_v40  ;;  %v19320_v39 = vld [vmem:[%s22287_s6 + $0xc] ss:$20 sps:$4 sm:$0xff]   ;;  %s22271_s2 = smov 13  }
  0x2f   :  { %1784 = vmatprep.subr.bf16.mxu1 %v19240_v41  ;;  %v19315_v40 = vld [vmem:[%s22287_s6 + $0x500] ss:$20 sps:$4 sm:$0xff]   ;;  %v19323_v41 = vld [vmem:[%s22287_s6 + $0x75c] ss:$20 sps:$4 sm:$0xff]  }
  0x31   :  { %1744 = vmatpush2.bf16.msra.mxu0 %v19239_v42  ;;  %v19318_v42 = vld [vmem:[%s22287_s6 + $0x8] ss:$20 sps:$4 sm:$0xff]  }
  0x32   :  { %1745 = vmatprep.subr.bf16.mxu0 %v19243_v43  ;;  %1785 = vmatpush2.bf16.msra.mxu1 %v19242_v44  ;;  %v19326_v43 = vld [vmem:[%s22287_s6 + $0x264] ss:$20 sps:$4 sm:$0xff]  }
  0x33   :  { %1786 = vmatprep.subr.bf16.mxu1 %v19246_v45  ;;  %v19321_v44 = vld [vmem:[%s22287_s6 + $0x758] ss:$20 sps:$4 sm:$0xff]   ;;  %v19329_v45 = vld [vmem:[%s22287_s6 + $0x734] ss:$20 sps:$4 sm:$0xff]  }
  0x35   :  { %1746 = vmatpush2.bf16.msra.mxu0 %v19245_v47  ;;  %v19332_v47 = vld [vmem:[%s22287_s6 + $0x23c] ss:$20 sps:$4 sm:$0xff]  }
  0x36   :  { %1747 = vmatprep.subr.bf16.mxu0 %v19249_v49  ;;  %1787 = vmatpush2.bf16.msra.mxu1 %v19248_v51  ;;  %v19327_v49 = vld [vmem:[%s22287_s6 + $0x730] ss:$20 sps:$4 sm:$0xff]   ;;  %v19330_v51 = vld [vmem:[%s22287_s6 + $0x238] ss:$20 sps:$4 sm:$0xff]  }
  0x37   :  { %1788 = vmatprep.subr.bf16.mxu1 %v19252_v53  ;;  %v19338_v53 = vld [vmem:[%s22287_s6 + $0x214] ss:$20 sps:$4 sm:$0xff]  }
  0x39   :  { %1748 = vmatpush2.bf16.msra.mxu0 %v19251_v54  ;;  %v19333_v54 = vld [vmem:[%s22287_s6 + $0x708] ss:$20 sps:$4 sm:$0xff]  }
  0x3a   :  { %1749 = vmatprep.subr.bf16.mxu0 %v19255_v55  ;;  %1789 = vmatpush2.bf16.msra.mxu1 %v19254_v56  ;;  %v19341_v55 = vld [vmem:[%s22287_s6 + $0x6e4] ss:$20 sps:$4 sm:$0xff]  }
  0x3b   :  { %1790 = vmatprep.subr.bf16.mxu1 %v19258_v57  ;;  %v19336_v56 = vld [vmem:[%s22287_s6 + $0x210] ss:$20 sps:$4 sm:$0xff]   ;;  %v19344_v57 = vld [vmem:[%s22287_s6 + $0x1ec] ss:$20 sps:$4 sm:$0xff]  }
  0x3d   :  { %1750 = vmatpush2.bf16.msra.mxu0 %v19257_v58  ;;  %v19339_v58 = vld [vmem:[%s22287_s6 + $0x6e0] ss:$20 sps:$4 sm:$0xff]  }
  0x3e   :  { %1751 = vmatprep.subr.bf16.mxu0 %v19261_v59  ;;  %1791 = vmatpush2.bf16.msra.mxu1 %v19260_v60  ;;  %v19347_v59 = vld [vmem:[%s22287_s6 + $0x6bc] ss:$20 sps:$4 sm:$0xff]  }
  0x3f   :  { %1792 = vmatprep.subr.bf16.mxu1 %v19264_v61  ;;  %v19342_v60 = vld [vmem:[%s22287_s6 + $0x1e8] ss:$20 sps:$4 sm:$0xff]   ;;  %v19350_v61 = vld [vmem:[%s22287_s6 + $0x1c4] ss:$20 sps:$4 sm:$0xff]  }
  0x41   :  { %1752 = vmatpush2.bf16.msra.mxu0 %v19263_v62  ;;  %v19345_v62 = vld [vmem:[%s22287_s6 + $0x6b8] ss:$20 sps:$4 sm:$0xff]  }
  0x42   :  { %1753 = vmatprep.subr.bf16.mxu0 %v19267_v63  ;;  %1793 = vmatpush2.bf16.msra.mxu1 %v19266_v0  ;;  %v19353_v63 = vld [vmem:[%s22287_s6 + $0x694] ss:$20 sps:$4 sm:$0xff]  }
  0x43   :  { %1794 = vmatprep.subr.bf16.mxu1 %v19270_v2  ;;  %v19348_v0 = vld [vmem:[%s22287_s6 + $0x1c0] ss:$20 sps:$4 sm:$0xff]   ;;  %v19351_v2 = vld [vmem:[%s22287_s6 + $0x690] ss:$20 sps:$4 sm:$0xff]  }
  0x45   :  { %1754 = vmatpush2.bf16.msra.mxu0 %v19269_v1  ;;  %v19356_v1 = vld [vmem:[%s22287_s6 + $0x19c] ss:$20 sps:$4 sm:$0xff]  }
  0x46   :  { %1805 = vmatprep.subr.bf16.mxu0 %v19275_v5  ;;  %1795 = vmatpush2.bf16.msra.mxu1 %v19272_v3  ;;  %v19359_v3 = vld [vmem:[%s22287_s6 + $0x66c] ss:$20 sps:$4 sm:$0xff]   ;;  %v19362_v5 = vld [vmem:[%s22287_s6 + $0x174] ss:$20 sps:$4 sm:$0xff]  }
  0x47   :  { %1846 = vmatprep.subr.bf16.mxu1 %v19278_v8  ;;  %v19365_v8 = vld [vmem:[%s22287_s6 + $0x644] ss:$20 sps:$4 sm:$0xff]  }
  0x48   :  { %1756 = vmatmul.mubr.bf16.vlgmr.msra.gmra.mxu0 %v22369_v7 }
  0x49   :  { %1806 = vmatpush1.bf16.msra.mxu0 %v19273_v9  ;;  %1797 = vmatmul.mubr.bf16.vlgmr.msra.gmra.mxu1 %v22373_v10  ;;  %v19360_v9 = vld [vmem:[%s22287_s6 + $0x170] ss:$20 sps:$4 sm:$0xff]  }
  0x4a   :  { %1807 = vmatprep.subr.bf16.mxu0 %v19281_v11  ;;  %1847 = vmatpush1.bf16.msra.mxu1 %v19276_v12  ;;  %v19363_v11 = vld [vmem:[%s22287_s6 + $0x640] ss:$20 sps:$4 sm:$0xff]  }
  0x4b   :  { %1878 = vmatprep.mubr.bf16.mxu1 %v22342_v48  ;;  %1848 = vmatprep.subr.bf16.mxu1 %v19284_v13  ;;  %v19368_v12 = vld [vmem:[%s22287_s6 + $0x14c] ss:$20 sps:$4 sm:$0xff]  }
  0x4c   :  { %1837 = vmatprep.mubr.bf16.mxu0 %v22403_v36  ;;  %v152_v13 = vld [vmem:[%s22330_s9 + $0x20] sm:$0xff] }
  0x4d   :  { %1808 = vmatpush1.bf16.msra.mxu0 %v19279_v14  ;;  %v19371_v14 = vld [vmem:[%s22287_s6 + $0x3a4] ss:$20 sps:$4 sm:$0xff]  }
  0x4e   :  { %1809 = vmatprep.subr.bf16.mxu0 %v19287_v15  ;;  %1849 = vmatpush1.bf16.msra.mxu1 %v19282_v16  ;;  %v19366_v15 = vld [vmem:[%s22287_s6 + $0x148] ss:$20 sps:$4 sm:$0xff]   ;;  %v22445_v16 = vpack.c.bf16 %v152_v13, %v152_v13  ;;  %v19450_v13 = vld [vmem:[%s22287_s6 + $0x698] ss:$20 sps:$4 sm:$0xff]  }
  0x4f   :  { %1850 = vmatprep.subr.bf16.mxu1 %v19290_v17  ;;  %v19374_v17 = vld [vmem:[%s22287_s6 + $0x624] ss:$20 sps:$4 sm:$0xff]  }
  0x51   :  { %1810 = vmatpush1.bf16.msra.mxu0 %v19285_v18  ;;  %v19369_v18 = vld [vmem:[%s22287_s6 + $0x3a0] ss:$20 sps:$4 sm:$0xff]  }
  0x52   :  { %1811 = vmatprep.subr.bf16.mxu0 %v19293_v19  ;;  %1851 = vmatpush1.bf16.msra.mxu1 %v19288_v20  ;;  %v19377_v19 = vld [vmem:[%s22287_s6 + $0x37c] ss:$20 sps:$4 sm:$0xff]   ;;  %v19372_v20 = vld [vmem:[%s22287_s6 + $0x620] ss:$20 sps:$4 sm:$0xff]  }
  0x53   :  { %1852 = vmatprep.subr.bf16.mxu1 %v19296_v21  ;;  %v19380_v21 = vld [vmem:[%s22287_s6 + $0x5fc] ss:$20 sps:$4 sm:$0xff]  }
  0x55   :  { %1812 = vmatpush1.bf16.msra.mxu0 %v19291_v22  ;;  %v19375_v22 = vld [vmem:[%s22287_s6 + $0x378] ss:$20 sps:$4 sm:$0xff]  }
  0x56   :  { %1813 = vmatprep.subr.bf16.mxu0 %v19299_v23  ;;  %1853 = vmatpush1.bf16.msra.mxu1 %v19294_v24  ;;  %v19383_v23 = vld [vmem:[%s22287_s6 + $0x354] ss:$20 sps:$4 sm:$0xff]   ;;  %v19378_v24 = vld [vmem:[%s22287_s6 + $0x5f8] ss:$20 sps:$4 sm:$0xff]  }
  0x57   :  { %1854 = vmatprep.subr.bf16.mxu1 %v19302_v25  ;;  %v19386_v25 = vld [vmem:[%s22287_s6 + $0x5d4] ss:$20 sps:$4 sm:$0xff]  }
  0x59   :  { %1814 = vmatpush1.bf16.msra.mxu0 %v19297_v26  ;;  %v19381_v26 = vld [vmem:[%s22287_s6 + $0x350] ss:$20 sps:$4 sm:$0xff]  }
  0x5a   :  { %1815 = vmatprep.subr.bf16.mxu0 %v19305_v27  ;;  %1855 = vmatpush1.bf16.msra.mxu1 %v19300_v28  ;;  %v19389_v27 = vld [vmem:[%s22287_s6 + $0x32c] ss:$20 sps:$4 sm:$0xff]   ;;  %v19384_v28 = vld [vmem:[%s22287_s6 + $0x5d0] ss:$20 sps:$4 sm:$0xff]  }
  0x5b   :  { %1856 = vmatprep.subr.bf16.mxu1 %v19308_v29  ;;  %v19392_v29 = vld [vmem:[%s22287_s6 + $0x5ac] ss:$20 sps:$4 sm:$0xff]  }
  0x5d   :  { %1816 = vmatpush1.bf16.msra.mxu0 %v19303_v30  ;;  %v19387_v30 = vld [vmem:[%s22287_s6 + $0x328] ss:$20 sps:$4 sm:$0xff]  }
  0x5e   :  { %1817 = vmatprep.subr.bf16.mxu0 %v19311_v31  ;;  %1857 = vmatpush1.bf16.msra.mxu1 %v19306_v32  ;;  %v19395_v31 = vld [vmem:[%s22287_s6 + $0x304] ss:$20 sps:$4 sm:$0xff]   ;;  %v19390_v32 = vld [vmem:[%s22287_s6 + $0x5a8] ss:$20 sps:$4 sm:$0xff]  }
  0x5f   :  { %1858 = vmatprep.subr.bf16.mxu1 %v19314_v33  ;;  %v19398_v33 = vld [vmem:[%s22287_s6 + $0x584] ss:$20 sps:$4 sm:$0xff]  }
  0x61   :  { %1818 = vmatpush1.bf16.msra.mxu0 %v19309_v35  ;;  %v19401_v35 = vld [vmem:[%s22287_s6 + $0x2dc] ss:$20 sps:$4 sm:$0xff]  }
  0x62   :  { %1819 = vmatprep.subr.bf16.mxu0 %v19317_v37  ;;  %1859 = vmatpush1.bf16.msra.mxu1 %v19312_v38  ;;  %v19396_v37 = vld [vmem:[%s22287_s6 + $0x580] ss:$20 sps:$4 sm:$0xff]   ;;  %v19404_v38 = vld [vmem:[%s22287_s6 + $0x55c] ss:$20 sps:$4 sm:$0xff]  }
  0x63   :  { %1860 = vmatprep.subr.bf16.mxu1 %v19320_v39  ;;  %v19399_v39 = vld [vmem:[%s22287_s6 + $0x2d8] ss:$20 sps:$4 sm:$0xff]  }
  0x65   :  { %1820 = vmatpush1.bf16.msra.mxu0 %v19315_v40  ;;  %v19407_v40 = vld [vmem:[%s22287_s6 + $0x2b4] ss:$20 sps:$4 sm:$0xff]  }
  0x66   :  { %1821 = vmatprep.subr.bf16.mxu0 %v19323_v41  ;;  %1861 = vmatpush1.bf16.msra.mxu1 %v19318_v42  ;;  %v19402_v41 = vld [vmem:[%s22287_s6 + $0x558] ss:$20 sps:$4 sm:$0xff]   ;;  %v19410_v42 = vld [vmem:[%s22287_s6 + $0x534] ss:$20 sps:$4 sm:$0xff]  }
  0x67   :  { %1862 = vmatprep.subr.bf16.mxu1 %v19326_v43  ;;  %v19405_v43 = vld [vmem:[%s22287_s6 + $0x2b0] ss:$20 sps:$4 sm:$0xff]  }
  0x69   :  { %1822 = vmatpush2.bf16.msra.mxu0 %v19321_v44  ;;  %v19413_v44 = vld [vmem:[%s22287_s6 + $0x28c] ss:$20 sps:$4 sm:$0xff]  }
  0x6a   :  { %1823 = vmatprep.subr.bf16.mxu0 %v19329_v45  ;;  %1863 = vmatpush2.bf16.msra.mxu1 %v19324_v46  ;;  %v19408_v45 = vld [vmem:[%s22287_s6 + $0x530] ss:$20 sps:$4 sm:$0xff]   ;;  %v19416_v46 = vld [vmem:[%s22287_s6 + $0x50c] ss:$20 sps:$4 sm:$0xff]  }
  0x6b   :  { %1864 = vmatprep.subr.bf16.mxu1 %v19332_v47  ;;  %v19411_v47 = vld [vmem:[%s22287_s6 + $0x288] ss:$20 sps:$4 sm:$0xff]  }
  0x6d   :  { %1824 = vmatpush2.bf16.msra.mxu0 %v19327_v49  ;;  %v19419_v49 = vld [vmem:[%s22287_s6 + $0x4e4] ss:$20 sps:$4 sm:$0xff]  }
  0x6e   :  { %1825 = vmatprep.subr.bf16.mxu0 %v19335_v50  ;;  %1865 = vmatpush2.bf16.msra.mxu1 %v19330_v51  ;;  %v19414_v50 = vld [vmem:[%s22287_s6 + $0x508] ss:$20 sps:$4 sm:$0xff]   ;;  %v19422_v51 = vld [vmem:[%s22287_s6 + $0x764] ss:$20 sps:$4 sm:$0xff]  }
  0x6f   :  { %1866 = vmatprep.subr.bf16.mxu1 %v19338_v53  ;;  %v19417_v53 = vld [vmem:[%s22287_s6 + $0x4e0] ss:$20 sps:$4 sm:$0xff]  }
  0x71   :  { %1826 = vmatpush2.bf16.msra.mxu0 %v19333_v54  ;;  %v19425_v54 = vld [vmem:[%s22287_s6 + $0x4bc] ss:$20 sps:$4 sm:$0xff]  }
  0x72   :  { %1827 = vmatprep.subr.bf16.mxu0 %v19341_v55  ;;  %1867 = vmatpush2.bf16.msra.mxu1 %v19336_v56  ;;  %v19420_v55 = vld [vmem:[%s22287_s6 + $0x760] ss:$20 sps:$4 sm:$0xff]   ;;  %v19428_v56 = vld [vmem:[%s22287_s6 + $0x73c] ss:$20 sps:$4 sm:$0xff]  }
  0x73   :  { %1868 = vmatprep.subr.bf16.mxu1 %v19344_v57  ;;  %v19423_v57 = vld [vmem:[%s22287_s6 + $0x4b8] ss:$20 sps:$4 sm:$0xff]  }
  0x75   :  { %1828 = vmatpush2.bf16.msra.mxu0 %v19339_v58  ;;  %v19431_v58 = vld [vmem:[%s22287_s6 + $0x494] ss:$20 sps:$4 sm:$0xff]  }
  0x76   :  { %1829 = vmatprep.subr.bf16.mxu0 %v19347_v59  ;;  %1869 = vmatpush2.bf16.msra.mxu1 %v19342_v60  ;;  %v19426_v59 = vld [vmem:[%s22287_s6 + $0x738] ss:$20 sps:$4 sm:$0xff]   ;;  %v19434_v60 = vld [vmem:[%s22287_s6 + $0x714] ss:$20 sps:$4 sm:$0xff]  }
  0x77   :  { %1870 = vmatprep.subr.bf16.mxu1 %v19350_v61  ;;  %v19429_v61 = vld [vmem:[%s22287_s6 + $0x490] ss:$20 sps:$4 sm:$0xff]  }
  0x79   :  { %1830 = vmatpush2.bf16.msra.mxu0 %v19345_v62  ;;  %v19437_v62 = vld [vmem:[%s22287_s6 + $0x46c] ss:$20 sps:$4 sm:$0xff]  }
  0x7a   :  { %1831 = vmatprep.subr.bf16.mxu0 %v19353_v63  ;;  %1871 = vmatpush2.bf16.msra.mxu1 %v19348_v0  ;;  %v19432_v63 = vld [vmem:[%s22287_s6 + $0x710] ss:$20 sps:$4 sm:$0xff]   ;;  %v19440_v0 = vld [vmem:[%s22287_s6 + $0x6ec] ss:$20 sps:$4 sm:$0xff]  }
  0x7b   :  { %1872 = vmatprep.subr.bf16.mxu1 %v19356_v1  ;;  %v19435_v1 = vld [vmem:[%s22287_s6 + $0x468] ss:$20 sps:$4 sm:$0xff]  }
  0x7d   :  { %1832 = vmatpush2.bf16.msra.mxu0 %v19351_v2  ;;  %v19443_v2 = vld [vmem:[%s22287_s6 + $0x444] ss:$20 sps:$4 sm:$0xff]  }
  0x7e   :  { %1833 = vmatprep.subr.bf16.mxu0 %v19359_v3  ;;  %1873 = vmatpush2.bf16.msra.mxu1 %v19354_v4  ;;  %v19438_v3 = vld [vmem:[%s22287_s6 + $0x6e8] ss:$20 sps:$4 sm:$0xff]   ;;  %v19446_v4 = vld [vmem:[%s22287_s6 + $0x6c4] ss:$20 sps:$4 sm:$0xff]  }
  0x7f   :  { %1874 = vmatprep.subr.bf16.mxu1 %v19362_v5  ;;  %v19441_v5 = vld [vmem:[%s22287_s6 + $0x440] ss:$20 sps:$4 sm:$0xff]  }
  0x81   :  { %1834 = vmatpush2.bf16.msra.mxu0 %v19357_v6  ;;  %v19449_v6 = vld [vmem:[%s22287_s6 + $0x41c] ss:$20 sps:$4 sm:$0xff]  }
  0x82   :  { %1835 = vmatprep.subr.bf16.mxu0 %v19365_v8  ;;  %1875 = vmatpush2.bf16.msra.mxu1 %v19360_v9  ;;  %v19444_v8 = vld [vmem:[%s22287_s6 + $0x6c0] ss:$20 sps:$4 sm:$0xff]   ;;  %v19452_v9 = vld [vmem:[%s22287_s6 + $0x69c] ss:$20 sps:$4 sm:$0xff]  }
  0x83   :  { %1876 = vmatprep.subr.bf16.mxu1 %v19368_v12  ;;  %v19455_v12 = vld [vmem:[%s22287_s6 + $0x3f4] ss:$20 sps:$4 sm:$0xff]  }
  0x85   :  { %1836 = vmatpush2.bf16.msra.mxu0 %v19363_v11  ;;  %v19447_v11 = vld [vmem:[%s22287_s6 + $0x418] ss:$20 sps:$4 sm:$0xff]  }
  0x86   :  { %1887 = vmatprep.subr.bf16.mxu0 %v19371_v14  ;;  %1877 = vmatpush2.bf16.msra.mxu1 %v19366_v15  ;;  %v19458_v14 = vld [vmem:[%s22287_s6 + $0x674] ss:$20 sps:$4 sm:$0xff]   ;;  %v19453_v15 = vld [vmem:[%s22287_s6 + $0x3f0] ss:$20 sps:$4 sm:$0xff]  }
  0x87   :  { %1928 = vmatprep.subr.bf16.mxu1 %v19374_v17  ;;  %v19461_v17 = vld [vmem:[%s22287_s6 + $0x3cc] ss:$20 sps:$4 sm:$0xff]  }
  0x88   :  { %1838 = vmatmul.mubr.bf16.vlgmr.msra.gmra.mxu0 %v22445_v16 }
  0x89   :  { %1888 = vmatpush1.bf16.msra.mxu0 %v19369_v18  ;;  %1919 = vmatprep.mubr.bf16.mxu0 %v22348_v52  ;;  %v19456_v18 = vld [vmem:[%s22287_s6 + $0x670] ss:$20 sps:$4 sm:$0xff]  }
  0x8a   :  { %1879 = vmatmul.mubr.bf16.vlgmr.msra.gmra.mxu1 %v22369_v7  ;;  %1889 = vmatprep.subr.bf16.mxu0 %v19377_v19  ;;  %v19464_v19 = vld [vmem:[%s22287_s6 + $0x64c] ss:$20 sps:$4 sm:$0xff]  }
  0x8b   :  { %1929 = vmatpush1.bf16.msra.mxu1 %v19372_v20  ;;  %1960 = vmatprep.mubr.bf16.mxu1 %v22403_v36  ;;  %v19459_v20 = vld [vmem:[%s22287_s6 + $0x3c8] ss:$20 sps:$4 sm:$0xff]  }
  0x8c   :  { %1930 = vmatprep.subr.bf16.mxu1 %v19380_v21  ;;  %v19465_v21 = vld [vmem:[%s22287_s6 + $0x268] ss:$20 sps:$4 sm:$0xff]  }
  0x8d   :  { %1890 = vmatpush1.bf16.msra.mxu0 %v19375_v22  ;;  %v19462_v22 = vld [vmem:[%s22287_s6 + $0x648] ss:$20 sps:$4 sm:$0xff]  }
  0x8e   :  { %1891 = vmatprep.subr.bf16.mxu0 %v19383_v23  ;;  %v19467_v23 = vld [vmem:[%s22287_s6 + $0x4e8] ss:$20 sps:$4 sm:$0xff]  }
  0x8f   :  { %1931 = vmatpush1.bf16.msra.mxu1 %v19378_v24  ;;  %v19466_v24 = vld [vmem:[%s22287_s6 + $0x128] ss:$20 sps:$4 sm:$0xff]  }
  0x90   :  { %1932 = vmatprep.subr.bf16.mxu1 %v19386_v25  ;;  %v19469_v25 = vld [vmem:[%s22287_s6 + $0x240] ss:$20 sps:$4 sm:$0xff]  }
  0x91   :  { %1892 = vmatpush1.bf16.msra.mxu0 %v19381_v26  ;;  %v19468_v26 = vld [vmem:[%s22287_s6 + $0x3a8] ss:$20 sps:$4 sm:$0xff]  }
  0x92   :  { %1893 = vmatprep.subr.bf16.mxu0 %v19389_v27  ;;  %v19471_v27 = vld [vmem:[%s22287_s6 + $0x4c0] ss:$20 sps:$4 sm:$0xff]  }
  0x93   :  { %1933 = vmatpush1.bf16.msra.mxu1 %v19384_v28  ;;  %v19470_v28 = vld [vmem:[%s22287_s6 + $0x100] ss:$20 sps:$4 sm:$0xff]  }
  0x94   :  { %1934 = vmatprep.subr.bf16.mxu1 %v19392_v29  ;;  %v19473_v29 = vld [vmem:[%s22287_s6 + $0x218] ss:$20 sps:$4 sm:$0xff]  }
  0x95   :  { %1894 = vmatpush1.bf16.msra.mxu0 %v19387_v30  ;;  %v19472_v30 = vld [vmem:[%s22287_s6 + $0x380] ss:$20 sps:$4 sm:$0xff]  }
  0x96   :  { %1895 = vmatprep.subr.bf16.mxu0 %v19395_v31  ;;  %v19475_v31 = vld [vmem:[%s22287_s6 + $0x498] ss:$20 sps:$4 sm:$0xff]  }
  0x97   :  { %1935 = vmatpush1.bf16.msra.mxu1 %v19390_v32  ;;  %v19474_v32 = vld [vmem:[%s22287_s6 + $0xd8] ss:$20 sps:$4 sm:$0xff]  }
  0x98   :  { %1936 = vmatprep.subr.bf16.mxu1 %v19398_v33  ;;  %v19476_v33 = vld [vmem:[%s22287_s6 + $0x358] ss:$20 sps:$4 sm:$0xff]  }
  0x99   :  { %1896 = vmatpush1.bf16.msra.mxu0 %v19393_v34  ;;  %v19478_v34 = vld [vmem:[%s22287_s6 + $0xb0] ss:$20 sps:$4 sm:$0xff]  }
  0x9a   :  { %1897 = vmatprep.subr.bf16.mxu0 %v19401_v35  ;;  %v19479_v35 = vld [vmem:[%s22287_s6 + $0x470] ss:$20 sps:$4 sm:$0xff]  }
  0x9b   :  { %1937 = vmatpush1.bf16.msra.mxu1 %v19396_v37  ;;  %v19480_v37 = vld [vmem:[%s22287_s6 + $0x330] ss:$20 sps:$4 sm:$0xff]  }
  0x9c   :  { %1938 = vmatprep.subr.bf16.mxu1 %v19404_v38  ;;  %v19482_v38 = vld [vmem:[%s22287_s6 + $0x88] ss:$20 sps:$4 sm:$0xff]  }
  0x9d   :  { %1898 = vmatpush1.bf16.msra.mxu0 %v19399_v39  ;;  %v19483_v39 = vld [vmem:[%s22287_s6 + $0x448] ss:$20 sps:$4 sm:$0xff]  }
  0x9e   :  { %1899 = vmatprep.subr.bf16.mxu0 %v19407_v40  ;;  %v19484_v40 = vld [vmem:[%s22287_s6 + $0x308] ss:$20 sps:$4 sm:$0xff]  }
  0x9f   :  { %1939 = vmatpush1.bf16.msra.mxu1 %v19402_v41  ;;  %v19485_v41 = vld [vmem:[%s22287_s6 + $0x1a0] ss:$20 sps:$4 sm:$0xff]  }
  0xa0   :  { %1940 = vmatprep.subr.bf16.mxu1 %v19410_v42  ;;  %v19486_v42 = vld [vmem:[%s22287_s6 + $0x60] ss:$20 sps:$4 sm:$0xff]  }
  0xa1   :  { %1900 = vmatpush1.bf16.msra.mxu0 %v19405_v43  ;;  %v19487_v43 = vld [vmem:[%s22287_s6 + $0x420] ss:$20 sps:$4 sm:$0xff]  }
  0xa2   :  { %1901 = vmatprep.subr.bf16.mxu0 %v19413_v44  ;;  %v19488_v44 = vld [vmem:[%s22287_s6 + $0x2e0] ss:$20 sps:$4 sm:$0xff]  }
  0xa3   :  { %1941 = vmatpush1.bf16.msra.mxu1 %v19408_v45  ;;  %v19489_v45 = vld [vmem:[%s22287_s6 + $0x178] ss:$20 sps:$4 sm:$0xff]  }
  0xa4   :  { %1942 = vmatprep.subr.bf16.mxu1 %v19416_v46  ;;  %v19490_v46 = vld [vmem:[%s22287_s6 + $0x38] ss:$20 sps:$4 sm:$0xff]  }
  0xa5   :  { %1902 = vmatpush1.bf16.msra.mxu0 %v19411_v47  ;;  %v19491_v47 = vld [vmem:[%s22287_s6 + $0x3f8] ss:$20 sps:$4 sm:$0xff]  }
  0xa6   :  { %1903 = vmatprep.subr.bf16.mxu0 %v19419_v49  ;;  %v19492_v49 = vld [vmem:[%s22287_s6 + $0x2b8] ss:$20 sps:$4 sm:$0xff]  }
  0xa7   :  { %1943 = vmatpush1.bf16.msra.mxu1 %v19414_v50  ;;  %v19493_v50 = vld [vmem:[%s22287_s6 + $0x150] ss:$20 sps:$4 sm:$0xff]  }
  0xa8   :  { %1944 = vmatprep.subr.bf16.mxu1 %v19422_v51  ;;  %v19494_v51 = vld [vmem:[%s22287_s6 + $0x10] ss:$20 sps:$4 sm:$0xff]  }
  0xa9   :  { %1904 = vmatpush2.bf16.msra.mxu0 %v19417_v53  ;;  %v19495_v53 = vld [vmem:[%s22287_s6 + $0x3d0] ss:$20 sps:$4 sm:$0xff]  }
  0xaa   :  { %1905 = vmatprep.subr.bf16.mxu0 %v19425_v54  ;;  %v19497_v54 = vld [vmem:[%s22287_s6 + $0x768] ss:$20 sps:$4 sm:$0xff]  }
  0xab   :  { %1945 = vmatpush2.bf16.msra.mxu1 %v19420_v55  ;;  %v19496_v55 = vld [vmem:[%s22287_s6 + $0x290] ss:$20 sps:$4 sm:$0xff]  }
  0xac   :  { %1946 = vmatprep.subr.bf16.mxu1 %v19428_v56  ;;  %v19515_v56 = vld [vmem:[%s22508_s13 + $0xe4] ss:$16 sps:$4 sm:$0xff]  }
  0xad   :  { %1906 = vmatpush2.bf16.msra.mxu0 %v19423_v57  ;;  %v19498_v57 = vld [vmem:[%s22287_s6 + $0x628] ss:$20 sps:$4 sm:$0xff]  }
  0xae   :  { %1907 = vmatprep.subr.bf16.mxu0 %v19431_v58  ;;  %v19499_v58 = vld [vmem:[%s22287_s6 + $0x740] ss:$20 sps:$4 sm:$0xff]  }
  0xaf   :  { %1947 = vmatpush2.bf16.msra.mxu1 %v19426_v59  ;;  %v19513_v59 = vld [vmem:[%s22508_s13 + $0xe0] ss:$16 sps:$4 sm:$0xff]  }
  0xb0   :  { %1948 = vmatprep.subr.bf16.mxu1 %v19434_v60  ;;  %v19500_v60 = vld [vmem:[%s22287_s6 + $0x600] ss:$20 sps:$4 sm:$0xff]  }
  0xb1   :  { %1908 = vmatpush2.bf16.msra.mxu0 %v19429_v61  ;;  %v19518_v61 = vld [vmem:[%s22508_s13 + $0xc4] ss:$16 sps:$4 sm:$0xff]  }
  0xb2   :  { %1909 = vmatprep.subr.bf16.mxu0 %v19437_v62  ;;  %v19501_v62 = vld [vmem:[%s22287_s6 + $0x718] ss:$20 sps:$4 sm:$0xff]  }
  0xb3   :  { %1949 = vmatpush2.bf16.msra.mxu1 %v19432_v63  ;;  %v19516_v63 = vld [vmem:[%s22508_s13 + $0xc0] ss:$16 sps:$4 sm:$0xff]  }
  0xb4   :  { %1950 = vmatprep.subr.bf16.mxu1 %v19440_v0  ;;  %v19521_v0 = vld [vmem:[%s22508_s13 + $0xa4] ss:$16 sps:$4 sm:$0xff]  }
  0xb5   :  { %1910 = vmatpush2.bf16.msra.mxu0 %v19435_v1  ;;  %v19502_v1 = vld [vmem:[%s22287_s6 + $0x5d8] ss:$20 sps:$4 sm:$0xff]  }
  0xb6   :  { %1911 = vmatprep.subr.bf16.mxu0 %v19443_v2  ;;  %v19519_v2 = vld [vmem:[%s22508_s13 + $0xa0] ss:$16 sps:$4 sm:$0xff]  }
  0xb7   :  { %1951 = vmatpush2.bf16.msra.mxu1 %v19438_v3  ;;  %v19524_v3 = vld [vmem:[%s22508_s13 + $0x84] ss:$16 sps:$4 sm:$0xff]  }
  0xb8   :  { %1952 = vmatprep.subr.bf16.mxu1 %v19446_v4  ;;  %v19522_v4 = vld [vmem:[%s22508_s13 + $0x80] ss:$16 sps:$4 sm:$0xff]  }
  0xb9   :  { %1912 = vmatpush2.bf16.msra.mxu0 %v19441_v5  ;;  %v19527_v5 = vld [vmem:[%s22508_s13 + $0x64] ss:$16 sps:$4 sm:$0xff]  }
  0xba   :  { %1913 = vmatprep.subr.bf16.mxu0 %v19449_v6  ;;  %v19506_v6 = vld [vmem:[%s22287_s6 + $0x588] ss:$20 sps:$4 sm:$0xff]  }
  0xbb   :  { %1953 = vmatpush2.bf16.msra.mxu1 %v19444_v8  ;;  %v19507_v8 = vld [vmem:[%s22287_s6 + $0x6a0] ss:$20 sps:$4 sm:$0xff]  }
  0xbc   :  { %1954 = vmatprep.subr.bf16.mxu1 %v19452_v9  ;;  %v19525_v9 = vld [vmem:[%s22508_s13 + $0x60] ss:$16 sps:$4 sm:$0xff]  }
  0xbd   :  { %1914 = vmatpush2.bf16.msra.mxu0 %v19447_v11  ;;  %v19530_v11 = vld [vmem:[%s22508_s13 + $0x44] ss:$16 sps:$4 sm:$0xff]  }
  0xbe   :  { %1915 = vmatprep.subr.bf16.mxu0 %v19455_v12  ;;  %v19508_v12 = vld [vmem:[%s22287_s6 + $0x560] ss:$20 sps:$4 sm:$0xff]  }
  0xbf   :  { %1955 = vmatpush2.bf16.msra.mxu1 %v19450_v13  ;;  %v19509_v13 = vld [vmem:[%s22287_s6 + $0x678] ss:$20 sps:$4 sm:$0xff]  }
  0xc0   :  { %1956 = vmatprep.subr.bf16.mxu1 %v19458_v14  ;;  %v19528_v14 = vld [vmem:[%s22508_s13 + $0x40] ss:$16 sps:$4 sm:$0xff]  }
  0xc1   :  { %1916 = vmatpush2.bf16.msra.mxu0 %v19453_v15  ;;  %v19533_v15 = vld [vmem:[%s22508_s13 + $0x24] ss:$16 sps:$4 sm:$0xff]  }
  0xc2   :  { %1917 = vmatprep.subr.bf16.mxu0 %v19461_v17  ;;  %v19510_v17 = vld [vmem:[%s22287_s6 + $0x538] ss:$20 sps:$4 sm:$0xff]  }
  0xc3   :  { %1957 = vmatpush2.bf16.msra.mxu1 %v19456_v18  ;;  %v19511_v18 = vld [vmem:[%s22287_s6 + $0x650] ss:$20 sps:$4 sm:$0xff]  }
  0xc4   :  { %1958 = vmatprep.subr.bf16.mxu1 %v19464_v19  ;;  %v19531_v19 = vld [vmem:[%s22508_s13 + $0x20] ss:$16 sps:$4 sm:$0xff]  }
  0xc5   :  { %1918 = vmatpush2.bf16.msra.mxu0 %v19459_v20  ;;  %v19536_v20 = vld [vmem:[%s22508_s13 + $0x4] ss:$16 sps:$4 sm:$0xff]  }
  0xc6   :  { %18815 = vmatprep.subr.bf16.mxu0 %v19465_v21  ;;  %v19512_v21 = vld [vmem:[%s22287_s6 + $0x510] ss:$20 sps:$4 sm:$0xff]  }
  0xc7   :  { %1959 = vmatpush2.bf16.msra.mxu1 %v19462_v22  ;;  %v19563_v22 = vld [vmem:[%s22508_s13 + $0x2e4] ss:$16 sps:$4 sm:$0xff]  }
  0xc8   :  { %1920 = vmatmul.mubr.bf16.vlgmr.msra.gmra.mxu0 %v22373_v10  ;;  %18837 = vmatprep.subr.bf16.mxu1 %v19467_v23  ;;  %v19534_v23 = vld [vmem:[%s22508_s13] ss:$16 sps:$4 sm:$0xff]  }
  0xc9   :  { %18816 = vmatpush3.bf16.msra.mxu0 %v19466_v24  ;;  %2001 = vmatprep.mubr.bf16.mxu0 %v22342_v48  ;;  %v19477_v48 = vld [vmem:[%s22287_s6 + $0x1f0] ss:$20 sps:$4 sm:$0xff]  }
  0xca   :  { %1961 = vmatmul.mubr.bf16.vlgmr.msra.gmra.mxu1 %v22445_v16  ;;  %18817 = vmatprep.subr.bf16.mxu0 %v19469_v25  ;;  %v19539_v24 = vld [vmem:[%s22508_s13 + $0x1e4] ss:$16 sps:$4 sm:$0xff]   ;;  %v19561_v25 = vld [vmem:[%s22508_s13 + $0x2e0] ss:$16 sps:$4 sm:$0xff]  }
  0xcb   :  { %18838 = vmatpush3.bf16.msra.mxu1 %v19468_v26  ;;  %2041 = vmatprep.mubr.bf16.mxu1 %v22348_v52  ;;  %v19481_v52 = vld [vmem:[%s22287_s6 + $0x1c8] ss:$20 sps:$4 sm:$0xff]   ;;  %v19566_v26 = vld [vmem:[%s22508_s13 + $0x2c4] ss:$16 sps:$4 sm:$0xff]  }
  0xcc   :  { %18839 = vmatprep.subr.bf16.mxu1 %v19471_v27  ;;  %v19537_v27 = vld [vmem:[%s22508_s13 + $0x1e0] ss:$16 sps:$4 sm:$0xff]  }
  0xcd   :  { %18818 = vmatpush3.bf16.msra.mxu0 %v19470_v28 }
  0xce   :  { %18819 = vmatprep.subr.bf16.mxu0 %v19473_v29  ;;  %v19542_v29 = vld [vmem:[%s22508_s13 + $0x1c4] ss:$16 sps:$4 sm:$0xff]  }
  0xcf   :  { %18840 = vmatpush3.bf16.msra.mxu1 %v19472_v30  ;;  %v19564_v30 = vld [vmem:[%s22508_s13 + $0x2c0] ss:$16 sps:$4 sm:$0xff]  }
  0xd0   :  { %18841 = vmatprep.subr.bf16.mxu1 %v19475_v31 }
  0xd1   :  { %18820 = vmatpush3.bf16.msra.mxu0 %v19474_v32 }
  0xd2   :  { %18821 = vmatprep.subr.bf16.mxu0 %v19477_v48  ;;  %v19540_v48 = vld [vmem:[%s22508_s13 + $0x1c0] ss:$16 sps:$4 sm:$0xff]  }
  0xd3   :  { %18842 = vmatpush3.bf16.msra.mxu1 %v19476_v33  ;;  %v19569_v33 = vld [vmem:[%s22508_s13 + $0x2a4] ss:$16 sps:$4 sm:$0xff]  }
  0xd4   :  { %18843 = vmatprep.subr.bf16.mxu1 %v19479_v35 }
  0xd5   :  { %18822 = vmatpush3.bf16.msra.mxu0 %v19478_v34 }
  0xd6   :  { %18823 = vmatprep.subr.bf16.mxu0 %v19481_v52 }
  0xd7   :  { %18844 = vmatpush3.bf16.msra.mxu1 %v19480_v37  ;;  %v19567_v37 = vld [vmem:[%s22508_s13 + $0x2a0] ss:$16 sps:$4 sm:$0xff]  }
  0xd8   :  { %18845 = vmatprep.subr.bf16.mxu1 %v19483_v39  ;;  %v19572_v39 = vld [vmem:[%s22508_s13 + $0x284] ss:$16 sps:$4 sm:$0xff]  }
  0xd9   :  { %18824 = vmatpush3.bf16.msra.mxu0 %v19482_v38 }
  0xda   :  { %18825 = vmatprep.subr.bf16.mxu0 %v19485_v41 }
  0xdb   :  { %18846 = vmatpush3.bf16.msra.mxu1 %v19484_v40  ;;  %v19543_v40 = vld [vmem:[%s22508_s13 + $0x1a0] ss:$16 sps:$4 sm:$0xff]  }
  0xdc   :  { %18847 = vmatprep.subr.bf16.mxu1 %v19487_v43  ;;  %v19570_v43 = vld [vmem:[%s22508_s13 + $0x280] ss:$16 sps:$4 sm:$0xff]  }
  0xdd   :  { %18826 = vmatpush3.bf16.msra.mxu0 %v19486_v42  ;;  %v19548_v42 = vld [vmem:[%s22508_s13 + $0x184] ss:$16 sps:$4 sm:$0xff]  }
  0xde   :  { %18827 = vmatprep.subr.bf16.mxu0 %v19489_v45  ;;  %v19546_v45 = vld [vmem:[%s22508_s13 + $0x180] ss:$16 sps:$4 sm:$0xff]  }
  0xdf   :  { %18848 = vmatpush3.bf16.msra.mxu1 %v19488_v44  ;;  %v19575_v44 = vld [vmem:[%s22508_s13 + $0x264] ss:$16 sps:$4 sm:$0xff]  }
  0xe0   :  { %18849 = vmatprep.subr.bf16.mxu1 %v19491_v47  ;;  %v19573_v47 = vld [vmem:[%s22508_s13 + $0x260] ss:$16 sps:$4 sm:$0xff]  }
  0xe1   :  { %18828 = vmatpush3.bf16.msra.mxu0 %v19490_v46  ;;  %v19551_v46 = vld [vmem:[%s22508_s13 + $0x164] ss:$16 sps:$4 sm:$0xff]  }
  0xe2   :  { %18829 = vmatprep.subr.bf16.mxu0 %v19493_v50  ;;  %v19549_v50 = vld [vmem:[%s22508_s13 + $0x160] ss:$16 sps:$4 sm:$0xff]  }
  0xe3   :  { %18850 = vmatpush3.bf16.msra.mxu1 %v19492_v49  ;;  %v19578_v49 = vld [vmem:[%s22508_s13 + $0x244] ss:$16 sps:$4 sm:$0xff]  }
  0xe4   :  { %18851 = vmatprep.subr.bf16.mxu1 %v19495_v53  ;;  %v19576_v53 = vld [vmem:[%s22508_s13 + $0x240] ss:$16 sps:$4 sm:$0xff]  }
  0xe5   :  { %18830 = vmatpush3.bf16.msra.mxu0 %v19494_v51  ;;  %v19554_v51 = vld [vmem:[%s22508_s13 + $0x144] ss:$16 sps:$4 sm:$0xff]  }
  0xe6   :  { %18859 = vmatprep.subr.bf16.mxu0 %v19497_v54  ;;  %v19581_v54 = vld [vmem:[%s22508_s13 + $0x224] ss:$16 sps:$4 sm:$0xff]  }
  0xe7   :  { %18852 = vmatpush3.bf16.msra.mxu1 %v19496_v55  ;;  %v19552_v55 = vld [vmem:[%s22508_s13 + $0x140] ss:$16 sps:$4 sm:$0xff]  }
  0xe8   :  { %2002 = vmatmul.mubr.bf16.vlgmr.msra.gmra.mxu0 %v22369_v7  ;;  %3101 = vmatprep.subr.bf16.mxu1 %v19515_v56  ;;  %v19503_v7 = vld [vmem:[%s22287_s6 + $0x6f0] ss:$20 sps:$4 sm:$0xff]  }
  0xe9   :  { %18860 = vmatpush3.bf16.msra.mxu0 %v19498_v57  ;;  %2081 = vmatprep.mubr.bf16.mxu0 %v22403_v36  ;;  %v19504_v36 = vld [vmem:[%s22287_s6 + $0x5b0] ss:$20 sps:$4 sm:$0xff]  }
  0xea   :  { %2042 = vmatmul.mubr.bf16.vlgmr.msra.gmra.mxu1 %v22373_v10  ;;  %18861 = vmatprep.subr.bf16.mxu0 %v19499_v58  ;;  %v19505_v10 = vld [vmem:[%s22287_s6 + $0x6c8] ss:$20 sps:$4 sm:$0xff]   ;;  %v19557_v56 = vld [vmem:[%s22508_s13 + $0x124] ss:$16 sps:$4 sm:$0xff]   ;;  %v19579_v57 = vld [vmem:[%s22508_s13 + $0x220] ss:$16 sps:$4 sm:$0xff]  }
  0xeb   :  { %3102 = vmatpush1.bf16.msra.mxu1 %v19513_v59  ;;  %v19584_v58 = vld [vmem:[%s22508_s13 + $0x204] ss:$16 sps:$4 sm:$0xff]   ;;  %v19555_v59 = vld [vmem:[%s22508_s13 + $0x120] ss:$16 sps:$4 sm:$0xff]   ;;  %s22255_s6 = smov 9  }
  0xec   :  { %3103 = vmatprep.subr.bf16.mxu1 %v19518_v61  ;;  %v19582_v61 = vld [vmem:[%s22508_s13 + $0x200] ss:$16 sps:$4 sm:$0xff]   ;;  %s23217_s9 = sld [smem:[%s25011_s0 + %s22255_s6]]   ;;  %s22272_s6 = smov 12  }
  0xed   :  { %18862 = vmatpush3.bf16.msra.mxu0 %v19500_v60  ;;  %v19560_v60 = vld [vmem:[%s22508_s13 + $0x104] ss:$16 sps:$4 sm:$0xff]  }
  0xee   :  { %18863 = vmatprep.subr.bf16.mxu0 %v19501_v62  ;;  %v19587_v62 = vld [vmem:[%s22508_s13 + $0x3e4] ss:$16 sps:$4 sm:$0xff]  }
  0xef   :  { %3104 = vmatpush1.bf16.msra.mxu1 %v19516_v63  ;;  %v19558_v63 = vld [vmem:[%s22508_s13 + $0x100] ss:$16 sps:$4 sm:$0xff]  }
  0xf0   :  { %3105 = vmatprep.subr.bf16.mxu1 %v19521_v0  ;;  %v19585_v0 = vld [vmem:[%s22508_s13 + $0x3e0] ss:$16 sps:$4 sm:$0xff]  }
  0xf1   :  { %18864 = vmatpush3.bf16.msra.mxu0 %v19502_v1  ;;  %v19590_v1 = vld [vmem:[%s22508_s13 + $0x3c4] ss:$16 sps:$4 sm:$0xff]  }
  0xf2   :  { %18865 = vmatprep.subr.bf16.mxu0 %v19503_v7  ;;  %v19588_v7 = vld [vmem:[%s22508_s13 + $0x3c0] ss:$16 sps:$4 sm:$0xff]  }
  0xf3   :  { %3106 = vmatpush1.bf16.msra.mxu1 %v19519_v2  ;;  %v19593_v2 = vld [vmem:[%s22508_s13 + $0x3a4] ss:$16 sps:$4 sm:$0xff]  }
  0xf4   :  { %3107 = vmatprep.subr.bf16.mxu1 %v19524_v3  ;;  %v19591_v3 = vld [vmem:[%s22508_s13 + $0x3a0] ss:$16 sps:$4 sm:$0xff]  }
  0xf5   :  { %18866 = vmatpush3.bf16.msra.mxu0 %v19504_v36  ;;  %v19596_v36 = vld [vmem:[%s22508_s13 + $0x384] ss:$16 sps:$4 sm:$0xff]  }
  0xf6   :  { %18867 = vmatprep.subr.bf16.mxu0 %v19505_v10  ;;  %v19594_v10 = vld [vmem:[%s22508_s13 + $0x380] ss:$16 sps:$4 sm:$0xff]  }
  0xf7   :  { %3108 = vmatpush1.bf16.msra.mxu1 %v19522_v4  ;;  %v19599_v4 = vld [vmem:[%s22508_s13 + $0x364] ss:$16 sps:$4 sm:$0xff]  }
  0xf8   :  { %3109 = vmatprep.subr.bf16.mxu1 %v19527_v5  ;;  %v450_v5 = vlaneseq }
  0xf9   :  { %18868 = vmatpush3.bf16.msra.mxu0 %v19506_v6  ;;  %v19597_v6 = vld [vmem:[%s22508_s13 + $0x360] ss:$16 sps:$4 sm:$0xff]  }
  0xfa   :  { %18869 = vmatprep.subr.bf16.mxu0 %v19507_v8  ;;  %v19602_v8 = vld [vmem:[%s22508_s13 + $0x344] ss:$16 sps:$4 sm:$0xff]  }
  0xfb   :  { %3110 = vmatpush1.bf16.msra.mxu1 %v19525_v9  ;;  %v22645_v9 = vshrl.u32 %v450_v5, 7 }
  0xfc   :  { %3111 = vmatprep.subr.bf16.mxu1 %v19530_v11  ;;  %v19600_v11 = vld [vmem:[%s22508_s13 + $0x340] ss:$16 sps:$4 sm:$0xff]  }
  0xfd   :  { %18870 = vmatpush3.bf16.msra.mxu0 %v19508_v12  ;;  %v19605_v12 = vld [vmem:[%s22508_s13 + $0x324] ss:$16 sps:$4 sm:$0xff]  }
  0xfe   :  { %18871 = vmatprep.subr.bf16.mxu0 %v19509_v13  ;;  %v22650_v13 = vsub.s32 0, %v22645_v9 }
  0xff   :  { %3112 = vmatpush1.bf16.msra.mxu1 %v19528_v14  ;;  %v22652_v14 = vld [vmem:[%s16763_s17] sm:$0x1f]  ;;  %s23254_s17 = sld [smem:[%s25011_s0 + %s22257_s14]]   ;;  %s22274_s14 = smov 34  }
 0x100   :  { %3113 = vmatprep.subr.bf16.mxu1 %v19533_v15  ;;  %v22655_v15 = vsub.s32 1, %v22645_v9 }
 0x101   :  { %18872 = vmatpush3.bf16.msra.mxu0 %v19510_v17  ;;  %v19603_v17 = vld [vmem:[%s22508_s13 + $0x320] ss:$16 sps:$4 sm:$0xff]  }
 0x102   :  { %18873 = vmatprep.subr.bf16.mxu0 %v19511_v18  ;;  %v19608_v18 = vld [vmem:[%s22508_s13 + $0x304] ss:$16 sps:$4 sm:$0xff]  }
 0x103   :  { %3114 = vmatpush1.bf16.msra.mxu1 %v19531_v19  ;;  %v453_v19 = vrot.slane %v22652_v14, %v22650_v13 }
 0x104   :  { %3115 = vmatprep.subr.bf16.mxu1 %v19536_v20  ;;  %v457_v20 = vrot.slane %v22652_v14, %v22655_v15 }
 0x105   :  { %18874 = vmatpush3.bf16.msra.mxu0 %v19512_v21  ;;  %v19606_v21 = vld [vmem:[%s22508_s13 + $0x300] ss:$16 sps:$4 sm:$0xff]  }
 0x106   :  { %3142 = vmatprep.subr.bf16.mxu0 %v19563_v22  ;;  %v19611_v22 = vld [vmem:[%s22508_s13 + $0xec] ss:$16 sps:$4 sm:$0xff]  }
 0x107   :  { %3116 = vmatpush1.bf16.msra.mxu1 %v19534_v23 }
 0x108   :  { %v22595_v28 = vpop.f32.mrf.mxu0  ;;  %2082 = vmatmul.mubr.bf16.vlgmr.msra.gmra.mxu0 %v22445_v16  ;;  %3117 = vmatprep.subr.bf16.mxu1 %v19539_v24  ;;  %v19545_v16 = vld [vmem:[%s22508_s13 + $0x1a4] ss:$16 sps:$4 sm:$0xff]  }
 0x109   :  { %3143 = vmatpush1.bf16.msra.mxu0 %v19561_v25  ;;  %v22602_v32 = vpop.f32.mrf.mxu1  ;;  %v1758_v23 = vadd.f32 %v22595_v28, %v453_v19  ;;  %v19635_v24 = vld [vmem:[%s22508_s13 + $0x4e4] ss:$16 sps:$4 sm:$0xff]  }
 0x10a   :  { %v22600_v31 = vpop.f32.mrf.mxu0  ;;  %3144 = vmatprep.subr.bf16.mxu0 %v19566_v26 }
 0x10b   :  { %3118 = vmatpush2.bf16.msra.mxu1 %v19537_v27  ;;  %v22606_v35 = vpop.f32.mrf.mxu1  ;;  %v1760_v25 = vadd.f32 %v22600_v31, %v457_v20  ;;  %v1799_v26 = vadd.f32 %v22602_v32, %v1758_v23 }
 0x10c   :  { %v1761_v34 = vpop.f32.mrf.mxu0  ;;  %3119 = vmatprep.subr.bf16.mxu1 %v19542_v29 }
 0x10d   :  { %3145 = vmatpush1.bf16.msra.mxu0 %v19564_v30  ;;  %v1802_v38 = vpop.f32.mrf.mxu1  ;;  %v1801_v29 = vadd.f32 %v22606_v35, %v1760_v25 }
 0x10e   :  { %v1762_v52 = vpop.f32.mrf.mxu0  ;;  %3146 = vmatprep.subr.bf16.mxu0 %v19569_v33 }
 0x10f   :  { %3120 = vmatpush2.bf16.msra.mxu1 %v19540_v48  ;;  %v1803_v41 = vpop.f32.mrf.mxu1 }
 0x110   :  { %3121 = vmatprep.subr.bf16.mxu1 %v19545_v16 }
 0x111   :  { %3147 = vmatpush1.bf16.msra.mxu0 %v19567_v37 }
 0x112   :  { %3148 = vmatprep.subr.bf16.mxu0 %v19572_v39 }
 0x113   :  { %3122 = vmatpush2.bf16.msra.mxu1 %v19543_v40 }
 0x114   :  { %3123 = vmatprep.subr.bf16.mxu1 %v19548_v42 }
 0x115   :  { %3149 = vmatpush1.bf16.msra.mxu0 %v19570_v43 }
 0x116   :  { %3150 = vmatprep.subr.bf16.mxu0 %v19575_v44 }
 0x117   :  { %3124 = vmatpush2.bf16.msra.mxu1 %v19546_v45 }
 0x118   :  { %3125 = vmatprep.subr.bf16.mxu1 %v19551_v46 }
 0x119   :  { %3151 = vmatpush1.bf16.msra.mxu0 %v19573_v47  ;;  %v19633_v47 = vld [vmem:[%s22508_s13 + $0x4e0] ss:$16 sps:$4 sm:$0xff]  }
 0x11a   :  { %3152 = vmatprep.subr.bf16.mxu0 %v19578_v49 }
 0x11b   :  { %3126 = vmatpush2.bf16.msra.mxu1 %v19549_v50  ;;  %v19641_v50 = vld [vmem:[%s22508_s13 + $0x4c4] ss:$16 sps:$4 sm:$0xff]  }
 0x11c   :  { %3127 = vmatprep.subr.bf16.mxu1 %v19554_v51  ;;  %v19639_v51 = vld [vmem:[%s22508_s13 + $0x4c0] ss:$16 sps:$4 sm:$0xff]  }
 0x11d   :  { %3153 = vmatpush1.bf16.msra.mxu0 %v19576_v53  ;;  %v22242_v53 = vmov 0  }
 0x11e   :  { %3154 = vmatprep.subr.bf16.mxu0 %v19581_v54  ;;  %v19647_v54 = vld [vmem:[%s22508_s13 + $0x4a4] ss:$16 sps:$4 sm:$0xff]  }
 0x11f   :  { %3128 = vmatpush2.bf16.msra.mxu1 %v19552_v55  ;;  %v19645_v55 = vld [vmem:[%s22508_s13 + $0x4a0] ss:$16 sps:$4 sm:$0xff]  }
 0x120   :  { %3129 = vmatprep.subr.bf16.mxu1 %v19557_v56  ;;  %v19653_v56 = vld [vmem:[%s22508_s13 + $0x484] ss:$16 sps:$4 sm:$0xff]  }
 0x121   :  { %3155 = vmatpush1.bf16.msra.mxu0 %v19579_v57  ;;  %v19651_v57 = vld [vmem:[%s22508_s13 + $0x480] ss:$16 sps:$4 sm:$0xff]  }
 0x122   :  { %3156 = vmatprep.subr.bf16.mxu0 %v19584_v58  ;;  %v19659_v58 = vld [vmem:[%s22508_s13 + $0x464] ss:$16 sps:$4 sm:$0xff]  }
 0x123   :  { %3130 = vmatpush2.bf16.msra.mxu1 %v19555_v59  ;;  %v19657_v59 = vld [vmem:[%s22508_s13 + $0x460] ss:$16 sps:$4 sm:$0xff]  }
 0x124   :  { %3131 = vmatprep.subr.bf16.mxu1 %v19560_v60  ;;  %v19665_v60 = vld [vmem:[%s22508_s13 + $0x444] ss:$16 sps:$4 sm:$0xff]  }
 0x125   :  { %3157 = vmatpush1.bf16.msra.mxu0 %v19582_v61  ;;  %v19663_v61 = vld [vmem:[%s22508_s13 + $0x440] ss:$16 sps:$4 sm:$0xff]  }
 0x126   :  { %3158 = vmatprep.subr.bf16.mxu0 %v19587_v62  ;;  %v19671_v62 = vld [vmem:[%s22508_s13 + $0x424] ss:$16 sps:$4 sm:$0xff]  }
 0x127   :  { %3132 = vmatpush2.bf16.msra.mxu1 %v19558_v63  ;;  %v19669_v63 = vld [vmem:[%s22508_s13 + $0x420] ss:$16 sps:$4 sm:$0xff]  }
 0x128   :  { %3183 = vmatprep.subr.bf16.mxu1 %v19635_v24 }
 0x129   :  { %3159 = vmatpush2.bf16.msra.mxu0 %v19585_v0  ;;  %v19677_v0 = vld [vmem:[%s22508_s13 + $0x404] ss:$16 sps:$4 sm:$0xff]  }
 0x12a   :  { %3160 = vmatprep.subr.bf16.mxu0 %v19590_v1  ;;  %v19675_v1 = vld [vmem:[%s22508_s13 + $0x400] ss:$16 sps:$4 sm:$0xff]  }
 0x12d   :  { %3161 = vmatpush2.bf16.msra.mxu0 %v19588_v7  ;;  %v19683_v7 = vld [vmem:[%s22508_s13 + $0x2ec] ss:$16 sps:$4 sm:$0xff]  }
 0x12e   :  { %3162 = vmatprep.subr.bf16.mxu0 %v19593_v2  ;;  %v22694_v2 = vsub.s32 2, %v22645_v9 }
 0x131   :  { %3163 = vmatpush2.bf16.msra.mxu0 %v19591_v3  ;;  %v22697_v3 = vsub.s32 3, %v22645_v9 }
 0x132   :  { %3164 = vmatprep.subr.bf16.mxu0 %v19596_v36  ;;  %v461_v36 = vrot.slane %v22652_v14, %v22694_v2 }
 0x135   :  { %3165 = vmatpush2.bf16.msra.mxu0 %v19594_v10  ;;  %v465_v10 = vrot.slane %v22652_v14, %v22697_v3 }
 0x136   :  { %3166 = vmatprep.subr.bf16.mxu0 %v19599_v4 }
 0x139   :  { %3167 = vmatpush2.bf16.msra.mxu0 %v19597_v6 }
 0x13a   :  { %3168 = vmatprep.subr.bf16.mxu0 %v19602_v8 }
 0x13d   :  { %3169 = vmatpush2.bf16.msra.mxu0 %v19600_v11 }
 0x13e   :  { %3170 = vmatprep.subr.bf16.mxu0 %v19605_v12 }
 0x141   :  { %3171 = vmatpush2.bf16.msra.mxu0 %v19603_v17 }
 0x142   :  { %3172 = vmatprep.subr.bf16.mxu0 %v19608_v18 }
 0x145   :  { %3173 = vmatpush2.bf16.msra.mxu0 %v19606_v21 }
 0x146   :  { %3224 = vmatprep.subr.bf16.mxu0 %v19611_v22 }
 0x148   :  { %v1839_v27 = vpop.f32.mrf.mxu0 }
 0x149   :  { %v1840_v30 = vadd.f32 %v1839_v27, %v1799_v26 }
 0x14a   :  { %v1841_v33 = vpop.f32.mrf.mxu0  ;;  %v1880_v48 = vpop.f32.mrf.mxu1 }
 0x14b   :  { %v2094_v34 = vmul.f32 0.70710677, %v1840_v30  ;;  %v1842_v16 = vadd.f32 %v1841_v33, %v1801_v29  ;;  %v2089_v35 = vmul.f32 0.5, %v1840_v30  ;;  %v1881_v4 = vadd.f32 %v1880_v48, %v461_v36  ;;  %v19636_v36 = vld [vmem:[%s22508_s13 + $0x1e8] ss:$16 sps:$4 sm:$0xff]  }
 0x14c   :  { %v1843_v37 = vpop.f32.mrf.mxu0  ;;  %v1882_v52 = vpop.f32.mrf.mxu1 }
 0x14d   :  { %22121 = verf.f32 %v2094_v34  ;;  %v2095_v28 = vmul.f32 0.70710677, %v1842_v16  ;;  %v2090_v42 = vmul.f32 0.5, %v1842_v16  ;;  %v1883_v6 = vadd.f32 %v1882_v52, %v465_v10  ;;  %v19644_v10 = vld [vmem:[%s22508_s13 + $0x1cc] ss:$16 sps:$4 sm:$0xff]  }
 0x14e   :  { %v1844_v31 = vpop.f32.mrf.mxu0  ;;  %v1884_v38 = vpop.f32.mrf.mxu1 }
 0x14f   :  { %22123 = verf.f32 %v2095_v28  ;;  %v19609_v28 = vld [vmem:[%s22508_s13 + $0xe8] ss:$16 sps:$4 sm:$0xff]   ;;  %v19614_v38 = vld [vmem:[%s22508_s13 + $0xcc] ss:$16 sps:$4 sm:$0xff]  }
 0x150   :  { %v1885_v39 = vpop.f32.mrf.mxu1 }
 0x151   :  { %v19612_v39 = vld [vmem:[%s22508_s13 + $0xc8] ss:$16 sps:$4 sm:$0xff]  }
 0x15a   :  { %v22122_v32 = vpop.eup %22121 }
 0x15b   :  { %v2104_v40 = vadd.f32 1.0, %v22122_v32 }
 0x15c   :  { %v22124_v41 = vpop.eup %22123 }
 0x15d   :  { %v2105_v43 = vadd.f32 1.0, %v22124_v41  ;;  %v2109_v44 = vmul.f32 %v2104_v40, %v2089_v35  ;;  %v19617_v40 = vld [vmem:[%s22508_s13 + $0xac] ss:$16 sps:$4 sm:$0xff]  }
 0x15f   :  { %v2110_v45 = vmul.f32 %v2105_v43, %v2090_v42  ;;  %v22673_v49 = vpack.c.bf16 %v2109_v44, %v2109_v44  ;;  %v19615_v42 = vld [vmem:[%s22508_s13 + $0xa8] ss:$16 sps:$4 sm:$0xff]  }
 0x161   :  { %v22670_v46 = vpack.c.bf16 %v2110_v45, %v2110_v45  ;;  %v19620_v45 = vld [vmem:[%s22508_s13 + $0x8c] ss:$16 sps:$4 sm:$0xff]  }
 0x163   :  { %3133 = vmatprep.mubr.bf16.mxu1 %v22670_v46 }
 0x164   :  { %3134 = vmatmul.mubr.bf16.vlgmr.msra.gmra.mxu1 %v22673_v49 }
 0x165   :  { %3184 = vmatpush1.bf16.msra.mxu1 %v19633_v47  ;;  %3215 = vmatprep.mubr.bf16.mxu1 %v22242_v53 }
 0x166   :  { %3185 = vmatprep.subr.bf16.mxu1 %v19641_v50 }
 0x169   :  { %3186 = vmatpush1.bf16.msra.mxu1 %v19639_v51  ;;  %v19618_v51 = vld [vmem:[%s22508_s13 + $0x88] ss:$16 sps:$4 sm:$0xff]  }
 0x16a   :  { %3187 = vmatprep.subr.bf16.mxu1 %v19647_v54  ;;  %v19623_v54 = vld [vmem:[%s22508_s13 + $0x6c] ss:$16 sps:$4 sm:$0xff]  }
 0x16d   :  { %3188 = vmatpush1.bf16.msra.mxu1 %v19645_v55 }
 0x16e   :  { %3189 = vmatprep.subr.bf16.mxu1 %v19653_v56  ;;  %v19621_v56 = vld [vmem:[%s22508_s13 + $0x68] ss:$16 sps:$4 sm:$0xff]  }
 0x171   :  { %3190 = vmatpush1.bf16.msra.mxu1 %v19651_v57  ;;  %v19626_v57 = vld [vmem:[%s22508_s13 + $0x4c] ss:$16 sps:$4 sm:$0xff]  }
 0x172   :  { %3191 = vmatprep.subr.bf16.mxu1 %v19659_v58  ;;  %v19624_v58 = vld [vmem:[%s22508_s13 + $0x48] ss:$16 sps:$4 sm:$0xff]  }
 0x175   :  { %3192 = vmatpush1.bf16.msra.mxu1 %v19657_v59  ;;  %v19629_v59 = vld [vmem:[%s22508_s13 + $0x2c] ss:$16 sps:$4 sm:$0xff]  }
 0x176   :  { %3193 = vmatprep.subr.bf16.mxu1 %v19665_v60  ;;  %v19627_v60 = vld [vmem:[%s22508_s13 + $0x28] ss:$16 sps:$4 sm:$0xff]  }
 0x179   :  { %3194 = vmatpush1.bf16.msra.mxu1 %v19663_v61  ;;  %v19632_v61 = vld [vmem:[%s22508_s13 + $0xc] ss:$16 sps:$4 sm:$0xff]  }
 0x17a   :  { %3195 = vmatprep.subr.bf16.mxu1 %v19671_v62  ;;  %v22725_v62 = vsub.s32 4, %v22645_v9 }
 0x17d   :  { %3196 = vmatpush1.bf16.msra.mxu1 %v19669_v63  ;;  %v19630_v63 = vld [vmem:[%s22508_s13 + $0x8] ss:$16 sps:$4 sm:$0xff]  }
 0x17e   :  { %3197 = vmatprep.subr.bf16.mxu1 %v19677_v0  ;;  %v19638_v0 = vld [vmem:[%s22508_s13 + $0x1ec] ss:$16 sps:$4 sm:$0xff]  }
 0x181   :  { %3198 = vmatpush1.bf16.msra.mxu1 %v19675_v1  ;;  %v469_v1 = vrot.slane %v22652_v14, %v22725_v62 }
 0x182   :  { %3265 = vmatprep.subr.bf16.mxu1 %v19683_v7 }
 0x188   :  { %v1921_v5 = vpop.f32.mrf.mxu0 }
 0x189   :  { %v1922_v8 = vadd.f32 %v1921_v5, %v1881_v4 }
 0x18a   :  { %v1923_v11 = vpop.f32.mrf.mxu0  ;;  %v1962_v12 = vpop.f32.mrf.mxu1 }
 0x18b   :  { %v1924_v17 = vadd.f32 %v1923_v11, %v1883_v6  ;;  %v1963_v18 = vadd.f32 %v1962_v12, %v1922_v8  ;;  %v19642_v6 = vld [vmem:[%s22508_s13 + $0x1c8] ss:$16 sps:$4 sm:$0xff]   ;;  %v19650_v11 = vld [vmem:[%s22508_s13 + $0x1ac] ss:$16 sps:$4 sm:$0xff]  }
 0x18c   :  { %v1925_v19 = vpop.f32.mrf.mxu0  ;;  %v1964_v20 = vpop.f32.mrf.mxu1 }
 0x18d   :  { %v2096_v21 = vmul.f32 0.70710677, %v1963_v18  ;;  %v1965_v22 = vadd.f32 %v1964_v20, %v1924_v17  ;;  %v2091_v33 = vmul.f32 0.5, %v1963_v18  ;;  %v19648_v18 = vld [vmem:[%s22508_s13 + $0x1a8] ss:$16 sps:$4 sm:$0xff]  }
 0x18e   :  { %v1926_v23 = vpop.f32.mrf.mxu0  ;;  %v1966_v24 = vpop.f32.mrf.mxu1  ;;  %v19656_v20 = vld [vmem:[%s22508_s13 + $0x18c] ss:$16 sps:$4 sm:$0xff]  }
 0x18f   :  { %22125 = verf.f32 %v2096_v21  ;;  %v2097_v25 = vmul.f32 0.70710677, %v1965_v22  ;;  %v2092_v48 = vmul.f32 0.5, %v1965_v22  ;;  %v19654_v24 = vld [vmem:[%s22508_s13 + $0x188] ss:$16 sps:$4 sm:$0xff]  }
 0x190   :  { %v1967_v26 = vpop.f32.mrf.mxu1 }
 0x191   :  { %22127 = verf.f32 %v2097_v25  ;;  %v19662_v25 = vld [vmem:[%s22508_s13 + $0x16c] ss:$16 sps:$4 sm:$0xff]   ;;  %v19660_v26 = vld [vmem:[%s22508_s13 + $0x168] ss:$16 sps:$4 sm:$0xff]  }
 0x19c   :  { %v22126_v27 = vpop.eup %22125 }
 0x19d   :  { %v2106_v29 = vadd.f32 1.0, %v22126_v27  ;;  %v19668_v27 = vld [vmem:[%s22508_s13 + $0x14c] ss:$16 sps:$4 sm:$0xff]  }
 0x19e   :  { %v22128_v30 = vpop.eup %22127 }
 0x19f   :  { %v2107_v34 = vadd.f32 1.0, %v22128_v30  ;;  %v2111_v16 = vmul.f32 %v2106_v29, %v2091_v33  ;;  %v19666_v29 = vld [vmem:[%s22508_s13 + $0x148] ss:$16 sps:$4 sm:$0xff]   ;;  %v19674_v30 = vld [vmem:[%s22508_s13 + $0x12c] ss:$16 sps:$4 sm:$0xff]  }
 0x1a0   :  { %v19672_v33 = vld [vmem:[%s22508_s13 + $0x128] ss:$16 sps:$4 sm:$0xff]  }
 0x1a1   :  { %v2112_v37 = vmul.f32 %v2107_v34, %v2092_v48  ;;  %v22706_v31 = vpack.c.bf16 %v2111_v16, %v2111_v16  ;;  %v19680_v48 = vld [vmem:[%s22508_s13 + $0x10c] ss:$16 sps:$4 sm:$0xff]  }
 0x1a3   :  { %v22703_v52 = vpack.c.bf16 %v2112_v37, %v2112_v37 }
 0x1a5   :  { %3174 = vmatprep.mubr.bf16.mxu0 %v22703_v52 }
 0x1a6   :  { %3175 = vmatmul.mubr.bf16.vlgmr.msra.gmra.mxu0 %v22706_v31 }
 0x1a7   :  { %3225 = vmatpush1.bf16.msra.mxu0 %v19609_v28  ;;  %3256 = vmatprep.mubr.bf16.mxu0 %v22670_v46  ;;  %v19678_v28 = vld [vmem:[%s22508_s13 + $0x108] ss:$16 sps:$4 sm:$0xff]  }
 0x1a8   :  { %v18831_v32 = vpop.f32.mrf.mxu0  ;;  %3226 = vmatprep.subr.bf16.mxu0 %v19614_v38  ;;  %v19686_v38 = vld [vmem:[%s22508_s13 + $0x4ec] ss:$16 sps:$4 sm:$0xff]  }
 0x1aa   :  { %v18832_v41 = vpop.f32.mrf.mxu0  ;;  %v18853_v35 = vpop.f32.mrf.mxu1 }
 0x1ab   :  { %3227 = vmatpush1.bf16.msra.mxu0 %v19612_v39  ;;  %v18833_v7 = vadd.f32 %v18832_v41, %v18831_v32  ;;  %v19681_v32 = vld [vmem:[%s22508_s13 + $0x2e8] ss:$16 sps:$4 sm:$0xff]  }
 0x1ac   :  { %v18834_v43 = vpop.f32.mrf.mxu0  ;;  %v18854_v44 = vpop.f32.mrf.mxu1  ;;  %3228 = vmatprep.subr.bf16.mxu0 %v19617_v40  ;;  %v19684_v41 = vld [vmem:[%s22508_s13 + $0x4e8] ss:$16 sps:$4 sm:$0xff]  }
 0x1ad   :  { %v2004_v4 = vadd.f32 %v18833_v7, %v469_v1  ;;  %v18855_v5 = vadd.f32 %v18854_v44, %v18853_v35  ;;  %v19689_v35 = vld [vmem:[%s22508_s13 + $0x2cc] ss:$16 sps:$4 sm:$0xff]   ;;  %v19687_v43 = vld [vmem:[%s22508_s13 + $0x2c8] ss:$16 sps:$4 sm:$0xff]  }
 0x1ae   :  { %v18835_v47 = vpop.f32.mrf.mxu0  ;;  %v18856_v50 = vpop.f32.mrf.mxu1  ;;  %v19690_v44 = vld [vmem:[%s22508_s13 + $0x4c8] ss:$16 sps:$4 sm:$0xff]  }
 0x1af   :  { %3229 = vmatpush1.bf16.msra.mxu0 %v19615_v42  ;;  %v2044_v17 = vadd.f32 %v18855_v5, %v2004_v4  ;;  %v19692_v42 = vld [vmem:[%s22508_s13 + $0x4cc] ss:$16 sps:$4 sm:$0xff]   ;;  %v19693_v50 = vld [vmem:[%s22508_s13 + $0x2a8] ss:$16 sps:$4 sm:$0xff]  }
 0x1b0   :  { %3230 = vmatprep.subr.bf16.mxu0 %v19620_v45  ;;  %v18857_v55 = vpop.f32.mrf.mxu1  ;;  %v19695_v45 = vld [vmem:[%s22508_s13 + $0x2ac] ss:$16 sps:$4 sm:$0xff]   ;;  %v19711_v1 = vld [vmem:[%s22508_s13 + $0x248] ss:$16 sps:$4 sm:$0xff]  }
 0x1b1   :  { %v19698_v47 = vld [vmem:[%s22508_s13 + $0x4ac] ss:$16 sps:$4 sm:$0xff]   ;;  %v19714_v7 = vld [vmem:[%s22508_s13 + $0x448] ss:$16 sps:$4 sm:$0xff]  }
 0x1b2   :  { %v19704_v55 = vld [vmem:[%s22508_s13 + $0x48c] ss:$16 sps:$4 sm:$0xff]   ;;  %v19717_v4 = vld [vmem:[%s22508_s13 + $0x228] ss:$16 sps:$4 sm:$0xff]  }
 0x1b3   :  { %3231 = vmatpush1.bf16.msra.mxu0 %v19618_v51  ;;  %v19696_v51 = vld [vmem:[%s22508_s13 + $0x4a8] ss:$16 sps:$4 sm:$0xff]  }
 0x1b4   :  { %3232 = vmatprep.subr.bf16.mxu0 %v19623_v54  ;;  %v19701_v54 = vld [vmem:[%s22508_s13 + $0x28c] ss:$16 sps:$4 sm:$0xff]   ;;  %v19720_v5 = vld [vmem:[%s22508_s13 + $0x428] ss:$16 sps:$4 sm:$0xff]  }
 0x1b7   :  { %3233 = vmatpush1.bf16.msra.mxu0 %v19621_v56  ;;  %v19699_v56 = vld [vmem:[%s22508_s13 + $0x288] ss:$16 sps:$4 sm:$0xff]  }
 0x1b8   :  { %3234 = vmatprep.subr.bf16.mxu0 %v19626_v57  ;;  %v19702_v57 = vld [vmem:[%s22508_s13 + $0x488] ss:$16 sps:$4 sm:$0xff]  }
 0x1bb   :  { %3235 = vmatpush1.bf16.msra.mxu0 %v19624_v58  ;;  %v19707_v58 = vld [vmem:[%s22508_s13 + $0x26c] ss:$16 sps:$4 sm:$0xff]  }
 0x1bc   :  { %3236 = vmatprep.subr.bf16.mxu0 %v19629_v59  ;;  %v19710_v59 = vld [vmem:[%s22508_s13 + $0x46c] ss:$16 sps:$4 sm:$0xff]  }
 0x1bf   :  { %3237 = vmatpush1.bf16.msra.mxu0 %v19627_v60  ;;  %v19705_v60 = vld [vmem:[%s22508_s13 + $0x268] ss:$16 sps:$4 sm:$0xff]  }
 0x1c0   :  { %3238 = vmatprep.subr.bf16.mxu0 %v19632_v61  ;;  %v19708_v61 = vld [vmem:[%s22508_s13 + $0x468] ss:$16 sps:$4 sm:$0xff]  }
 0x1c3   :  { %3239 = vmatpush1.bf16.msra.mxu0 %v19630_v63  ;;  %v19713_v63 = vld [vmem:[%s22508_s13 + $0x24c] ss:$16 sps:$4 sm:$0xff]  }
 0x1c4   :  { %3240 = vmatprep.subr.bf16.mxu0 %v19638_v0  ;;  %v19716_v0 = vld [vmem:[%s22508_s13 + $0x44c] ss:$16 sps:$4 sm:$0xff]  }
 0x1c7   :  { %3241 = vmatpush2.bf16.msra.mxu0 %v19636_v36  ;;  %v19719_v36 = vld [vmem:[%s22508_s13 + $0x22c] ss:$16 sps:$4 sm:$0xff]  }
 0x1c8   :  { %v18875_v8 = vpop.f32.mrf.mxu0  ;;  %3242 = vmatprep.subr.bf16.mxu0 %v19644_v10  ;;  %v19722_v10 = vld [vmem:[%s22508_s13 + $0x42c] ss:$16 sps:$4 sm:$0xff]  }
 0x1ca   :  { %v18876_v12 = vpop.f32.mrf.mxu0 }
 0x1cb   :  { %v18877_v14 = vadd.f32 %v18876_v12, %v18875_v8  ;;  %3243 = vmatpush2.bf16.msra.mxu0 %v19642_v6  ;;  %v19725_v6 = vld [vmem:[%s22508_s13 + $0x20c] ss:$16 sps:$4 sm:$0xff]   ;;  %v19726_v12 = vld [vmem:[%s22508_s13 + $0x408] ss:$16 sps:$4 sm:$0xff]  }
 0x1cc   :  { %v18878_v19 = vpop.f32.mrf.mxu0  ;;  %3244 = vmatprep.subr.bf16.mxu0 %v19650_v11  ;;  %v19728_v8 = vld [vmem:[%s22508_s13 + $0x40c] ss:$16 sps:$4 sm:$0xff]   ;;  %v19723_v11 = vld [vmem:[%s22508_s13 + $0x208] ss:$16 sps:$4 sm:$0xff]  }
 0x1cd   :  { %v2084_v21 = vadd.f32 %v18877_v14, %v2044_v17  ;;  %v19731_v17 = vld [vmem:[%s22508_s13 + $0x3ec] ss:$16 sps:$4 sm:$0xff]   ;;  %v19729_v14 = vld [vmem:[%s22508_s13 + $0x3e8] ss:$16 sps:$4 sm:$0xff]  }
 0x1ce   :  { %v18879_v22 = vpop.f32.mrf.mxu0  ;;  %v19732_v19 = vld [vmem:[%s22508_s13 + $0x3c8] ss:$16 sps:$4 sm:$0xff]  }
 0x1cf   :  { %v2098_v23 = vmul.f32 0.70710677, %v2084_v21  ;;  %3245 = vmatpush2.bf16.msra.mxu0 %v19648_v18  ;;  %v2093_v16 = vmul.f32 0.5, %v2084_v21  ;;  %v19734_v18 = vld [vmem:[%s22508_s13 + $0x3cc] ss:$16 sps:$4 sm:$0xff]  }
 0x1d0   :  { %3246 = vmatprep.subr.bf16.mxu0 %v19656_v20  ;;  %v19737_v20 = vld [vmem:[%s22508_s13 + $0x3ac] ss:$16 sps:$4 sm:$0xff]   ;;  %v19735_v21 = vld [vmem:[%s22508_s13 + $0x3a8] ss:$16 sps:$4 sm:$0xff]  }
 0x1d1   :  { %22129 = verf.f32 %v2098_v23  ;;  %v19740_v22 = vld [vmem:[%s22508_s13 + $0x38c] ss:$16 sps:$4 sm:$0xff]   ;;  %v19738_v23 = vld [vmem:[%s22508_s13 + $0x388] ss:$16 sps:$4 sm:$0xff]  }
 0x1d3   :  { %3247 = vmatpush2.bf16.msra.mxu0 %v19654_v24  ;;  %v19743_v24 = vld [vmem:[%s22508_s13 + $0x36c] ss:$16 sps:$4 sm:$0xff]  }
 0x1d4   :  { %3248 = vmatprep.subr.bf16.mxu0 %v19662_v25  ;;  %v19741_v25 = vld [vmem:[%s22508_s13 + $0x368] ss:$16 sps:$4 sm:$0xff]  }
 0x1d7   :  { %3249 = vmatpush2.bf16.msra.mxu0 %v19660_v26  ;;  %v19746_v26 = vld [vmem:[%s22508_s13 + $0x34c] ss:$16 sps:$4 sm:$0xff]  }
 0x1d8   :  { %3250 = vmatprep.subr.bf16.mxu0 %v19668_v27  ;;  %v19744_v27 = vld [vmem:[%s22508_s13 + $0x348] ss:$16 sps:$4 sm:$0xff]  }
 0x1db   :  { %3251 = vmatpush2.bf16.msra.mxu0 %v19666_v29  ;;  %v19749_v29 = vld [vmem:[%s22508_s13 + $0x32c] ss:$16 sps:$4 sm:$0xff]  }
 0x1dc   :  { %3252 = vmatprep.subr.bf16.mxu0 %v19674_v30  ;;  %v19747_v30 = vld [vmem:[%s22508_s13 + $0x328] ss:$16 sps:$4 sm:$0xff]  }
 0x1de   :  { %v22130_v34 = vpop.eup %22129 }
 0x1df   :  { %v2108_v37 = vadd.f32 1.0, %v22130_v34  ;;  %3253 = vmatpush2.bf16.msra.mxu0 %v19672_v33  ;;  %v19752_v33 = vld [vmem:[%s22508_s13 + $0x30c] ss:$16 sps:$4 sm:$0xff]  }
 0x1e0   :  { %3254 = vmatprep.subr.bf16.mxu0 %v19680_v48  ;;  %v19750_v48 = vld [vmem:[%s22508_s13 + $0x308] ss:$16 sps:$4 sm:$0xff]   ;;  %s23238_s13 = sld [smem:[%s25011_s0 + %s22256_s10]]   ;;  %s22273_s10 = smov 29  }
 0x1e1   :  { %v2113_v39 = vmul.f32 %v2108_v37, %v2093_v16  ;;  %v19755_v34 = vld [vmem:[%s22768_s21 + $0xac] ss:$12 sps:$4 sm:$0xff]   ;;  %v19753_v16 = vld [vmem:[%s22768_s21 + $0xa8] ss:$12 sps:$4 sm:$0xff]  }
 0x1e2   :  { %v19758_v37 = vld [vmem:[%s22768_s21 + $0x94] ss:$12 sps:$4 sm:$0xff]  }
 0x1e3   :  { %v22748_v40 = vpack.c.bf16 %v2113_v39, %v2113_v39  ;;  %3255 = vmatpush2.bf16.msra.mxu0 %v19678_v28  ;;  %v19756_v39 = vld [vmem:[%s22768_s21 + $0x90] ss:$12 sps:$4 sm:$0xff]  }
 0x1e4   :  { %3306 = vmatprep.subr.bf16.mxu0 %v19686_v38 }
 0x1e5   :  { %3216 = vmatmul.mubr.bf16.vlgmr.msra.gmra.mxu1 %v22748_v40 }
 0x1e6   :  { %3257 = vmatmul.mubr.bf16.vlgmr.msra.gmra.mxu0 %v22673_v49  ;;  %3266 = vmatpush1.bf16.msra.mxu1 %v19681_v32  ;;  %v19761_v32 = vld [vmem:[%s22768_s21 + $0x7c] ss:$12 sps:$4 sm:$0xff]  }
 0x1e7   :  { %3297 = vmatprep.mubr.bf16.mxu1 %v22703_v52  ;;  %3307 = vmatpush1.bf16.msra.mxu0 %v19684_v41 }
 0x1e8   :  { %3267 = vmatprep.subr.bf16.mxu1 %v19689_v35  ;;  %3308 = vmatprep.subr.bf16.mxu0 %v19692_v42  ;;  %v19759_v42 = vld [vmem:[%s22768_s21 + $0x78] ss:$12 sps:$4 sm:$0xff]  }
 0x1e9   :  { %3338 = vmatprep.mubr.bf16.mxu0 %v22242_v53 }
 0x1ea   :  { %3268 = vmatpush1.bf16.msra.mxu1 %v19687_v43  ;;  %v19764_v43 = vld [vmem:[%s22768_s21 + $0x64] ss:$12 sps:$4 sm:$0xff]  }
 0x1eb   :  { %3309 = vmatpush1.bf16.msra.mxu0 %v19690_v44  ;;  %3269 = vmatprep.subr.bf16.mxu1 %v19695_v45  ;;  %v19762_v44 = vld [vmem:[%s22768_s21 + $0x60] ss:$12 sps:$4 sm:$0xff]  }
 0x1ec   :  { %3310 = vmatprep.subr.bf16.mxu0 %v19698_v47  ;;  %v19767_v45 = vld [vmem:[%s22768_s21 + $0x4c] ss:$12 sps:$4 sm:$0xff]   ;;  %v19765_v47 = vld [vmem:[%s22768_s21 + $0x48] ss:$12 sps:$4 sm:$0xff]  }
 0x1ee   :  { %3270 = vmatpush1.bf16.msra.mxu1 %v19693_v50  ;;  %v19770_v50 = vld [vmem:[%s22768_s21 + $0x34] ss:$12 sps:$4 sm:$0xff]  }
 0x1ef   :  { %3311 = vmatpush1.bf16.msra.mxu0 %v19696_v51  ;;  %3271 = vmatprep.subr.bf16.mxu1 %v19701_v54  ;;  %v19768_v51 = vld [vmem:[%s22768_s21 + $0x30] ss:$12 sps:$4 sm:$0xff]  }
 0x1f0   :  { %3312 = vmatprep.subr.bf16.mxu0 %v19704_v55  ;;  %v19773_v54 = vld [vmem:[%s22768_s21 + $0x1c] ss:$12 sps:$4 sm:$0xff]   ;;  %v19771_v55 = vld [vmem:[%s22768_s21 + $0x18] ss:$12 sps:$4 sm:$0xff]  }
 0x1f2   :  { %3272 = vmatpush1.bf16.msra.mxu1 %v19699_v56  ;;  %v19776_v56 = vld [vmem:[%s22768_s21 + $0x4] ss:$12 sps:$4 sm:$0xff]  }
 0x1f3   :  { %3313 = vmatpush1.bf16.msra.mxu0 %v19702_v57  ;;  %3273 = vmatprep.subr.bf16.mxu1 %v19707_v58  ;;  %v19774_v57 = vld [vmem:[%s22768_s21] ss:$12 sps:$4 sm:$0xff]  }
 0x1f4   :  { %3314 = vmatprep.subr.bf16.mxu0 %v19710_v59  ;;  %v19779_v58 = vld [vmem:[%s22768_s21 + $0x16c] ss:$12 sps:$4 sm:$0xff]  }
 0x1f5   :  { %v19804_v59 = vld [vmem:[%s22768_s21 + $0x22c] ss:$12 sps:$4 sm:$0xff]  }
 0x1f6   :  { %3274 = vmatpush1.bf16.msra.mxu1 %v19705_v60  ;;  %v19802_v60 = vld [vmem:[%s22768_s21 + $0x228] ss:$12 sps:$4 sm:$0xff]  }
 0x1f7   :  { %3315 = vmatpush1.bf16.msra.mxu0 %v19708_v61  ;;  %3275 = vmatprep.subr.bf16.mxu1 %v19713_v63  ;;  %v19777_v61 = vld [vmem:[%s22768_s21 + $0x168] ss:$12 sps:$4 sm:$0xff]  }
 0x1f8   :  { %3316 = vmatprep.subr.bf16.mxu0 %v19716_v0  ;;  %v19782_v63 = vld [vmem:[%s22768_s21 + $0x154] ss:$12 sps:$4 sm:$0xff]  }
 0x1f9   :  { %v19809_v0 = vld [vmem:[%s22768_s21 + $0x214] ss:$12 sps:$4 sm:$0xff]  }
 0x1fa   :  { %3276 = vmatpush1.bf16.msra.mxu1 %v19711_v1  ;;  %v19807_v1 = vld [vmem:[%s22768_s21 + $0x210] ss:$12 sps:$4 sm:$0xff]  }
 0x1fb   :  { %3317 = vmatpush1.bf16.msra.mxu0 %v19714_v7  ;;  %3277 = vmatprep.subr.bf16.mxu1 %v19719_v36  ;;  %v19780_v7 = vld [vmem:[%s22768_s21 + $0x150] ss:$12 sps:$4 sm:$0xff]  }
 0x1fc   :  { %3318 = vmatprep.subr.bf16.mxu0 %v19722_v10  ;;  %v19785_v36 = vld [vmem:[%s22768_s21 + $0x13c] ss:$12 sps:$4 sm:$0xff]  }
 0x1fd   :  { %v19814_v10 = vld [vmem:[%s22768_s21 + $0x1fc] ss:$12 sps:$4 sm:$0xff]  }
 0x1fe   :  { %3278 = vmatpush1.bf16.msra.mxu1 %v19717_v4  ;;  %v19812_v4 = vld [vmem:[%s22768_s21 + $0x1f8] ss:$12 sps:$4 sm:$0xff]  }
 0x1ff   :  { %3319 = vmatpush1.bf16.msra.mxu0 %v19720_v5  ;;  %3279 = vmatprep.subr.bf16.mxu1 %v19725_v6  ;;  %v19783_v5 = vld [vmem:[%s22768_s21 + $0x138] ss:$12 sps:$4 sm:$0xff]  }
 0x200   :  { %3320 = vmatprep.subr.bf16.mxu0 %v19728_v8  ;;  %v19788_v6 = vld [vmem:[%s22768_s21 + $0x124] ss:$12 sps:$4 sm:$0xff]   ;;  %v19817_v8 = vld [vmem:[%s22768_s21 + $0x1e0] ss:$12 sps:$4 sm:$0xff]  }
 0x202   :  { %3280 = vmatpush1.bf16.msra.mxu1 %v19723_v11  ;;  %v19819_v11 = vld [vmem:[%s22768_s21 + $0x1e4] ss:$12 sps:$4 sm:$0xff]  }
 0x203   :  { %3321 = vmatpush1.bf16.msra.mxu0 %v19726_v12  ;;  %3281 = vmatprep.subr.bf16.mxu1 %v19731_v17  ;;  %v19786_v12 = vld [vmem:[%s22768_s21 + $0x120] ss:$12 sps:$4 sm:$0xff]  }
 0x204   :  { %4069 = vmatprep.subr.bf16.mxu0 %v19804_v59  ;;  %v19791_v17 = vld [vmem:[%s22768_s21 + $0x10c] ss:$12 sps:$4 sm:$0xff]   ;;  %v19856_v59 = vld [vmem:[%s22768_s21 + $0x270] ss:$12 sps:$4 sm:$0xff]  }
 0x206   :  { %3282 = vmatpush2.bf16.msra.mxu1 %v19729_v14  ;;  %3339 = vmatmul.mubr.bf16.vlgmr.msra.gmra.mxu0 %v22748_v40  ;;  %v19822_v14 = vld [vmem:[%s22768_s21 + $0x1c8] ss:$12 sps:$4 sm:$0xff]  }
 0x207   :  { %3283 = vmatprep.subr.bf16.mxu1 %v19734_v18  ;;  %4070 = vmatpush1.bf16.msra.mxu0 %v19802_v60  ;;  %v19824_v18 = vld [vmem:[%s22768_s21 + $0x1cc] ss:$12 sps:$4 sm:$0xff]   ;;  %v19861_v60 = vld [vmem:[%s22768_s21 + $0x25c] ss:$12 sps:$4 sm:$0xff]  }
 0x208   :  { %4071 = vmatprep.subr.bf16.mxu0 %v19809_v0  ;;  %v19862_v0 = vld [vmem:[%s22768_s21 + $0x240] ss:$12 sps:$4 sm:$0xff]  }
 0x20a   :  { %3284 = vmatpush2.bf16.msra.mxu1 %v19732_v19  ;;  %v19789_v19 = vld [vmem:[%s22768_s21 + $0x108] ss:$12 sps:$4 sm:$0xff]  }
 0x20b   :  { %3285 = vmatprep.subr.bf16.mxu1 %v19737_v20  ;;  %4072 = vmatpush1.bf16.msra.mxu0 %v19807_v1  ;;  %v19794_v20 = vld [vmem:[%s22768_s21 + $0xf4] ss:$12 sps:$4 sm:$0xff]   ;;  %v19865_v1 = vld [vmem:[%s22768_s21 + $0x2f0] ss:$12 sps:$4 sm:$0xff]  }
 0x20c   :  { %4073 = vmatprep.subr.bf16.mxu0 %v19814_v10 }
 0x20e   :  { %3286 = vmatpush2.bf16.msra.mxu1 %v19735_v21  ;;  %v19827_v21 = vld [vmem:[%s22768_s21 + $0x1b0] ss:$12 sps:$4 sm:$0xff]  }
 0x20f   :  { %3287 = vmatprep.subr.bf16.mxu1 %v19740_v22  ;;  %4074 = vmatpush1.bf16.msra.mxu0 %v19812_v4  ;;  %v19829_v22 = vld [vmem:[%s22768_s21 + $0x1b4] ss:$12 sps:$4 sm:$0xff]  }
 0x210   :  { %4075 = vmatprep.subr.bf16.mxu0 %v19819_v11 }
 0x212   :  { %3288 = vmatpush2.bf16.msra.mxu1 %v19738_v23  ;;  %v19792_v23 = vld [vmem:[%s22768_s21 + $0xf0] ss:$12 sps:$4 sm:$0xff]  }
 0x213   :  { %3289 = vmatprep.subr.bf16.mxu1 %v19743_v24  ;;  %4076 = vmatpush1.bf16.msra.mxu0 %v19817_v8  ;;  %v19797_v24 = vld [vmem:[%s22768_s21 + $0xdc] ss:$12 sps:$4 sm:$0xff]  }
 0x214   :  { %4077 = vmatprep.subr.bf16.mxu0 %v19824_v18 }
 0x216   :  { %3290 = vmatpush2.bf16.msra.mxu1 %v19741_v25  ;;  %v19832_v25 = vld [vmem:[%s22768_s21 + $0x198] ss:$12 sps:$4 sm:$0xff]  }
 0x217   :  { %3291 = vmatprep.subr.bf16.mxu1 %v19746_v26  ;;  %4078 = vmatpush1.bf16.msra.mxu0 %v19822_v14  ;;  %v19834_v26 = vld [vmem:[%s22768_s21 + $0x19c] ss:$12 sps:$4 sm:$0xff]  }
 0x218   :  { %4079 = vmatprep.subr.bf16.mxu0 %v19829_v22 }
 0x21a   :  { %3292 = vmatpush2.bf16.msra.mxu1 %v19744_v27  ;;  %v19795_v27 = vld [vmem:[%s22768_s21 + $0xd8] ss:$12 sps:$4 sm:$0xff]  }
 0x21b   :  { %3293 = vmatprep.subr.bf16.mxu1 %v19749_v29  ;;  %4080 = vmatpush1.bf16.msra.mxu0 %v19827_v21  ;;  %v19800_v29 = vld [vmem:[%s22768_s21 + $0xc4] ss:$12 sps:$4 sm:$0xff]  }
 0x21c   :  { %4081 = vmatprep.subr.bf16.mxu0 %v19834_v26 }
 0x21e   :  { %3294 = vmatpush2.bf16.msra.mxu1 %v19747_v30  ;;  %v19837_v30 = vld [vmem:[%s22768_s21 + $0x180] ss:$12 sps:$4 sm:$0xff]  }
 0x21f   :  { %3295 = vmatprep.subr.bf16.mxu1 %v19752_v33  ;;  %4082 = vmatpush1.bf16.msra.mxu0 %v19832_v25  ;;  %v19839_v33 = vld [vmem:[%s22768_s21 + $0x184] ss:$12 sps:$4 sm:$0xff]  }
 0x220   :  { %4083 = vmatprep.subr.bf16.mxu0 %v19839_v33  ;;  %v19805_v33 = vld [vmem:[%s22768_s21 + $0xb0] ss:$12 sps:$4 sm:$0xff]  }
 0x222   :  { %3296 = vmatpush2.bf16.msra.mxu1 %v19750_v48  ;;  %v22860_v48 = vld [vmem:[%s16764_s25] sm:$0xf]  ;;  %s23436_s25 = sld [smem:[%s25011_s0 + %s22261_s22]]   ;;  %s22276_s22 = smov 27  }
 0x223   :  { %4028 = vmatprep.subr.bf16.mxu1 %v19755_v34  ;;  %v19798_v34 = vld [vmem:[%s22768_s21 + $0xc0] ss:$12 sps:$4 sm:$0xff]   ;;  %4084 = vmatpush1.bf16.msra.mxu0 %v19837_v30 }
 0x224   :  { %v22808_v28 = vpop.f32.mrf.mxu1 }
 0x225   :  { %3298 = vmatmul.mubr.bf16.vlgmr.msra.gmra.mxu1 %v22706_v31 }
 0x226   :  { %v22811_v38 = vpop.f32.mrf.mxu1  ;;  %4029 = vmatpush1.bf16.msra.mxu1 %v19753_v16  ;;  %v19801_v16 = vld [vmem:[%s22768_s21 + $0x170] ss:$12 sps:$4 sm:$0xff]  }
 0x227   :  { %4030 = vmatprep.subr.bf16.mxu1 %v19758_v37  ;;  %v19843_v37 = vld [vmem:[%s22768_s21 + $0x2ec] ss:$12 sps:$4 sm:$0xff]  }
 0x228   :  { %v3139_v41 = vpop.f32.mrf.mxu1  ;;  %4085 = vmatprep.subr.bf16.mxu0 %v19843_v37  ;;  %v19810_v37 = vld [vmem:[%s22768_s21 + $0x98] ss:$12 sps:$4 sm:$0xff]  }
 0x229   :  { %v19846_v41 = vld [vmem:[%s22768_s21 + $0x2d4] ss:$12 sps:$4 sm:$0xff]  }
 0x22a   :  { %v3140_v35 = vpop.f32.mrf.mxu1  ;;  %4031 = vmatpush1.bf16.msra.mxu1 %v19756_v39  ;;  %v2284_v39 = vrot.slane %v22860_v48, %v22650_v13 }
 0x22b   :  { %4032 = vmatprep.subr.bf16.mxu1 %v19761_v32  ;;  %v19841_v32 = vld [vmem:[%s22768_s21 + $0x2e8] ss:$12 sps:$4 sm:$0xff]  }
 0x22c   :  { %4086 = vmatpush2.bf16.msra.mxu0 %v19841_v32  ;;  %v3136_v35 = vadd.f32 %v22808_v28, %v2284_v39  ;;  %v19850_v28 = vld [vmem:[%s22768_s21 + $0x2a0] ss:$12 sps:$4 sm:$0xff]  }
 0x22d   :  { %4087 = vmatprep.subr.bf16.mxu0 %v19846_v41  ;;  %v19811_v39 = vld [vmem:[%s22768_s21 + $0x140] ss:$12 sps:$4 sm:$0xff]  }
 0x22e   :  { %4033 = vmatpush1.bf16.msra.mxu1 %v19759_v42  ;;  %v19844_v42 = vld [vmem:[%s22768_s21 + $0x2d0] ss:$12 sps:$4 sm:$0xff]   ;;  %v19815_v41 = vld [vmem:[%s22768_s21 + $0x80] ss:$12 sps:$4 sm:$0xff]  }
 0x22f   :  { %4034 = vmatprep.subr.bf16.mxu1 %v19764_v43 }
 0x230   :  { %4088 = vmatpush2.bf16.msra.mxu0 %v19844_v42 }
 0x232   :  { %4035 = vmatpush1.bf16.msra.mxu1 %v19762_v44 }
 0x233   :  { %4036 = vmatprep.subr.bf16.mxu1 %v19767_v45 }
 0x236   :  { %4037 = vmatpush1.bf16.msra.mxu1 %v19765_v47  ;;  %v19849_v47 = vld [vmem:[%s22768_s21 + $0x2bc] ss:$12 sps:$4 sm:$0xff]  }
 0x237   :  { %4038 = vmatprep.subr.bf16.mxu1 %v19770_v50  ;;  %v19847_v50 = vld [vmem:[%s22768_s21 + $0x2b8] ss:$12 sps:$4 sm:$0xff]   ;;  %4089 = vmatprep.subr.bf16.mxu0 %v19849_v47 }
 0x238   :  { %4090 = vmatpush2.bf16.msra.mxu0 %v19847_v50  ;;  %v19825_v50 = vld [vmem:[%s22768_s21 + $0x50] ss:$12 sps:$4 sm:$0xff]  }
 0x23a   :  { %4039 = vmatpush1.bf16.msra.mxu1 %v19768_v51 }
 0x23b   :  { %4040 = vmatprep.subr.bf16.mxu1 %v19773_v54 }
 0x23e   :  { %4041 = vmatpush1.bf16.msra.mxu1 %v19771_v55  ;;  %v19852_v55 = vld [vmem:[%s22768_s21 + $0x2a4] ss:$12 sps:$4 sm:$0xff]  }
 0x23f   :  { %4042 = vmatprep.subr.bf16.mxu1 %v19776_v56  ;;  %4091 = vmatprep.subr.bf16.mxu0 %v19852_v55  ;;  %v19855_v56 = vld [vmem:[%s22768_s21 + $0x28c] ss:$12 sps:$4 sm:$0xff]  }
 0x240   :  { %4092 = vmatpush2.bf16.msra.mxu0 %v19850_v28  ;;  %v19831_v55 = vld [vmem:[%s22768_s21 + $0xe0] ss:$12 sps:$4 sm:$0xff]  }
 0x241   :  { %4093 = vmatprep.subr.bf16.mxu0 %v19855_v56  ;;  %v19835_v28 = vld [vmem:[%s22768_s21 + $0x20] ss:$12 sps:$4 sm:$0xff]   ;;  %v19836_v56 = vld [vmem:[%s22768_s21 + $0xc8] ss:$12 sps:$4 sm:$0xff]  }
 0x242   :  { %4043 = vmatpush1.bf16.msra.mxu1 %v19774_v57  ;;  %v19853_v57 = vld [vmem:[%s22768_s21 + $0x288] ss:$12 sps:$4 sm:$0xff]  }
 0x243   :  { %4044 = vmatprep.subr.bf16.mxu1 %v19779_v58  ;;  %v19858_v58 = vld [vmem:[%s22768_s21 + $0x274] ss:$12 sps:$4 sm:$0xff]  }
 0x244   :  { %4094 = vmatpush2.bf16.msra.mxu0 %v19853_v57  ;;  %v19840_v57 = vld [vmem:[%s22768_s21 + $0x8] ss:$12 sps:$4 sm:$0xff]  }
 0x245   :  { %4095 = vmatprep.subr.bf16.mxu0 %v19858_v58  ;;  %v2292_v58 = vrot.slane %v22860_v48, %v22694_v2 }
 0x246   :  { %4045 = vmatpush2.bf16.msra.mxu1 %v19777_v61  ;;  %v19859_v61 = vld [vmem:[%s22768_s21 + $0x258] ss:$12 sps:$4 sm:$0xff]  }
 0x247   :  { %4046 = vmatprep.subr.bf16.mxu1 %v19782_v63  ;;  %v19864_v63 = vld [vmem:[%s22768_s21 + $0x244] ss:$12 sps:$4 sm:$0xff]  }
 0x248   :  { %4096 = vmatpush2.bf16.msra.mxu0 %v19856_v59  ;;  %v2296_v59 = vrot.slane %v22860_v48, %v22697_v3 }
 0x249   :  { %4097 = vmatprep.subr.bf16.mxu0 %v19861_v60 }
 0x24a   :  { %4047 = vmatpush2.bf16.msra.mxu1 %v19780_v7  ;;  %v2288_v7 = vrot.slane %v22860_v48, %v22655_v15 }
 0x24b   :  { %4048 = vmatprep.subr.bf16.mxu1 %v19785_v36 }
 0x24c   :  { %4098 = vmatpush2.bf16.msra.mxu0 %v19859_v61  ;;  %v3138_v36 = vadd.f32 %v22811_v38, %v2288_v7 }
 0x24d   :  { %4099 = vmatprep.subr.bf16.mxu0 %v19864_v63 }
 0x24e   :  { %4049 = vmatpush2.bf16.msra.mxu1 %v19783_v5 }
 0x24f   :  { %4050 = vmatprep.subr.bf16.mxu1 %v19788_v6 }
 0x250   :  { %4100 = vmatpush2.bf16.msra.mxu0 %v19862_v0 }
 0x251   :  { %18903 = vmatprep.subr.bf16.mxu0 %v19865_v1 }
 0x252   :  { %4051 = vmatpush2.bf16.msra.mxu1 %v19786_v12 }
 0x253   :  { %4052 = vmatprep.subr.bf16.mxu1 %v19791_v17 }
 0x256   :  { %4053 = vmatpush2.bf16.msra.mxu1 %v19789_v19 }
 0x257   :  { %4054 = vmatprep.subr.bf16.mxu1 %v19794_v20 }
 0x25a   :  { %4055 = vmatpush2.bf16.msra.mxu1 %v19792_v23 }
 0x25b   :  { %4056 = vmatprep.subr.bf16.mxu1 %v19797_v24 }
 0x25e   :  { %4057 = vmatpush2.bf16.msra.mxu1 %v19795_v27 }
 0x25f   :  { %4058 = vmatprep.subr.bf16.mxu1 %v19800_v29 }
 0x262   :  { %4059 = vmatpush2.bf16.msra.mxu1 %v19798_v34 }
 0x263   :  { %18881 = vmatprep.subr.bf16.mxu1 %v19801_v16  ;;  %v19806_v16 = vld [vmem:[%s22768_s21 + $0x158] ss:$12 sps:$4 sm:$0xff]  }
 0x266   :  { %v3176_v43 = vpop.f32.mrf.mxu0 }
 0x267   :  { %v3177_v44 = vadd.f32 %v3176_v43, %v3136_v35  ;;  %v19816_v35 = vld [vmem:[%s22768_s21 + $0x128] ss:$12 sps:$4 sm:$0xff]  }
 0x268   :  { %v3178_v45 = vpop.f32.mrf.mxu0 }
 0x269   :  { %v3179_v4 = vadd.f32 %v3178_v45, %v3138_v36  ;;  %v19821_v45 = vld [vmem:[%s22768_s21 + $0x110] ss:$12 sps:$4 sm:$0xff]  }
 0x26a   :  { %v3180_v51 = vpop.f32.mrf.mxu0 }
 0x26b   :  { %v19826_v51 = vld [vmem:[%s22768_s21 + $0xf8] ss:$12 sps:$4 sm:$0xff]  }
 0x26c   :  { %v3181_v54 = vpop.f32.mrf.mxu0 }
 0x26d   :  { %v19830_v54 = vld [vmem:[%s22768_s21 + $0x38] ss:$12 sps:$4 sm:$0xff]  }
 0x2a5   :  { %v3217_v10 = vpop.f32.mrf.mxu1 }
 0x2a6   :  { %v3218_v5 = vadd.f32 %v3217_v10, %v3177_v44  ;;  %v3258_v6 = vpop.f32.mrf.mxu0  ;;  %v19820_v44 = vld [vmem:[%s22768_s21 + $0x68] ss:$12 sps:$4 sm:$0xff]  }
 0x2a7   :  { %v3219_v8 = vpop.f32.mrf.mxu1  ;;  %v3259_v60 = vadd.f32 %v3258_v6, %v2292_v58  ;;  %v19896_v58 = vld [vmem:[%s22929_s29 + $0x20] ss:$8 sps:$4 sm:$0xff]  }
 0x2a8   :  { %v3351_v11 = vmul.f32 0.70710677, %v3218_v5  ;;  %v3220_v12 = vadd.f32 %v3219_v8, %v3179_v4  ;;  %v3260_v17 = vpop.f32.mrf.mxu0  ;;  %v3347_v24 = vmul.f32 0.5, %v3218_v5 }
 0x2a9   :  { %v3221_v14 = vpop.f32.mrf.mxu1  ;;  %v3261_v63 = vadd.f32 %v3260_v17, %v2296_v59  ;;  %v19901_v59 = vld [vmem:[%s22929_s29 + $0x14] ss:$8 sps:$4 sm:$0xff]  }
 0x2aa   :  { %22131 = verf.f32 %v3351_v11  ;;  %v3352_v18 = vmul.f32 0.70710677, %v3220_v12  ;;  %v3262_v19 = vpop.f32.mrf.mxu0  ;;  %v3348_v25 = vmul.f32 0.5, %v3220_v12 }
 0x2ab   :  { %v3222_v20 = vpop.f32.mrf.mxu1 }
 0x2ac   :  { %22133 = verf.f32 %v3352_v18  ;;  %v3263_v21 = vpop.f32.mrf.mxu0 }
 0x2b7   :  { %v22132_v22 = vpop.eup %22131 }
 0x2b8   :  { %v3359_v38 = vadd.f32 1.0, %v22132_v22  ;;  %v19866_v22 = vld [vmem:[%s22768_s21 + $0x230] ss:$12 sps:$4 sm:$0xff]  }
 0x2b9   :  { %v22134_v23 = vpop.eup %22133 }
 0x2ba   :  { %v3360_v26 = vadd.f32 1.0, %v22134_v23  ;;  %v3363_v27 = vmul.f32 %v3359_v38, %v3347_v24  ;;  %v19867_v23 = vld [vmem:[%s22768_s21 + $0x2d8] ss:$12 sps:$4 sm:$0xff]  }
 0x2bb   :  { %v19868_v24 = vld [vmem:[%s22768_s21 + $0x218] ss:$12 sps:$4 sm:$0xff]  }
 0x2bc   :  { %v3364_v29 = vmul.f32 %v3360_v26, %v3348_v25  ;;  %v22890_v34 = vpack.c.bf16 %v3363_v27, %v3363_v27  ;;  %v19869_v25 = vld [vmem:[%s22768_s21 + $0x2c0] ss:$12 sps:$4 sm:$0xff]   ;;  %v19871_v27 = vld [vmem:[%s22768_s21 + $0x2a8] ss:$12 sps:$4 sm:$0xff]  }
 0x2bd   :  { %v19870_v26 = vld [vmem:[%s22768_s21 + $0x200] ss:$12 sps:$4 sm:$0xff]  }
 0x2be   :  { %v22887_v30 = vpack.c.bf16 %v3364_v29, %v3364_v29  ;;  %v19872_v29 = vld [vmem:[%s22768_s21 + $0x1e8] ss:$12 sps:$4 sm:$0xff]  }
 0x2c0   :  { %4060 = vmatprep.mubr.bf16.mxu1 %v22887_v30 }
 0x2c1   :  { %4061 = vmatmul.mubr.bf16.vlgmr.msra.gmra.mxu1 %v22890_v34 }
 0x2c2   :  { %18882 = vmatpush3.bf16.msra.mxu1 %v19805_v33  ;;  %4142 = vmatprep.mubr.bf16.mxu1 %v22887_v30  ;;  %v19873_v33 = vld [vmem:[%s22768_s21 + $0x290] ss:$12 sps:$4 sm:$0xff]  }
 0x2c3   :  { %18883 = vmatprep.subr.bf16.mxu1 %v19806_v16  ;;  %v19874_v16 = vld [vmem:[%s22768_s21 + $0x1d0] ss:$12 sps:$4 sm:$0xff]  }
 0x2c6   :  { %v3340_v32 = vpop.f32.mrf.mxu0  ;;  %18884 = vmatpush3.bf16.msra.mxu1 %v19810_v37  ;;  %v19881_v37 = vld [vmem:[%s22929_s29 + $0x70] ss:$8 sps:$4 sm:$0xff]  }
 0x2c7   :  { %18885 = vmatprep.subr.bf16.mxu1 %v19811_v39  ;;  %v19875_v39 = vld [vmem:[%s22768_s21 + $0x278] ss:$12 sps:$4 sm:$0xff]  }
 0x2c8   :  { %v3342_v42 = vpop.f32.mrf.mxu0 }
 0x2ca   :  { %v3344_v43 = vpop.f32.mrf.mxu0  ;;  %18886 = vmatpush3.bf16.msra.mxu1 %v19815_v41  ;;  %v19876_v41 = vld [vmem:[%s22768_s21 + $0x1b8] ss:$12 sps:$4 sm:$0xff]  }
 0x2cb   :  { %18887 = vmatprep.subr.bf16.mxu1 %v19816_v35  ;;  %v19877_v35 = vld [vmem:[%s22768_s21 + $0x260] ss:$12 sps:$4 sm:$0xff]   ;;  %v19879_v43 = vld [vmem:[%s22768_s21 + $0x248] ss:$12 sps:$4 sm:$0xff]  }
 0x2cc   :  { %v3345_v47 = vpop.f32.mrf.mxu0 }
 0x2cd   :  { %v19884_v47 = vld [vmem:[%s22929_s29 + $0x60] ss:$8 sps:$4 sm:$0xff]  }
 0x2ce   :  { %18888 = vmatpush3.bf16.msra.mxu1 %v19820_v44  ;;  %v19880_v44 = vld [vmem:[%s22768_s21 + $0x188] ss:$12 sps:$4 sm:$0xff]  }
 0x2cf   :  { %18889 = vmatprep.subr.bf16.mxu1 %v19821_v45  ;;  %v19886_v45 = vld [vmem:[%s22929_s29 + $0x64] ss:$8 sps:$4 sm:$0xff]  }
 0x2d2   :  { %18890 = vmatpush3.bf16.msra.mxu1 %v19825_v50  ;;  %v19889_v50 = vld [vmem:[%s22929_s29 + $0x54] ss:$8 sps:$4 sm:$0xff]  }
 0x2d3   :  { %18891 = vmatprep.subr.bf16.mxu1 %v19826_v51  ;;  %v19887_v51 = vld [vmem:[%s22929_s29 + $0x50] ss:$8 sps:$4 sm:$0xff]  }
 0x2d6   :  { %18892 = vmatpush3.bf16.msra.mxu1 %v19830_v54  ;;  %v19892_v54 = vld [vmem:[%s22929_s29 + $0x44] ss:$8 sps:$4 sm:$0xff]  }
 0x2d7   :  { %18893 = vmatprep.subr.bf16.mxu1 %v19831_v55  ;;  %v19890_v55 = vld [vmem:[%s22929_s29 + $0x40] ss:$8 sps:$4 sm:$0xff]  }
 0x2da   :  { %18894 = vmatpush3.bf16.msra.mxu1 %v19835_v28  ;;  %v19895_v28 = vld [vmem:[%s22929_s29 + $0x34] ss:$8 sps:$4 sm:$0xff]  }
 0x2db   :  { %18895 = vmatprep.subr.bf16.mxu1 %v19836_v56  ;;  %v19893_v56 = vld [vmem:[%s22929_s29 + $0x30] ss:$8 sps:$4 sm:$0xff]  }
 0x2de   :  { %18896 = vmatpush3.bf16.msra.mxu1 %v19840_v57  ;;  %v19898_v57 = vld [vmem:[%s22929_s29 + $0x24] ss:$8 sps:$4 sm:$0xff]  }
 0x2e1   :  { %4143 = vmatmul.mubr.bf16.vlgmr.msra.gmra.mxu1 %v22890_v34 }
 0x2e5   :  { %v3299_v61 = vpop.f32.mrf.mxu1 }
 0x2e6   :  { %v3300_v0 = vadd.f32 %v3299_v61, %v3259_v60  ;;  %v19899_v60 = vld [vmem:[%s22929_s29 + $0x10] ss:$8 sps:$4 sm:$0xff]   ;;  %v19904_v61 = vld [vmem:[%s22929_s29 + $0x4] ss:$8 sps:$4 sm:$0xff]  }
 0x2e7   :  { %v3301_v1 = vpop.f32.mrf.mxu1 }
 0x2e8   :  { %v3341_v7 = vadd.f32 %v3340_v32, %v3300_v0  ;;  %v3302_v36 = vadd.f32 %v3301_v1, %v3261_v63  ;;  %v19883_v32 = vld [vmem:[%s22929_s29 + $0x74] ss:$8 sps:$4 sm:$0xff]   ;;  %v19902_v63 = vld [vmem:[%s22929_s29] ss:$8 sps:$4 sm:$0xff]   ;;  %v19905_v1 = vld [vmem:[%s22929_s29 + $0xf0] ss:$8 sps:$4 sm:$0xff]  }
 0x2e9   :  { %v3303_v10 = vpop.f32.mrf.mxu1  ;;  %4508 = vmatprep.subr.bf16.mxu1 %v19883_v32  ;;  %v19907_v0 = vld [vmem:[%s22929_s29 + $0xf4] ss:$8 sps:$4 sm:$0xff]  }
 0x2ea   :  { %v3353_v4 = vmul.f32 0.70710677, %v3341_v7  ;;  %v3343_v5 = vadd.f32 %v3342_v42, %v3302_v36  ;;  %v3349_v6 = vmul.f32 0.5, %v3341_v7  ;;  %4509 = vmatpush1.bf16.msra.mxu1 %v19881_v37  ;;  %v19878_v42 = vld [vmem:[%s22768_s21 + $0x1a0] ss:$12 sps:$4 sm:$0xff]   ;;  %s16768_s21 = sld [smem:[%s25011_s0 + %s22258_s18]]   ;;  %s22275_s18 = smov 14  }
 0x2eb   :  { %v3304_v8 = vpop.f32.mrf.mxu1  ;;  %4510 = vmatprep.subr.bf16.mxu1 %v19886_v45  ;;  %v19910_v7 = vld [vmem:[%s22929_s29 + $0xe4] ss:$8 sps:$4 sm:$0xff]   ;;  %v19908_v36 = vld [vmem:[%s22929_s29 + $0xe0] ss:$8 sps:$4 sm:$0xff]   ;;  %v19913_v10 = vld [vmem:[%s22929_s29 + $0xd4] ss:$8 sps:$4 sm:$0xff]  }
 0x2ec   :  { %22135 = verf.f32 %v3353_v4  ;;  %v3354_v11 = vmul.f32 0.70710677, %v3343_v5  ;;  %v3350_v17 = vmul.f32 0.5, %v3343_v5  ;;  %v19911_v4 = vld [vmem:[%s22929_s29 + $0xd0] ss:$8 sps:$4 sm:$0xff]  }
 0x2ed   :  { %v19916_v5 = vld [vmem:[%s22929_s29 + $0xc4] ss:$8 sps:$4 sm:$0xff]   ;;  %v19914_v8 = vld [vmem:[%s22929_s29 + $0xc0] ss:$8 sps:$4 sm:$0xff]   ;;  %v19949_v32 = vld [vmem:[%s22929_s29 + $0x114] ss:$8 sps:$4 sm:$0xff]  }
 0x2ee   :  { %22137 = verf.f32 %v3354_v11  ;;  %4511 = vmatpush1.bf16.msra.mxu1 %v19884_v47  ;;  %v19919_v11 = vld [vmem:[%s22929_s29 + $0xb4] ss:$8 sps:$4 sm:$0xff]   ;;  %v19946_v37 = vld [vmem:[%s22929_s29 + $0x124] ss:$8 sps:$4 sm:$0xff]  }
 0x2ef   :  { %4512 = vmatprep.subr.bf16.mxu1 %v19889_v50 }
 0x2f2   :  { %4513 = vmatpush1.bf16.msra.mxu1 %v19887_v51 }
 0x2f3   :  { %4514 = vmatprep.subr.bf16.mxu1 %v19892_v54 }
 0x2f6   :  { %4515 = vmatpush1.bf16.msra.mxu1 %v19890_v55 }
 0x2f7   :  { %4516 = vmatprep.subr.bf16.mxu1 %v19895_v28 }
 0x2f9   :  { %v22136_v12 = vpop.eup %22135 }
 0x2fa   :  { %v3361_v14 = vadd.f32 1.0, %v22136_v12  ;;  %4517 = vmatpush1.bf16.msra.mxu1 %v19893_v56  ;;  %v19917_v12 = vld [vmem:[%s22929_s29 + $0xb0] ss:$8 sps:$4 sm:$0xff]   ;;  %v3499_v56 = vld [vmem:[%s16765_s3] sm:$0x7]  ;;  %s23477_s3 = sld [smem:[%s25011_s0 + %s22263_s30]]   ;;  %s22278_s30 = smov 33  }
 0x2fb   :  { %v22138_v48 = vpop.eup %22137  ;;  %4518 = vmatprep.subr.bf16.mxu1 %v19898_v57  ;;  %v3504_v57 = vrot.slane %v3499_v56, %v22650_v13 }
 0x2fc   :  { %v3362_v18 = vadd.f32 1.0, %v22138_v48  ;;  %v3365_v19 = vmul.f32 %v3361_v14, %v3349_v6  ;;  %v19922_v14 = vld [vmem:[%s22929_s29 + $0xa4] ss:$8 sps:$4 sm:$0xff]   ;;  %v19920_v48 = vld [vmem:[%s22929_s29 + $0xa0] ss:$8 sps:$4 sm:$0xff]  }
 0x2fd   :  { %v19925_v6 = vld [vmem:[%s22929_s29 + $0x94] ss:$8 sps:$4 sm:$0xff]  }
 0x2fe   :  { %v3366_v20 = vmul.f32 %v3362_v18, %v3350_v17  ;;  %v22917_v38 = vpack.c.bf16 %v3365_v19, %v3365_v19  ;;  %4519 = vmatpush1.bf16.msra.mxu1 %v19896_v58  ;;  %v19923_v17 = vld [vmem:[%s22929_s29 + $0x90] ss:$8 sps:$4 sm:$0xff]   ;;  %v19926_v18 = vld [vmem:[%s22929_s29 + $0x80] ss:$8 sps:$4 sm:$0xff]   ;;  %v19928_v19 = vld [vmem:[%s22929_s29 + $0x84] ss:$8 sps:$4 sm:$0xff]   ;;  %v3508_v58 = vrot.slane %v3499_v56, %v22655_v15 }
 0x2ff   :  { %4520 = vmatprep.subr.bf16.mxu1 %v19901_v59 }
 0x300   :  { %v22914_v21 = vpack.c.bf16 %v3366_v20, %v3366_v20  ;;  %v19931_v20 = vld [vmem:[%s22929_s29 + $0x174] ss:$8 sps:$4 sm:$0xff]  }
 0x302   :  { %4101 = vmatprep.mubr.bf16.mxu0 %v22914_v21  ;;  %4521 = vmatpush1.bf16.msra.mxu1 %v19899_v60 }
 0x303   :  { %4102 = vmatmul.mubr.bf16.vlgmr.msra.gmra.mxu0 %v22917_v38  ;;  %4522 = vmatprep.subr.bf16.mxu1 %v19904_v61 }
 0x304   :  { %18904 = vmatpush3.bf16.msra.mxu0 %v19866_v22  ;;  %4182 = vmatprep.mubr.bf16.mxu0 %v22914_v21  ;;  %v19929_v22 = vld [vmem:[%s22929_s29 + $0x170] ss:$8 sps:$4 sm:$0xff]  }
 0x305   :  { %18905 = vmatprep.subr.bf16.mxu0 %v19867_v23  ;;  %v19934_v23 = vld [vmem:[%s22929_s29 + $0x164] ss:$8 sps:$4 sm:$0xff]  }
 0x306   :  { %4523 = vmatpush1.bf16.msra.mxu1 %v19902_v63 }
 0x307   :  { %4524 = vmatprep.subr.bf16.mxu1 %v19907_v0 }
 0x308   :  { %18906 = vmatpush3.bf16.msra.mxu0 %v19868_v24  ;;  %v19932_v24 = vld [vmem:[%s22929_s29 + $0x160] ss:$8 sps:$4 sm:$0xff]  }
 0x309   :  { %18907 = vmatprep.subr.bf16.mxu0 %v19869_v25  ;;  %v19937_v25 = vld [vmem:[%s22929_s29 + $0x154] ss:$8 sps:$4 sm:$0xff]  }
 0x30a   :  { %4525 = vmatpush2.bf16.msra.mxu1 %v19905_v1 }
 0x30b   :  { %4526 = vmatprep.subr.bf16.mxu1 %v19910_v7 }
 0x30c   :  { %18908 = vmatpush3.bf16.msra.mxu0 %v19870_v26  ;;  %v19935_v26 = vld [vmem:[%s22929_s29 + $0x150] ss:$8 sps:$4 sm:$0xff]  }
 0x30d   :  { %18909 = vmatprep.subr.bf16.mxu0 %v19871_v27  ;;  %v19940_v27 = vld [vmem:[%s22929_s29 + $0x144] ss:$8 sps:$4 sm:$0xff]  }
 0x30e   :  { %4527 = vmatpush2.bf16.msra.mxu1 %v19908_v36 }
 0x30f   :  { %4528 = vmatprep.subr.bf16.mxu1 %v19913_v10 }
 0x310   :  { %18910 = vmatpush3.bf16.msra.mxu0 %v19872_v29  ;;  %v19938_v29 = vld [vmem:[%s22929_s29 + $0x140] ss:$8 sps:$4 sm:$0xff]  }
 0x311   :  { %18911 = vmatprep.subr.bf16.mxu0 %v19873_v33  ;;  %v19943_v33 = vld [vmem:[%s22929_s29 + $0x134] ss:$8 sps:$4 sm:$0xff]  }
 0x312   :  { %4529 = vmatpush2.bf16.msra.mxu1 %v19911_v4 }
 0x313   :  { %4530 = vmatprep.subr.bf16.mxu1 %v19916_v5 }
 0x314   :  { %18912 = vmatpush3.bf16.msra.mxu0 %v19874_v16  ;;  %v19941_v16 = vld [vmem:[%s22929_s29 + $0x130] ss:$8 sps:$4 sm:$0xff]  }
 0x315   :  { %18913 = vmatprep.subr.bf16.mxu0 %v19875_v39  ;;  %v19944_v39 = vld [vmem:[%s22929_s29 + $0x120] ss:$8 sps:$4 sm:$0xff]  }
 0x316   :  { %4531 = vmatpush2.bf16.msra.mxu1 %v19914_v8 }
 0x317   :  { %4532 = vmatprep.subr.bf16.mxu1 %v19919_v11 }
 0x318   :  { %18914 = vmatpush3.bf16.msra.mxu0 %v19876_v41  ;;  %v19947_v41 = vld [vmem:[%s22929_s29 + $0x110] ss:$8 sps:$4 sm:$0xff]  }
 0x319   :  { %18915 = vmatprep.subr.bf16.mxu0 %v19877_v35  ;;  %v19952_v35 = vld [vmem:[%s22929_s29 + $0x104] ss:$8 sps:$4 sm:$0xff]  }
 0x31a   :  { %4533 = vmatpush2.bf16.msra.mxu1 %v19917_v12 }
 0x31b   :  { %4534 = vmatprep.subr.bf16.mxu1 %v19922_v14 }
 0x31c   :  { %18916 = vmatpush3.bf16.msra.mxu0 %v19878_v42  ;;  %v19950_v42 = vld [vmem:[%s22929_s29 + $0x100] ss:$8 sps:$4 sm:$0xff]   ;;  %s16775_s29 = sld [smem:[%s25011_s0 + %s22262_s26]]   ;;  %s22277_s26 = smov 28  }
 0x31d   :  { %18917 = vmatprep.subr.bf16.mxu0 %v19879_v43 }
 0x31e   :  { %4535 = vmatpush2.bf16.msra.mxu1 %v19920_v48 }
 0x31f   :  { %4536 = vmatprep.subr.bf16.mxu1 %v19925_v6 }
 0x320   :  { %18918 = vmatpush3.bf16.msra.mxu0 %v19880_v44 }
 0x321   :  { %4549 = vmatprep.subr.bf16.mxu0 %v19931_v20  ;;  %v3512_v20 = vrot.slane %v3499_v56, %v22694_v2  ;;  %v19964_v56 = vld [vmem:[%s16749_s7 + $0x10] sm:$0xff]  }
 0x322   :  { %4537 = vmatpush2.bf16.msra.mxu1 %v19923_v17 }
 0x323   :  { %4183 = vmatmul.mubr.bf16.vlgmr.msra.gmra.mxu0 %v22917_v38  ;;  %4538 = vmatprep.subr.bf16.mxu1 %v19928_v19 }
 0x324   :  { %4581 = vmatprep.mubr.bf16.mxu0 %v22242_v53  ;;  %4550 = vmatpush1.bf16.msra.mxu0 %v19929_v22 }
 0x325   :  { %4551 = vmatprep.subr.bf16.mxu0 %v19934_v23 }
 0x326   :  { %4539 = vmatpush2.bf16.msra.mxu1 %v19926_v18 }
 0x328   :  { %4552 = vmatpush1.bf16.msra.mxu0 %v19932_v24 }
 0x329   :  { %4553 = vmatprep.subr.bf16.mxu0 %v19937_v25 }
 0x32c   :  { %4554 = vmatpush1.bf16.msra.mxu0 %v19935_v26 }
 0x32d   :  { %4555 = vmatprep.subr.bf16.mxu0 %v19940_v27 }
 0x330   :  { %4556 = vmatpush1.bf16.msra.mxu0 %v19938_v29 }
 0x331   :  { %4557 = vmatprep.subr.bf16.mxu0 %v19943_v33 }
 0x334   :  { %4558 = vmatpush1.bf16.msra.mxu0 %v19941_v16 }
 0x335   :  { %4559 = vmatprep.subr.bf16.mxu0 %v19946_v37 }
 0x338   :  { %4560 = vmatpush1.bf16.msra.mxu0 %v19944_v39 }
 0x339   :  { %4561 = vmatprep.subr.bf16.mxu0 %v19949_v32 }
 0x33c   :  { %4562 = vmatpush1.bf16.msra.mxu0 %v19947_v41 }
 0x33d   :  { %4563 = vmatprep.subr.bf16.mxu0 %v19952_v35  ;;  %v19953_v35 = vld [vmem:[%s16749_s7 + $0x78] sm:$0xff]  }
 0x340   :  { %4564 = vmatpush1.bf16.msra.mxu0 %v19950_v42  ;;  %v19954_v42 = vld [vmem:[%s16749_s7 + $0x38] sm:$0xff]  }
 0x341   :  { %18925 = vmatprep.subr.bf16.mxu0 %v19953_v35  ;;  %v19972_v35 = vld [vmem:[%s23013_s11 + $0x158] ss:$24 sps:$4 sm:$0xff]  }
 0x381   :  { %v4062_v43 = vpop.f32.mrf.mxu1 }
 0x382   :  { %v4063_v59 = vadd.f32 %v4062_v43, %v3504_v57  ;;  %v19955_v43 = vld [vmem:[%s16749_s7 + $0x70] sm:$0xff]   ;;  %v19965_v57 = vld [vmem:[%s16749_s7 + $0x48] sm:$0xff]  }
 0x383   :  { %v4064_v44 = vpop.f32.mrf.mxu1 }
 0x384   :  { %v4065_v61 = vadd.f32 %v4064_v44, %v3508_v58  ;;  %v19956_v44 = vld [vmem:[%s16749_s7 + $0x30] sm:$0xff]   ;;  %v19966_v58 = vld [vmem:[%s16749_s7 + $0x8] sm:$0xff]  }
 0x385   :  { %v4066_v45 = vpop.f32.mrf.mxu1 }
 0x386   :  { %v19957_v45 = vld [vmem:[%s16749_s7 + $0x68] sm:$0xff]  }
 0x387   :  { %v4067_v47 = vpop.f32.mrf.mxu1 }
 0x388   :  { %v19958_v47 = vld [vmem:[%s16749_s7 + $0x28] sm:$0xff]  }
 0x3a1   :  { %v18897_v50 = vpop.f32.mrf.mxu1 }
 0x3a3   :  { %v18898_v51 = vpop.f32.mrf.mxu1 }
 0x3a4   :  { %v18899_v54 = vadd.f32 %v18898_v51, %v18897_v50  ;;  %v19959_v50 = vld [vmem:[%s16749_s7 + $0x60] sm:$0xff]  }
 0x3a5   :  { %v18900_v55 = vpop.f32.mrf.mxu1  ;;  %v19960_v51 = vld [vmem:[%s16749_s7 + $0x20] sm:$0xff]  }
 0x3a6   :  { %v4145_v24 = vadd.f32 %v18899_v54, %v3512_v20  ;;  %v19961_v54 = vld [vmem:[%s16749_s7 + $0x58] sm:$0xff]  }
 0x3a7   :  { %v18901_v28 = vpop.f32.mrf.mxu1  ;;  %v19962_v55 = vld [vmem:[%s16749_s7 + $0x18] sm:$0xff]  }
 0x3a8   :  { %v19963_v28 = vld [vmem:[%s16749_s7 + $0x50] sm:$0xff]  }
 0x3c3   :  { %v4103_v60 = vpop.f32.mrf.mxu0 }
 0x3c4   :  { %v4104_v63 = vadd.f32 %v4103_v60, %v4063_v59  ;;  %v19967_v59 = vld [vmem:[%s16749_s7 + $0x40] sm:$0xff]  }
 0x3c5   :  { %v4105_v0 = vpop.f32.mrf.mxu0  ;;  %v19968_v60 = vld [vmem:[%s16749_s7] sm:$0xff]   ;;  %s16769_s7 = sld [smem:[%s25011_s0 + %s22264_s4]]  }
 0x3c6   :  { %v4193_v1 = vmul.f32 0.70710677, %v4104_v63  ;;  %v4106_v7 = vadd.f32 %v4105_v0, %v4065_v61  ;;  %v4190_v12 = vmul.f32 0.5, %v4104_v63  ;;  %v19969_v61 = vld [vmem:[%s23013_s11 + $0x150] ss:$24 sps:$4 sm:$0xff]  }
 0x3c7   :  { %v4107_v36 = vpop.f32.mrf.mxu0  ;;  %v19971_v63 = vld [vmem:[%s23013_s11 + $0x154] ss:$24 sps:$4 sm:$0xff]  }
 0x3c8   :  { %22139 = verf.f32 %v4193_v1  ;;  %v4194_v10 = vmul.f32 0.70710677, %v4106_v7  ;;  %v4191_v14 = vmul.f32 0.5, %v4106_v7  ;;  %v19974_v0 = vld [vmem:[%s23013_s11 + $0x15c] ss:$24 sps:$4 sm:$0xff]   ;;  %5103 = vmatprep.subr.bf16.mxu1 %v19971_v63 }
 0x3c9   :  { %v4108_v4 = vpop.f32.mrf.mxu0  ;;  %v19996_v63 = vld [vmem:[%s23013_s11 + $0x98] ss:$24 sps:$4 sm:$0xff]  }
 0x3ca   :  { %22141 = verf.f32 %v4194_v10  ;;  %v4256_v4 = vld [vmem:[%s16766_s15] sm:$0x3]  ;;  %s23610_s15 = sld [smem:[%s25011_s0 + %s22266_s12]]  }
 0x3d5   :  { %v22140_v5 = vpop.eup %22139 }
 0x3d6   :  { %v4199_v8 = vadd.f32 1.0, %v22140_v5  ;;  %v4261_v5 = vrot.slane %v4256_v4, %v22650_v13 }
 0x3d7   :  { %v22142_v11 = vpop.eup %22141 }
 0x3d8   :  { %v4200_v48 = vadd.f32 1.0, %v22142_v11  ;;  %v4202_v6 = vmul.f32 %v4199_v8, %v4190_v12  ;;  %v4265_v8 = vrot.slane %v4256_v4, %v22655_v15  ;;  %v20010_v4 = vld [vmem:[%s23013_s11 + $0x3c] ss:$24 sps:$4 sm:$0xff]  }
 0x3da   :  { %v4203_v17 = vmul.f32 %v4200_v48, %v4191_v14  ;;  %v22998_v19 = vpack.c.bf16 %v4202_v6, %v4202_v6 }
 0x3dc   :  { %v22996_v18 = vpack.c.bf16 %v4203_v17, %v4203_v17 }
 0x3de   :  { %4540 = vmatprep.mubr.bf16.mxu1 %v22996_v18 }
 0x3df   :  { %4541 = vmatmul.mubr.bf16.vlgmr.msra.gmra.mxu1 %v22998_v19 }
 0x3e0   :  { %5135 = vmatprep.mubr.bf16.mxu1 %v22242_v53  ;;  %5104 = vmatpush1.bf16.msra.mxu1 %v19969_v61  ;;  %v19993_v61 = vld [vmem:[%s23013_s11 + $0x90] ss:$24 sps:$4 sm:$0xff]  }
 0x3e3   :  { %v18919_v22 = vpop.f32.mrf.mxu0 }
 0x3e5   :  { %v18920_v23 = vpop.f32.mrf.mxu0 }
 0x3e6   :  { %v18921_v25 = vadd.f32 %v18920_v23, %v18919_v22 }
 0x3e7   :  { %v18922_v26 = vpop.f32.mrf.mxu0 }
 0x3e8   :  { %v4185_v27 = vadd.f32 %v18921_v25, %v4145_v24 }
 0x3e9   :  { %v18923_v29 = vpop.f32.mrf.mxu0 }
 0x3ea   :  { %v4195_v33 = vmul.f32 0.70710677, %v4185_v27  ;;  %v4192_v37 = vmul.f32 0.5, %v4185_v27 }
 0x3ec   :  { %22143 = verf.f32 %v4195_v33 }
 0x3f9   :  { %v22144_v16 = vpop.eup %22143 }
 0x3fa   :  { %v4201_v39 = vadd.f32 1.0, %v22144_v16 }
 0x3fc   :  { %v4204_v32 = vmul.f32 %v4201_v39, %v4192_v37 }
 0x3fe   :  { %v23004_v41 = vpack.c.bf16 %v4204_v32, %v4204_v32 }
 0x400   :  { %4582 = vmatmul.mubr.bf16.vlgmr.msra.gmra.mxu0 %v23004_v41 }
 0x401   :  { %18926 = vmatpush3.bf16.msra.mxu0 %v19954_v42 }
 0x402   :  { %18927 = vmatprep.subr.bf16.mxu0 %v19955_v43  ;;  %v19977_v43 = vld [vmem:[%s23013_s11 + $0x124] ss:$24 sps:$4 sm:$0xff]  }
 0x403   :  { %5105 = vmatprep.subr.bf16.mxu1 %v19977_v43  ;;  %v20020_v43 = vld [vmem:[%s23058_s19 + $0x70] ss:$8 sps:$4 sm:$0xff]  }
 0x405   :  { %18928 = vmatpush3.bf16.msra.mxu0 %v19956_v44  ;;  %v19980_v44 = vld [vmem:[%s23013_s11 + $0x12c] ss:$24 sps:$4 sm:$0xff]  }
 0x406   :  { %18929 = vmatprep.subr.bf16.mxu0 %v19957_v45  ;;  %v19975_v45 = vld [vmem:[%s23013_s11 + $0x120] ss:$24 sps:$4 sm:$0xff]  }
 0x407   :  { %5106 = vmatpush1.bf16.msra.mxu1 %v19975_v45  ;;  %v20025_v45 = vld [vmem:[%s23013_s11 + $0x134] ss:$24 sps:$4 sm:$0xff]  }
 0x409   :  { %18930 = vmatpush3.bf16.msra.mxu0 %v19958_v47  ;;  %v19978_v47 = vld [vmem:[%s23013_s11 + $0x128] ss:$24 sps:$4 sm:$0xff]  }
 0x40a   :  { %18931 = vmatprep.subr.bf16.mxu0 %v19959_v50  ;;  %v19983_v50 = vld [vmem:[%s23013_s11 + $0xf4] ss:$24 sps:$4 sm:$0xff]  }
 0x40b   :  { %5107 = vmatprep.subr.bf16.mxu1 %v19983_v50  ;;  %v20023_v50 = vld [vmem:[%s23013_s11 + $0x130] ss:$24 sps:$4 sm:$0xff]  }
 0x40d   :  { %18932 = vmatpush3.bf16.msra.mxu0 %v19960_v51  ;;  %v19986_v51 = vld [vmem:[%s23013_s11 + $0xfc] ss:$24 sps:$4 sm:$0xff]  }
 0x40e   :  { %18933 = vmatprep.subr.bf16.mxu0 %v19961_v54  ;;  %v19981_v54 = vld [vmem:[%s23013_s11 + $0xf0] ss:$24 sps:$4 sm:$0xff]  }
 0x40f   :  { %5108 = vmatpush1.bf16.msra.mxu1 %v19981_v54  ;;  %v20031_v54 = vld [vmem:[%s23013_s11 + $0x104] ss:$24 sps:$4 sm:$0xff]  }
 0x411   :  { %18934 = vmatpush3.bf16.msra.mxu0 %v19962_v55  ;;  %v19984_v55 = vld [vmem:[%s23013_s11 + $0xf8] ss:$24 sps:$4 sm:$0xff]  }
 0x412   :  { %18935 = vmatprep.subr.bf16.mxu0 %v19963_v28  ;;  %v19989_v28 = vld [vmem:[%s23013_s11 + $0xc4] ss:$24 sps:$4 sm:$0xff]  }
 0x413   :  { %5109 = vmatprep.subr.bf16.mxu1 %v19989_v28  ;;  %v20029_v28 = vld [vmem:[%s23013_s11 + $0x100] ss:$24 sps:$4 sm:$0xff]  }
 0x415   :  { %18936 = vmatpush3.bf16.msra.mxu0 %v19964_v56  ;;  %v19992_v56 = vld [vmem:[%s23013_s11 + $0xcc] ss:$24 sps:$4 sm:$0xff]  }
 0x416   :  { %18937 = vmatprep.subr.bf16.mxu0 %v19965_v57  ;;  %v19987_v57 = vld [vmem:[%s23013_s11 + $0xc0] ss:$24 sps:$4 sm:$0xff]  }
 0x417   :  { %5110 = vmatpush1.bf16.msra.mxu1 %v19987_v57  ;;  %v20037_v57 = vld [vmem:[%s23013_s11 + $0xd4] ss:$24 sps:$4 sm:$0xff]  }
 0x419   :  { %18938 = vmatpush3.bf16.msra.mxu0 %v19966_v58  ;;  %v19990_v58 = vld [vmem:[%s23013_s11 + $0xc8] ss:$24 sps:$4 sm:$0xff]  }
 0x41a   :  { %18939 = vmatprep.subr.bf16.mxu0 %v19967_v59  ;;  %v19995_v59 = vld [vmem:[%s23013_s11 + $0x94] ss:$24 sps:$4 sm:$0xff]  }
 0x41b   :  { %5111 = vmatprep.subr.bf16.mxu1 %v19995_v59  ;;  %v20035_v59 = vld [vmem:[%s23013_s11 + $0xd0] ss:$24 sps:$4 sm:$0xff]  }
 0x41c   :  { %5112 = vmatpush1.bf16.msra.mxu1 %v19993_v61  ;;  %v20043_v61 = vld [vmem:[%s23013_s11 + $0xa4] ss:$24 sps:$4 sm:$0xff]  }
 0x41d   :  { %18940 = vmatpush3.bf16.msra.mxu0 %v19968_v60  ;;  %v19998_v60 = vld [vmem:[%s23013_s11 + $0x9c] ss:$24 sps:$4 sm:$0xff]  }
 0x41e   :  { %5144 = vmatprep.subr.bf16.mxu0 %v19974_v0  ;;  %v20001_v0 = vld [vmem:[%s23013_s11 + $0x64] ss:$24 sps:$4 sm:$0xff]  }
 0x41f   :  { %5113 = vmatprep.subr.bf16.mxu1 %v20001_v0  ;;  %v20041_v0 = vld [vmem:[%s23013_s11 + $0xa0] ss:$24 sps:$4 sm:$0xff]  }
 0x49f   :  { %v4542_v1 = vpop.f32.mrf.mxu1 }
 0x4a0   :  { %v4543_v11 = vadd.f32 %v4542_v1, %v4261_v5  ;;  %v20004_v1 = vld [vmem:[%s23013_s11 + $0x6c] ss:$24 sps:$4 sm:$0xff]   ;;  %v20005_v5 = vld [vmem:[%s23013_s11 + $0x30] ss:$24 sps:$4 sm:$0xff]  }
 0x4a1   :  { %v4544_v7 = vpop.f32.mrf.mxu1 }
 0x4a2   :  { %v4545_v14 = vadd.f32 %v4544_v7, %v4265_v8  ;;  %v19999_v7 = vld [vmem:[%s23013_s11 + $0x60] ss:$24 sps:$4 sm:$0xff]  }
 0x4a3   :  { %v4546_v36 = vpop.f32.mrf.mxu1  ;;  %5114 = vmatpush1.bf16.msra.mxu1 %v19999_v7  ;;  %v20008_v8 = vld [vmem:[%s23013_s11 + $0x38] ss:$24 sps:$4 sm:$0xff]   ;;  %v20049_v7 = vld [vmem:[%s23013_s11 + $0x74] ss:$24 sps:$4 sm:$0xff]  }
 0x4a4   :  { %v20002_v36 = vld [vmem:[%s23013_s11 + $0x68] ss:$24 sps:$4 sm:$0xff]  }
 0x4a5   :  { %v4547_v10 = vpop.f32.mrf.mxu1 }
 0x4a6   :  { %v20007_v10 = vld [vmem:[%s23013_s11 + $0x34] ss:$24 sps:$4 sm:$0xff]  }
 0x4a7   :  { %5115 = vmatprep.subr.bf16.mxu1 %v20007_v10  ;;  %v20047_v10 = vld [vmem:[%s23013_s11 + $0x70] ss:$24 sps:$4 sm:$0xff]  }
 0x4a8   :  { %5116 = vmatpush1.bf16.msra.mxu1 %v20005_v5  ;;  %v20055_v5 = vld [vmem:[%s23013_s11 + $0x44] ss:$24 sps:$4 sm:$0xff]  }
 0x4c0   :  { %v4583_v12 = vpop.f32.mrf.mxu0 }
 0x4c1   :  { %v4584_v48 = vadd.f32 %v4583_v12, %v4543_v11  ;;  %v20013_v11 = vld [vmem:[%s23013_s11 + $0x4] ss:$24 sps:$4 sm:$0xff]  }
 0x4c2   :  { %v4585_v6 = vpop.f32.mrf.mxu0  ;;  %v20016_v12 = vld [vmem:[%s23013_s11 + $0xc] ss:$24 sps:$4 sm:$0xff]   ;;  %5117 = vmatprep.subr.bf16.mxu1 %v20013_v11  ;;  %v20053_v11 = vld [vmem:[%s23013_s11 + $0x40] ss:$24 sps:$4 sm:$0xff]  }
 0x4c3   :  { %v4592_v17 = vmul.f32 0.70710677, %v4584_v48  ;;  %v4586_v20 = vadd.f32 %v4585_v6, %v4545_v14  ;;  %v4590_v29 = vmul.f32 0.5, %v4584_v48  ;;  %v20011_v14 = vld [vmem:[%s23013_s11] ss:$24 sps:$4 sm:$0xff]  }
 0x4c4   :  { %v4587_v22 = vpop.f32.mrf.mxu0  ;;  %v20014_v48 = vld [vmem:[%s23013_s11 + $0x8] ss:$24 sps:$4 sm:$0xff]   ;;  %5118 = vmatpush1.bf16.msra.mxu1 %v20011_v14  ;;  %v20019_v6 = vld [vmem:[%s23013_s11 + $0x164] ss:$24 sps:$4 sm:$0xff]   ;;  %v20061_v14 = vld [vmem:[%s23013_s11 + $0x14] ss:$24 sps:$4 sm:$0xff]  }
 0x4c5   :  { %22145 = verf.f32 %v4592_v17  ;;  %v4593_v23 = vmul.f32 0.70710677, %v4586_v20  ;;  %v4591_v33 = vmul.f32 0.5, %v4586_v20  ;;  %v20022_v17 = vld [vmem:[%s23058_s19 + $0x74] ss:$8 sps:$4 sm:$0xff]   ;;  %5185 = vmatprep.subr.bf16.mxu1 %v20019_v6 }
 0x4c6   :  { %v4588_v24 = vpop.f32.mrf.mxu0  ;;  %v17326_v22 = vld [vmem:[%s16767_s27] ss:$0 sm:$0xff]  ;;  %v20059_v6 = vld [vmem:[%s23013_s11 + $0x10] ss:$24 sps:$4 sm:$0xff]   ;;  %s23899_s27 = sld [smem:[%s25011_s0 + %s22269_s24]]  }
 0x4c7   :  { %22147 = verf.f32 %v4593_v23 }
 0x4d2   :  { %v22146_v25 = vpop.eup %22145 }
 0x4d3   :  { %v4596_v26 = vadd.f32 1.0, %v22146_v25 }
 0x4d4   :  { %v22148_v27 = vpop.eup %22147 }
 0x4d5   :  { %v4597_v16 = vadd.f32 1.0, %v22148_v27  ;;  %v4598_v37 = vmul.f32 %v4596_v26, %v4590_v29 }
 0x4d7   :  { %v4599_v39 = vmul.f32 %v4597_v16, %v4591_v33  ;;  %v23026_v42 = vpack.c.bf16 %v4598_v37, %v4598_v37 }
 0x4d9   :  { %v23023_v32 = vpack.c.bf16 %v4599_v39, %v4599_v39 }
 0x4db   :  { %4769 = vmatprep.mubr.bf16.mxu0 %v23023_v32 }
 0x4dc   :  { %4770 = vmatmul.mubr.bf16.vlgmr.msra.gmra.mxu0 %v23026_v42 }
 0x4dd   :  { %5145 = vmatpush1.bf16.msra.mxu0 %v19972_v35  ;;  %5176 = vmatprep.mubr.bf16.mxu0 %v22242_v53  ;;  %v20017_v35 = vld [vmem:[%s23013_s11 + $0x160] ss:$24 sps:$4 sm:$0xff]   ;;  %s23538_s11 = sld [smem:[%s25011_s0 + %s22265_s8]]  }
 0x4de   :  { %5146 = vmatprep.subr.bf16.mxu0 %v19980_v44 }
 0x4e1   :  { %5147 = vmatpush1.bf16.msra.mxu0 %v19978_v47  ;;  %v20028_v47 = vld [vmem:[%s23058_s19 + $0x64] ss:$8 sps:$4 sm:$0xff]  }
 0x4e2   :  { %5148 = vmatprep.subr.bf16.mxu0 %v19986_v51  ;;  %v20026_v51 = vld [vmem:[%s23058_s19 + $0x60] ss:$8 sps:$4 sm:$0xff]  }
 0x4e5   :  { %5149 = vmatpush1.bf16.msra.mxu0 %v19984_v55  ;;  %v20034_v55 = vld [vmem:[%s23058_s19 + $0x54] ss:$8 sps:$4 sm:$0xff]  }
 0x4e6   :  { %5150 = vmatprep.subr.bf16.mxu0 %v19992_v56  ;;  %v20032_v56 = vld [vmem:[%s23058_s19 + $0x50] ss:$8 sps:$4 sm:$0xff]  }
 0x4e9   :  { %5151 = vmatpush1.bf16.msra.mxu0 %v19990_v58  ;;  %v20040_v58 = vld [vmem:[%s23058_s19 + $0x44] ss:$8 sps:$4 sm:$0xff]  }
 0x4ea   :  { %5152 = vmatprep.subr.bf16.mxu0 %v19998_v60  ;;  %v20038_v60 = vld [vmem:[%s23058_s19 + $0x40] ss:$8 sps:$4 sm:$0xff]  }
 0x4ed   :  { %5153 = vmatpush1.bf16.msra.mxu0 %v19996_v63  ;;  %v20046_v63 = vld [vmem:[%s23058_s19 + $0x34] ss:$8 sps:$4 sm:$0xff]  }
 0x4ee   :  { %5154 = vmatprep.subr.bf16.mxu0 %v20004_v1  ;;  %v20044_v1 = vld [vmem:[%s23058_s19 + $0x30] ss:$8 sps:$4 sm:$0xff]  }
 0x4f1   :  { %5155 = vmatpush1.bf16.msra.mxu0 %v20002_v36  ;;  %v20052_v36 = vld [vmem:[%s23058_s19 + $0x24] ss:$8 sps:$4 sm:$0xff]  }
 0x4f2   :  { %5156 = vmatprep.subr.bf16.mxu0 %v20010_v4  ;;  %v20050_v4 = vld [vmem:[%s23058_s19 + $0x20] ss:$8 sps:$4 sm:$0xff]  }
 0x4f5   :  { %5157 = vmatpush1.bf16.msra.mxu0 %v20008_v8  ;;  %v20058_v8 = vld [vmem:[%s23058_s19 + $0x14] ss:$8 sps:$4 sm:$0xff]  }
 0x4f6   :  { %5158 = vmatprep.subr.bf16.mxu0 %v20016_v12  ;;  %v20056_v12 = vld [vmem:[%s23058_s19 + $0x10] ss:$8 sps:$4 sm:$0xff]  }
 0x4f9   :  { %5159 = vmatpush1.bf16.msra.mxu0 %v20014_v48  ;;  %v20064_v48 = vld [vmem:[%s23058_s19 + $0x4] ss:$8 sps:$4 sm:$0xff]  }
 0x4fa   :  { %5390 = vmatprep.subr.bf16.mxu0 %v20022_v17  ;;  %v20062_v17 = vld [vmem:[%s23058_s19] ss:$8 sps:$4 sm:$0xff]   ;;  %s16774_s19 = sld [smem:[%s25011_s0 + %s22267_s16]]  }
 0x59c   :  { %v18941_v20 = vpop.f32.mrf.mxu0 }
 0x59e   :  { %v18942_v23 = vpop.f32.mrf.mxu0 }
 0x59f   :  { %v18943_v24 = vadd.f32 %v18942_v23, %v18941_v20  ;;  %v20067_v20 = vld [vmem:[%s23069_s23 + $0x74] ss:$8 sps:$4 sm:$0xff]   ;;  %v20070_v23 = vld [vmem:[%s23069_s23 + $0x64] ss:$8 sps:$4 sm:$0xff]  }
 0x5a0   :  { %v18944_v25 = vpop.f32.mrf.mxu0 }
 0x5a1   :  { %v4772_v26 = vadd.f32 %v18943_v24, %v17326_v22  ;;  %v20065_v22 = vld [vmem:[%s23069_s23 + $0x70] ss:$8 sps:$4 sm:$0xff]   ;;  %v20068_v24 = vld [vmem:[%s23069_s23 + $0x60] ss:$8 sps:$4 sm:$0xff]   ;;  %v20073_v25 = vld [vmem:[%s23069_s23 + $0x54] ss:$8 sps:$4 sm:$0xff]  }
 0x5a2   :  { %v18945_v27 = vpop.f32.mrf.mxu0 }
 0x5a3   :  { %v4778_v29 = vmul.f32 0.70710677, %v4772_v26  ;;  %v4777_v16 = vmul.f32 0.5, %v4772_v26  ;;  %v20071_v26 = vld [vmem:[%s23069_s23 + $0x50] ss:$8 sps:$4 sm:$0xff]  }
 0x5a4   :  { %v20076_v27 = vld [vmem:[%s23069_s23 + $0x44] ss:$8 sps:$4 sm:$0xff]  }
 0x5a5   :  { %22149 = verf.f32 %v4778_v29  ;;  %v20074_v29 = vld [vmem:[%s23069_s23 + $0x40] ss:$8 sps:$4 sm:$0xff]  }
 0x5b2   :  { %v22150_v33 = vpop.eup %22149 }
 0x5b3   :  { %v4780_v37 = vadd.f32 1.0, %v22150_v33  ;;  %v20079_v33 = vld [vmem:[%s23069_s23 + $0x34] ss:$8 sps:$4 sm:$0xff]  }
 0x5b5   :  { %v4781_v39 = vmul.f32 %v4780_v37, %v4777_v16  ;;  %v20077_v16 = vld [vmem:[%s23069_s23 + $0x30] ss:$8 sps:$4 sm:$0xff]   ;;  %v20080_v37 = vld [vmem:[%s23069_s23 + $0x20] ss:$8 sps:$4 sm:$0xff]  }
 0x5b7   :  { %v23076_v44 = vpack.c.bf16 %v4781_v39, %v4781_v39  ;;  %v20085_v39 = vld [vmem:[%s23069_s23 + $0x14] ss:$8 sps:$4 sm:$0xff]  }
 0x5b9   :  { %5136 = vmatmul.mubr.bf16.vlgmr.msra.gmra.mxu1 %v23076_v44  ;;  %5177 = vmatmul.mubr.bf16.vlgmr.msra.gmra.mxu0 %v23076_v44 }
 0x5ba   :  { %5186 = vmatpush1.bf16.msra.mxu1 %v20017_v35  ;;  %5391 = vmatpush1.bf16.msra.mxu0 %v20020_v43  ;;  %v20083_v35 = vld [vmem:[%s23069_s23 + $0x10] ss:$8 sps:$4 sm:$0xff]   ;;  %v20088_v43 = vld [vmem:[%s23069_s23 + $0x4] ss:$8 sps:$4 sm:$0xff]  }
 0x5bb   :  { %5187 = vmatprep.subr.bf16.mxu1 %v20025_v45  ;;  %5392 = vmatprep.subr.bf16.mxu0 %v20028_v47  ;;  %v20091_v45 = vld [vmem:[%s23069_s23 + $0xf4] ss:$8 sps:$4 sm:$0xff]   ;;  %v20089_v47 = vld [vmem:[%s23069_s23 + $0xf0] ss:$8 sps:$4 sm:$0xff]  }
 0x5bc   :  { %5217 = vmatprep.mubr.bf16.mxu1 %v22242_v53  ;;  %5422 = vmatprep.mubr.bf16.mxu0 %v22242_v53 }
 0x5be   :  { %5188 = vmatpush1.bf16.msra.mxu1 %v20023_v50  ;;  %5393 = vmatpush1.bf16.msra.mxu0 %v20026_v51  ;;  %v20094_v50 = vld [vmem:[%s23069_s23 + $0xe4] ss:$8 sps:$4 sm:$0xff]   ;;  %v20092_v51 = vld [vmem:[%s23069_s23 + $0xe0] ss:$8 sps:$4 sm:$0xff]  }
 0x5bf   :  { %5189 = vmatprep.subr.bf16.mxu1 %v20031_v54  ;;  %5394 = vmatprep.subr.bf16.mxu0 %v20034_v55  ;;  %v20097_v54 = vld [vmem:[%s23069_s23 + $0xd4] ss:$8 sps:$4 sm:$0xff]   ;;  %v20095_v55 = vld [vmem:[%s23069_s23 + $0xd0] ss:$8 sps:$4 sm:$0xff]  }
 0x5c2   :  { %5190 = vmatpush1.bf16.msra.mxu1 %v20029_v28  ;;  %5395 = vmatpush1.bf16.msra.mxu0 %v20032_v56  ;;  %v20100_v28 = vld [vmem:[%s23069_s23 + $0xc4] ss:$8 sps:$4 sm:$0xff]   ;;  %v20098_v56 = vld [vmem:[%s23069_s23 + $0xc0] ss:$8 sps:$4 sm:$0xff]  }
 0x5c3   :  { %5191 = vmatprep.subr.bf16.mxu1 %v20037_v57  ;;  %5396 = vmatprep.subr.bf16.mxu0 %v20040_v58  ;;  %v20103_v57 = vld [vmem:[%s23069_s23 + $0xb4] ss:$8 sps:$4 sm:$0xff]   ;;  %v20101_v58 = vld [vmem:[%s23069_s23 + $0xb0] ss:$8 sps:$4 sm:$0xff]  }
 0x5c6   :  { %5192 = vmatpush1.bf16.msra.mxu1 %v20035_v59  ;;  %5397 = vmatpush1.bf16.msra.mxu0 %v20038_v60  ;;  %v20106_v59 = vld [vmem:[%s23069_s23 + $0xa4] ss:$8 sps:$4 sm:$0xff]   ;;  %v20104_v60 = vld [vmem:[%s23069_s23 + $0xa0] ss:$8 sps:$4 sm:$0xff]  }
 0x5c7   :  { %5193 = vmatprep.subr.bf16.mxu1 %v20043_v61  ;;  %5398 = vmatprep.subr.bf16.mxu0 %v20046_v63  ;;  %v20109_v61 = vld [vmem:[%s23069_s23 + $0x94] ss:$8 sps:$4 sm:$0xff]   ;;  %v20107_v63 = vld [vmem:[%s23069_s23 + $0x90] ss:$8 sps:$4 sm:$0xff]  }
 0x5ca   :  { %5194 = vmatpush1.bf16.msra.mxu1 %v20041_v0  ;;  %5399 = vmatpush1.bf16.msra.mxu0 %v20044_v1  ;;  %v20112_v0 = vld [vmem:[%s23069_s23 + $0x84] ss:$8 sps:$4 sm:$0xff]   ;;  %v20110_v1 = vld [vmem:[%s23069_s23 + $0x80] ss:$8 sps:$4 sm:$0xff]  }
 0x5cb   :  { %5195 = vmatprep.subr.bf16.mxu1 %v20049_v7  ;;  %5400 = vmatprep.subr.bf16.mxu0 %v20052_v36  ;;  %v20113_v7 = vld [vmem:[%s23149_s1 + $0x150] ss:$24 sps:$4 sm:$0xff]   ;;  %v20115_v36 = vld [vmem:[%s23149_s1 + $0x154] ss:$24 sps:$4 sm:$0xff]  }
 0x5ce   :  { %5196 = vmatpush1.bf16.msra.mxu1 %v20047_v10  ;;  %5401 = vmatpush1.bf16.msra.mxu0 %v20050_v4  ;;  %v20118_v10 = vld [vmem:[%s23149_s1 + $0x15c] ss:$24 sps:$4 sm:$0xff]   ;;  %v20119_v4 = vld [vmem:[%s23149_s1 + $0x120] ss:$24 sps:$4 sm:$0xff]  }
 0x5cf   :  { %5197 = vmatprep.subr.bf16.mxu1 %v20055_v5  ;;  %5402 = vmatprep.subr.bf16.mxu0 %v20058_v8  ;;  %v20121_v5 = vld [vmem:[%s23149_s1 + $0x124] ss:$24 sps:$4 sm:$0xff]   ;;  %v20122_v8 = vld [vmem:[%s23149_s1 + $0x128] ss:$24 sps:$4 sm:$0xff]  }
 0x5d2   :  { %5198 = vmatpush1.bf16.msra.mxu1 %v20053_v11  ;;  %5403 = vmatpush1.bf16.msra.mxu0 %v20056_v12  ;;  %v20124_v11 = vld [vmem:[%s23149_s1 + $0x12c] ss:$24 sps:$4 sm:$0xff]  }
 0x5d3   :  { %5199 = vmatprep.subr.bf16.mxu1 %v20061_v14  ;;  %5404 = vmatprep.subr.bf16.mxu0 %v20064_v48  ;;  %v20127_v12 = vld [vmem:[%s23149_s1 + $0xf4] ss:$24 sps:$4 sm:$0xff]   ;;  %v20125_v14 = vld [vmem:[%s23149_s1 + $0xf0] ss:$24 sps:$4 sm:$0xff]  }
 0x5d4   :  { %v20130_v48 = vld [vmem:[%s23149_s1 + $0xfc] ss:$24 sps:$4 sm:$0xff]  }
 0x5d6   :  { %5200 = vmatpush1.bf16.msra.mxu1 %v20059_v6  ;;  %5405 = vmatpush1.bf16.msra.mxu0 %v20062_v17  ;;  %v20128_v6 = vld [vmem:[%s23149_s1 + $0xf8] ss:$24 sps:$4 sm:$0xff]   ;;  %v20133_v17 = vld [vmem:[%s23149_s1 + $0xc4] ss:$24 sps:$4 sm:$0xff]  }
 0x5d7   :  { %5591 = vmatprep.subr.bf16.mxu1 %v20067_v20  ;;  %6266 = vmatprep.subr.bf16.mxu0 %v20115_v36  ;;  %v20136_v20 = vld [vmem:[%s23149_s1 + $0xcc] ss:$24 sps:$4 sm:$0xff]   ;;  %v20179_v36 = vld [vmem:[%s23149_s1 + $0x240] ss:$24 sps:$4 sm:$0xff]  }
 0x5d9   :  { %5218 = vmatmul.mubr.bf16.vlgmr.msra.gmra.mxu1 %v23076_v44  ;;  %5423 = vmatmul.mubr.bf16.vlgmr.msra.gmra.mxu0 %v23076_v44  ;;  %v20086_v44 = vld [vmem:[%s23069_s23] ss:$8 sps:$4 sm:$0xff]  }
 0x5da   :  { %5592 = vmatpush1.bf16.msra.mxu1 %v20065_v22  ;;  %5623 = vmatprep.mubr.bf16.mxu1 %v23023_v32  ;;  %v20082_v32 = vld [vmem:[%s23069_s23 + $0x24] ss:$8 sps:$4 sm:$0xff]   ;;  %v20131_v22 = vld [vmem:[%s23149_s1 + $0xc0] ss:$24 sps:$4 sm:$0xff]   ;;  %s23821_s23 = sld [smem:[%s25011_s0 + %s22268_s20]]  }
 0x5db   :  { %5593 = vmatprep.subr.bf16.mxu1 %v20070_v23  ;;  %6267 = vmatpush1.bf16.msra.mxu0 %v20113_v7  ;;  %v20134_v23 = vld [vmem:[%s23149_s1 + $0xc8] ss:$24 sps:$4 sm:$0xff]   ;;  %v20184_v7 = vld [vmem:[%s23149_s1 + $0x24c] ss:$24 sps:$4 sm:$0xff]  }
 0x5dc   :  { %6268 = vmatprep.subr.bf16.mxu0 %v20121_v5  ;;  %v20185_v5 = vld [vmem:[%s23149_s1 + $0x210] ss:$24 sps:$4 sm:$0xff]  }
 0x5de   :  { %5594 = vmatpush1.bf16.msra.mxu1 %v20068_v24  ;;  %v20139_v24 = vld [vmem:[%s23149_s1 + $0x94] ss:$24 sps:$4 sm:$0xff]  }
 0x5df   :  { %5595 = vmatprep.subr.bf16.mxu1 %v20073_v25  ;;  %6269 = vmatpush1.bf16.msra.mxu0 %v20119_v4  ;;  %v20142_v25 = vld [vmem:[%s23149_s1 + $0x9c] ss:$24 sps:$4 sm:$0xff]  }
 0x5e0   :  { %6270 = vmatprep.subr.bf16.mxu0 %v20127_v12  ;;  %v20190_v4 = vld [vmem:[%s23149_s1 + $0x21c] ss:$24 sps:$4 sm:$0xff]   ;;  %v20196_v12 = vld [vmem:[%s23149_s1 + $0x1ec] ss:$24 sps:$4 sm:$0xff]  }
 0x5e2   :  { %5596 = vmatpush1.bf16.msra.mxu1 %v20071_v26  ;;  %v20137_v26 = vld [vmem:[%s23149_s1 + $0x90] ss:$24 sps:$4 sm:$0xff]  }
 0x5e3   :  { %5597 = vmatprep.subr.bf16.mxu1 %v20076_v27  ;;  %6271 = vmatpush1.bf16.msra.mxu0 %v20125_v14  ;;  %v20140_v27 = vld [vmem:[%s23149_s1 + $0x98] ss:$24 sps:$4 sm:$0xff]  }
 0x5e4   :  { %6272 = vmatprep.subr.bf16.mxu0 %v20133_v17  ;;  %v20191_v14 = vld [vmem:[%s23149_s1 + $0x1e0] ss:$24 sps:$4 sm:$0xff]   ;;  %v20202_v17 = vld [vmem:[%s23149_s1 + $0x1bc] ss:$24 sps:$4 sm:$0xff]  }
 0x5e6   :  { %5598 = vmatpush1.bf16.msra.mxu1 %v20074_v29  ;;  %v20145_v29 = vld [vmem:[%s23149_s1 + $0x64] ss:$24 sps:$4 sm:$0xff]  }
 0x5e7   :  { %5599 = vmatprep.subr.bf16.mxu1 %v20079_v33  ;;  %6273 = vmatpush1.bf16.msra.mxu0 %v20131_v22  ;;  %v20148_v33 = vld [vmem:[%s23149_s1 + $0x6c] ss:$24 sps:$4 sm:$0xff]   ;;  %v20200_v22 = vld [vmem:[%s23149_s1 + $0x1b8] ss:$24 sps:$4 sm:$0xff]  }
 0x5e8   :  { %6274 = vmatprep.subr.bf16.mxu0 %v20139_v24  ;;  %v20208_v24 = vld [vmem:[%s23149_s1 + $0x18c] ss:$24 sps:$4 sm:$0xff]  }
 0x5ea   :  { %5600 = vmatpush1.bf16.msra.mxu1 %v20077_v16  ;;  %v20143_v16 = vld [vmem:[%s23149_s1 + $0x60] ss:$24 sps:$4 sm:$0xff]  }
 0x5eb   :  { %5601 = vmatprep.subr.bf16.mxu1 %v20082_v32  ;;  %6275 = vmatpush1.bf16.msra.mxu0 %v20137_v26  ;;  %v20146_v32 = vld [vmem:[%s23149_s1 + $0x68] ss:$24 sps:$4 sm:$0xff]  }
 0x5ec   :  { %6276 = vmatprep.subr.bf16.mxu0 %v20145_v29  ;;  %v20206_v26 = vld [vmem:[%s23149_s1 + $0x188] ss:$24 sps:$4 sm:$0xff]   ;;  %v20211_v29 = vld [vmem:[%s23149_s1 + $0x164] ss:$24 sps:$4 sm:$0xff]  }
 0x5ee   :  { %5602 = vmatpush1.bf16.msra.mxu1 %v20080_v37  ;;  %v20151_v37 = vld [vmem:[%s23149_s1 + $0x34] ss:$24 sps:$4 sm:$0xff]  }
 0x5ef   :  { %5603 = vmatprep.subr.bf16.mxu1 %v20085_v39  ;;  %v20149_v39 = vld [vmem:[%s23149_s1 + $0x30] ss:$24 sps:$4 sm:$0xff]   ;;  %6277 = vmatpush1.bf16.msra.mxu0 %v20143_v16 }
 0x5f0   :  { %6278 = vmatprep.subr.bf16.mxu0 %v20151_v37 }
 0x5f2   :  { %5604 = vmatpush1.bf16.msra.mxu1 %v20083_v35  ;;  %v20154_v35 = vld [vmem:[%s23149_s1 + $0x3c] ss:$24 sps:$4 sm:$0xff]  }
 0x5f3   :  { %5605 = vmatprep.subr.bf16.mxu1 %v20088_v43  ;;  %v20152_v43 = vld [vmem:[%s23149_s1 + $0x38] ss:$24 sps:$4 sm:$0xff]   ;;  %6279 = vmatpush1.bf16.msra.mxu0 %v20149_v39 }
 0x5f6   :  { %5606 = vmatpush1.bf16.msra.mxu1 %v20086_v44  ;;  %v20157_v44 = vld [vmem:[%s23149_s1 + $0x4] ss:$24 sps:$4 sm:$0xff]  }
 0x5f7   :  { %5607 = vmatprep.subr.bf16.mxu1 %v20091_v45  ;;  %v20160_v45 = vld [vmem:[%s23149_s1 + $0xc] ss:$24 sps:$4 sm:$0xff]   ;;  %6280 = vmatprep.subr.bf16.mxu0 %v20157_v44 }
 0x5fa   :  { %5608 = vmatpush2.bf16.msra.mxu1 %v20089_v47  ;;  %v20155_v47 = vld [vmem:[%s23149_s1] ss:$24 sps:$4 sm:$0xff]  }
 0x5fb   :  { %5609 = vmatprep.subr.bf16.mxu1 %v20094_v50  ;;  %v20158_v50 = vld [vmem:[%s23149_s1 + $0x8] ss:$24 sps:$4 sm:$0xff]   ;;  %6281 = vmatpush1.bf16.msra.mxu0 %v20155_v47 }
 0x5fe   :  { %5610 = vmatpush2.bf16.msra.mxu1 %v20092_v51  ;;  %v20163_v51 = vld [vmem:[%s23149_s1 + $0x2d4] ss:$24 sps:$4 sm:$0xff]  }
 0x5ff   :  { %5611 = vmatprep.subr.bf16.mxu1 %v20097_v54  ;;  %v20166_v54 = vld [vmem:[%s23149_s1 + $0x2dc] ss:$24 sps:$4 sm:$0xff]   ;;  %6282 = vmatprep.subr.bf16.mxu0 %v20163_v51 }
 0x602   :  { %5612 = vmatpush2.bf16.msra.mxu1 %v20095_v55  ;;  %v20161_v55 = vld [vmem:[%s23149_s1 + $0x2d0] ss:$24 sps:$4 sm:$0xff]  }
 0x603   :  { %5613 = vmatprep.subr.bf16.mxu1 %v20100_v28  ;;  %v20164_v28 = vld [vmem:[%s23149_s1 + $0x2d8] ss:$24 sps:$4 sm:$0xff]   ;;  %6283 = vmatpush2.bf16.msra.mxu0 %v20161_v55 }
 0x606   :  { %5614 = vmatpush2.bf16.msra.mxu1 %v20098_v56  ;;  %v20169_v56 = vld [vmem:[%s23149_s1 + $0x2a4] ss:$24 sps:$4 sm:$0xff]  }
 0x607   :  { %5615 = vmatprep.subr.bf16.mxu1 %v20103_v57  ;;  %v20172_v57 = vld [vmem:[%s23149_s1 + $0x2ac] ss:$24 sps:$4 sm:$0xff]   ;;  %6284 = vmatprep.subr.bf16.mxu0 %v20169_v56 }
 0x60a   :  { %5616 = vmatpush2.bf16.msra.mxu1 %v20101_v58  ;;  %v20167_v58 = vld [vmem:[%s23149_s1 + $0x2a0] ss:$24 sps:$4 sm:$0xff]  }
 0x60b   :  { %5617 = vmatprep.subr.bf16.mxu1 %v20106_v59  ;;  %v20170_v59 = vld [vmem:[%s23149_s1 + $0x2a8] ss:$24 sps:$4 sm:$0xff]   ;;  %6285 = vmatpush2.bf16.msra.mxu0 %v20167_v58 }
 0x60e   :  { %5618 = vmatpush2.bf16.msra.mxu1 %v20104_v60  ;;  %v20175_v60 = vld [vmem:[%s23149_s1 + $0x274] ss:$24 sps:$4 sm:$0xff]  }
 0x60f   :  { %5619 = vmatprep.subr.bf16.mxu1 %v20109_v61  ;;  %v20178_v61 = vld [vmem:[%s23149_s1 + $0x27c] ss:$24 sps:$4 sm:$0xff]   ;;  %6286 = vmatprep.subr.bf16.mxu0 %v20175_v60 }
 0x612   :  { %5620 = vmatpush2.bf16.msra.mxu1 %v20107_v63  ;;  %v20173_v63 = vld [vmem:[%s23149_s1 + $0x270] ss:$24 sps:$4 sm:$0xff]  }
 0x613   :  { %5621 = vmatprep.subr.bf16.mxu1 %v20112_v0  ;;  %v20176_v0 = vld [vmem:[%s23149_s1 + $0x278] ss:$24 sps:$4 sm:$0xff]   ;;  %6287 = vmatpush2.bf16.msra.mxu0 %v20173_v63 }
 0x616   :  { %5622 = vmatpush2.bf16.msra.mxu1 %v20110_v1  ;;  %v20181_v1 = vld [vmem:[%s23149_s1 + $0x244] ss:$24 sps:$4 sm:$0xff]  }
 0x617   :  { %6307 = vmatprep.subr.bf16.mxu1 %v20118_v10  ;;  %6288 = vmatprep.subr.bf16.mxu0 %v20181_v1  ;;  %v20187_v10 = vld [vmem:[%s23149_s1 + $0x214] ss:$24 sps:$4 sm:$0xff]  }
 0x618   :  { %6289 = vmatpush2.bf16.msra.mxu0 %v20179_v36 }
 0x619   :  { %5624 = vmatmul.mubr.bf16.vlgmr.msra.gmra.mxu1 %v23026_v42  ;;  %v20116_v42 = vld [vmem:[%s23149_s1 + $0x158] ss:$24 sps:$4 sm:$0xff]   ;;  %6290 = vmatprep.subr.bf16.mxu0 %v20187_v10 }
 0x61a   :  { %6308 = vmatpush1.bf16.msra.mxu1 %v20116_v42  ;;  %v20182_v42 = vld [vmem:[%s23149_s1 + $0x248] ss:$24 sps:$4 sm:$0xff]  }
 0x61b   :  { %6309 = vmatprep.subr.bf16.mxu1 %v20124_v11  ;;  %v20193_v11 = vld [vmem:[%s23149_s1 + $0x1e4] ss:$24 sps:$4 sm:$0xff]  }
 0x61c   :  { %6291 = vmatpush2.bf16.msra.mxu0 %v20185_v5 }
 0x61d   :  { %6292 = vmatprep.subr.bf16.mxu0 %v20193_v11 }
 0x61e   :  { %6310 = vmatpush1.bf16.msra.mxu1 %v20122_v8  ;;  %v20188_v8 = vld [vmem:[%s23149_s1 + $0x218] ss:$24 sps:$4 sm:$0xff]  }
 0x61f   :  { %6311 = vmatprep.subr.bf16.mxu1 %v20130_v48  ;;  %v20194_v48 = vld [vmem:[%s23149_s1 + $0x1e8] ss:$24 sps:$4 sm:$0xff]  }
 0x620   :  { %6293 = vmatpush2.bf16.msra.mxu0 %v20191_v14 }
 0x622   :  { %6312 = vmatpush1.bf16.msra.mxu1 %v20128_v6  ;;  %v20199_v6 = vld [vmem:[%s23149_s1 + $0x1b4] ss:$24 sps:$4 sm:$0xff]  }
 0x623   :  { %6313 = vmatprep.subr.bf16.mxu1 %v20136_v20  ;;  %v20197_v20 = vld [vmem:[%s23149_s1 + $0x1b0] ss:$24 sps:$4 sm:$0xff]   ;;  %6294 = vmatprep.subr.bf16.mxu0 %v20199_v6 }
 0x624   :  { %6295 = vmatpush2.bf16.msra.mxu0 %v20197_v20  ;;  %v23245_v20 = vsub.s32 5, %v22645_v9 }
 0x626   :  { %6314 = vmatpush1.bf16.msra.mxu1 %v20134_v23  ;;  %v20205_v23 = vld [vmem:[%s23149_s1 + $0x184] ss:$24 sps:$4 sm:$0xff]  }
 0x627   :  { %6315 = vmatprep.subr.bf16.mxu1 %v20142_v25  ;;  %v20203_v25 = vld [vmem:[%s23149_s1 + $0x180] ss:$24 sps:$4 sm:$0xff]   ;;  %6296 = vmatprep.subr.bf16.mxu0 %v20205_v23 }
 0x628   :  { %6297 = vmatpush2.bf16.msra.mxu0 %v20203_v25 }
 0x629   :  { %6348 = vmatprep.subr.bf16.mxu0 %v20211_v29 }
 0x62a   :  { %6316 = vmatpush1.bf16.msra.mxu1 %v20140_v27  ;;  %v23223_v27 = vld [vmem:[%s16776_s5] sm:$0x3f]  ;;  %s24043_s5 = sld [smem:[%s25011_s0 + %s22271_s2]]  }
 0x62b   :  { %6317 = vmatprep.subr.bf16.mxu1 %v20148_v33  ;;  %v4836_v33 = vrot.slane %v23223_v27, %v22650_v13  ;;  %v4844_v16 = vrot.slane %v23223_v27, %v22694_v2  ;;  %v4856_v23 = vrot.slane %v23223_v27, %v23245_v20 }
 0x62e   :  { %6318 = vmatpush1.bf16.msra.mxu1 %v20146_v32  ;;  %v20214_v32 = vld [vmem:[%s23217_s9 + $0xac] ss:$12 sps:$4 sm:$0xff]  }
 0x62f   :  { %6319 = vmatprep.subr.bf16.mxu1 %v20154_v35  ;;  %v4840_v35 = vrot.slane %v23223_v27, %v22655_v15 }
 0x632   :  { %6320 = vmatpush1.bf16.msra.mxu1 %v20152_v43  ;;  %v4848_v43 = vrot.slane %v23223_v27, %v22697_v3 }
 0x633   :  { %6321 = vmatprep.subr.bf16.mxu1 %v20160_v45 }
 0x636   :  { %6322 = vmatpush1.bf16.msra.mxu1 %v20158_v50 }
 0x637   :  { %6323 = vmatprep.subr.bf16.mxu1 %v20166_v54 }
 0x63a   :  { %6324 = vmatpush2.bf16.msra.mxu1 %v20164_v28 }
 0x63b   :  { %6325 = vmatprep.subr.bf16.mxu1 %v20172_v57 }
 0x63e   :  { %6326 = vmatpush2.bf16.msra.mxu1 %v20170_v59 }
 0x63f   :  { %6327 = vmatprep.subr.bf16.mxu1 %v20178_v61 }
 0x642   :  { %6328 = vmatpush2.bf16.msra.mxu1 %v20176_v0 }
 0x643   :  { %6329 = vmatprep.subr.bf16.mxu1 %v20184_v7 }
 0x646   :  { %6330 = vmatpush2.bf16.msra.mxu1 %v20182_v42 }
 0x647   :  { %6331 = vmatprep.subr.bf16.mxu1 %v20190_v4 }
 0x64a   :  { %6332 = vmatpush2.bf16.msra.mxu1 %v20188_v8 }
 0x64b   :  { %6333 = vmatprep.subr.bf16.mxu1 %v20196_v12 }
 0x64e   :  { %6334 = vmatpush2.bf16.msra.mxu1 %v20194_v48 }
 0x64f   :  { %6335 = vmatprep.subr.bf16.mxu1 %v20202_v17 }
 0x652   :  { %6336 = vmatpush2.bf16.msra.mxu1 %v20200_v22  ;;  %v4852_v22 = vrot.slane %v23223_v27, %v22725_v62 }
 0x653   :  { %6337 = vmatprep.subr.bf16.mxu1 %v20208_v24 }
 0x656   :  { %6338 = vmatpush2.bf16.msra.mxu1 %v20206_v26 }
 0x657   :  { %6841 = vmatprep.subr.bf16.mxu1 %v20214_v32 }
 0x679   :  { %v5137_v37 = vpop.f32.mrf.mxu1  ;;  %v5178_v39 = vpop.f32.mrf.mxu0 }
 0x67a   :  { %v5138_v44 = vadd.f32 %v5137_v37, %v4836_v33  ;;  %v5179_v45 = vadd.f32 %v5178_v39, %v4844_v16 }
 0x67b   :  { %v5139_v47 = vpop.f32.mrf.mxu1  ;;  %v5180_v50 = vpop.f32.mrf.mxu0 }
 0x67c   :  { %v5232_v51 = vmul.f32 0.70710677, %v5138_v44  ;;  %v5234_v54 = vmul.f32 0.70710677, %v5179_v45  ;;  %v5140_v55 = vadd.f32 %v5139_v47, %v4840_v35  ;;  %v5181_v28 = vadd.f32 %v5180_v50, %v4848_v43 }
 0x67d   :  { %v5141_v56 = vpop.f32.mrf.mxu1  ;;  %v5182_v57 = vpop.f32.mrf.mxu0  ;;  %v5226_v1 = vmul.f32 0.5, %v5138_v44  ;;  %v5228_v36 = vmul.f32 0.5, %v5179_v45 }
 0x67e   :  { %22151 = verf.f32 %v5232_v51  ;;  %v5233_v58 = vmul.f32 0.70710677, %v5140_v55  ;;  %v5235_v61 = vmul.f32 0.70710677, %v5181_v28  ;;  %v5227_v11 = vmul.f32 0.5, %v5140_v55 }
 0x67f   :  { %22153 = verf.f32 %v5234_v54  ;;  %v5142_v59 = vpop.f32.mrf.mxu1  ;;  %v5183_v60 = vpop.f32.mrf.mxu0  ;;  %v5229_v14 = vmul.f32 0.5, %v5181_v28  ;;  %v5632_v28 = vld [vmem:[%s16768_s21] sm:$0x3]  ;;  %s24564_s21 = sld [smem:[%s25011_s0 + %s22275_s18]]  }
 0x680   :  { %22155 = verf.f32 %v5233_v58  ;;  %v5637_v56 = vrot.slane %v5632_v28, %v22650_v13  ;;  %v5641_v59 = vrot.slane %v5632_v28, %v22655_v15  ;;  %v20247_v28 = vld [vmem:[%s23149_s1 + $0x44] ss:$24 sps:$4 sm:$0xff]  }
 0x681   :  { %22157 = verf.f32 %v5235_v61 }
 0x68b   :  { %v22152_v63 = vpop.eup %22151 }
 0x68c   :  { %v22154_v0 = vpop.eup %22153  ;;  %v5244_v7 = vadd.f32 1.0, %v22152_v63 }
 0x68d   :  { %v5246_v42 = vadd.f32 1.0, %v22154_v0  ;;  %v22156_v10 = vpop.eup %22155 }
 0x68e   :  { %v5250_v4 = vmul.f32 %v5244_v7, %v5226_v1  ;;  %v22158_v5 = vpop.eup %22157  ;;  %v5245_v12 = vadd.f32 1.0, %v22156_v10 }
 0x68f   :  { %v5252_v8 = vmul.f32 %v5246_v42, %v5228_v36  ;;  %v5247_v48 = vadd.f32 1.0, %v22158_v5 }
 0x690   :  { %5256 = vst [vmem:[%s23238_s13] sm:$0xff] %v5250_v4  ;;  %v5251_v6 = vmul.f32 %v5245_v12, %v5227_v11 }
 0x691   :  { %5258 = vst [vmem:[%s23238_s13 + $0x10] sm:$0xff] %v5252_v8  ;;  %v5253_v17 = vmul.f32 %v5247_v48, %v5229_v14 }
 0x692   :  { %5257 = vst [vmem:[%s23238_s13 + $0x8] sm:$0xff] %v5251_v6 }
 0x693   :  { %5259 = vst [vmem:[%s23238_s13 + $0x18] sm:$0xff] %v5253_v17  ;;  %v20209_v17 = vld [vmem:[%s23149_s1 + $0x160] ss:$24 sps:$4 sm:$0xff]  }
 0x699   :  { %v5219_v24 = vpop.f32.mrf.mxu1  ;;  %v5424_v25 = vpop.f32.mrf.mxu0 }
 0x69a   :  { %v5220_v26 = vadd.f32 %v5219_v24, %v4852_v22  ;;  %v20212_v22 = vld [vmem:[%s23217_s9 + $0xa8] ss:$12 sps:$4 sm:$0xff]  }
 0x69b   :  { %v5221_v29 = vpop.f32.mrf.mxu1  ;;  %v5426_v33 = vpop.f32.mrf.mxu0  ;;  %v20217_v24 = vld [vmem:[%s23149_s1 + $0x134] ss:$24 sps:$4 sm:$0xff]  }
 0x69c   :  { %v5236_v16 = vmul.f32 0.70710677, %v5220_v26  ;;  %v5222_v32 = vadd.f32 %v5221_v29, %v4856_v23  ;;  %v5230_v45 = vmul.f32 0.5, %v5220_v26  ;;  %v20215_v26 = vld [vmem:[%s23149_s1 + $0x130] ss:$24 sps:$4 sm:$0xff]  }
 0x69d   :  { %v5223_v37 = vpop.f32.mrf.mxu1  ;;  %v5428_v39 = vpop.f32.mrf.mxu0  ;;  %v20218_v29 = vld [vmem:[%s23217_s9 + $0x90] ss:$12 sps:$4 sm:$0xff]  }
 0x69e   :  { %22159 = verf.f32 %v5236_v16  ;;  %v5237_v9 = vmul.f32 0.70710677, %v5222_v32  ;;  %v5231_v51 = vmul.f32 0.5, %v5222_v32  ;;  %v20226_v16 = vld [vmem:[%s23217_s9 + $0x7c] ss:$12 sps:$4 sm:$0xff]  }
 0x69f   :  { %v5224_v35 = vpop.f32.mrf.mxu1  ;;  %v5429_v43 = vpop.f32.mrf.mxu0  ;;  %v20221_v32 = vld [vmem:[%s23149_s1 + $0x100] ss:$24 sps:$4 sm:$0xff]   ;;  %v20229_v39 = vld [vmem:[%s23149_s1 + $0xd4] ss:$24 sps:$4 sm:$0xff]  }
 0x6a0   :  { %22161 = verf.f32 %v5237_v9  ;;  %v20224_v37 = vld [vmem:[%s23217_s9 + $0x78] ss:$12 sps:$4 sm:$0xff]   ;;  %v20227_v35 = vld [vmem:[%s23149_s1 + $0xd0] ss:$24 sps:$4 sm:$0xff]   ;;  %v20230_v43 = vld [vmem:[%s23217_s9 + $0x60] ss:$12 sps:$4 sm:$0xff]  }
 0x6a1   :  { %v20232_v9 = vld [vmem:[%s23217_s9 + $0x64] ss:$12 sps:$4 sm:$0xff]  }
 0x6ab   :  { %v22160_v44 = vpop.eup %22159 }
 0x6ac   :  { %v5248_v47 = vadd.f32 1.0, %v22160_v44  ;;  %v20235_v44 = vld [vmem:[%s23149_s1 + $0xa4] ss:$24 sps:$4 sm:$0xff]  }
 0x6ad   :  { %v22162_v27 = vpop.eup %22161 }
 0x6ae   :  { %v5254_v50 = vmul.f32 %v5248_v47, %v5230_v45  ;;  %v5249_v54 = vadd.f32 1.0, %v22162_v27  ;;  %v20238_v45 = vld [vmem:[%s23217_s9 + $0x4c] ss:$12 sps:$4 sm:$0xff]   ;;  %v20236_v27 = vld [vmem:[%s23217_s9 + $0x48] ss:$12 sps:$4 sm:$0xff]  }
 0x6af   :  { %v20233_v47 = vld [vmem:[%s23149_s1 + $0xa0] ss:$24 sps:$4 sm:$0xff]  }
 0x6b0   :  { %5260 = vst [vmem:[%s23238_s13 + $0x20] sm:$0xff] %v5254_v50  ;;  %v5255_v55 = vmul.f32 %v5249_v54, %v5231_v51  ;;  %v20241_v50 = vld [vmem:[%s23149_s1 + $0x74] ss:$24 sps:$4 sm:$0xff]   ;;  %v20239_v54 = vld [vmem:[%s23149_s1 + $0x70] ss:$24 sps:$4 sm:$0xff]  }
 0x6b1   :  { %v20244_v51 = vld [vmem:[%s23217_s9 + $0x34] ss:$12 sps:$4 sm:$0xff]  }
 0x6b2   :  { %5261 = vst [vmem:[%s23238_s13 + $0x28] sm:$0xff] %v5255_v55  ;;  %v20242_v55 = vld [vmem:[%s23217_s9 + $0x30] ss:$12 sps:$4 sm:$0xff]   ;;  %s16773_s13 = sld [smem:[%s25011_s0 + %s22273_s10]]  }
 0x6d9   :  { %v5625_v57 = vpop.f32.mrf.mxu1 }
 0x6da   :  { %v5626_v58 = vadd.f32 %v5625_v57, %v5424_v25  ;;  %v20220_v25 = vld [vmem:[%s23217_s9 + $0x94] ss:$12 sps:$4 sm:$0xff]  }
 0x6db   :  { %v5627_v60 = vpop.f32.mrf.mxu1  ;;  %v20245_v57 = vld [vmem:[%s23149_s1 + $0x40] ss:$24 sps:$4 sm:$0xff]  }
 0x6dc   :  { %v5644_v61 = vadd.f32 %v5637_v56, %v5626_v58  ;;  %v5628_v63 = vadd.f32 %v5627_v60, %v5426_v33  ;;  %v20223_v33 = vld [vmem:[%s23149_s1 + $0x104] ss:$24 sps:$4 sm:$0xff]  }
 0x6dd   :  { %v5629_v0 = vpop.f32.mrf.mxu1  ;;  %v20250_v56 = vld [vmem:[%s23217_s9 + $0x1c] ss:$12 sps:$4 sm:$0xff]   ;;  %v20248_v58 = vld [vmem:[%s23217_s9 + $0x18] ss:$12 sps:$4 sm:$0xff]  }
 0x6de   :  { %v5648_v1 = vmul.f32 0.70710677, %v5644_v61  ;;  %v5645_v7 = vadd.f32 %v5641_v59, %v5628_v63  ;;  %v5646_v8 = vmul.f32 0.5, %v5644_v61  ;;  %v20253_v59 = vld [vmem:[%s23149_s1 + $0x14] ss:$24 sps:$4 sm:$0xff]  }
 0x6df   :  { %v5630_v36 = vpop.f32.mrf.mxu1  ;;  %v20256_v60 = vld [vmem:[%s23217_s9 + $0x4] ss:$12 sps:$4 sm:$0xff]   ;;  %v20254_v63 = vld [vmem:[%s23217_s9] ss:$12 sps:$4 sm:$0xff]  }
 0x6e0   :  { %22163 = verf.f32 %v5648_v1  ;;  %v5649_v42 = vmul.f32 0.70710677, %v5645_v7  ;;  %v5647_v11 = vmul.f32 0.5, %v5645_v7  ;;  %v20251_v61 = vld [vmem:[%s23149_s1 + $0x10] ss:$24 sps:$4 sm:$0xff]  }
 0x6e1   :  { %v20259_v0 = vld [vmem:[%s23149_s1 + $0x2e4] ss:$24 sps:$4 sm:$0xff]   ;;  %v20262_v1 = vld [vmem:[%s23217_s9 + $0x16c] ss:$12 sps:$4 sm:$0xff]   ;;  %v20260_v36 = vld [vmem:[%s23217_s9 + $0x168] ss:$12 sps:$4 sm:$0xff]  }
 0x6e2   :  { %22165 = verf.f32 %v5649_v42  ;;  %v20257_v7 = vld [vmem:[%s23149_s1 + $0x2e0] ss:$24 sps:$4 sm:$0xff]   ;;  %v20265_v42 = vld [vmem:[%s23149_s1 + $0x2b4] ss:$24 sps:$4 sm:$0xff]  }
 0x6ed   :  { %v22164_v10 = vpop.eup %22163 }
 0x6ee   :  { %v5652_v4 = vadd.f32 1.0, %v22164_v10  ;;  %v20268_v10 = vld [vmem:[%s23217_s9 + $0x154] ss:$12 sps:$4 sm:$0xff]  }
 0x6ef   :  { %v22166_v5 = vpop.eup %22165 }
 0x6f0   :  { %v5653_v12 = vadd.f32 1.0, %v22166_v5  ;;  %v5654_v14 = vmul.f32 %v5652_v4, %v5646_v8  ;;  %v20263_v4 = vld [vmem:[%s23149_s1 + $0x2b0] ss:$24 sps:$4 sm:$0xff]   ;;  %v20271_v8 = vld [vmem:[%s23149_s1 + $0x284] ss:$24 sps:$4 sm:$0xff]  }
 0x6f1   :  { %v20266_v5 = vld [vmem:[%s23217_s9 + $0x150] ss:$12 sps:$4 sm:$0xff]  }
 0x6f2   :  { %v5655_v48 = vmul.f32 %v5653_v12, %v5647_v11  ;;  %v23267_v23 = vpack.c.bf16 %v5654_v14, %v5654_v14  ;;  %v20274_v11 = vld [vmem:[%s23217_s9 + $0x13c] ss:$12 sps:$4 sm:$0xff]   ;;  %v20269_v12 = vld [vmem:[%s23149_s1 + $0x280] ss:$24 sps:$4 sm:$0xff]  }
 0x6f3   :  { %v20272_v14 = vld [vmem:[%s23217_s9 + $0x138] ss:$12 sps:$4 sm:$0xff]  }
 0x6f4   :  { %v23263_v6 = vpack.c.bf16 %v5655_v48, %v5655_v48  ;;  %v20277_v48 = vld [vmem:[%s23149_s1 + $0x254] ss:$24 sps:$4 sm:$0xff]  }
 0x6f6   :  { %6298 = vmatprep.mubr.bf16.mxu0 %v23263_v6  ;;  %6339 = vmatprep.mubr.bf16.mxu1 %v23263_v6 }
 0x6f7   :  { %6299 = vmatmul.mubr.bf16.vlgmr.msra.gmra.mxu0 %v23267_v23  ;;  %6340 = vmatmul.mubr.bf16.vlgmr.msra.gmra.mxu1 %v23267_v23 }
 0x6f8   :  { %6349 = vmatpush1.bf16.msra.mxu0 %v20209_v17  ;;  %6842 = vmatpush1.bf16.msra.mxu1 %v20212_v22  ;;  %v20280_v17 = vld [vmem:[%s23217_s9 + $0x124] ss:$12 sps:$4 sm:$0xff]  }
 0x6f9   :  { %6380 = vmatprep.mubr.bf16.mxu0 %v23263_v6  ;;  %6873 = vmatprep.mubr.bf16.mxu1 %v23263_v6  ;;  %v20275_v22 = vld [vmem:[%s23149_s1 + $0x250] ss:$24 sps:$4 sm:$0xff]  }
 0x6fa   :  { %6350 = vmatprep.subr.bf16.mxu0 %v20217_v24  ;;  %6843 = vmatprep.subr.bf16.mxu1 %v20220_v25  ;;  %v20278_v24 = vld [vmem:[%s23217_s9 + $0x120] ss:$12 sps:$4 sm:$0xff]   ;;  %v20283_v25 = vld [vmem:[%s23149_s1 + $0x224] ss:$24 sps:$4 sm:$0xff]  }
 0x6fc   :  { %6351 = vmatpush1.bf16.msra.mxu0 %v20215_v26  ;;  %6844 = vmatpush1.bf16.msra.mxu1 %v20218_v29  ;;  %v20286_v26 = vld [vmem:[%s23217_s9 + $0x10c] ss:$12 sps:$4 sm:$0xff]  }
 0x6fd   :  { %6352 = vmatprep.subr.bf16.mxu0 %v20223_v33  ;;  %6845 = vmatprep.subr.bf16.mxu1 %v20226_v16  ;;  %v20281_v29 = vld [vmem:[%s23149_s1 + $0x220] ss:$24 sps:$4 sm:$0xff]   ;;  %v20284_v33 = vld [vmem:[%s23217_s9 + $0x108] ss:$12 sps:$4 sm:$0xff]  }
 0x6fe   :  { %v20289_v16 = vld [vmem:[%s23149_s1 + $0x1f4] ss:$24 sps:$4 sm:$0xff]  }
 0x700   :  { %6353 = vmatpush1.bf16.msra.mxu0 %v20221_v32  ;;  %6846 = vmatpush1.bf16.msra.mxu1 %v20224_v37  ;;  %v20292_v32 = vld [vmem:[%s23217_s9 + $0xf4] ss:$12 sps:$4 sm:$0xff]   ;;  %v20287_v37 = vld [vmem:[%s23149_s1 + $0x1f0] ss:$24 sps:$4 sm:$0xff]  }
 0x701   :  { %6354 = vmatprep.subr.bf16.mxu0 %v20229_v39  ;;  %6847 = vmatprep.subr.bf16.mxu1 %v20232_v9  ;;  %v20290_v39 = vld [vmem:[%s23217_s9 + $0xf0] ss:$12 sps:$4 sm:$0xff]  }
 0x702   :  { %v20295_v9 = vld [vmem:[%s23149_s1 + $0x1c4] ss:$24 sps:$4 sm:$0xff]  }
 0x704   :  { %6355 = vmatpush1.bf16.msra.mxu0 %v20227_v35  ;;  %6848 = vmatpush1.bf16.msra.mxu1 %v20230_v43  ;;  %v20298_v35 = vld [vmem:[%s23217_s9 + $0xdc] ss:$12 sps:$4 sm:$0xff]   ;;  %v20293_v43 = vld [vmem:[%s23149_s1 + $0x1c0] ss:$24 sps:$4 sm:$0xff]  }
 0x705   :  { %6356 = vmatprep.subr.bf16.mxu0 %v20235_v44  ;;  %6849 = vmatprep.subr.bf16.mxu1 %v20238_v45  ;;  %v20296_v44 = vld [vmem:[%s23217_s9 + $0xd8] ss:$12 sps:$4 sm:$0xff]   ;;  %v20301_v45 = vld [vmem:[%s23149_s1 + $0x194] ss:$24 sps:$4 sm:$0xff]  }
 0x708   :  { %6357 = vmatpush1.bf16.msra.mxu0 %v20233_v47  ;;  %6850 = vmatpush1.bf16.msra.mxu1 %v20236_v27  ;;  %v20304_v47 = vld [vmem:[%s23217_s9 + $0xc4] ss:$12 sps:$4 sm:$0xff]  }
 0x709   :  { %6358 = vmatprep.subr.bf16.mxu0 %v20241_v50  ;;  %6851 = vmatprep.subr.bf16.mxu1 %v20244_v51  ;;  %v20299_v27 = vld [vmem:[%s23149_s1 + $0x190] ss:$24 sps:$4 sm:$0xff]   ;;  %v20302_v50 = vld [vmem:[%s23217_s9 + $0xc0] ss:$12 sps:$4 sm:$0xff]   ;;  %s16770_s1 = sld [smem:[%s25011_s0 + %s22270_s28]]  }
 0x70a   :  { %v20305_v51 = vld [vmem:[%s23217_s9 + $0x170] ss:$12 sps:$4 sm:$0xff]  }
 0x70c   :  { %6359 = vmatpush1.bf16.msra.mxu0 %v20239_v54  ;;  %6852 = vmatpush1.bf16.msra.mxu1 %v20242_v55  ;;  %v20308_v54 = vld [vmem:[%s23254_s17 + $0x22c] ss:$12 sps:$4 sm:$0xff]   ;;  %v20309_v55 = vld [vmem:[%s23217_s9 + $0xb0] ss:$12 sps:$4 sm:$0xff]  }
 0x70d   :  { %6360 = vmatprep.subr.bf16.mxu0 %v20247_v28  ;;  %6853 = vmatprep.subr.bf16.mxu1 %v20250_v56  ;;  %v20306_v28 = vld [vmem:[%s23254_s17 + $0x228] ss:$12 sps:$4 sm:$0xff]   ;;  %v20310_v56 = vld [vmem:[%s23217_s9 + $0x158] ss:$12 sps:$4 sm:$0xff]  }
 0x710   :  { %6361 = vmatpush1.bf16.msra.mxu0 %v20245_v57  ;;  %6854 = vmatpush1.bf16.msra.mxu1 %v20248_v58  ;;  %v20313_v57 = vld [vmem:[%s23254_s17 + $0x214] ss:$12 sps:$4 sm:$0xff]   ;;  %v20314_v58 = vld [vmem:[%s23217_s9 + $0x98] ss:$12 sps:$4 sm:$0xff]  }
 0x711   :  { %6362 = vmatprep.subr.bf16.mxu0 %v20253_v59  ;;  %6855 = vmatprep.subr.bf16.mxu1 %v20256_v60  ;;  %v20311_v59 = vld [vmem:[%s23254_s17 + $0x210] ss:$12 sps:$4 sm:$0xff]   ;;  %v20315_v60 = vld [vmem:[%s23217_s9 + $0x140] ss:$12 sps:$4 sm:$0xff]  }
 0x714   :  { %6363 = vmatpush1.bf16.msra.mxu0 %v20251_v61  ;;  %6856 = vmatpush1.bf16.msra.mxu1 %v20254_v63  ;;  %v20318_v61 = vld [vmem:[%s23254_s17 + $0x1fc] ss:$12 sps:$4 sm:$0xff]   ;;  %v20319_v63 = vld [vmem:[%s23217_s9 + $0x80] ss:$12 sps:$4 sm:$0xff]  }
 0x715   :  { %6364 = vmatprep.subr.bf16.mxu0 %v20259_v0  ;;  %6857 = vmatprep.subr.bf16.mxu1 %v20262_v1  ;;  %v20320_v0 = vld [vmem:[%s23217_s9 + $0x128] ss:$12 sps:$4 sm:$0xff]   ;;  %v20323_v1 = vld [vmem:[%s23254_s17 + $0x1e4] ss:$12 sps:$4 sm:$0xff]  }
 0x718   :  { %6365 = vmatpush2.bf16.msra.mxu0 %v20257_v7  ;;  %6858 = vmatpush2.bf16.msra.mxu1 %v20260_v36  ;;  %v20324_v7 = vld [vmem:[%s23217_s9 + $0x68] ss:$12 sps:$4 sm:$0xff]   ;;  %v20321_v36 = vld [vmem:[%s23254_s17 + $0x1e0] ss:$12 sps:$4 sm:$0xff]  }
 0x719   :  { %6366 = vmatprep.subr.bf16.mxu0 %v20265_v42  ;;  %6859 = vmatprep.subr.bf16.mxu1 %v20268_v10  ;;  %v20325_v42 = vld [vmem:[%s23217_s9 + $0x110] ss:$12 sps:$4 sm:$0xff]   ;;  %v20328_v10 = vld [vmem:[%s23254_s17 + $0x1cc] ss:$12 sps:$4 sm:$0xff]  }
 0x71c   :  { %6367 = vmatpush2.bf16.msra.mxu0 %v20263_v4  ;;  %6860 = vmatpush2.bf16.msra.mxu1 %v20266_v5  ;;  %v20329_v4 = vld [vmem:[%s23217_s9 + $0x50] ss:$12 sps:$4 sm:$0xff]   ;;  %v20326_v5 = vld [vmem:[%s23254_s17 + $0x1c8] ss:$12 sps:$4 sm:$0xff]  }
 0x71d   :  { %6368 = vmatprep.subr.bf16.mxu0 %v20271_v8  ;;  %6861 = vmatprep.subr.bf16.mxu1 %v20274_v11  ;;  %v20330_v8 = vld [vmem:[%s23217_s9 + $0xf8] ss:$12 sps:$4 sm:$0xff]   ;;  %v20333_v11 = vld [vmem:[%s23254_s17 + $0x1b4] ss:$12 sps:$4 sm:$0xff]  }
 0x720   :  { %6369 = vmatpush2.bf16.msra.mxu0 %v20269_v12  ;;  %6862 = vmatpush2.bf16.msra.mxu1 %v20272_v14  ;;  %v20334_v12 = vld [vmem:[%s23217_s9 + $0x38] ss:$12 sps:$4 sm:$0xff]   ;;  %v20331_v14 = vld [vmem:[%s23254_s17 + $0x1b0] ss:$12 sps:$4 sm:$0xff]  }
 0x721   :  { %6370 = vmatprep.subr.bf16.mxu0 %v20277_v48  ;;  %6863 = vmatprep.subr.bf16.mxu1 %v20280_v17  ;;  %v20335_v48 = vld [vmem:[%s23217_s9 + $0xe0] ss:$12 sps:$4 sm:$0xff]   ;;  %v20338_v17 = vld [vmem:[%s23254_s17 + $0x19c] ss:$12 sps:$4 sm:$0xff]  }
 0x724   :  { %6371 = vmatpush2.bf16.msra.mxu0 %v20275_v22  ;;  %6864 = vmatpush2.bf16.msra.mxu1 %v20278_v24  ;;  %v20339_v22 = vld [vmem:[%s23217_s9 + $0x20] ss:$12 sps:$4 sm:$0xff]   ;;  %v20336_v24 = vld [vmem:[%s23254_s17 + $0x198] ss:$12 sps:$4 sm:$0xff]  }
 0x725   :  { %6372 = vmatprep.subr.bf16.mxu0 %v20283_v25  ;;  %6865 = vmatprep.subr.bf16.mxu1 %v20286_v26  ;;  %v20340_v25 = vld [vmem:[%s23217_s9 + $0xc8] ss:$12 sps:$4 sm:$0xff]   ;;  %v20343_v26 = vld [vmem:[%s23254_s17 + $0x184] ss:$12 sps:$4 sm:$0xff]  }
 0x728   :  { %6373 = vmatpush2.bf16.msra.mxu0 %v20281_v29  ;;  %6866 = vmatpush2.bf16.msra.mxu1 %v20284_v33  ;;  %v20344_v29 = vld [vmem:[%s23217_s9 + $0x8] ss:$12 sps:$4 sm:$0xff]   ;;  %v20341_v33 = vld [vmem:[%s23254_s17 + $0x180] ss:$12 sps:$4 sm:$0xff]   ;;  %s24201_s9 = sld [smem:[%s25011_s0 + %s22272_s6]]  }
 0x729   :  { %6374 = vmatprep.subr.bf16.mxu0 %v20289_v16  ;;  %6867 = vmatprep.subr.bf16.mxu1 %v20292_v32  ;;  %v20347_v16 = vld [vmem:[%s23254_s17 + $0xac] ss:$12 sps:$4 sm:$0xff]   ;;  %v20348_v32 = vld [vmem:[%s23254_s17 + $0x170] ss:$12 sps:$4 sm:$0xff]  }
 0x72c   :  { %6375 = vmatpush2.bf16.msra.mxu0 %v20287_v37  ;;  %6868 = vmatpush2.bf16.msra.mxu1 %v20290_v39  ;;  %v20345_v37 = vld [vmem:[%s23254_s17 + $0xa8] ss:$12 sps:$4 sm:$0xff]   ;;  %v20349_v39 = vld [vmem:[%s23254_s17 + $0xb0] ss:$12 sps:$4 sm:$0xff]  }
 0x72d   :  { %6376 = vmatprep.subr.bf16.mxu0 %v20295_v9  ;;  %6869 = vmatprep.subr.bf16.mxu1 %v20298_v35  ;;  %v20352_v9 = vld [vmem:[%s23254_s17 + $0x94] ss:$12 sps:$4 sm:$0xff]   ;;  %v20353_v35 = vld [vmem:[%s23254_s17 + $0x158] ss:$12 sps:$4 sm:$0xff]  }
 0x730   :  { %6377 = vmatpush2.bf16.msra.mxu0 %v20293_v43  ;;  %6870 = vmatpush2.bf16.msra.mxu1 %v20296_v44  ;;  %v20350_v43 = vld [vmem:[%s23254_s17 + $0x90] ss:$12 sps:$4 sm:$0xff]   ;;  %v20354_v44 = vld [vmem:[%s23254_s17 + $0x98] ss:$12 sps:$4 sm:$0xff]  }
 0x731   :  { %6378 = vmatprep.subr.bf16.mxu0 %v20301_v45  ;;  %6871 = vmatprep.subr.bf16.mxu1 %v20304_v47  ;;  %v20357_v45 = vld [vmem:[%s23254_s17 + $0x7c] ss:$12 sps:$4 sm:$0xff]   ;;  %v20355_v47 = vld [vmem:[%s23254_s17 + $0x78] ss:$12 sps:$4 sm:$0xff]  }
 0x734   :  { %6379 = vmatpush2.bf16.msra.mxu0 %v20299_v27  ;;  %6872 = vmatpush2.bf16.msra.mxu1 %v20302_v50  ;;  %v20359_v27 = vld [vmem:[%s23254_s17 + $0x80] ss:$12 sps:$4 sm:$0xff]   ;;  %v20362_v50 = vld [vmem:[%s23254_s17 + $0x64] ss:$12 sps:$4 sm:$0xff]  }
 0x735   :  { %18947 = vmatprep.subr.bf16.mxu0 %v20305_v51  ;;  %7347 = vmatprep.subr.bf16.mxu1 %v20308_v54  ;;  %v20363_v51 = vld [vmem:[%s23254_s17 + $0x128] ss:$12 sps:$4 sm:$0xff]  }
 0x736   :  { %v20364_v54 = vld [vmem:[%s23254_s17 + $0x68] ss:$12 sps:$4 sm:$0xff]  }
 0x737   :  { %6381 = vmatmul.mubr.bf16.vlgmr.msra.gmra.mxu0 %v23267_v23  ;;  %6874 = vmatmul.mubr.bf16.vlgmr.msra.gmra.mxu1 %v23267_v23 }
 0x738   :  { %18948 = vmatpush3.bf16.msra.mxu0 %v20309_v55  ;;  %6914 = vmatprep.mubr.bf16.mxu0 %v23263_v6  ;;  %v20316_v6 = vld [vmem:[%s23254_s17 + $0x1f8] ss:$12 sps:$4 sm:$0xff]  }
 0x739   :  { %7348 = vmatpush1.bf16.msra.mxu1 %v20306_v28  ;;  %18949 = vmatprep.subr.bf16.mxu0 %v20310_v56  ;;  %v20367_v55 = vld [vmem:[%s23254_s17 + $0x4c] ss:$12 sps:$4 sm:$0xff]   ;;  %v20368_v28 = vld [vmem:[%s23254_s17 + $0x110] ss:$12 sps:$4 sm:$0xff]   ;;  %v20365_v56 = vld [vmem:[%s23254_s17 + $0x48] ss:$12 sps:$4 sm:$0xff]  }
 0x73a   :  { %7349 = vmatprep.subr.bf16.mxu1 %v20313_v57  ;;  %7379 = vmatprep.mubr.bf16.mxu1 %v22242_v53  ;;  %v20369_v57 = vld [vmem:[%s23254_s17 + $0x50] ss:$12 sps:$4 sm:$0xff]  }
 0x73c   :  { %18950 = vmatpush3.bf16.msra.mxu0 %v20314_v58  ;;  %v20372_v58 = vld [vmem:[%s23254_s17 + $0x34] ss:$12 sps:$4 sm:$0xff]  }
 0x73d   :  { %7350 = vmatpush1.bf16.msra.mxu1 %v20311_v59  ;;  %18951 = vmatprep.subr.bf16.mxu0 %v20315_v60  ;;  %v20373_v59 = vld [vmem:[%s23254_s17 + $0xf8] ss:$12 sps:$4 sm:$0xff]   ;;  %v20370_v60 = vld [vmem:[%s23254_s17 + $0x30] ss:$12 sps:$4 sm:$0xff]  }
 0x73e   :  { %7351 = vmatprep.subr.bf16.mxu1 %v20318_v61  ;;  %v20374_v61 = vld [vmem:[%s23254_s17 + $0x38] ss:$12 sps:$4 sm:$0xff]  }
 0x740   :  { %18952 = vmatpush3.bf16.msra.mxu0 %v20319_v63  ;;  %v20377_v63 = vld [vmem:[%s23254_s17 + $0x1c] ss:$12 sps:$4 sm:$0xff]  }
 0x741   :  { %7352 = vmatpush1.bf16.msra.mxu1 %v20316_v6  ;;  %18953 = vmatprep.subr.bf16.mxu0 %v20320_v0  ;;  %v20378_v6 = vld [vmem:[%s23254_s17 + $0xe0] ss:$12 sps:$4 sm:$0xff]   ;;  %v20375_v0 = vld [vmem:[%s23254_s17 + $0x18] ss:$12 sps:$4 sm:$0xff]  }
 0x742   :  { %7353 = vmatprep.subr.bf16.mxu1 %v20323_v1  ;;  %v20379_v1 = vld [vmem:[%s23254_s17 + $0x20] ss:$12 sps:$4 sm:$0xff]  }
 0x744   :  { %18954 = vmatpush3.bf16.msra.mxu0 %v20324_v7  ;;  %v20382_v7 = vld [vmem:[%s23254_s17 + $0x4] ss:$12 sps:$4 sm:$0xff]  }
 0x745   :  { %7354 = vmatpush1.bf16.msra.mxu1 %v20321_v36  ;;  %18955 = vmatprep.subr.bf16.mxu0 %v20325_v42  ;;  %v20383_v36 = vld [vmem:[%s23254_s17 + $0xc8] ss:$12 sps:$4 sm:$0xff]   ;;  %v20380_v42 = vld [vmem:[%s23254_s17] ss:$12 sps:$4 sm:$0xff]  }
 0x746   :  { %7355 = vmatprep.subr.bf16.mxu1 %v20328_v10  ;;  %v20384_v10 = vld [vmem:[%s23254_s17 + $0x8] ss:$12 sps:$4 sm:$0xff]  }
 0x748   :  { %18956 = vmatpush3.bf16.msra.mxu0 %v20329_v4  ;;  %v20387_v4 = vld [vmem:[%s23254_s17 + $0x16c] ss:$12 sps:$4 sm:$0xff]  }
 0x749   :  { %7356 = vmatpush1.bf16.msra.mxu1 %v20326_v5  ;;  %18957 = vmatprep.subr.bf16.mxu0 %v20330_v8  ;;  %v20385_v5 = vld [vmem:[%s23254_s17 + $0x168] ss:$12 sps:$4 sm:$0xff]  }
 0x74a   :  { %7357 = vmatprep.subr.bf16.mxu1 %v20333_v11  ;;  %v20390_v8 = vld [vmem:[%s23254_s17 + $0x154] ss:$12 sps:$4 sm:$0xff]   ;;  %v20388_v11 = vld [vmem:[%s23254_s17 + $0x150] ss:$12 sps:$4 sm:$0xff]  }
 0x74c   :  { %18958 = vmatpush3.bf16.msra.mxu0 %v20334_v12  ;;  %v20393_v12 = vld [vmem:[%s23254_s17 + $0x13c] ss:$12 sps:$4 sm:$0xff]  }
 0x74d   :  { %7358 = vmatpush1.bf16.msra.mxu1 %v20331_v14  ;;  %18959 = vmatprep.subr.bf16.mxu0 %v20335_v48  ;;  %v20391_v14 = vld [vmem:[%s23254_s17 + $0x138] ss:$12 sps:$4 sm:$0xff]  }
 0x74e   :  { %7359 = vmatprep.subr.bf16.mxu1 %v20338_v17  ;;  %v20396_v48 = vld [vmem:[%s23254_s17 + $0x124] ss:$12 sps:$4 sm:$0xff]   ;;  %v20394_v17 = vld [vmem:[%s23254_s17 + $0x120] ss:$12 sps:$4 sm:$0xff]  }
 0x750   :  { %18960 = vmatpush3.bf16.msra.mxu0 %v20339_v22  ;;  %v20399_v22 = vld [vmem:[%s23254_s17 + $0x10c] ss:$12 sps:$4 sm:$0xff]  }
 0x751   :  { %7360 = vmatpush1.bf16.msra.mxu1 %v20336_v24  ;;  %18961 = vmatprep.subr.bf16.mxu0 %v20340_v25  ;;  %v20397_v24 = vld [vmem:[%s23254_s17 + $0x108] ss:$12 sps:$4 sm:$0xff]  }
 0x752   :  { %7361 = vmatprep.subr.bf16.mxu1 %v20343_v26  ;;  %v20402_v25 = vld [vmem:[%s23254_s17 + $0xf4] ss:$12 sps:$4 sm:$0xff]   ;;  %v20400_v26 = vld [vmem:[%s23254_s17 + $0xf0] ss:$12 sps:$4 sm:$0xff]  }
 0x754   :  { %18962 = vmatpush3.bf16.msra.mxu0 %v20344_v29  ;;  %v20405_v29 = vld [vmem:[%s23254_s17 + $0xdc] ss:$12 sps:$4 sm:$0xff]  }
 0x755   :  { %7362 = vmatpush1.bf16.msra.mxu1 %v20341_v33  ;;  %7306 = vmatprep.subr.bf16.mxu0 %v20347_v16  ;;  %v20403_v33 = vld [vmem:[%s23254_s17 + $0xd8] ss:$12 sps:$4 sm:$0xff]  }
 0x756   :  { %18969 = vmatprep.subr.bf16.mxu1 %v20348_v32  ;;  %v20408_v16 = vld [vmem:[%s23254_s17 + $0xc4] ss:$12 sps:$4 sm:$0xff]   ;;  %v20406_v32 = vld [vmem:[%s23254_s17 + $0xc0] ss:$12 sps:$4 sm:$0xff]  }
 0x757   :  { %6915 = vmatmul.mubr.bf16.vlgmr.msra.gmra.mxu0 %v23267_v23  ;;  %v20358_v23 = vld [vmem:[%s23254_s17 + $0x140] ss:$12 sps:$4 sm:$0xff]  }
 0x758   :  { %7380 = vmatmul.mubr.bf16.vlgmr.msra.gmra.mxu1 %v23004_v41  ;;  %7307 = vmatpush1.bf16.msra.mxu0 %v20345_v37  ;;  %v20409_v37 = vld [vmem:[%s23254_s17 + $0x230] ss:$12 sps:$4 sm:$0xff]  }
 0x759   :  { %7338 = vmatprep.mubr.bf16.mxu0 %v22996_v18  ;;  %18970 = vmatpush3.bf16.msra.mxu1 %v20349_v39  ;;  %v22259_v39 = vmov 0.0  }
 0x75a   :  { %7420 = vmatprep.mubr.bf16.mxu1 %v22996_v18  ;;  %7308 = vmatprep.subr.bf16.mxu0 %v20352_v9  ;;  %v20360_v18 = vld [vmem:[%s23254_s17 + $0x60] ss:$12 sps:$4 sm:$0xff]   ;;  %v20410_v9 = vld [vmem:[%s23254_s17 + $0x218] ss:$12 sps:$4 sm:$0xff]  }
 0x75b   :  { %18971 = vmatprep.subr.bf16.mxu1 %v20353_v35  ;;  %v20411_v35 = vld [vmem:[%s23254_s17 + $0x200] ss:$12 sps:$4 sm:$0xff]  }
 0x75c   :  { %7309 = vmatpush1.bf16.msra.mxu0 %v20350_v43  ;;  %v20413_v43 = vld [vmem:[%s23254_s17 + $0x1d0] ss:$12 sps:$4 sm:$0xff]  }
 0x75d   :  { %18972 = vmatpush3.bf16.msra.mxu1 %v20354_v44  ;;  %7310 = vmatprep.subr.bf16.mxu0 %v20357_v45  ;;  %v20417_v44 = vld [vmem:[%s23436_s25 + $0x150] ss:$24 sps:$4 sm:$0xff]   ;;  %v20414_v45 = vld [vmem:[%s23254_s17 + $0x1b8] ss:$12 sps:$4 sm:$0xff]  }
 0x75e   :  { %18973 = vmatprep.subr.bf16.mxu1 %v20358_v23  ;;  %v20419_v23 = vld [vmem:[%s23436_s25 + $0x154] ss:$24 sps:$4 sm:$0xff]  }
 0x760   :  { %7311 = vmatpush1.bf16.msra.mxu0 %v20355_v47  ;;  %v20415_v47 = vld [vmem:[%s23254_s17 + $0x1a0] ss:$12 sps:$4 sm:$0xff]  }
 0x761   :  { %18974 = vmatpush3.bf16.msra.mxu1 %v20359_v27  ;;  %7312 = vmatprep.subr.bf16.mxu0 %v20362_v50  ;;  %v20416_v27 = vld [vmem:[%s23254_s17 + $0x188] ss:$12 sps:$4 sm:$0xff]   ;;  %v23452_v50 = vld [vmem:[%s16775_s29] sm:$0x3f]  ;;  %s16772_s29 = sld [smem:[%s25011_s0 + %s22277_s26]]  }
 0x762   :  { %18975 = vmatprep.subr.bf16.mxu1 %v20363_v51  ;;  %v5759_v51 = vrot.slane %v23452_v50, %v22650_v13 }
 0x764   :  { %7313 = vmatpush1.bf16.msra.mxu0 %v20360_v18  ;;  %v5767_v18 = vrot.slane %v23452_v50, %v22694_v2 }
 0x765   :  { %18976 = vmatpush3.bf16.msra.mxu1 %v20364_v54  ;;  %7314 = vmatprep.subr.bf16.mxu0 %v20367_v55 }
 0x766   :  { %18977 = vmatprep.subr.bf16.mxu1 %v20368_v28  ;;  %v5763_v28 = vrot.slane %v23452_v50, %v22655_v15 }
 0x768   :  { %7315 = vmatpush1.bf16.msra.mxu0 %v20365_v56  ;;  %v5771_v56 = vrot.slane %v23452_v50, %v22697_v3 }
 0x769   :  { %18978 = vmatpush3.bf16.msra.mxu1 %v20369_v57  ;;  %7316 = vmatprep.subr.bf16.mxu0 %v20372_v58 }
 0x76a   :  { %18979 = vmatprep.subr.bf16.mxu1 %v20373_v59 }
 0x76c   :  { %7317 = vmatpush1.bf16.msra.mxu0 %v20370_v60 }
 0x76d   :  { %18980 = vmatpush3.bf16.msra.mxu1 %v20374_v61  ;;  %7318 = vmatprep.subr.bf16.mxu0 %v20377_v63 }
 0x76e   :  { %18981 = vmatprep.subr.bf16.mxu1 %v20378_v6 }
 0x770   :  { %7319 = vmatpush1.bf16.msra.mxu0 %v20375_v0 }
 0x771   :  { %18982 = vmatpush3.bf16.msra.mxu1 %v20379_v1  ;;  %7320 = vmatprep.subr.bf16.mxu0 %v20382_v7  ;;  %v20420_v7 = vld [vmem:[%s23436_s25 + $0x120] ss:$24 sps:$4 sm:$0xff]  }
 0x772   :  { %18983 = vmatprep.subr.bf16.mxu1 %v20383_v36  ;;  %v20422_v36 = vld [vmem:[%s23436_s25 + $0x124] ss:$24 sps:$4 sm:$0xff]  }
 0x774   :  { %7321 = vmatpush1.bf16.msra.mxu0 %v20380_v42 }
 0x775   :  { %18984 = vmatpush3.bf16.msra.mxu1 %v20384_v10  ;;  %7322 = vmatprep.subr.bf16.mxu0 %v20387_v4 }
 0x776   :  { %8402 = vmatprep.subr.bf16.mxu1 %v20419_v23 }
 0x778   :  { %7421 = vmatmul.mubr.bf16.vlgmr.msra.gmra.mxu1 %v22998_v19  ;;  %7323 = vmatpush2.bf16.msra.mxu0 %v20385_v5 }
 0x779   :  { %7324 = vmatprep.subr.bf16.mxu0 %v20390_v8  ;;  %8403 = vmatpush1.bf16.msra.mxu1 %v20417_v44  ;;  %v20423_v8 = vld [vmem:[%s23436_s25 + $0xf0] ss:$24 sps:$4 sm:$0xff]  }
 0x77a   :  { %8404 = vmatprep.subr.bf16.mxu1 %v20422_v36  ;;  %v20459_v36 = vld [vmem:[%s23436_s25 + $0x1b0] ss:$24 sps:$4 sm:$0xff]  }
 0x77c   :  { %7325 = vmatpush2.bf16.msra.mxu0 %v20388_v11  ;;  %v20425_v11 = vld [vmem:[%s23436_s25 + $0xf4] ss:$24 sps:$4 sm:$0xff]  }
 0x77d   :  { %7326 = vmatprep.subr.bf16.mxu0 %v20393_v12  ;;  %8405 = vmatpush1.bf16.msra.mxu1 %v20420_v7  ;;  %v20428_v12 = vld [vmem:[%s23436_s25 + $0xc4] ss:$24 sps:$4 sm:$0xff]   ;;  %v20461_v7 = vld [vmem:[%s23436_s25 + $0x1b4] ss:$24 sps:$4 sm:$0xff]  }
 0x77e   :  { %8406 = vmatprep.subr.bf16.mxu1 %v20425_v11  ;;  %v20468_v11 = vld [vmem:[%s23436_s25 + $0x420] ss:$24 sps:$4 sm:$0xff]  }
 0x780   :  { %7327 = vmatpush2.bf16.msra.mxu0 %v20391_v14  ;;  %v20426_v14 = vld [vmem:[%s23436_s25 + $0xc0] ss:$24 sps:$4 sm:$0xff]  }
 0x781   :  { %7328 = vmatprep.subr.bf16.mxu0 %v20396_v48  ;;  %8407 = vmatpush1.bf16.msra.mxu1 %v20423_v8  ;;  %v20431_v48 = vld [vmem:[%s23436_s25 + $0x94] ss:$24 sps:$4 sm:$0xff]   ;;  %v5775_v8 = vrot.slane %v23452_v50, %v22725_v62 }
 0x782   :  { %8408 = vmatprep.subr.bf16.mxu1 %v20428_v12  ;;  %v20470_v12 = vld [vmem:[%s23436_s25 + $0x424] ss:$24 sps:$4 sm:$0xff]  }
 0x784   :  { %7329 = vmatpush2.bf16.msra.mxu0 %v20394_v17  ;;  %v20429_v17 = vld [vmem:[%s23436_s25 + $0x90] ss:$24 sps:$4 sm:$0xff]  }
 0x785   :  { %7330 = vmatprep.subr.bf16.mxu0 %v20399_v22  ;;  %v20434_v22 = vld [vmem:[%s23436_s25 + $0x64] ss:$24 sps:$4 sm:$0xff]   ;;  %8409 = vmatpush1.bf16.msra.mxu1 %v20426_v14  ;;  %v5779_v14 = vrot.slane %v23452_v50, %v23245_v20  ;;  %v20474_v50 = vld [vmem:[%s23436_s25 + $0x3f0] ss:$24 sps:$4 sm:$0xff]  }
 0x786   :  { %8410 = vmatprep.subr.bf16.mxu1 %v20431_v48  ;;  %v20473_v48 = vld [vmem:[%s23436_s25 + $0x45c] ss:$24 sps:$4 sm:$0xff]  }
 0x788   :  { %7331 = vmatpush2.bf16.msra.mxu0 %v20397_v24  ;;  %v20432_v24 = vld [vmem:[%s23436_s25 + $0x60] ss:$24 sps:$4 sm:$0xff]  }
 0x789   :  { %7332 = vmatprep.subr.bf16.mxu0 %v20402_v25  ;;  %8411 = vmatpush1.bf16.msra.mxu1 %v20429_v17 }
 0x78a   :  { %8412 = vmatprep.subr.bf16.mxu1 %v20434_v22 }
 0x78c   :  { %7333 = vmatpush2.bf16.msra.mxu0 %v20400_v26  ;;  %v20437_v26 = vld [vmem:[%s23436_s25 + $0x34] ss:$24 sps:$4 sm:$0xff]  }
 0x78d   :  { %7334 = vmatprep.subr.bf16.mxu0 %v20405_v29  ;;  %8413 = vmatpush1.bf16.msra.mxu1 %v20432_v24 }
 0x78e   :  { %8414 = vmatprep.subr.bf16.mxu1 %v20437_v26 }
 0x790   :  { %7335 = vmatpush2.bf16.msra.mxu0 %v20403_v33 }
 0x791   :  { %7336 = vmatprep.subr.bf16.mxu0 %v20408_v16 }
 0x794   :  { %7337 = vmatpush2.bf16.msra.mxu0 %v20406_v32 }
 0x795   :  { %19097 = vmatprep.subr.bf16.mxu0 %v22259_v39 }
 0x797   :  { %7339 = vmatmul.mubr.bf16.vlgmr.msra.gmra.mxu0 %v22998_v19  ;;  %v20412_v19 = vld [vmem:[%s23254_s17 + $0x1e8] ss:$12 sps:$4 sm:$0xff]   ;;  %s24350_s17 = sld [smem:[%s25011_s0 + %s22274_s14]]  }
 0x798   :  { %19098 = vmatpush3.bf16.msra.mxu0 %v20409_v37  ;;  %19113 = vmatprep.mubr.msk.bf16.mxu0 %vm22260_vm0, %v22259_v39 }
 0x799   :  { %19099 = vmatprep.subr.bf16.mxu0 %v22259_v39 }
 0x79c   :  { %19100 = vmatpush3.bf16.msra.mxu0 %v20410_v9 }
 0x79d   :  { %19101 = vmatprep.subr.bf16.mxu0 %v22259_v39 }
 0x7a0   :  { %19102 = vmatpush3.bf16.msra.mxu0 %v20411_v35 }
 0x7a1   :  { %19103 = vmatprep.subr.bf16.mxu0 %v22259_v39 }
 0x7a4   :  { %19104 = vmatpush3.bf16.msra.mxu0 %v20412_v19  ;;  %v20435_v19 = vld [vmem:[%s23436_s25 + $0x30] ss:$24 sps:$4 sm:$0xff]  }
 0x7a5   :  { %19105 = vmatprep.subr.bf16.mxu0 %v22259_v39  ;;  %8415 = vmatpush1.bf16.msra.mxu1 %v20435_v19 }
 0x7a8   :  { %19106 = vmatpush3.bf16.msra.mxu0 %v20413_v43 }
 0x7a9   :  { %19107 = vmatprep.subr.bf16.mxu0 %v22259_v39 }
 0x7ac   :  { %19108 = vmatpush3.bf16.msra.mxu0 %v20414_v45 }
 0x7ad   :  { %19109 = vmatprep.subr.bf16.mxu0 %v22259_v39 }
 0x7b0   :  { %19110 = vmatpush3.bf16.msra.mxu0 %v20415_v47  ;;  %v20440_v47 = vld [vmem:[%s23436_s25 + $0x4] ss:$24 sps:$4 sm:$0xff]  }
 0x7b1   :  { %19111 = vmatprep.subr.bf16.mxu0 %v22259_v39  ;;  %8416 = vmatprep.subr.bf16.mxu1 %v20440_v47  ;;  %v20494_v47 = vld [vmem:[%s23436_s25 + $0x364] ss:$24 sps:$4 sm:$0xff]  }
 0x7b4   :  { %19112 = vmatpush3.bf16.msra.mxu0 %v20416_v27 }
 0x7b7   :  { %19114 = vmatmul.mubr.bf16.vlgmr.msra.gmra.mxu0 %v23004_v41  ;;  %v6300_v54 = vpop.f32.mrf.mxu0  ;;  %v6341_v55 = vpop.f32.mrf.mxu1 }
 0x7b8   :  { %v6301_v57 = vadd.f32 %v6300_v54, %v5759_v51  ;;  %v6342_v58 = vadd.f32 %v6341_v55, %v5767_v18  ;;  %8475 = vmatprep.mubr.bf16.mxu0 %v22242_v53  ;;  %v20438_v55 = vld [vmem:[%s23436_s25] ss:$24 sps:$4 sm:$0xff]  }
 0x7b9   :  { %v6302_v59 = vpop.f32.mrf.mxu0  ;;  %v6343_v60 = vpop.f32.mrf.mxu1  ;;  %8417 = vmatpush1.bf16.msra.mxu1 %v20438_v55 }
 0x7ba   :  { %v6395_v61 = vmul.f32 0.70710677, %v6301_v57  ;;  %v6397_v63 = vmul.f32 0.70710677, %v6342_v58  ;;  %v6303_v41 = vadd.f32 %v6302_v59, %v5763_v28  ;;  %v6344_v6 = vadd.f32 %v6343_v60, %v5771_v56  ;;  %v20443_v28 = vld [vmem:[%s23436_s25 + $0x2d4] ss:$24 sps:$4 sm:$0xff]  }
 0x7bb   :  { %v6304_v0 = vpop.f32.mrf.mxu0  ;;  %v6345_v1 = vpop.f32.mrf.mxu1  ;;  %v6389_v33 = vmul.f32 0.5, %v6301_v57  ;;  %v6391_v32 = vmul.f32 0.5, %v6342_v58  ;;  %v20441_v56 = vld [vmem:[%s23436_s25 + $0x2d0] ss:$24 sps:$4 sm:$0xff]   ;;  %8418 = vmatprep.subr.bf16.mxu1 %v20443_v28  ;;  %v20446_v57 = vld [vmem:[%s23436_s25 + $0x2a4] ss:$24 sps:$4 sm:$0xff]  }
 0x7bc   :  { %22167 = verf.f32 %v6395_v61  ;;  %v6396_v42 = vmul.f32 0.70710677, %v6303_v41  ;;  %v6398_v5 = vmul.f32 0.70710677, %v6344_v6  ;;  %v6390_v45 = vmul.f32 0.5, %v6303_v41 }
 0x7bd   :  { %22169 = verf.f32 %v6397_v63  ;;  %v6305_v10 = vpop.f32.mrf.mxu0  ;;  %v6346_v4 = vpop.f32.mrf.mxu1  ;;  %v6392_v27 = vmul.f32 0.5, %v6344_v6  ;;  %8419 = vmatpush2.bf16.msra.mxu1 %v20441_v56  ;;  %v20444_v58 = vld [vmem:[%s23436_s25 + $0x2a0] ss:$24 sps:$4 sm:$0xff]   ;;  %v20449_v59 = vld [vmem:[%s23436_s25 + $0x274] ss:$24 sps:$4 sm:$0xff]  }
 0x7be   :  { %22171 = verf.f32 %v6396_v42  ;;  %8420 = vmatprep.subr.bf16.mxu1 %v20446_v57  ;;  %v20447_v60 = vld [vmem:[%s23436_s25 + $0x270] ss:$24 sps:$4 sm:$0xff]   ;;  %v20452_v61 = vld [vmem:[%s23436_s25 + $0x244] ss:$24 sps:$4 sm:$0xff]   ;;  %v20450_v63 = vld [vmem:[%s23436_s25 + $0x240] ss:$24 sps:$4 sm:$0xff]  }
 0x7bf   :  { %22173 = verf.f32 %v6398_v5  ;;  %v20455_v41 = vld [vmem:[%s23436_s25 + $0x214] ss:$24 sps:$4 sm:$0xff]   ;;  %v20453_v6 = vld [vmem:[%s23436_s25 + $0x210] ss:$24 sps:$4 sm:$0xff]   ;;  %v20458_v0 = vld [vmem:[%s23436_s25 + $0x1e4] ss:$24 sps:$4 sm:$0xff]  }
 0x7c0   :  { %v20456_v1 = vld [vmem:[%s23436_s25 + $0x1e0] ss:$24 sps:$4 sm:$0xff]   ;;  %v20464_v42 = vld [vmem:[%s23436_s25 + $0x454] ss:$24 sps:$4 sm:$0xff]   ;;  %v20462_v10 = vld [vmem:[%s23436_s25 + $0x450] ss:$24 sps:$4 sm:$0xff]  }
 0x7c1   :  { %8421 = vmatpush2.bf16.msra.mxu1 %v20444_v58  ;;  %v20467_v4 = vld [vmem:[%s23436_s25 + $0x184] ss:$24 sps:$4 sm:$0xff]   ;;  %8443 = vmatprep.subr.bf16.mxu0 %v20464_v42  ;;  %v20465_v5 = vld [vmem:[%s23436_s25 + $0x180] ss:$24 sps:$4 sm:$0xff]   ;;  %v20498_v28 = vld [vmem:[%s23436_s25 + $0x330] ss:$24 sps:$4 sm:$0xff]  }
 0x7c2   :  { %8422 = vmatprep.subr.bf16.mxu1 %v20449_v59  ;;  %8444 = vmatpush1.bf16.msra.mxu0 %v20462_v10 }
 0x7c3   :  { %8445 = vmatprep.subr.bf16.mxu0 %v20470_v12 }
 0x7c5   :  { %8423 = vmatpush2.bf16.msra.mxu1 %v20447_v60  ;;  %v20506_v60 = vld [vmem:[%s23436_s25 + $0x304] ss:$24 sps:$4 sm:$0xff]  }
 0x7c6   :  { %8424 = vmatprep.subr.bf16.mxu1 %v20452_v61  ;;  %8446 = vmatpush1.bf16.msra.mxu0 %v20468_v11 }
 0x7c9   :  { %v22168_v25 = vpop.eup %22167  ;;  %8425 = vmatpush2.bf16.msra.mxu1 %v20450_v63  ;;  %v20504_v63 = vld [vmem:[%s23436_s25 + $0x300] ss:$24 sps:$4 sm:$0xff]  }
 0x7ca   :  { %v22170_v29 = vpop.eup %22169  ;;  %v6407_v16 = vadd.f32 1.0, %v22168_v25  ;;  %8426 = vmatprep.subr.bf16.mxu1 %v20455_v41  ;;  %v20512_v41 = vld [vmem:[%s23436_s25 + $0x15c] ss:$24 sps:$4 sm:$0xff]  }
 0x7cb   :  { %v6409_v37 = vadd.f32 1.0, %v22170_v29  ;;  %v22172_v9 = vpop.eup %22171  ;;  %v20476_v29 = vld [vmem:[%s23436_s25 + $0x3f4] ss:$24 sps:$4 sm:$0xff]  }
 0x7cc   :  { %v6413_v35 = vmul.f32 %v6407_v16, %v6389_v33  ;;  %v22174_v43 = vpop.eup %22173  ;;  %v6408_v23 = vadd.f32 1.0, %v22172_v9  ;;  %8447 = vmatprep.subr.bf16.mxu0 %v20476_v29 }
 0x7cd   :  { %v6415_v44 = vmul.f32 %v6409_v37, %v6391_v32  ;;  %v6410_v51 = vadd.f32 1.0, %v22174_v43  ;;  %8427 = vmatpush2.bf16.msra.mxu1 %v20453_v6  ;;  %8448 = vmatpush1.bf16.msra.mxu0 %v20474_v50  ;;  %v20482_v43 = vld [vmem:[%s23436_s25 + $0x3c4] ss:$24 sps:$4 sm:$0xff]  }
 0x7ce   :  { %6419 = vst [vmem:[%s23477_s3] sm:$0xff] %v6413_v35  ;;  %v6414_v18 = vmul.f32 %v6408_v23, %v6390_v45  ;;  %8428 = vmatprep.subr.bf16.mxu1 %v20458_v0  ;;  %8449 = vmatprep.subr.bf16.mxu0 %v20482_v43  ;;  %v20488_v45 = vld [vmem:[%s23436_s25 + $0x394] ss:$24 sps:$4 sm:$0xff]   ;;  %v20486_v23 = vld [vmem:[%s23436_s25 + $0x390] ss:$24 sps:$4 sm:$0xff]  }
 0x7cf   :  { %6421 = vst [vmem:[%s23477_s3 + $0x10] sm:$0xff] %v6415_v44  ;;  %v6416_v54 = vmul.f32 %v6410_v51, %v6392_v27  ;;  %v20480_v44 = vld [vmem:[%s23436_s25 + $0x3c0] ss:$24 sps:$4 sm:$0xff]  }
 0x7d0   :  { %6420 = vst [vmem:[%s23477_s3 + $0x8] sm:$0xff] %v6414_v18  ;;  %v20492_v27 = vld [vmem:[%s23436_s25 + $0x360] ss:$24 sps:$4 sm:$0xff]   ;;  %v20500_v18 = vld [vmem:[%s23436_s25 + $0x334] ss:$24 sps:$4 sm:$0xff]  }
 0x7d1   :  { %6422 = vst [vmem:[%s23477_s3 + $0x18] sm:$0xff] %v6416_v54  ;;  %8429 = vmatpush2.bf16.msra.mxu1 %v20456_v1  ;;  %8450 = vmatpush1.bf16.msra.mxu0 %v20480_v44 }
 0x7d2   :  { %8430 = vmatprep.subr.bf16.mxu1 %v20461_v7  ;;  %8451 = vmatprep.subr.bf16.mxu0 %v20488_v45 }
 0x7d5   :  { %8431 = vmatpush2.bf16.msra.mxu1 %v20459_v36  ;;  %8452 = vmatpush1.bf16.msra.mxu0 %v20486_v23 }
 0x7d6   :  { %8432 = vmatprep.subr.bf16.mxu1 %v20467_v4  ;;  %8453 = vmatprep.subr.bf16.mxu0 %v20494_v47 }
 0x7d9   :  { %8433 = vmatpush2.bf16.msra.mxu1 %v20465_v5  ;;  %8454 = vmatpush1.bf16.msra.mxu0 %v20492_v27 }
 0x7da   :  { %8525 = vmatprep.subr.bf16.mxu1 %v20473_v48  ;;  %8455 = vmatprep.subr.bf16.mxu0 %v20500_v18  ;;  %v7468_v48 = vld [vmem:[%s16769_s7] sm:$0x7] }
 0x7db   :  { %v7477_v50 = vrot.slane %v7468_v48, %v22655_v15 }
 0x7dd   :  { %8456 = vmatpush1.bf16.msra.mxu0 %v20498_v28  ;;  %v20471_v28 = vld [vmem:[%s23436_s25 + $0x458] ss:$24 sps:$4 sm:$0xff]  }
 0x7de   :  { %8457 = vmatprep.subr.bf16.mxu0 %v20506_v60 }
 0x7e1   :  { %8458 = vmatpush1.bf16.msra.mxu0 %v20504_v63  ;;  %v20477_v63 = vld [vmem:[%s23436_s25 + $0x428] ss:$24 sps:$4 sm:$0xff]  }
 0x7e2   :  { %8484 = vmatprep.subr.bf16.mxu0 %v20512_v41  ;;  %v20485_v41 = vld [vmem:[%s23436_s25 + $0x3fc] ss:$24 sps:$4 sm:$0xff]  }
 0x7f7   :  { %v6382_v17 = vpop.f32.mrf.mxu0  ;;  %v23513_v22 = vpop.f32.mrf.mxu1 }
 0x7f8   :  { %v6383_v24 = vadd.f32 %v6382_v17, %v5775_v8 }
 0x7f9   :  { %v6384_v25 = vpop.f32.mrf.mxu0  ;;  %v23515_v26 = vpop.f32.mrf.mxu1 }
 0x7fa   :  { %v6399_v33 = vmul.f32 0.70710677, %v6383_v24  ;;  %v6385_v16 = vadd.f32 %v6384_v25, %v5779_v14  ;;  %v6393_v54 = vmul.f32 0.5, %v6383_v24  ;;  %v7473_v25 = vrot.slane %v7468_v48, %v22650_v13 }
 0x7fb   :  { %v6386_v32 = vpop.f32.mrf.mxu0  ;;  %v6879_v37 = vpop.f32.mrf.mxu1 }
 0x7fc   :  { %22175 = verf.f32 %v6399_v33  ;;  %v6400_v9 = vmul.f32 0.70710677, %v6385_v16  ;;  %v6394_v58 = vmul.f32 0.5, %v6385_v16 }
 0x7fd   :  { %v6387_v35 = vpop.f32.mrf.mxu0  ;;  %v6880_v19 = vpop.f32.mrf.mxu1 }
 0x7fe   :  { %22177 = verf.f32 %v6400_v9 }
 0x809   :  { %v22176_v51 = vpop.eup %22175 }
 0x80a   :  { %v6411_v55 = vadd.f32 1.0, %v22176_v51 }
 0x80b   :  { %v22178_v56 = vpop.eup %22177 }
 0x80c   :  { %v6417_v57 = vmul.f32 %v6411_v55, %v6393_v54  ;;  %v6412_v59 = vadd.f32 1.0, %v22178_v56  ;;  %v20479_v56 = vld [vmem:[%s23436_s25 + $0x42c] ss:$24 sps:$4 sm:$0xff]  }
 0x80e   :  { %6423 = vst [vmem:[%s23477_s3 + $0x20] sm:$0xff] %v6417_v57  ;;  %v6418_v61 = vmul.f32 %v6412_v59, %v6394_v58  ;;  %v7481_v59 = vrot.slane %v7468_v48, %v22694_v2 }
 0x810   :  { %6424 = vst [vmem:[%s23477_s3 + $0x28] sm:$0xff] %v6418_v61  ;;  %s24995_s3 = sld [smem:[%s25011_s0 + %s22278_s30]]  }
 0x817   :  { %v18963_v6 = vpop.f32.mrf.mxu0 }
 0x818   :  { %v7381_v0 = vpop.f32.mrf.mxu1 }
 0x819   :  { %v18964_v1 = vpop.f32.mrf.mxu0 }
 0x81a   :  { %v18965_v7 = vadd.f32 %v18964_v1, %v18963_v6  ;;  %v7383_v36 = vpop.f32.mrf.mxu1 }
 0x81b   :  { %v18966_v42 = vpop.f32.mrf.mxu0 }
 0x81c   :  { %v7385_v10 = vpop.f32.mrf.mxu1 }
 0x81d   :  { %v18967_v4 = vpop.f32.mrf.mxu0  ;;  %v20491_v10 = vld [vmem:[%s23436_s25 + $0x3cc] ss:$24 sps:$4 sm:$0xff]  }
 0x81e   :  { %v7386_v5 = vpop.f32.mrf.mxu1  ;;  %v20489_v4 = vld [vmem:[%s23436_s25 + $0x3c8] ss:$24 sps:$4 sm:$0xff]  }
 0x81f   :  { %v20497_v5 = vld [vmem:[%s23436_s25 + $0x39c] ss:$24 sps:$4 sm:$0xff]  }
 0x838   :  { %v18985_v8 = vpop.f32.mrf.mxu1 }
 0x83a   :  { %v18986_v11 = vpop.f32.mrf.mxu1 }
 0x83b   :  { %v18987_v18 = vadd.f32 %v18986_v11, %v18985_v8  ;;  %v20495_v8 = vld [vmem:[%s23436_s25 + $0x398] ss:$24 sps:$4 sm:$0xff]   ;;  %v20503_v11 = vld [vmem:[%s23436_s25 + $0x36c] ss:$24 sps:$4 sm:$0xff]  }
 0x83c   :  { %v18988_v12 = vpop.f32.mrf.mxu1 }
 0x83d   :  { %v7423_v58 = vadd.f32 %v18987_v18, %v18965_v7  ;;  %v20501_v12 = vld [vmem:[%s23436_s25 + $0x368] ss:$24 sps:$4 sm:$0xff]   ;;  %v20539_v18 = vld [vmem:[%s23436_s25 + $0xd4] ss:$24 sps:$4 sm:$0xff]  }
 0x83e   :  { %v18989_v14 = vpop.f32.mrf.mxu1 }
 0x83f   :  { %v20509_v14 = vld [vmem:[%s23436_s25 + $0x33c] ss:$24 sps:$4 sm:$0xff]  }
 0x857   :  { %v7340_v17 = vpop.f32.mrf.mxu0 }
 0x858   :  { %v7341_v24 = vadd.f32 %v7340_v17, %v23513_v22 }
 0x859   :  { %v7342_v29 = vpop.f32.mrf.mxu0 }
 0x85a   :  { %v7382_v33 = vadd.f32 %v7381_v0, %v7341_v24  ;;  %v7343_v16 = vadd.f32 %v7342_v29, %v23515_v26  ;;  %v20515_v29 = vld [vmem:[%s23436_s25 + $0x30c] ss:$24 sps:$4 sm:$0xff]  }
 0x85b   :  { %v7344_v32 = vpop.f32.mrf.mxu0 }
 0x85c   :  { %v7485_v37 = vadd.f32 %v7473_v25, %v7382_v33  ;;  %v7384_v9 = vadd.f32 %v7383_v36, %v7343_v16  ;;  %v20483_v36 = vld [vmem:[%s23436_s25 + $0x3f8] ss:$24 sps:$4 sm:$0xff]   ;;  %v20513_v32 = vld [vmem:[%s23436_s25 + $0x308] ss:$24 sps:$4 sm:$0xff]  }
 0x85d   :  { %v7345_v35 = vpop.f32.mrf.mxu0  ;;  %v20507_v25 = vld [vmem:[%s23436_s25 + $0x338] ss:$24 sps:$4 sm:$0xff]  }
 0x85e   :  { %v7491_v19 = vmul.f32 0.70710677, %v7485_v37  ;;  %v7486_v43 = vadd.f32 %v7477_v50, %v7384_v9  ;;  %v7488_v47 = vmul.f32 0.5, %v7485_v37  ;;  %v20510_v16 = vld [vmem:[%s23436_s25 + $0x158] ss:$24 sps:$4 sm:$0xff]  }
 0x85f   :  { %v20518_v37 = vld [vmem:[%s23436_s25 + $0x12c] ss:$24 sps:$4 sm:$0xff]   ;;  %v20516_v35 = vld [vmem:[%s23436_s25 + $0x128] ss:$24 sps:$4 sm:$0xff]  }
 0x860   :  { %22179 = verf.f32 %v7491_v19  ;;  %v7492_v44 = vmul.f32 0.70710677, %v7486_v43  ;;  %v7489_v27 = vmul.f32 0.5, %v7486_v43  ;;  %v20521_v9 = vld [vmem:[%s23436_s25 + $0x164] ss:$24 sps:$4 sm:$0xff]  }
 0x861   :  { %v20519_v19 = vld [vmem:[%s23436_s25 + $0x160] ss:$24 sps:$4 sm:$0xff]   ;;  %v20524_v43 = vld [vmem:[%s23436_s25 + $0xfc] ss:$24 sps:$4 sm:$0xff]  }
 0x862   :  { %22181 = verf.f32 %v7492_v44  ;;  %v20527_v44 = vld [vmem:[%s23436_s25 + $0x134] ss:$24 sps:$4 sm:$0xff]  }
 0x86d   :  { %v22180_v22 = vpop.eup %22179 }
 0x86e   :  { %v7497_v45 = vadd.f32 1.0, %v22180_v22  ;;  %v20522_v22 = vld [vmem:[%s23436_s25 + $0xf8] ss:$24 sps:$4 sm:$0xff]  }
 0x86f   :  { %v22182_v23 = vpop.eup %22181 }
 0x870   :  { %v7498_v26 = vadd.f32 1.0, %v22182_v23  ;;  %v7500_v51 = vmul.f32 %v7497_v45, %v7488_v47  ;;  %v20525_v45 = vld [vmem:[%s23436_s25 + $0x130] ss:$24 sps:$4 sm:$0xff]   ;;  %v20530_v23 = vld [vmem:[%s23436_s25 + $0xcc] ss:$24 sps:$4 sm:$0xff]  }
 0x871   :  { %v20533_v47 = vld [vmem:[%s23436_s25 + $0x104] ss:$24 sps:$4 sm:$0xff]  }
 0x872   :  { %v7501_v54 = vmul.f32 %v7498_v26, %v7489_v27  ;;  %v23548_v57 = vpack.c.bf16 %v7500_v51, %v7500_v51  ;;  %v20528_v27 = vld [vmem:[%s23436_s25 + $0xc8] ss:$24 sps:$4 sm:$0xff]   ;;  %v20536_v51 = vld [vmem:[%s23436_s25 + $0x9c] ss:$24 sps:$4 sm:$0xff]  }
 0x873   :  { %v20531_v26 = vld [vmem:[%s23436_s25 + $0x100] ss:$24 sps:$4 sm:$0xff]  }
 0x874   :  { %v23544_v55 = vpack.c.bf16 %v7501_v54, %v7501_v54  ;;  %v20534_v54 = vld [vmem:[%s23436_s25 + $0x98] ss:$24 sps:$4 sm:$0xff]  }
 0x876   :  { %8434 = vmatprep.mubr.bf16.mxu1 %v23544_v55 }
 0x877   :  { %v7462_v60 = vpop.f32.mrf.mxu0  ;;  %8435 = vmatmul.mubr.bf16.vlgmr.msra.gmra.mxu1 %v23548_v57 }
 0x878   :  { %v7463_v61 = vadd.f32 %v7462_v60, %v7423_v58  ;;  %8526 = vmatpush1.bf16.msra.mxu1 %v20471_v28  ;;  %8557 = vmatprep.mubr.bf16.mxu1 %v22242_v53  ;;  %v20537_v28 = vld [vmem:[%s23436_s25 + $0xd0] ss:$24 sps:$4 sm:$0xff]   ;;  %v20545_v58 = vld [vmem:[%s23436_s25 + $0xa4] ss:$24 sps:$4 sm:$0xff]   ;;  %v20543_v60 = vld [vmem:[%s23436_s25 + $0xa0] ss:$24 sps:$4 sm:$0xff]  }
 0x879   :  { %v19115_v6 = vpop.f32.mrf.mxu0  ;;  %8527 = vmatprep.subr.bf16.mxu1 %v20479_v56  ;;  %v20542_v56 = vld [vmem:[%s23436_s25 + $0x6c] ss:$24 sps:$4 sm:$0xff]  }
 0x87a   :  { %v7487_v0 = vadd.f32 %v7481_v59, %v7463_v61  ;;  %v20540_v59 = vld [vmem:[%s23436_s25 + $0x68] ss:$24 sps:$4 sm:$0xff]   ;;  %v20548_v61 = vld [vmem:[%s23436_s25 + $0x3c] ss:$24 sps:$4 sm:$0xff]  }
 0x87b   :  { %v7465_v1 = vpop.f32.mrf.mxu0  ;;  %v20549_v6 = vld [vmem:[%s23436_s25 + $0x70] ss:$24 sps:$4 sm:$0xff]  }
 0x87c   :  { %v7493_v7 = vmul.f32 0.70710677, %v7487_v0  ;;  %8528 = vmatpush1.bf16.msra.mxu1 %v20477_v63  ;;  %v7490_v17 = vmul.f32 0.5, %v7487_v0  ;;  %v20551_v63 = vld [vmem:[%s23436_s25 + $0x74] ss:$24 sps:$4 sm:$0xff]  }
 0x87d   :  { %v19116_v42 = vpop.f32.mrf.mxu0  ;;  %8529 = vmatprep.subr.bf16.mxu1 %v20485_v41  ;;  %v20546_v41 = vld [vmem:[%s23436_s25 + $0x38] ss:$24 sps:$4 sm:$0xff]   ;;  %v20554_v0 = vld [vmem:[%s23436_s25 + $0xc] ss:$24 sps:$4 sm:$0xff]  }
 0x87e   :  { %22183 = verf.f32 %v7493_v7  ;;  %v20557_v1 = vld [vmem:[%s23436_s25 + $0x44] ss:$24 sps:$4 sm:$0xff]   ;;  %v20552_v7 = vld [vmem:[%s23436_s25 + $0x8] ss:$24 sps:$4 sm:$0xff]  }
 0x87f   :  { %v20560_v42 = vld [vmem:[%s23436_s25 + $0x2dc] ss:$24 sps:$4 sm:$0xff]  }
 0x880   :  { %8530 = vmatpush1.bf16.msra.mxu1 %v20483_v36  ;;  %v20555_v36 = vld [vmem:[%s23436_s25 + $0x40] ss:$24 sps:$4 sm:$0xff]  }
 0x881   :  { %8531 = vmatprep.subr.bf16.mxu1 %v20491_v10  ;;  %v20563_v10 = vld [vmem:[%s23436_s25 + $0x14] ss:$24 sps:$4 sm:$0xff]  }
 0x884   :  { %8532 = vmatpush1.bf16.msra.mxu1 %v20489_v4  ;;  %v20558_v4 = vld [vmem:[%s23436_s25 + $0x2d8] ss:$24 sps:$4 sm:$0xff]  }
 0x885   :  { %8533 = vmatprep.subr.bf16.mxu1 %v20497_v5  ;;  %v20561_v5 = vld [vmem:[%s23436_s25 + $0x10] ss:$24 sps:$4 sm:$0xff]  }
 0x888   :  { %8534 = vmatpush1.bf16.msra.mxu1 %v20495_v8  ;;  %v20566_v8 = vld [vmem:[%s23436_s25 + $0x2ac] ss:$24 sps:$4 sm:$0xff]  }
 0x889   :  { %8535 = vmatprep.subr.bf16.mxu1 %v20503_v11  ;;  %v20569_v11 = vld [vmem:[%s23436_s25 + $0x2e4] ss:$24 sps:$4 sm:$0xff]  }
 0x88b   :  { %v22184_v48 = vpop.eup %22183 }
 0x88c   :  { %v7499_v24 = vadd.f32 1.0, %v22184_v48  ;;  %8536 = vmatpush1.bf16.msra.mxu1 %v20501_v12  ;;  %v20564_v12 = vld [vmem:[%s23436_s25 + $0x2a8] ss:$24 sps:$4 sm:$0xff]   ;;  %v20572_v48 = vld [vmem:[%s23436_s25 + $0x27c] ss:$24 sps:$4 sm:$0xff]  }
 0x88d   :  { %8537 = vmatprep.subr.bf16.mxu1 %v20509_v14  ;;  %v20567_v14 = vld [vmem:[%s23436_s25 + $0x2e0] ss:$24 sps:$4 sm:$0xff]  }
 0x88e   :  { %v7502_v33 = vmul.f32 %v7499_v24, %v7490_v17  ;;  %v20575_v17 = vld [vmem:[%s23436_s25 + $0x2b4] ss:$24 sps:$4 sm:$0xff]   ;;  %v20570_v24 = vld [vmem:[%s23436_s25 + $0x278] ss:$24 sps:$4 sm:$0xff]  }
 0x890   :  { %v23567_v50 = vpack.c.bf16 %v7502_v33, %v7502_v33  ;;  %8538 = vmatpush1.bf16.msra.mxu1 %v20507_v25  ;;  %v20573_v25 = vld [vmem:[%s23436_s25 + $0x2b0] ss:$24 sps:$4 sm:$0xff]   ;;  %v20581_v33 = vld [vmem:[%s23436_s25 + $0x284] ss:$24 sps:$4 sm:$0xff]  }
 0x891   :  { %8539 = vmatprep.subr.bf16.mxu1 %v20515_v29  ;;  %v20578_v29 = vld [vmem:[%s23436_s25 + $0x24c] ss:$24 sps:$4 sm:$0xff]  }
 0x892   :  { %8476 = vmatmul.mubr.bf16.vlgmr.msra.gmra.mxu0 %v23567_v50 }
 0x893   :  { %8485 = vmatpush1.bf16.msra.mxu0 %v20510_v16  ;;  %8516 = vmatprep.mubr.bf16.mxu0 %v23544_v55  ;;  %v20576_v16 = vld [vmem:[%s23436_s25 + $0x248] ss:$24 sps:$4 sm:$0xff]  }
 0x894   :  { %8540 = vmatpush1.bf16.msra.mxu1 %v20513_v32  ;;  %8486 = vmatprep.subr.bf16.mxu0 %v20518_v37  ;;  %v20579_v32 = vld [vmem:[%s23436_s25 + $0x280] ss:$24 sps:$4 sm:$0xff]   ;;  %v20584_v37 = vld [vmem:[%s23436_s25 + $0x21c] ss:$24 sps:$4 sm:$0xff]  }
 0x895   :  { %8566 = vmatprep.subr.bf16.mxu1 %v20521_v9  ;;  %v20587_v9 = vld [vmem:[%s23436_s25 + $0x254] ss:$24 sps:$4 sm:$0xff]  }
 0x897   :  { %8487 = vmatpush1.bf16.msra.mxu0 %v20516_v35  ;;  %8558 = vmatmul.mubr.bf16.vlgmr.msra.gmra.mxu1 %v23567_v50  ;;  %v20582_v35 = vld [vmem:[%s23436_s25 + $0x218] ss:$24 sps:$4 sm:$0xff]  }
 0x898   :  { %8567 = vmatpush1.bf16.msra.mxu1 %v20519_v19  ;;  %8598 = vmatprep.mubr.bf16.mxu1 %v23544_v55  ;;  %v20585_v19 = vld [vmem:[%s23436_s25 + $0x250] ss:$24 sps:$4 sm:$0xff]  }
 0x899   :  { %8488 = vmatprep.subr.bf16.mxu0 %v20524_v43  ;;  %8568 = vmatprep.subr.bf16.mxu1 %v20527_v44  ;;  %v20590_v43 = vld [vmem:[%s23436_s25 + $0x1ec] ss:$24 sps:$4 sm:$0xff]  }
 0x89a   :  { %v20593_v44 = vld [vmem:[%s23436_s25 + $0x224] ss:$24 sps:$4 sm:$0xff]  }
 0x89b   :  { %8489 = vmatpush1.bf16.msra.mxu0 %v20522_v22  ;;  %v20588_v22 = vld [vmem:[%s23436_s25 + $0x1e8] ss:$24 sps:$4 sm:$0xff]  }
 0x89c   :  { %8569 = vmatpush1.bf16.msra.mxu1 %v20525_v45  ;;  %8490 = vmatprep.subr.bf16.mxu0 %v20530_v23  ;;  %v20591_v45 = vld [vmem:[%s23436_s25 + $0x220] ss:$24 sps:$4 sm:$0xff]   ;;  %v20596_v23 = vld [vmem:[%s23436_s25 + $0x1bc] ss:$24 sps:$4 sm:$0xff]  }
 0x89d   :  { %8570 = vmatprep.subr.bf16.mxu1 %v20533_v47  ;;  %v20599_v47 = vld [vmem:[%s23436_s25 + $0x1f4] ss:$24 sps:$4 sm:$0xff]  }
 0x89f   :  { %8491 = vmatpush1.bf16.msra.mxu0 %v20528_v27  ;;  %v20594_v27 = vld [vmem:[%s23436_s25 + $0x1b8] ss:$24 sps:$4 sm:$0xff]  }
 0x8a0   :  { %8571 = vmatpush1.bf16.msra.mxu1 %v20531_v26  ;;  %8492 = vmatprep.subr.bf16.mxu0 %v20536_v51  ;;  %v20597_v26 = vld [vmem:[%s23436_s25 + $0x1f0] ss:$24 sps:$4 sm:$0xff]   ;;  %v20602_v51 = vld [vmem:[%s23436_s25 + $0x18c] ss:$24 sps:$4 sm:$0xff]  }
 0x8a1   :  { %8572 = vmatprep.subr.bf16.mxu1 %v20539_v18  ;;  %v20605_v18 = vld [vmem:[%s23436_s25 + $0x1c4] ss:$24 sps:$4 sm:$0xff]  }
 0x8a3   :  { %8493 = vmatpush1.bf16.msra.mxu0 %v20534_v54  ;;  %v20600_v54 = vld [vmem:[%s23436_s25 + $0x188] ss:$24 sps:$4 sm:$0xff]  }
 0x8a4   :  { %8573 = vmatpush1.bf16.msra.mxu1 %v20537_v28  ;;  %8494 = vmatprep.subr.bf16.mxu0 %v20542_v56  ;;  %v20603_v28 = vld [vmem:[%s23436_s25 + $0x1c0] ss:$24 sps:$4 sm:$0xff]   ;;  %v20608_v56 = vld [vmem:[%s23436_s25 + $0x464] ss:$24 sps:$4 sm:$0xff]  }
 0x8a5   :  { %8574 = vmatprep.subr.bf16.mxu1 %v20545_v58  ;;  %v20611_v58 = vld [vmem:[%s23436_s25 + $0x194] ss:$24 sps:$4 sm:$0xff]  }
 0x8a7   :  { %8495 = vmatpush1.bf16.msra.mxu0 %v20540_v59  ;;  %v20606_v59 = vld [vmem:[%s23436_s25 + $0x460] ss:$24 sps:$4 sm:$0xff]  }
 0x8a8   :  { %8575 = vmatpush1.bf16.msra.mxu1 %v20543_v60  ;;  %8496 = vmatprep.subr.bf16.mxu0 %v20548_v61  ;;  %v20609_v60 = vld [vmem:[%s23436_s25 + $0x190] ss:$24 sps:$4 sm:$0xff]   ;;  %v20614_v61 = vld [vmem:[%s23436_s25 + $0x434] ss:$24 sps:$4 sm:$0xff]  }
 0x8a9   :  { %8576 = vmatprep.subr.bf16.mxu1 %v20551_v63  ;;  %v20617_v63 = vld [vmem:[%s23538_s11 + $0x2e4] ss:$16 sps:$4 sm:$0xff]  }
 0x8ab   :  { %8497 = vmatpush1.bf16.msra.mxu0 %v20546_v41  ;;  %v20612_v41 = vld [vmem:[%s23436_s25 + $0x430] ss:$24 sps:$4 sm:$0xff]  }
 0x8ac   :  { %8577 = vmatpush1.bf16.msra.mxu1 %v20549_v6  ;;  %8498 = vmatprep.subr.bf16.mxu0 %v20554_v0  ;;  %v20615_v6 = vld [vmem:[%s23538_s11 + $0x2e0] ss:$16 sps:$4 sm:$0xff]   ;;  %v20620_v0 = vld [vmem:[%s23436_s25 + $0x404] ss:$24 sps:$4 sm:$0xff]  }
 0x8ad   :  { %8578 = vmatprep.subr.bf16.mxu1 %v20557_v1  ;;  %v20623_v1 = vld [vmem:[%s23538_s11 + $0x2c4] ss:$16 sps:$4 sm:$0xff]  }
 0x8af   :  { %8499 = vmatpush1.bf16.msra.mxu0 %v20552_v7  ;;  %v20618_v7 = vld [vmem:[%s23436_s25 + $0x400] ss:$24 sps:$4 sm:$0xff]  }
 0x8b0   :  { %8579 = vmatpush1.bf16.msra.mxu1 %v20555_v36  ;;  %8500 = vmatprep.subr.bf16.mxu0 %v20560_v42  ;;  %v20621_v36 = vld [vmem:[%s23538_s11 + $0x2c0] ss:$16 sps:$4 sm:$0xff]   ;;  %v20626_v42 = vld [vmem:[%s23436_s25 + $0x3d4] ss:$24 sps:$4 sm:$0xff]  }
 0x8b1   :  { %8580 = vmatprep.subr.bf16.mxu1 %v20563_v10  ;;  %v20629_v10 = vld [vmem:[%s23538_s11 + $0x2a4] ss:$16 sps:$4 sm:$0xff]  }
 0x8b3   :  { %8501 = vmatpush2.bf16.msra.mxu0 %v20558_v4  ;;  %v20624_v4 = vld [vmem:[%s23436_s25 + $0x3d0] ss:$24 sps:$4 sm:$0xff]  }
 0x8b4   :  { %8581 = vmatpush1.bf16.msra.mxu1 %v20561_v5  ;;  %8502 = vmatprep.subr.bf16.mxu0 %v20566_v8  ;;  %v20627_v5 = vld [vmem:[%s23538_s11 + $0x2a0] ss:$16 sps:$4 sm:$0xff]   ;;  %v20632_v8 = vld [vmem:[%s23436_s25 + $0x3a4] ss:$24 sps:$4 sm:$0xff]  }
 0x8b5   :  { %8582 = vmatprep.subr.bf16.mxu1 %v20569_v11  ;;  %v20635_v11 = vld [vmem:[%s23538_s11 + $0x284] ss:$16 sps:$4 sm:$0xff]  }
 0x8b7   :  { %8503 = vmatpush2.bf16.msra.mxu0 %v20564_v12  ;;  %v20630_v12 = vld [vmem:[%s23436_s25 + $0x3a0] ss:$24 sps:$4 sm:$0xff]  }
 0x8b8   :  { %8583 = vmatpush2.bf16.msra.mxu1 %v20567_v14  ;;  %8504 = vmatprep.subr.bf16.mxu0 %v20572_v48  ;;  %v20633_v14 = vld [vmem:[%s23538_s11 + $0x280] ss:$16 sps:$4 sm:$0xff]   ;;  %v20638_v48 = vld [vmem:[%s23436_s25 + $0x374] ss:$24 sps:$4 sm:$0xff]  }
 0x8b9   :  { %8584 = vmatprep.subr.bf16.mxu1 %v20575_v17  ;;  %v20641_v17 = vld [vmem:[%s23538_s11 + $0x264] ss:$16 sps:$4 sm:$0xff]  }
 0x8bb   :  { %8505 = vmatpush2.bf16.msra.mxu0 %v20570_v24  ;;  %v20636_v24 = vld [vmem:[%s23436_s25 + $0x370] ss:$24 sps:$4 sm:$0xff]  }
 0x8bc   :  { %8585 = vmatpush2.bf16.msra.mxu1 %v20573_v25  ;;  %8506 = vmatprep.subr.bf16.mxu0 %v20578_v29  ;;  %v20639_v25 = vld [vmem:[%s23538_s11 + $0x260] ss:$16 sps:$4 sm:$0xff]   ;;  %v20644_v29 = vld [vmem:[%s23436_s25 + $0x344] ss:$24 sps:$4 sm:$0xff]  }
 0x8bd   :  { %8586 = vmatprep.subr.bf16.mxu1 %v20581_v33  ;;  %v20647_v33 = vld [vmem:[%s23538_s11 + $0x244] ss:$16 sps:$4 sm:$0xff]  }
 0x8bf   :  { %8507 = vmatpush2.bf16.msra.mxu0 %v20576_v16  ;;  %v20642_v16 = vld [vmem:[%s23436_s25 + $0x340] ss:$24 sps:$4 sm:$0xff]  }
 0x8c0   :  { %8587 = vmatpush2.bf16.msra.mxu1 %v20579_v32  ;;  %8508 = vmatprep.subr.bf16.mxu0 %v20584_v37  ;;  %v20645_v32 = vld [vmem:[%s23538_s11 + $0x240] ss:$16 sps:$4 sm:$0xff]   ;;  %v20650_v37 = vld [vmem:[%s23436_s25 + $0x314] ss:$24 sps:$4 sm:$0xff]  }
 0x8c1   :  { %8588 = vmatprep.subr.bf16.mxu1 %v20587_v9  ;;  %v20653_v9 = vld [vmem:[%s23538_s11 + $0x224] ss:$16 sps:$4 sm:$0xff]  }
 0x8c3   :  { %8509 = vmatpush2.bf16.msra.mxu0 %v20582_v35  ;;  %v20648_v35 = vld [vmem:[%s23436_s25 + $0x310] ss:$24 sps:$4 sm:$0xff]   ;;  %s16771_s25 = sld [smem:[%s25011_s0 + %s22276_s22]]  }
 0x8c4   :  { %8589 = vmatpush2.bf16.msra.mxu1 %v20585_v19  ;;  %8510 = vmatprep.subr.bf16.mxu0 %v20590_v43  ;;  %v20651_v19 = vld [vmem:[%s23538_s11 + $0x220] ss:$16 sps:$4 sm:$0xff]   ;;  %v20656_v43 = vld [vmem:[%s23538_s11 + $0xe4] ss:$16 sps:$4 sm:$0xff]  }
 0x8c5   :  { %8590 = vmatprep.subr.bf16.mxu1 %v20593_v44  ;;  %v20659_v44 = vld [vmem:[%s23538_s11 + $0x204] ss:$16 sps:$4 sm:$0xff]  }
 0x8c7   :  { %8511 = vmatpush2.bf16.msra.mxu0 %v20588_v22  ;;  %v20654_v22 = vld [vmem:[%s23538_s11 + $0xe0] ss:$16 sps:$4 sm:$0xff]  }
 0x8c8   :  { %8591 = vmatpush2.bf16.msra.mxu1 %v20591_v45  ;;  %8512 = vmatprep.subr.bf16.mxu0 %v20596_v23  ;;  %v20657_v45 = vld [vmem:[%s23538_s11 + $0x200] ss:$16 sps:$4 sm:$0xff]   ;;  %v20662_v23 = vld [vmem:[%s23538_s11 + $0xc4] ss:$16 sps:$4 sm:$0xff]  }
 0x8c9   :  { %8592 = vmatprep.subr.bf16.mxu1 %v20599_v47  ;;  %v20665_v47 = vld [vmem:[%s23538_s11 + $0xec] ss:$16 sps:$4 sm:$0xff]  }
 0x8cb   :  { %8513 = vmatpush2.bf16.msra.mxu0 %v20594_v27  ;;  %v20660_v27 = vld [vmem:[%s23538_s11 + $0xc0] ss:$16 sps:$4 sm:$0xff]  }
 0x8cc   :  { %8593 = vmatpush2.bf16.msra.mxu1 %v20597_v26  ;;  %8514 = vmatprep.subr.bf16.mxu0 %v20602_v51  ;;  %v20663_v26 = vld [vmem:[%s23538_s11 + $0xe8] ss:$16 sps:$4 sm:$0xff]   ;;  %v20668_v51 = vld [vmem:[%s23538_s11 + $0xa4] ss:$16 sps:$4 sm:$0xff]  }
 0x8cd   :  { %8594 = vmatprep.subr.bf16.mxu1 %v20605_v18  ;;  %v20671_v18 = vld [vmem:[%s23538_s11 + $0xcc] ss:$16 sps:$4 sm:$0xff]  }
 0x8cf   :  { %8515 = vmatpush2.bf16.msra.mxu0 %v20600_v54  ;;  %v20666_v54 = vld [vmem:[%s23538_s11 + $0xa0] ss:$16 sps:$4 sm:$0xff]  }
 0x8d0   :  { %8595 = vmatpush2.bf16.msra.mxu1 %v20603_v28  ;;  %8607 = vmatprep.subr.bf16.mxu0 %v20608_v56  ;;  %v20669_v28 = vld [vmem:[%s23538_s11 + $0xc8] ss:$16 sps:$4 sm:$0xff]   ;;  %v20674_v56 = vld [vmem:[%s23538_s11 + $0x84] ss:$16 sps:$4 sm:$0xff]  }
 0x8d1   :  { %8596 = vmatprep.subr.bf16.mxu1 %v20611_v58  ;;  %v20677_v58 = vld [vmem:[%s23538_s11 + $0xac] ss:$16 sps:$4 sm:$0xff]  }
 0x8d2   :  { %8517 = vmatmul.mubr.bf16.vlgmr.msra.gmra.mxu0 %v23548_v57 }
 0x8d3   :  { %8608 = vmatpush1.bf16.msra.mxu0 %v20606_v59  ;;  %8639 = vmatprep.mubr.bf16.mxu0 %v22242_v53  ;;  %v20672_v59 = vld [vmem:[%s23538_s11 + $0x80] ss:$16 sps:$4 sm:$0xff]  }
 0x8d4   :  { %8597 = vmatpush2.bf16.msra.mxu1 %v20609_v60  ;;  %8609 = vmatprep.subr.bf16.mxu0 %v20614_v61  ;;  %v20675_v60 = vld [vmem:[%s23538_s11 + $0xa8] ss:$16 sps:$4 sm:$0xff]   ;;  %v20680_v61 = vld [vmem:[%s23538_s11 + $0x64] ss:$16 sps:$4 sm:$0xff]  }
 0x8d5   :  { %9429 = vmatprep.subr.bf16.mxu1 %v20617_v63  ;;  %v20683_v63 = vld [vmem:[%s23538_s11 + $0x8c] ss:$16 sps:$4 sm:$0xff]  }
 0x8d7   :  { %8599 = vmatmul.mubr.bf16.vlgmr.msra.gmra.mxu1 %v23548_v57  ;;  %8610 = vmatpush1.bf16.msra.mxu0 %v20612_v41  ;;  %v20681_v41 = vld [vmem:[%s23538_s11 + $0x88] ss:$16 sps:$4 sm:$0xff]  }
 0x8d8   :  { %9430 = vmatpush1.bf16.msra.mxu1 %v20615_v6  ;;  %8611 = vmatprep.subr.bf16.mxu0 %v20620_v0  ;;  %v20686_v6 = vld [vmem:[%s23538_s11 + $0x44] ss:$16 sps:$4 sm:$0xff]   ;;  %v20689_v0 = vld [vmem:[%s23538_s11 + $0x6c] ss:$16 sps:$4 sm:$0xff]  }
 0x8d9   :  { %9431 = vmatprep.subr.bf16.mxu1 %v20623_v1  ;;  %9461 = vmatprep.mubr.bf16.mxu1 %v22242_v53  ;;  %v20684_v1 = vld [vmem:[%s23538_s11 + $0x40] ss:$16 sps:$4 sm:$0xff]  }
 0x8db   :  { %8612 = vmatpush1.bf16.msra.mxu0 %v20618_v7  ;;  %v20687_v7 = vld [vmem:[%s23538_s11 + $0x68] ss:$16 sps:$4 sm:$0xff]  }
 0x8dc   :  { %9432 = vmatpush1.bf16.msra.mxu1 %v20621_v36  ;;  %8613 = vmatprep.subr.bf16.mxu0 %v20626_v42  ;;  %v20692_v36 = vld [vmem:[%s23538_s11 + $0x24] ss:$16 sps:$4 sm:$0xff]   ;;  %v20695_v42 = vld [vmem:[%s23538_s11 + $0x4c] ss:$16 sps:$4 sm:$0xff]  }
 0x8dd   :  { %9433 = vmatprep.subr.bf16.mxu1 %v20629_v10  ;;  %v20690_v10 = vld [vmem:[%s23538_s11 + $0x20] ss:$16 sps:$4 sm:$0xff]  }
 0x8df   :  { %8614 = vmatpush1.bf16.msra.mxu0 %v20624_v4  ;;  %v20693_v4 = vld [vmem:[%s23538_s11 + $0x48] ss:$16 sps:$4 sm:$0xff]  }
 0x8e0   :  { %9434 = vmatpush1.bf16.msra.mxu1 %v20627_v5  ;;  %8615 = vmatprep.subr.bf16.mxu0 %v20632_v8  ;;  %v20698_v5 = vld [vmem:[%s23538_s11 + $0x4] ss:$16 sps:$4 sm:$0xff]   ;;  %v20701_v8 = vld [vmem:[%s23538_s11 + $0x2c] ss:$16 sps:$4 sm:$0xff]  }
 0x8e1   :  { %9435 = vmatprep.subr.bf16.mxu1 %v20635_v11  ;;  %v20696_v11 = vld [vmem:[%s23538_s11] ss:$16 sps:$4 sm:$0xff]  }
 0x8e3   :  { %8616 = vmatpush1.bf16.msra.mxu0 %v20630_v12  ;;  %v20699_v12 = vld [vmem:[%s23538_s11 + $0x28] ss:$16 sps:$4 sm:$0xff]  }
 0x8e4   :  { %9436 = vmatpush1.bf16.msra.mxu1 %v20633_v14  ;;  %8617 = vmatprep.subr.bf16.mxu0 %v20638_v48  ;;  %v20704_v14 = vld [vmem:[%s23538_s11 + $0x1e4] ss:$16 sps:$4 sm:$0xff]   ;;  %v20707_v48 = vld [vmem:[%s23538_s11 + $0xc] ss:$16 sps:$4 sm:$0xff]  }
 0x8e5   :  { %9437 = vmatprep.subr.bf16.mxu1 %v20641_v17  ;;  %v20702_v17 = vld [vmem:[%s23538_s11 + $0x1e0] ss:$16 sps:$4 sm:$0xff]  }
 0x8e7   :  { %8618 = vmatpush1.bf16.msra.mxu0 %v20636_v24  ;;  %v20705_v24 = vld [vmem:[%s23538_s11 + $0x8] ss:$16 sps:$4 sm:$0xff]  }
 0x8e8   :  { %9438 = vmatpush1.bf16.msra.mxu1 %v20639_v25  ;;  %8619 = vmatprep.subr.bf16.mxu0 %v20644_v29  ;;  %v20710_v25 = vld [vmem:[%s23538_s11 + $0x1c4] ss:$16 sps:$4 sm:$0xff]   ;;  %v20713_v29 = vld [vmem:[%s23538_s11 + $0x1ec] ss:$16 sps:$4 sm:$0xff]  }
 0x8e9   :  { %9439 = vmatprep.subr.bf16.mxu1 %v20647_v33  ;;  %v20708_v33 = vld [vmem:[%s23538_s11 + $0x1c0] ss:$16 sps:$4 sm:$0xff]  }
 0x8eb   :  { %8620 = vmatpush1.bf16.msra.mxu0 %v20642_v16  ;;  %v20711_v16 = vld [vmem:[%s23538_s11 + $0x1e8] ss:$16 sps:$4 sm:$0xff]  }
 0x8ec   :  { %9440 = vmatpush1.bf16.msra.mxu1 %v20645_v32  ;;  %8621 = vmatprep.subr.bf16.mxu0 %v20650_v37  ;;  %v20716_v32 = vld [vmem:[%s23538_s11 + $0x1a4] ss:$16 sps:$4 sm:$0xff]   ;;  %v20719_v37 = vld [vmem:[%s23538_s11 + $0x1cc] ss:$16 sps:$4 sm:$0xff]  }
 0x8ed   :  { %9441 = vmatprep.subr.bf16.mxu1 %v20653_v9  ;;  %v20714_v9 = vld [vmem:[%s23538_s11 + $0x1a0] ss:$16 sps:$4 sm:$0xff]  }
 0x8ef   :  { %8622 = vmatpush1.bf16.msra.mxu0 %v20648_v35  ;;  %v20717_v35 = vld [vmem:[%s23538_s11 + $0x1c8] ss:$16 sps:$4 sm:$0xff]  }
 0x8f0   :  { %9442 = vmatpush1.bf16.msra.mxu1 %v20651_v19  ;;  %9388 = vmatprep.subr.bf16.mxu0 %v20656_v43  ;;  %v20722_v19 = vld [vmem:[%s23538_s11 + $0x184] ss:$16 sps:$4 sm:$0xff]   ;;  %v20725_v43 = vld [vmem:[%s23538_s11 + $0x1ac] ss:$16 sps:$4 sm:$0xff]  }
 0x8f1   :  { %9443 = vmatprep.subr.bf16.mxu1 %v20659_v44  ;;  %v20720_v44 = vld [vmem:[%s23538_s11 + $0x180] ss:$16 sps:$4 sm:$0xff]  }
 0x8f2   :  { %8640 = vmatmul.mubr.bf16.vlgmr.msra.gmra.mxu0 %v23567_v50 }
 0x8f3   :  { %9389 = vmatpush1.bf16.msra.mxu0 %v20654_v22  ;;  %9420 = vmatprep.mubr.bf16.mxu0 %v23544_v55  ;;  %v20723_v22 = vld [vmem:[%s23538_s11 + $0x1a8] ss:$16 sps:$4 sm:$0xff]  }
 0x8f4   :  { %9444 = vmatpush1.bf16.msra.mxu1 %v20657_v45  ;;  %9390 = vmatprep.subr.bf16.mxu0 %v20662_v23  ;;  %v20728_v45 = vld [vmem:[%s23538_s11 + $0x164] ss:$16 sps:$4 sm:$0xff]   ;;  %v20731_v23 = vld [vmem:[%s23538_s11 + $0x18c] ss:$16 sps:$4 sm:$0xff]  }
 0x8f5   :  { %9470 = vmatprep.subr.bf16.mxu1 %v20665_v47  ;;  %v20726_v47 = vld [vmem:[%s23538_s11 + $0x160] ss:$16 sps:$4 sm:$0xff]  }
 0x8f7   :  { %9391 = vmatpush1.bf16.msra.mxu0 %v20660_v27  ;;  %9462 = vmatmul.mubr.bf16.vlgmr.msra.gmra.mxu1 %v23567_v50  ;;  %v20729_v27 = vld [vmem:[%s23538_s11 + $0x188] ss:$16 sps:$4 sm:$0xff]  }
 0x8f8   :  { %9471 = vmatpush1.bf16.msra.mxu1 %v20663_v26  ;;  %9502 = vmatprep.mubr.bf16.mxu1 %v23544_v55  ;;  %v20678_v55 = vld [vmem:[%s23538_s11 + $0x60] ss:$16 sps:$4 sm:$0xff]   ;;  %v20734_v26 = vld [vmem:[%s23538_s11 + $0x144] ss:$16 sps:$4 sm:$0xff]  }
 0x8f9   :  { %9392 = vmatprep.subr.bf16.mxu0 %v20668_v51  ;;  %9472 = vmatprep.subr.bf16.mxu1 %v20671_v18  ;;  %v20737_v51 = vld [vmem:[%s23538_s11 + $0x16c] ss:$16 sps:$4 sm:$0xff]   ;;  %v20732_v18 = vld [vmem:[%s23538_s11 + $0x140] ss:$16 sps:$4 sm:$0xff]  }
 0x8fb   :  { %9393 = vmatpush1.bf16.msra.mxu0 %v20666_v54  ;;  %v20735_v54 = vld [vmem:[%s23538_s11 + $0x168] ss:$16 sps:$4 sm:$0xff]  }
 0x8fc   :  { %9473 = vmatpush1.bf16.msra.mxu1 %v20669_v28  ;;  %9394 = vmatprep.subr.bf16.mxu0 %v20674_v56  ;;  %v20740_v28 = vld [vmem:[%s23538_s11 + $0x124] ss:$16 sps:$4 sm:$0xff]   ;;  %v20743_v56 = vld [vmem:[%s23538_s11 + $0x14c] ss:$16 sps:$4 sm:$0xff]  }
 0x8fd   :  { %9474 = vmatprep.subr.bf16.mxu1 %v20677_v58  ;;  %v20738_v58 = vld [vmem:[%s23538_s11 + $0x120] ss:$16 sps:$4 sm:$0xff]  }
 0x8ff   :  { %9395 = vmatpush1.bf16.msra.mxu0 %v20672_v59  ;;  %v20741_v59 = vld [vmem:[%s23538_s11 + $0x148] ss:$16 sps:$4 sm:$0xff]  }
 0x900   :  { %9475 = vmatpush1.bf16.msra.mxu1 %v20675_v60  ;;  %9396 = vmatprep.subr.bf16.mxu0 %v20680_v61  ;;  %v20746_v60 = vld [vmem:[%s23538_s11 + $0x104] ss:$16 sps:$4 sm:$0xff]   ;;  %v20749_v61 = vld [vmem:[%s23538_s11 + $0x12c] ss:$16 sps:$4 sm:$0xff]  }
 0x901   :  { %9476 = vmatprep.subr.bf16.mxu1 %v20683_v63  ;;  %v20744_v63 = vld [vmem:[%s23538_s11 + $0x100] ss:$16 sps:$4 sm:$0xff]  }
 0x903   :  { %9397 = vmatpush1.bf16.msra.mxu0 %v20678_v55  ;;  %v20747_v55 = vld [vmem:[%s23538_s11 + $0x128] ss:$16 sps:$4 sm:$0xff]  }
 0x904   :  { %9477 = vmatpush1.bf16.msra.mxu1 %v20681_v41  ;;  %9398 = vmatprep.subr.bf16.mxu0 %v20686_v6  ;;  %v20752_v41 = vld [vmem:[%s23538_s11 + $0x2ec] ss:$16 sps:$4 sm:$0xff]  }
 0x905   :  { %9478 = vmatprep.subr.bf16.mxu1 %v20689_v0  ;;  %v20755_v6 = vld [vmem:[%s23538_s11 + $0x10c] ss:$16 sps:$4 sm:$0xff]   ;;  %v20750_v0 = vld [vmem:[%s23538_s11 + $0x2e8] ss:$16 sps:$4 sm:$0xff]  }
 0x907   :  { %9399 = vmatpush1.bf16.msra.mxu0 %v20684_v1  ;;  %v20753_v1 = vld [vmem:[%s23538_s11 + $0x108] ss:$16 sps:$4 sm:$0xff]  }
 0x908   :  { %9479 = vmatpush1.bf16.msra.mxu1 %v20687_v7  ;;  %9400 = vmatprep.subr.bf16.mxu0 %v20692_v36  ;;  %v20758_v7 = vld [vmem:[%s23538_s11 + $0x2cc] ss:$16 sps:$4 sm:$0xff]   ;;  %v20761_v36 = vld [vmem:[%s23610_s15 + $0x2e4] ss:$16 sps:$4 sm:$0xff]  }
 0x909   :  { %9480 = vmatprep.subr.bf16.mxu1 %v20695_v42  ;;  %v20756_v42 = vld [vmem:[%s23538_s11 + $0x2c8] ss:$16 sps:$4 sm:$0xff]  }
 0x90b   :  { %9401 = vmatpush1.bf16.msra.mxu0 %v20690_v10  ;;  %v20759_v10 = vld [vmem:[%s23610_s15 + $0x2e0] ss:$16 sps:$4 sm:$0xff]  }
 0x90c   :  { %9481 = vmatpush1.bf16.msra.mxu1 %v20693_v4  ;;  %9402 = vmatprep.subr.bf16.mxu0 %v20698_v5  ;;  %v20764_v4 = vld [vmem:[%s23538_s11 + $0x2ac] ss:$16 sps:$4 sm:$0xff]   ;;  %v20767_v5 = vld [vmem:[%s23610_s15 + $0x2c4] ss:$16 sps:$4 sm:$0xff]  }
 0x90d   :  { %9482 = vmatprep.subr.bf16.mxu1 %v20701_v8 }
 0x90f   :  { %9403 = vmatpush1.bf16.msra.mxu0 %v20696_v11  ;;  %v20762_v11 = vld [vmem:[%s23538_s11 + $0x2a8] ss:$16 sps:$4 sm:$0xff]  }
 0x910   :  { %9483 = vmatpush1.bf16.msra.mxu1 %v20699_v12  ;;  %9404 = vmatprep.subr.bf16.mxu0 %v20704_v14  ;;  %v20765_v12 = vld [vmem:[%s23610_s15 + $0x2c0] ss:$16 sps:$4 sm:$0xff]   ;;  %v20770_v14 = vld [vmem:[%s23538_s11 + $0x28c] ss:$16 sps:$4 sm:$0xff]  }
 0x911   :  { %9484 = vmatprep.subr.bf16.mxu1 %v20707_v48 }
 0x913   :  { %9405 = vmatpush2.bf16.msra.mxu0 %v20702_v17  ;;  %v20773_v17 = vld [vmem:[%s23610_s15 + $0x2a4] ss:$16 sps:$4 sm:$0xff]  }
 0x914   :  { %9485 = vmatpush1.bf16.msra.mxu1 %v20705_v24  ;;  %9406 = vmatprep.subr.bf16.mxu0 %v20710_v25  ;;  %v20768_v24 = vld [vmem:[%s23538_s11 + $0x288] ss:$16 sps:$4 sm:$0xff]   ;;  %v20771_v25 = vld [vmem:[%s23610_s15 + $0x2a0] ss:$16 sps:$4 sm:$0xff]  }
 0x915   :  { %9486 = vmatprep.subr.bf16.mxu1 %v20713_v29  ;;  %v20776_v29 = vld [vmem:[%s23538_s11 + $0x26c] ss:$16 sps:$4 sm:$0xff]  }
 0x917   :  { %9407 = vmatpush2.bf16.msra.mxu0 %v20708_v33 }
 0x918   :  { %9487 = vmatpush2.bf16.msra.mxu1 %v20711_v16  ;;  %9408 = vmatprep.subr.bf16.mxu0 %v20716_v32  ;;  %v20779_v16 = vld [vmem:[%s23610_s15 + $0x284] ss:$16 sps:$4 sm:$0xff]   ;;  %v20774_v32 = vld [vmem:[%s23538_s11 + $0x268] ss:$16 sps:$4 sm:$0xff]  }
 0x919   :  { %9488 = vmatprep.subr.bf16.mxu1 %v20719_v37  ;;  %v20777_v37 = vld [vmem:[%s23610_s15 + $0x280] ss:$16 sps:$4 sm:$0xff]  }
 0x91b   :  { %9409 = vmatpush2.bf16.msra.mxu0 %v20714_v9  ;;  %v20782_v9 = vld [vmem:[%s23538_s11 + $0x24c] ss:$16 sps:$4 sm:$0xff]  }
 0x91c   :  { %9489 = vmatpush2.bf16.msra.mxu1 %v20717_v35  ;;  %9410 = vmatprep.subr.bf16.mxu0 %v20722_v19  ;;  %v20785_v35 = vld [vmem:[%s23610_s15 + $0x264] ss:$16 sps:$4 sm:$0xff]   ;;  %v20780_v19 = vld [vmem:[%s23538_s11 + $0x248] ss:$16 sps:$4 sm:$0xff]  }
 0x91d   :  { %9490 = vmatprep.subr.bf16.mxu1 %v20725_v43  ;;  %v20783_v43 = vld [vmem:[%s23610_s15 + $0x260] ss:$16 sps:$4 sm:$0xff]  }
 0x91f   :  { %9411 = vmatpush2.bf16.msra.mxu0 %v20720_v44  ;;  %v20788_v44 = vld [vmem:[%s23538_s11 + $0x22c] ss:$16 sps:$4 sm:$0xff]  }
 0x920   :  { %9491 = vmatpush2.bf16.msra.mxu1 %v20723_v22  ;;  %9412 = vmatprep.subr.bf16.mxu0 %v20728_v45  ;;  %v20791_v22 = vld [vmem:[%s23610_s15 + $0x244] ss:$16 sps:$4 sm:$0xff]   ;;  %v20786_v45 = vld [vmem:[%s23538_s11 + $0x228] ss:$16 sps:$4 sm:$0xff]  }
 0x921   :  { %9492 = vmatprep.subr.bf16.mxu1 %v20731_v23  ;;  %v20789_v23 = vld [vmem:[%s23610_s15 + $0x240] ss:$16 sps:$4 sm:$0xff]  }
 0x923   :  { %9413 = vmatpush2.bf16.msra.mxu0 %v20726_v47  ;;  %v20794_v47 = vld [vmem:[%s23538_s11 + $0x20c] ss:$16 sps:$4 sm:$0xff]  }
 0x924   :  { %9493 = vmatpush2.bf16.msra.mxu1 %v20729_v27  ;;  %9414 = vmatprep.subr.bf16.mxu0 %v20734_v26  ;;  %v20797_v27 = vld [vmem:[%s23610_s15 + $0x224] ss:$16 sps:$4 sm:$0xff]  }
 0x925   :  { %9494 = vmatprep.subr.bf16.mxu1 %v20737_v51  ;;  %v23782_v26 = vld [vmem:[%s16774_s19] sm:$0x3f]  ;;  %v20792_v51 = vld [vmem:[%s23538_s11 + $0x208] ss:$16 sps:$4 sm:$0xff]  }
 0x927   :  { %9415 = vmatpush2.bf16.msra.mxu0 %v20732_v18  ;;  %v20795_v18 = vld [vmem:[%s23610_s15 + $0x220] ss:$16 sps:$4 sm:$0xff]  }
 0x928   :  { %9495 = vmatpush2.bf16.msra.mxu1 %v20735_v54  ;;  %9416 = vmatprep.subr.bf16.mxu0 %v20740_v28  ;;  %v20800_v54 = vld [vmem:[%s23610_s15 + $0xe4] ss:$16 sps:$4 sm:$0xff]   ;;  %v7655_v28 = vrot.slane %v23782_v26, %v22650_v13 }
 0x929   :  { %9496 = vmatprep.subr.bf16.mxu1 %v20743_v56  ;;  %v20803_v56 = vld [vmem:[%s23610_s15 + $0x204] ss:$16 sps:$4 sm:$0xff]  }
 0x92b   :  { %9417 = vmatpush2.bf16.msra.mxu0 %v20738_v58  ;;  %v7659_v58 = vrot.slane %v23782_v26, %v22655_v15 }
 0x92c   :  { %9497 = vmatpush2.bf16.msra.mxu1 %v20741_v59  ;;  %9418 = vmatprep.subr.bf16.mxu0 %v20746_v60  ;;  %v20798_v59 = vld [vmem:[%s23610_s15 + $0xe0] ss:$16 sps:$4 sm:$0xff]  }
 0x92d   :  { %9498 = vmatprep.subr.bf16.mxu1 %v20749_v61  ;;  %v20801_v60 = vld [vmem:[%s23610_s15 + $0x200] ss:$16 sps:$4 sm:$0xff]   ;;  %v20806_v61 = vld [vmem:[%s23610_s15 + $0xc4] ss:$16 sps:$4 sm:$0xff]  }
 0x92f   :  { %9419 = vmatpush2.bf16.msra.mxu0 %v20744_v63 }
 0x930   :  { %9499 = vmatpush2.bf16.msra.mxu1 %v20747_v55  ;;  %9511 = vmatprep.subr.bf16.mxu0 %v20752_v41  ;;  %v20809_v55 = vld [vmem:[%s23610_s15 + $0x3e4] ss:$16 sps:$4 sm:$0xff]  }
 0x931   :  { %9500 = vmatprep.subr.bf16.mxu1 %v20755_v6 }
 0x932   :  { %9421 = vmatmul.mubr.bf16.vlgmr.msra.gmra.mxu0 %v23548_v57 }
 0x933   :  { %9512 = vmatpush1.bf16.msra.mxu0 %v20750_v0  ;;  %9543 = vmatprep.mubr.bf16.mxu0 %v22242_v53 }
 0x934   :  { %9501 = vmatpush2.bf16.msra.mxu1 %v20753_v1  ;;  %9513 = vmatprep.subr.bf16.mxu0 %v20758_v7  ;;  %v20804_v1 = vld [vmem:[%s23610_s15 + $0xc0] ss:$16 sps:$4 sm:$0xff]  }
 0x935   :  { %10233 = vmatprep.subr.bf16.mxu1 %v20761_v36  ;;  %v20807_v36 = vld [vmem:[%s23610_s15 + $0x3e0] ss:$16 sps:$4 sm:$0xff]  }
 0x937   :  { %9503 = vmatmul.mubr.bf16.vlgmr.msra.gmra.mxu1 %v23548_v57  ;;  %9514 = vmatpush1.bf16.msra.mxu0 %v20756_v42  ;;  %v23756_v8 = vpop.f32.mrf.mxu1  ;;  %v20812_v42 = vld [vmem:[%s23610_s15 + $0xa4] ss:$16 sps:$4 sm:$0xff]  }
 0x938   :  { %10234 = vmatpush1.bf16.msra.mxu1 %v20759_v10  ;;  %10265 = vmatprep.mubr.bf16.mxu1 %v22914_v21  ;;  %v8437_v63 = vadd.f32 %v23756_v8, %v7655_v28 }
 0x939   :  { %v8438_v48 = vpop.f32.mrf.mxu1  ;;  %9515 = vmatprep.subr.bf16.mxu0 %v20764_v4  ;;  %10235 = vmatprep.subr.bf16.mxu1 %v20767_v5 }
 0x93a   :  { %v8439_v6 = vadd.f32 %v8438_v48, %v7659_v58  ;;  %v20813_v48 = vld [vmem:[%s23610_s15 + $0x3c0] ss:$16 sps:$4 sm:$0xff]  }
 0x93b   :  { %9516 = vmatpush1.bf16.msra.mxu0 %v20762_v11  ;;  %v8440_v57 = vpop.f32.mrf.mxu1  ;;  %v20834_v58 = vld [vmem:[%s23610_s15 + $0x20] ss:$16 sps:$4 sm:$0xff]  }
 0x93c   :  { %10236 = vmatpush1.bf16.msra.mxu1 %v20765_v12  ;;  %9517 = vmatprep.subr.bf16.mxu0 %v20770_v14  ;;  %v20810_v12 = vld [vmem:[%s23610_s15 + $0xa0] ss:$16 sps:$4 sm:$0xff]  }
 0x93d   :  { %v8441_v33 = vpop.f32.mrf.mxu1  ;;  %10237 = vmatprep.subr.bf16.mxu1 %v20773_v17  ;;  %v20818_v17 = vld [vmem:[%s23610_s15 + $0x84] ss:$16 sps:$4 sm:$0xff]  }
 0x93e   :  { %v20819_v33 = vld [vmem:[%s23610_s15 + $0x3a0] ss:$16 sps:$4 sm:$0xff]  }
 0x93f   :  { %9518 = vmatpush1.bf16.msra.mxu0 %v20768_v24  ;;  %v20821_v24 = vld [vmem:[%s23610_s15 + $0x3a4] ss:$16 sps:$4 sm:$0xff]  }
 0x940   :  { %10238 = vmatpush1.bf16.msra.mxu1 %v20771_v25  ;;  %9519 = vmatprep.subr.bf16.mxu0 %v20776_v29  ;;  %v20816_v29 = vld [vmem:[%s23610_s15 + $0x80] ss:$16 sps:$4 sm:$0xff]  }
 0x941   :  { %10239 = vmatprep.subr.bf16.mxu1 %v20779_v16  ;;  %v20824_v16 = vld [vmem:[%s23610_s15 + $0x64] ss:$16 sps:$4 sm:$0xff]  }
 0x943   :  { %9520 = vmatpush1.bf16.msra.mxu0 %v20774_v32 }
 0x944   :  { %10240 = vmatpush1.bf16.msra.mxu1 %v20777_v37  ;;  %9521 = vmatprep.subr.bf16.mxu0 %v20782_v9  ;;  %v20827_v37 = vld [vmem:[%s23610_s15 + $0x384] ss:$16 sps:$4 sm:$0xff]   ;;  %v20822_v9 = vld [vmem:[%s23610_s15 + $0x60] ss:$16 sps:$4 sm:$0xff]  }
 0x945   :  { %10241 = vmatprep.subr.bf16.mxu1 %v20785_v35  ;;  %v20825_v35 = vld [vmem:[%s23610_s15 + $0x380] ss:$16 sps:$4 sm:$0xff]  }
 0x947   :  { %9522 = vmatpush1.bf16.msra.mxu0 %v20780_v19  ;;  %v20830_v19 = vld [vmem:[%s23610_s15 + $0x44] ss:$16 sps:$4 sm:$0xff]  }
 0x948   :  { %10242 = vmatpush1.bf16.msra.mxu1 %v20783_v43  ;;  %9523 = vmatprep.subr.bf16.mxu0 %v20788_v44  ;;  %v20833_v43 = vld [vmem:[%s23610_s15 + $0x364] ss:$16 sps:$4 sm:$0xff]   ;;  %v20828_v44 = vld [vmem:[%s23610_s15 + $0x40] ss:$16 sps:$4 sm:$0xff]  }
 0x949   :  { %10243 = vmatprep.subr.bf16.mxu1 %v20791_v22 }
 0x94b   :  { %9524 = vmatpush1.bf16.msra.mxu0 %v20786_v45  ;;  %v20831_v45 = vld [vmem:[%s23610_s15 + $0x360] ss:$16 sps:$4 sm:$0xff]  }
 0x94c   :  { %10244 = vmatpush1.bf16.msra.mxu1 %v20789_v23  ;;  %9525 = vmatprep.subr.bf16.mxu0 %v20794_v47  ;;  %v20836_v23 = vld [vmem:[%s23610_s15 + $0x24] ss:$16 sps:$4 sm:$0xff]  }
 0x94d   :  { %10245 = vmatprep.subr.bf16.mxu1 %v20797_v27 }
 0x94f   :  { %9526 = vmatpush1.bf16.msra.mxu0 %v20792_v51  ;;  %v20839_v51 = vld [vmem:[%s23610_s15 + $0x344] ss:$16 sps:$4 sm:$0xff]  }
 0x950   :  { %10246 = vmatpush1.bf16.msra.mxu1 %v20795_v18  ;;  %10192 = vmatprep.subr.bf16.mxu0 %v20800_v54 }
 0x951   :  { %10247 = vmatprep.subr.bf16.mxu1 %v20803_v56 }
 0x952   :  { %9544 = vmatmul.mubr.bf16.vlgmr.msra.gmra.mxu0 %v23567_v50  ;;  %v8477_v41 = vpop.f32.mrf.mxu0  ;;  %v20815_v50 = vld [vmem:[%s23610_s15 + $0x3c4] ss:$16 sps:$4 sm:$0xff]  }
 0x953   :  { %v8478_v0 = vadd.f32 %v8477_v41, %v8437_v63  ;;  %10193 = vmatpush1.bf16.msra.mxu0 %v20798_v59  ;;  %10224 = vmatprep.mubr.bf16.mxu0 %v22887_v30  ;;  %v20837_v59 = vld [vmem:[%s23610_s15 + $0x340] ss:$16 sps:$4 sm:$0xff]   ;;  %v20845_v63 = vld [vmem:[%s23610_s15 + $0x324] ss:$16 sps:$4 sm:$0xff]  }
 0x954   :  { %10248 = vmatpush1.bf16.msra.mxu1 %v20801_v60  ;;  %v8479_v7 = vpop.f32.mrf.mxu0  ;;  %10194 = vmatprep.subr.bf16.mxu0 %v20806_v61  ;;  %v20842_v60 = vld [vmem:[%s23610_s15 + $0x4] ss:$16 sps:$4 sm:$0xff]   ;;  %v20843_v41 = vld [vmem:[%s23610_s15 + $0x320] ss:$16 sps:$4 sm:$0xff]  }
 0x955   :  { %v8654_v10 = vmul.f32 0.70710677, %v8478_v0  ;;  %v8480_v4 = vadd.f32 %v8479_v7, %v8439_v6  ;;  %10249 = vmatprep.subr.bf16.mxu1 %v20809_v55  ;;  %v8648_v47 = vmul.f32 0.5, %v8478_v0  ;;  %v20840_v55 = vld [vmem:[%s23610_s15] ss:$16 sps:$4 sm:$0xff]  }
 0x956   :  { %v8481_v5 = vpop.f32.mrf.mxu0  ;;  %v20848_v6 = vld [vmem:[%s23610_s15 + $0x1e4] ss:$16 sps:$4 sm:$0xff]   ;;  %v20849_v7 = vld [vmem:[%s23610_s15 + $0x300] ss:$16 sps:$4 sm:$0xff]  }
 0x957   :  { %22185 = verf.f32 %v8654_v10  ;;  %v8655_v8 = vmul.f32 0.70710677, %v8480_v4  ;;  %v23803_v11 = vpop.f32.mrf.mxu1  ;;  %10195 = vmatpush1.bf16.msra.mxu0 %v20804_v1  ;;  %v8649_v28 = vmul.f32 0.5, %v8480_v4  ;;  %v20851_v0 = vld [vmem:[%s23610_s15 + $0x304] ss:$16 sps:$4 sm:$0xff]  }
 0x958   :  { %10250 = vmatpush2.bf16.msra.mxu1 %v20807_v36  ;;  %v8482_v14 = vpop.f32.mrf.mxu0  ;;  %10196 = vmatprep.subr.bf16.mxu0 %v20812_v42  ;;  %v20846_v1 = vld [vmem:[%s23610_s15 + $0x1e0] ss:$16 sps:$4 sm:$0xff]   ;;  %v20854_v36 = vld [vmem:[%s23610_s15 + $0x1c4] ss:$16 sps:$4 sm:$0xff]   ;;  %v20857_v42 = vld [vmem:[%s23610_s15 + $0x2ec] ss:$16 sps:$4 sm:$0xff]  }
 0x959   :  { %22187 = verf.f32 %v8655_v8  ;;  %v23808_v57 = vpop.f32.mrf.mxu1  ;;  %10251 = vmatprep.subr.bf16.mxu1 %v20815_v50  ;;  %v20852_v10 = vld [vmem:[%s23610_s15 + $0x1c0] ss:$16 sps:$4 sm:$0xff]   ;;  %v20855_v4 = vld [vmem:[%s23610_s15 + $0x2e8] ss:$16 sps:$4 sm:$0xff]   ;;  %v20860_v50 = vld [vmem:[%s23610_s15 + $0x1a4] ss:$16 sps:$4 sm:$0xff]  }
 0x95a   :  { %v20863_v5 = vld [vmem:[%s23610_s15 + $0x2cc] ss:$16 sps:$4 sm:$0xff]   ;;  %v20858_v8 = vld [vmem:[%s23610_s15 + $0x1a0] ss:$16 sps:$4 sm:$0xff]   ;;  %v20866_v14 = vld [vmem:[%s23610_s15 + $0x184] ss:$16 sps:$4 sm:$0xff]  }
 0x95b   :  { %v8563_v25 = vpop.f32.mrf.mxu1  ;;  %10197 = vmatpush1.bf16.msra.mxu0 %v20810_v12  ;;  %v20861_v12 = vld [vmem:[%s23610_s15 + $0x2c8] ss:$16 sps:$4 sm:$0xff]  }
 0x95c   :  { %10252 = vmatpush2.bf16.msra.mxu1 %v20813_v48  ;;  %10198 = vmatprep.subr.bf16.mxu0 %v20818_v17  ;;  %v20869_v48 = vld [vmem:[%s23610_s15 + $0x2ac] ss:$16 sps:$4 sm:$0xff]   ;;  %v20864_v17 = vld [vmem:[%s23610_s15 + $0x180] ss:$16 sps:$4 sm:$0xff]   ;;  %v20872_v25 = vld [vmem:[%s23610_s15 + $0x164] ss:$16 sps:$4 sm:$0xff]  }
 0x95d   :  { %v8564_v32 = vpop.f32.mrf.mxu1  ;;  %10253 = vmatprep.subr.bf16.mxu1 %v20821_v24  ;;  %v20867_v24 = vld [vmem:[%s23610_s15 + $0x2a8] ss:$16 sps:$4 sm:$0xff]  }
 0x95e   :  { %v20881_v32 = vld [vmem:[%s23610_s15 + $0x26c] ss:$16 sps:$4 sm:$0xff]  }
 0x95f   :  { %10199 = vmatpush1.bf16.msra.mxu0 %v20816_v29  ;;  %v20875_v29 = vld [vmem:[%s23610_s15 + $0x28c] ss:$16 sps:$4 sm:$0xff]  }
 0x960   :  { %10254 = vmatpush2.bf16.msra.mxu1 %v20819_v33  ;;  %10200 = vmatprep.subr.bf16.mxu0 %v20824_v16  ;;  %v20873_v33 = vld [vmem:[%s23610_s15 + $0x288] ss:$16 sps:$4 sm:$0xff]   ;;  %v20878_v16 = vld [vmem:[%s23610_s15 + $0x144] ss:$16 sps:$4 sm:$0xff]  }
 0x961   :  { %10255 = vmatprep.subr.bf16.mxu1 %v20827_v37  ;;  %v20876_v37 = vld [vmem:[%s23610_s15 + $0x140] ss:$16 sps:$4 sm:$0xff]  }
 0x963   :  { %10201 = vmatpush1.bf16.msra.mxu0 %v20822_v9  ;;  %v20879_v9 = vld [vmem:[%s23610_s15 + $0x268] ss:$16 sps:$4 sm:$0xff]  }
 0x964   :  { %v22186_v22 = vpop.eup %22185  ;;  %10256 = vmatpush2.bf16.msra.mxu1 %v20825_v35  ;;  %10202 = vmatprep.subr.bf16.mxu0 %v20830_v19  ;;  %v20884_v35 = vld [vmem:[%s23610_s15 + $0x124] ss:$16 sps:$4 sm:$0xff]   ;;  %v20887_v19 = vld [vmem:[%s23610_s15 + $0x24c] ss:$16 sps:$4 sm:$0xff]  }
 0x965   :  { %v8666_v27 = vadd.f32 1.0, %v22186_v22  ;;  %10257 = vmatprep.subr.bf16.mxu1 %v20833_v43  ;;  %v20882_v43 = vld [vmem:[%s23610_s15 + $0x120] ss:$16 sps:$4 sm:$0xff]   ;;  %v20890_v22 = vld [vmem:[%s23610_s15 + $0x104] ss:$16 sps:$4 sm:$0xff]  }
 0x966   :  { %v22188_v18 = vpop.eup %22187 }
 0x967   :  { %v8672_v54 = vmul.f32 %v8666_v27, %v8648_v47  ;;  %v8667_v56 = vadd.f32 1.0, %v22188_v18  ;;  %10203 = vmatpush1.bf16.msra.mxu0 %v20828_v44  ;;  %v20885_v44 = vld [vmem:[%s23610_s15 + $0x248] ss:$16 sps:$4 sm:$0xff]   ;;  %v20896_v27 = vld [vmem:[%s23610_s15 + $0xec] ss:$16 sps:$4 sm:$0xff]   ;;  %v7663_v18 = vrot.slane %v23782_v26, %v22694_v2 }
 0x968   :  { %10258 = vmatpush2.bf16.msra.mxu1 %v20831_v45  ;;  %10204 = vmatprep.subr.bf16.mxu0 %v20836_v23  ;;  %v20893_v45 = vld [vmem:[%s23610_s15 + $0x22c] ss:$16 sps:$4 sm:$0xff]   ;;  %v20888_v23 = vld [vmem:[%s23610_s15 + $0x100] ss:$16 sps:$4 sm:$0xff]   ;;  %v20891_v47 = vld [vmem:[%s23610_s15 + $0x228] ss:$16 sps:$4 sm:$0xff]  }
 0x969   :  { %8678 = vst [vmem:[%s23821_s23] sm:$0xff] %v8672_v54  ;;  %v8673_v61 = vmul.f32 %v8667_v56, %v8649_v28  ;;  %10259 = vmatprep.subr.bf16.mxu1 %v20839_v51  ;;  %v20899_v51 = vld [vmem:[%s23610_s15 + $0x20c] ss:$16 sps:$4 sm:$0xff]   ;;  %v20894_v54 = vld [vmem:[%s23610_s15 + $0xe8] ss:$16 sps:$4 sm:$0xff]  }
 0x96a   :  { %v20897_v28 = vld [vmem:[%s23610_s15 + $0x208] ss:$16 sps:$4 sm:$0xff]   ;;  %v20902_v56 = vld [vmem:[%s23610_s15 + $0xcc] ss:$16 sps:$4 sm:$0xff]  }
 0x96b   :  { %8679 = vst [vmem:[%s23821_s23 + $0x8] sm:$0xff] %v8673_v61  ;;  %10205 = vmatpush1.bf16.msra.mxu0 %v20834_v58  ;;  %v7667_v58 = vrot.slane %v23782_v26, %v22697_v3 }
 0x96c   :  { %10260 = vmatpush2.bf16.msra.mxu1 %v20837_v59  ;;  %10206 = vmatprep.subr.bf16.mxu0 %v20842_v60  ;;  %v20905_v59 = vld [vmem:[%s23610_s15 + $0x3ec] ss:$16 sps:$4 sm:$0xff]  }
 0x96d   :  { %10261 = vmatprep.subr.bf16.mxu1 %v20845_v63  ;;  %v20900_v63 = vld [vmem:[%s23610_s15 + $0xc8] ss:$16 sps:$4 sm:$0xff]  }
 0x96f   :  { %10207 = vmatpush1.bf16.msra.mxu0 %v20840_v55 }
 0x970   :  { %10262 = vmatpush2.bf16.msra.mxu1 %v20843_v41  ;;  %10208 = vmatprep.subr.bf16.mxu0 %v20848_v6  ;;  %v20903_v41 = vld [vmem:[%s23610_s15 + $0x3e8] ss:$16 sps:$4 sm:$0xff]   ;;  %v20908_v6 = vld [vmem:[%s23610_s15 + $0xac] ss:$16 sps:$4 sm:$0xff]  }
 0x971   :  { %10263 = vmatprep.subr.bf16.mxu1 %v20851_v0 }
 0x973   :  { %10209 = vmatpush2.bf16.msra.mxu0 %v20846_v1 }
 0x974   :  { %10264 = vmatpush2.bf16.msra.mxu1 %v20849_v7  ;;  %10210 = vmatprep.subr.bf16.mxu0 %v20854_v36  ;;  %v20911_v7 = vld [vmem:[%s23610_s15 + $0x3cc] ss:$16 sps:$4 sm:$0xff]  }
 0x975   :  { %10315 = vmatprep.subr.bf16.mxu1 %v20857_v42 }
 0x977   :  { %10211 = vmatpush2.bf16.msra.mxu0 %v20852_v10  ;;  %10266 = vmatmul.mubr.bf16.vlgmr.msra.gmra.mxu1 %v22917_v38 }
 0x978   :  { %10316 = vmatpush1.bf16.msra.mxu1 %v20855_v4  ;;  %10347 = vmatprep.mubr.bf16.mxu1 %v22914_v21  ;;  %v20870_v21 = vld [vmem:[%s23610_s15 + $0x160] ss:$16 sps:$4 sm:$0xff]   ;;  %v20906_v4 = vld [vmem:[%s23610_s15 + $0xa8] ss:$16 sps:$4 sm:$0xff]  }
 0x979   :  { %10212 = vmatprep.subr.bf16.mxu0 %v20860_v50  ;;  %10317 = vmatprep.subr.bf16.mxu1 %v20863_v5  ;;  %v20909_v5 = vld [vmem:[%s23610_s15 + $0x3c8] ss:$16 sps:$4 sm:$0xff]  }
 0x97b   :  { %10213 = vmatpush2.bf16.msra.mxu0 %v20858_v8 }
 0x97c   :  { %10318 = vmatpush1.bf16.msra.mxu1 %v20861_v12  ;;  %10214 = vmatprep.subr.bf16.mxu0 %v20866_v14 }
 0x97d   :  { %10319 = vmatprep.subr.bf16.mxu1 %v20869_v48  ;;  %v20912_v48 = vld [vmem:[%s23610_s15 + $0x88] ss:$16 sps:$4 sm:$0xff]  }
 0x97f   :  { %10215 = vmatpush2.bf16.msra.mxu0 %v20864_v17  ;;  %v20915_v17 = vld [vmem:[%s23610_s15 + $0x3a8] ss:$16 sps:$4 sm:$0xff]  }
 0x980   :  { %10320 = vmatpush1.bf16.msra.mxu1 %v20867_v24  ;;  %10216 = vmatprep.subr.bf16.mxu0 %v20872_v25  ;;  %v20920_v24 = vld [vmem:[%s23610_s15 + $0x6c] ss:$16 sps:$4 sm:$0xff]  }
 0x981   :  { %10321 = vmatprep.subr.bf16.mxu1 %v20875_v29  ;;  %v20923_v29 = vld [vmem:[%s23610_s15 + $0x38c] ss:$16 sps:$4 sm:$0xff]  }
 0x983   :  { %10217 = vmatpush2.bf16.msra.mxu0 %v20870_v21  ;;  %v20918_v21 = vld [vmem:[%s23610_s15 + $0x68] ss:$16 sps:$4 sm:$0xff]  }
 0x984   :  { %10322 = vmatpush1.bf16.msra.mxu1 %v20873_v33  ;;  %10218 = vmatprep.subr.bf16.mxu0 %v20878_v16  ;;  %v20921_v33 = vld [vmem:[%s23610_s15 + $0x388] ss:$16 sps:$4 sm:$0xff]   ;;  %v20926_v16 = vld [vmem:[%s23610_s15 + $0x4c] ss:$16 sps:$4 sm:$0xff]  }
 0x985   :  { %10323 = vmatprep.subr.bf16.mxu1 %v20881_v32  ;;  %v20924_v32 = vld [vmem:[%s23610_s15 + $0x48] ss:$16 sps:$4 sm:$0xff]  }
 0x987   :  { %10219 = vmatpush2.bf16.msra.mxu0 %v20876_v37  ;;  %v20929_v37 = vld [vmem:[%s23610_s15 + $0x36c] ss:$16 sps:$4 sm:$0xff]  }
 0x988   :  { %10324 = vmatpush1.bf16.msra.mxu1 %v20879_v9  ;;  %10220 = vmatprep.subr.bf16.mxu0 %v20884_v35  ;;  %v20927_v9 = vld [vmem:[%s23610_s15 + $0x368] ss:$16 sps:$4 sm:$0xff]   ;;  %v20932_v35 = vld [vmem:[%s23610_s15 + $0x2c] ss:$16 sps:$4 sm:$0xff]  }
 0x989   :  { %10325 = vmatprep.subr.bf16.mxu1 %v20887_v19  ;;  %v20935_v19 = vld [vmem:[%s23610_s15 + $0x34c] ss:$16 sps:$4 sm:$0xff]  }
 0x98b   :  { %10221 = vmatpush2.bf16.msra.mxu0 %v20882_v43  ;;  %v20930_v43 = vld [vmem:[%s23610_s15 + $0x28] ss:$16 sps:$4 sm:$0xff]  }
 0x98c   :  { %10326 = vmatpush1.bf16.msra.mxu1 %v20885_v44  ;;  %10222 = vmatprep.subr.bf16.mxu0 %v20890_v22  ;;  %v20933_v22 = vld [vmem:[%s23610_s15 + $0x348] ss:$16 sps:$4 sm:$0xff]  }
 0x98d   :  { %10327 = vmatprep.subr.bf16.mxu1 %v20893_v45  ;;  %v20938_v45 = vld [vmem:[%s23610_s15 + $0xc] ss:$16 sps:$4 sm:$0xff]  }
 0x98f   :  { %10223 = vmatpush2.bf16.msra.mxu0 %v20888_v23 }
 0x990   :  { %10328 = vmatpush1.bf16.msra.mxu1 %v20891_v47  ;;  %10274 = vmatprep.subr.bf16.mxu0 %v20896_v27  ;;  %v20941_v27 = vld [vmem:[%s23610_s15 + $0x32c] ss:$16 sps:$4 sm:$0xff]  }
 0x991   :  { %10329 = vmatprep.subr.bf16.mxu1 %v20899_v51 }
 0x992   :  { %v8518_v60 = vpop.f32.mrf.mxu0  ;;  %10225 = vmatmul.mubr.bf16.vlgmr.msra.gmra.mxu0 %v22890_v34 }
 0x993   :  { %v8519_v61 = vadd.f32 %v8518_v60, %v7663_v18  ;;  %10275 = vmatpush1.bf16.msra.mxu0 %v20894_v54  ;;  %10306 = vmatprep.mubr.bf16.mxu0 %v22887_v30 }
 0x994   :  { %v8520_v55 = vpop.f32.mrf.mxu0  ;;  %10330 = vmatpush1.bf16.msra.mxu1 %v20897_v28  ;;  %10276 = vmatprep.subr.bf16.mxu0 %v20902_v56  ;;  %v20936_v56 = vld [vmem:[%s23610_s15 + $0x8] ss:$16 sps:$4 sm:$0xff]  }
 0x995   :  { %v8560_v0 = vadd.f32 %v23803_v11, %v8519_v61  ;;  %v8521_v1 = vadd.f32 %v8520_v55, %v7667_v58  ;;  %10331 = vmatprep.subr.bf16.mxu1 %v20905_v59  ;;  %v20914_v11 = vld [vmem:[%s23610_s15 + $0x8c] ss:$16 sps:$4 sm:$0xff]   ;;  %v20939_v58 = vld [vmem:[%s23610_s15 + $0x328] ss:$16 sps:$4 sm:$0xff]  }
 0x996   :  { %v8522_v36 = vpop.f32.mrf.mxu0  ;;  %v20944_v59 = vld [vmem:[%s23610_s15 + $0x1ec] ss:$16 sps:$4 sm:$0xff]   ;;  %v20942_v55 = vld [vmem:[%s23610_s15 + $0x1e8] ss:$16 sps:$4 sm:$0xff]  }
 0x997   :  { %v8656_v42 = vmul.f32 0.70710677, %v8560_v0  ;;  %v8562_v10 = vadd.f32 %v23808_v57, %v8521_v1  ;;  %v23888_v30 = vpop.f32.mrf.mxu1  ;;  %10277 = vmatpush1.bf16.msra.mxu0 %v20900_v63  ;;  %v20917_v57 = vld [vmem:[%s23610_s15 + $0x3ac] ss:$16 sps:$4 sm:$0xff]   ;;  %v8650_v23 = vmul.f32 0.5, %v8560_v0  ;;  %v7671_v63 = vrot.slane %v23782_v26, %v22725_v62 }
 0x998   :  { %v8523_v50 = vpop.f32.mrf.mxu0  ;;  %10332 = vmatpush2.bf16.msra.mxu1 %v20903_v41  ;;  %10278 = vmatprep.subr.bf16.mxu0 %v20908_v6  ;;  %v20947_v61 = vld [vmem:[%s23610_s15 + $0x30c] ss:$16 sps:$4 sm:$0xff]   ;;  %v20945_v41 = vld [vmem:[%s23610_s15 + $0x308] ss:$16 sps:$4 sm:$0xff]   ;;  %v7675_v0 = vrot.slane %v23782_v26, %v23245_v20 }
 0x999   :  { %22189 = verf.f32 %v8656_v42  ;;  %v8657_v8 = vmul.f32 0.70710677, %v8562_v10  ;;  %v23893_v12 = vpop.f32.mrf.mxu1  ;;  %10333 = vmatprep.subr.bf16.mxu1 %v20911_v7  ;;  %v8651_v54 = vmul.f32 0.5, %v8562_v10  ;;  %v20950_v6 = vld [vmem:[%s23610_s15 + $0x1cc] ss:$16 sps:$4 sm:$0xff]   ;;  %v8601_v1 = vadd.f32 %v23888_v30, %v7671_v63 }
 0x99a   :  { %v20948_v7 = vld [vmem:[%s23610_s15 + $0x1c8] ss:$16 sps:$4 sm:$0xff]   ;;  %v20953_v42 = vld [vmem:[%s23610_s15 + $0x1ac] ss:$16 sps:$4 sm:$0xff]   ;;  %v8603_v10 = vadd.f32 %v23893_v12, %v7675_v0 }
 0x99b   :  { %22191 = verf.f32 %v8657_v8  ;;  %v8604_v14 = vpop.f32.mrf.mxu1  ;;  %10279 = vmatpush1.bf16.msra.mxu0 %v20906_v4  ;;  %v20984_v63 = vld [vmem:[%s23899_s27 + $0x60] ss:$24 sps:$4 sm:$0xff]  }
 0x99c   :  { %10334 = vmatpush2.bf16.msra.mxu1 %v20909_v5  ;;  %10280 = vmatprep.subr.bf16.mxu0 %v20914_v11  ;;  %v20951_v11 = vld [vmem:[%s23610_s15 + $0x1a8] ss:$16 sps:$4 sm:$0xff]   ;;  %v20956_v14 = vld [vmem:[%s23610_s15 + $0x18c] ss:$16 sps:$4 sm:$0xff]  }
 0x99d   :  { %v8605_v25 = vpop.f32.mrf.mxu1  ;;  %10335 = vmatprep.subr.bf16.mxu1 %v20917_v57  ;;  %v20990_v0 = vld [vmem:[%s23899_s27] ss:$24 sps:$4 sm:$0xff]  }
 0x99e   :  { %v20959_v25 = vld [vmem:[%s23610_s15 + $0x16c] ss:$16 sps:$4 sm:$0xff]  }
 0x99f   :  { %10281 = vmatpush1.bf16.msra.mxu0 %v20912_v48 }
 0x9a0   :  { %10336 = vmatpush2.bf16.msra.mxu1 %v20915_v17  ;;  %10282 = vmatprep.subr.bf16.mxu0 %v20920_v24  ;;  %v20954_v17 = vld [vmem:[%s23610_s15 + $0x188] ss:$16 sps:$4 sm:$0xff]  }
 0x9a1   :  { %10337 = vmatprep.subr.bf16.mxu1 %v20923_v29 }
 0x9a3   :  { %10283 = vmatpush1.bf16.msra.mxu0 %v20918_v21  ;;  %v20957_v21 = vld [vmem:[%s23610_s15 + $0x168] ss:$16 sps:$4 sm:$0xff]  }
 0x9a4   :  { %10338 = vmatpush2.bf16.msra.mxu1 %v20921_v33  ;;  %10284 = vmatprep.subr.bf16.mxu0 %v20926_v16  ;;  %v20960_v33 = vld [vmem:[%s23610_s15 + $0x148] ss:$16 sps:$4 sm:$0xff]   ;;  %v20965_v16 = vld [vmem:[%s23610_s15 + $0x12c] ss:$16 sps:$4 sm:$0xff]  }
 0x9a5   :  { %10339 = vmatprep.subr.bf16.mxu1 %v20929_v37 }
 0x9a6   :  { %v22190_v44 = vpop.eup %22189 }
 0x9a7   :  { %v8668_v47 = vadd.f32 1.0, %v22190_v44  ;;  %10285 = vmatpush1.bf16.msra.mxu0 %v20924_v32 }
 0x9a8   :  { %v22192_v51 = vpop.eup %22191  ;;  %10340 = vmatpush2.bf16.msra.mxu1 %v20927_v9  ;;  %10286 = vmatprep.subr.bf16.mxu0 %v20932_v35  ;;  %v20963_v35 = vld [vmem:[%s23610_s15 + $0x128] ss:$16 sps:$4 sm:$0xff]  }
 0x9a9   :  { %v8674_v18 = vmul.f32 %v8668_v47, %v8650_v23  ;;  %v8669_v28 = vadd.f32 1.0, %v22192_v51  ;;  %10341 = vmatprep.subr.bf16.mxu1 %v20935_v19  ;;  %v20966_v47 = vld [vmem:[%s23610_s15 + $0x108] ss:$16 sps:$4 sm:$0xff]  }
 0x9aa   :  { %v20969_v51 = vld [vmem:[%s23899_s27 + $0x150] ss:$24 sps:$4 sm:$0xff]  }
 0x9ab   :  { %8680 = vst [vmem:[%s23821_s23 + $0x10] sm:$0xff] %v8674_v18  ;;  %v8675_v60 = vmul.f32 %v8669_v28, %v8651_v54  ;;  %10287 = vmatpush1.bf16.msra.mxu0 %v20930_v43  ;;  %v20968_v43 = vld [vmem:[%s23610_s15 + $0x10c] ss:$16 sps:$4 sm:$0xff]   ;;  %v20972_v54 = vld [vmem:[%s23899_s27 + $0x120] ss:$24 sps:$4 sm:$0xff]  }
 0x9ac   :  { %10342 = vmatpush2.bf16.msra.mxu1 %v20933_v22  ;;  %10288 = vmatprep.subr.bf16.mxu0 %v20938_v45  ;;  %v20974_v18 = vld [vmem:[%s23899_s27 + $0x124] ss:$24 sps:$4 sm:$0xff]   ;;  %v20977_v28 = vld [vmem:[%s23899_s27 + $0xf4] ss:$24 sps:$4 sm:$0xff]  }
 0x9ad   :  { %8681 = vst [vmem:[%s23821_s23 + $0x18] sm:$0xff] %v8675_v60  ;;  %10343 = vmatprep.subr.bf16.mxu1 %v20941_v27  ;;  %v20971_v27 = vld [vmem:[%s23899_s27 + $0x154] ss:$24 sps:$4 sm:$0xff]  }
 0x9ae   :  { %v20983_v60 = vld [vmem:[%s23899_s27 + $0x94] ss:$24 sps:$4 sm:$0xff]  }
 0x9af   :  { %10289 = vmatpush1.bf16.msra.mxu0 %v20936_v56  ;;  %v20975_v56 = vld [vmem:[%s23899_s27 + $0xf0] ss:$24 sps:$4 sm:$0xff]  }
 0x9b0   :  { %10344 = vmatpush2.bf16.msra.mxu1 %v20939_v58  ;;  %10290 = vmatprep.subr.bf16.mxu0 %v20944_v59  ;;  %v20980_v58 = vld [vmem:[%s23899_s27 + $0xc4] ss:$24 sps:$4 sm:$0xff]   ;;  %v20978_v59 = vld [vmem:[%s23899_s27 + $0xc0] ss:$24 sps:$4 sm:$0xff]  }
 0x9b1   :  { %10345 = vmatprep.subr.bf16.mxu1 %v20947_v61  ;;  %v20981_v61 = vld [vmem:[%s23899_s27 + $0x90] ss:$24 sps:$4 sm:$0xff]  }
 0x9b2   :  { %v8641_v36 = vpop.f32.mrf.mxu0 }
 0x9b3   :  { %v8642_v4 = vadd.f32 %v8641_v36, %v8601_v1  ;;  %10291 = vmatpush2.bf16.msra.mxu0 %v20942_v55  ;;  %v20989_v55 = vld [vmem:[%s23899_s27 + $0x34] ss:$24 sps:$4 sm:$0xff]   ;;  %v20998_v36 = vld [vmem:[%s23899_s27 + $0x2a4] ss:$24 sps:$4 sm:$0xff]  }
 0x9b4   :  { %v8643_v50 = vpop.f32.mrf.mxu0  ;;  %10346 = vmatpush2.bf16.msra.mxu1 %v20945_v41  ;;  %10292 = vmatprep.subr.bf16.mxu0 %v20950_v6  ;;  %v20987_v41 = vld [vmem:[%s23899_s27 + $0x30] ss:$24 sps:$4 sm:$0xff]   ;;  %v20992_v6 = vld [vmem:[%s23899_s27 + $0x4] ss:$24 sps:$4 sm:$0xff]   ;;  %v20995_v1 = vld [vmem:[%s23899_s27 + $0x2d4] ss:$24 sps:$4 sm:$0xff]  }
 0x9b5   :  { %v8658_v26 = vmul.f32 0.70710677, %v8642_v4  ;;  %v8644_v5 = vadd.f32 %v8643_v50, %v8603_v10  ;;  %v8652_v37 = vmul.f32 0.5, %v8642_v4  ;;  %v21017_v10 = vld [vmem:[%s23899_s27 + $0x450] ss:$24 sps:$4 sm:$0xff]  }
 0x9b6   :  { %v8645_v8 = vpop.f32.mrf.mxu0 }
 0x9b7   :  { %22193 = verf.f32 %v8658_v26  ;;  %v8659_v30 = vmul.f32 0.70710677, %v8644_v5  ;;  %v23935_v57 = vpop.f32.mrf.mxu1  ;;  %10293 = vmatpush2.bf16.msra.mxu0 %v20948_v7  ;;  %10348 = vmatmul.mubr.bf16.vlgmr.msra.gmra.mxu1 %v22917_v38  ;;  %v20962_v38 = vld [vmem:[%s23610_s15 + $0x14c] ss:$16 sps:$4 sm:$0xff]   ;;  %v8653_v22 = vmul.f32 0.5, %v8644_v5 }
 0x9b8   :  { %v8646_v12 = vpop.f32.mrf.mxu0  ;;  %10294 = vmatprep.subr.bf16.mxu0 %v20953_v42  ;;  %v20993_v7 = vld [vmem:[%s23899_s27 + $0x2d0] ss:$24 sps:$4 sm:$0xff]   ;;  %v21019_v42 = vld [vmem:[%s23899_s27 + $0x454] ss:$24 sps:$4 sm:$0xff]   ;;  %v20996_v26 = vld [vmem:[%s23899_s27 + $0x2a0] ss:$24 sps:$4 sm:$0xff]  }
 0x9b9   :  { %22195 = verf.f32 %v8659_v30  ;;  %v23939_v48 = vpop.f32.mrf.mxu1  ;;  %11631 = vmatprep.subr.bf16.mxu1 %v21019_v42  ;;  %v21023_v5 = vld [vmem:[%s23899_s27 + $0x420] ss:$24 sps:$4 sm:$0xff]   ;;  %v21001_v30 = vld [vmem:[%s23899_s27 + $0x274] ss:$24 sps:$4 sm:$0xff]   ;;  %v21077_v42 = vld [vmem:[%s23899_s27 + $0x570] ss:$24 sps:$4 sm:$0xff]  }
 0x9ba   :  { %11632 = vmatpush1.bf16.msra.mxu1 %v21017_v10  ;;  %v21085_v10 = vld [vmem:[%s23899_s27 + $0x544] ss:$24 sps:$4 sm:$0xff]  }
 0x9bb   :  { %v9467_v24 = vpop.f32.mrf.mxu1  ;;  %10295 = vmatpush2.bf16.msra.mxu0 %v20951_v11  ;;  %v21025_v11 = vld [vmem:[%s23899_s27 + $0x424] ss:$24 sps:$4 sm:$0xff]  }
 0x9bc   :  { %10296 = vmatprep.subr.bf16.mxu0 %v20956_v14  ;;  %11633 = vmatprep.subr.bf16.mxu1 %v21025_v11  ;;  %v21097_v11 = vld [vmem:[%s23899_s27 + $0x4e4] ss:$24 sps:$4 sm:$0xff]  }
 0x9bd   :  { %v9468_v29 = vpop.f32.mrf.mxu1 }
 0x9be   :  { %11634 = vmatpush1.bf16.msra.mxu1 %v21023_v5  ;;  %v21031_v29 = vld [vmem:[%s23899_s27 + $0x3f4] ss:$24 sps:$4 sm:$0xff]   ;;  %v21089_v5 = vld [vmem:[%s23899_s27 + $0x510] ss:$24 sps:$4 sm:$0xff]  }
 0x9bf   :  { %10297 = vmatpush2.bf16.msra.mxu0 %v20954_v17  ;;  %11635 = vmatprep.subr.bf16.mxu1 %v21031_v29 }
 0x9c0   :  { %10298 = vmatprep.subr.bf16.mxu0 %v20959_v25  ;;  %v21004_v25 = vld [vmem:[%s23899_s27 + $0x244] ss:$24 sps:$4 sm:$0xff]  }
 0x9c3   :  { %10299 = vmatpush2.bf16.msra.mxu0 %v20957_v21 }
 0x9c4   :  { %v22194_v32 = vpop.eup %22193  ;;  %10300 = vmatprep.subr.bf16.mxu0 %v20962_v38  ;;  %v21029_v38 = vld [vmem:[%s23899_s27 + $0x3f0] ss:$24 sps:$4 sm:$0xff]  }
 0x9c5   :  { %v8670_v9 = vadd.f32 1.0, %v22194_v32  ;;  %11636 = vmatpush1.bf16.msra.mxu1 %v21029_v38  ;;  %v21037_v32 = vld [vmem:[%s23899_s27 + $0x3c4] ss:$24 sps:$4 sm:$0xff]  }
 0x9c6   :  { %v22196_v19 = vpop.eup %22195  ;;  %11637 = vmatprep.subr.bf16.mxu1 %v21037_v32 }
 0x9c7   :  { %v8676_v44 = vmul.f32 %v8670_v9, %v8652_v37  ;;  %v8671_v45 = vadd.f32 1.0, %v22196_v19  ;;  %10301 = vmatpush2.bf16.msra.mxu0 %v20960_v33  ;;  %v21002_v33 = vld [vmem:[%s23899_s27 + $0x240] ss:$24 sps:$4 sm:$0xff]   ;;  %v21041_v19 = vld [vmem:[%s23899_s27 + $0x390] ss:$24 sps:$4 sm:$0xff]  }
 0x9c8   :  { %10302 = vmatprep.subr.bf16.mxu0 %v20965_v16  ;;  %v21007_v16 = vld [vmem:[%s23899_s27 + $0x214] ss:$24 sps:$4 sm:$0xff]   ;;  %v21035_v9 = vld [vmem:[%s23899_s27 + $0x3c0] ss:$24 sps:$4 sm:$0xff]  }
 0x9c9   :  { %8682 = vst [vmem:[%s23821_s23 + $0x20] sm:$0xff] %v8676_v44  ;;  %v8677_v23 = vmul.f32 %v8671_v45, %v8653_v22  ;;  %11638 = vmatpush1.bf16.msra.mxu1 %v21035_v9  ;;  %v21010_v44 = vld [vmem:[%s23899_s27 + $0x1e4] ss:$24 sps:$4 sm:$0xff]   ;;  %v21008_v22 = vld [vmem:[%s23899_s27 + $0x1e0] ss:$24 sps:$4 sm:$0xff]  }
 0x9ca   :  { %v21047_v45 = vld [vmem:[%s23899_s27 + $0x360] ss:$24 sps:$4 sm:$0xff]  }
 0x9cb   :  { %8683 = vst [vmem:[%s23821_s23 + $0x28] sm:$0xff] %v8677_v23  ;;  %10303 = vmatpush2.bf16.msra.mxu0 %v20963_v35  ;;  %v21005_v35 = vld [vmem:[%s23899_s27 + $0x210] ss:$24 sps:$4 sm:$0xff]   ;;  %v21049_v23 = vld [vmem:[%s23899_s27 + $0x364] ss:$24 sps:$4 sm:$0xff]  }
 0x9cc   :  { %10304 = vmatprep.subr.bf16.mxu0 %v20968_v43  ;;  %v21043_v43 = vld [vmem:[%s23899_s27 + $0x394] ss:$24 sps:$4 sm:$0xff]  }
 0x9cd   :  { %11639 = vmatprep.subr.bf16.mxu1 %v21043_v43 }
 0x9ce   :  { %11640 = vmatpush1.bf16.msra.mxu1 %v21041_v19 }
 0x9cf   :  { %10305 = vmatpush2.bf16.msra.mxu0 %v20966_v47  ;;  %v21013_v47 = vld [vmem:[%s23899_s27 + $0x1b4] ss:$24 sps:$4 sm:$0xff]   ;;  %11641 = vmatprep.subr.bf16.mxu1 %v21049_v23 }
 0x9d0   :  { %11590 = vmatprep.subr.bf16.mxu0 %v20971_v27  ;;  %v21011_v27 = vld [vmem:[%s23899_s27 + $0x1b0] ss:$24 sps:$4 sm:$0xff]  }
 0x9d2   :  { %10307 = vmatmul.mubr.bf16.vlgmr.msra.gmra.mxu0 %v22890_v34  ;;  %v20986_v34 = vld [vmem:[%s23899_s27 + $0x64] ss:$24 sps:$4 sm:$0xff]   ;;  %11642 = vmatpush1.bf16.msra.mxu1 %v21047_v45 }
 0x9d3   :  { %11591 = vmatpush1.bf16.msra.mxu0 %v20969_v51  ;;  %v21053_v51 = vld [vmem:[%s23899_s27 + $0x330] ss:$24 sps:$4 sm:$0xff]  }
 0x9d4   :  { %11592 = vmatprep.subr.bf16.mxu0 %v20974_v18  ;;  %v21055_v18 = vld [vmem:[%s23899_s27 + $0x334] ss:$24 sps:$4 sm:$0xff]  }
 0x9d5   :  { %11643 = vmatprep.subr.bf16.mxu1 %v21055_v18 }
 0x9d6   :  { %11644 = vmatpush1.bf16.msra.mxu1 %v21053_v51 }
 0x9d7   :  { %11593 = vmatpush1.bf16.msra.mxu0 %v20972_v54  ;;  %v21016_v54 = vld [vmem:[%s23899_s27 + $0x184] ss:$24 sps:$4 sm:$0xff]  }
 0x9d8   :  { %11594 = vmatprep.subr.bf16.mxu0 %v20977_v28  ;;  %v21014_v28 = vld [vmem:[%s23899_s27 + $0x180] ss:$24 sps:$4 sm:$0xff]  }
 0x9db   :  { %11595 = vmatpush1.bf16.msra.mxu0 %v20975_v56  ;;  %v21059_v56 = vld [vmem:[%s23899_s27 + $0x300] ss:$24 sps:$4 sm:$0xff]  }
 0x9dc   :  { %11596 = vmatprep.subr.bf16.mxu0 %v20980_v58  ;;  %v21061_v58 = vld [vmem:[%s23899_s27 + $0x304] ss:$24 sps:$4 sm:$0xff]  }
 0x9dd   :  { %11645 = vmatprep.subr.bf16.mxu1 %v21061_v58 }
 0x9de   :  { %11646 = vmatpush1.bf16.msra.mxu1 %v21059_v56 }
 0x9df   :  { %11597 = vmatpush1.bf16.msra.mxu0 %v20978_v59  ;;  %v21022_v59 = vld [vmem:[%s23899_s27 + $0x15c] ss:$24 sps:$4 sm:$0xff]  }
 0x9e0   :  { %11598 = vmatprep.subr.bf16.mxu0 %v20983_v60  ;;  %v21065_v60 = vld [vmem:[%s23899_s27 + $0x5d0] ss:$24 sps:$4 sm:$0xff]  }
 0x9e3   :  { %11599 = vmatpush1.bf16.msra.mxu0 %v20981_v61  ;;  %v21067_v61 = vld [vmem:[%s23899_s27 + $0x5d4] ss:$24 sps:$4 sm:$0xff]  }
 0x9e4   :  { %11600 = vmatprep.subr.bf16.mxu0 %v20986_v34  ;;  %11647 = vmatprep.subr.bf16.mxu1 %v21067_v61 }
 0x9e5   :  { %11648 = vmatpush2.bf16.msra.mxu1 %v21065_v60  ;;  %v21020_v60 = vld [vmem:[%s23899_s27 + $0x158] ss:$24 sps:$4 sm:$0xff]  }
 0x9e7   :  { %11601 = vmatpush1.bf16.msra.mxu0 %v20984_v63 }
 0x9e8   :  { %11602 = vmatprep.subr.bf16.mxu0 %v20989_v55 }
 0x9eb   :  { %11603 = vmatpush1.bf16.msra.mxu0 %v20987_v41  ;;  %v21073_v41 = vld [vmem:[%s23899_s27 + $0x5a4] ss:$24 sps:$4 sm:$0xff]  }
 0x9ec   :  { %11604 = vmatprep.subr.bf16.mxu0 %v20992_v6  ;;  %11649 = vmatprep.subr.bf16.mxu1 %v21073_v41  ;;  %v21034_v41 = vld [vmem:[%s23899_s27 + $0xfc] ss:$24 sps:$4 sm:$0xff]  }
 0x9ef   :  { %11605 = vmatpush1.bf16.msra.mxu0 %v20990_v0  ;;  %v21071_v0 = vld [vmem:[%s23899_s27 + $0x5a0] ss:$24 sps:$4 sm:$0xff]  }
 0x9f0   :  { %11606 = vmatprep.subr.bf16.mxu0 %v20995_v1  ;;  %11650 = vmatpush2.bf16.msra.mxu1 %v21071_v0  ;;  %v21032_v0 = vld [vmem:[%s23899_s27 + $0xf8] ss:$24 sps:$4 sm:$0xff]  }
 0x9f2   :  { %v9422_v4 = vpop.f32.mrf.mxu0 }
 0x9f3   :  { %v23975_v50 = vadd.f32 %v23935_v57, %v9422_v4  ;;  %11607 = vmatpush2.bf16.msra.mxu0 %v20993_v7  ;;  %v20999_v57 = vld [vmem:[%s23899_s27 + $0x270] ss:$24 sps:$4 sm:$0xff]   ;;  %v21083_v4 = vld [vmem:[%s23899_s27 + $0x540] ss:$24 sps:$4 sm:$0xff]  }
 0x9f4   :  { %v9424_v8 = vpop.f32.mrf.mxu0  ;;  %11608 = vmatprep.subr.bf16.mxu0 %v20998_v36  ;;  %v21079_v36 = vld [vmem:[%s23899_s27 + $0x574] ss:$24 sps:$4 sm:$0xff]  }
 0x9f5   :  { %v23982_v12 = vadd.f32 %v23939_v48, %v9424_v8  ;;  %11651 = vmatprep.subr.bf16.mxu1 %v21079_v36  ;;  %v21095_v8 = vld [vmem:[%s23899_s27 + $0x4e0] ss:$24 sps:$4 sm:$0xff]  }
 0x9f6   :  { %v9426_v14 = vpop.f32.mrf.mxu0  ;;  %11652 = vmatpush2.bf16.msra.mxu1 %v21077_v42  ;;  %v21038_v42 = vld [vmem:[%s23899_s27 + $0xc8] ss:$24 sps:$4 sm:$0xff]  }
 0x9f7   :  { %v9504_v17 = vpop.f32.mrf.mxu1  ;;  %11609 = vmatpush2.bf16.msra.mxu0 %v20996_v26  ;;  %11653 = vmatprep.subr.bf16.mxu1 %v21085_v10  ;;  %v21091_v26 = vld [vmem:[%s23899_s27 + $0x514] ss:$24 sps:$4 sm:$0xff]   ;;  %v21101_v14 = vld [vmem:[%s23899_s27 + $0x4b0] ss:$24 sps:$4 sm:$0xff]  }
 0x9f8   :  { %v9427_v24 = vpop.f32.mrf.mxu0  ;;  %11610 = vmatprep.subr.bf16.mxu0 %v21001_v30  ;;  %v21103_v30 = vld [vmem:[%s23899_s27 + $0x4b4] ss:$24 sps:$4 sm:$0xff]  }
 0x9f9   :  { %v9506_v21 = vpop.f32.mrf.mxu1  ;;  %v21115_v24 = vld [vmem:[%s23899_s27 + $0x45c] ss:$24 sps:$4 sm:$0xff]  }
 0x9fa   :  { %11654 = vmatpush2.bf16.msra.mxu1 %v21083_v4  ;;  %v21046_v4 = vld [vmem:[%s23899_s27 + $0x9c] ss:$24 sps:$4 sm:$0xff]  }
 0x9fb   :  { %v9508_v48 = vpop.f32.mrf.mxu1  ;;  %11611 = vmatpush2.bf16.msra.mxu0 %v20999_v57  ;;  %11655 = vmatprep.subr.bf16.mxu1 %v21091_v26  ;;  %v21107_v57 = vld [vmem:[%s23899_s27 + $0x480] ss:$24 sps:$4 sm:$0xff]  }
 0x9fc   :  { %11612 = vmatprep.subr.bf16.mxu0 %v21004_v25  ;;  %v24032_v48 = vld [vmem:[%s16770_s1] sm:$0xf] }
 0x9fd   :  { %v9509_v37 = vpop.f32.mrf.mxu1  ;;  %v10361_v32 = vrot.slane %v24032_v48, %v22650_v13  ;;  %v10365_v19 = vrot.slane %v24032_v48, %v22655_v15 }
 0x9fe   :  { %11656 = vmatpush2.bf16.msra.mxu1 %v21089_v5  ;;  %v21044_v5 = vld [vmem:[%s23899_s27 + $0x98] ss:$24 sps:$4 sm:$0xff]  }
 0x9ff   :  { %11613 = vmatpush2.bf16.msra.mxu0 %v21002_v33  ;;  %11657 = vmatprep.subr.bf16.mxu1 %v21097_v11  ;;  %v21052_v11 = vld [vmem:[%s23899_s27 + $0x6c] ss:$24 sps:$4 sm:$0xff]  }
 0xa00   :  { %11614 = vmatprep.subr.bf16.mxu0 %v21007_v16 }
 0xa02   :  { %11658 = vmatpush2.bf16.msra.mxu1 %v21095_v8  ;;  %v21050_v8 = vld [vmem:[%s23899_s27 + $0x68] ss:$24 sps:$4 sm:$0xff]  }
 0xa03   :  { %11615 = vmatpush2.bf16.msra.mxu0 %v21005_v35  ;;  %11659 = vmatprep.subr.bf16.mxu1 %v21103_v30  ;;  %v21058_v30 = vld [vmem:[%s23899_s27 + $0x3c] ss:$24 sps:$4 sm:$0xff]  }
 0xa04   :  { %11616 = vmatprep.subr.bf16.mxu0 %v21010_v44 }
 0xa06   :  { %11660 = vmatpush2.bf16.msra.mxu1 %v21101_v14  ;;  %v21056_v14 = vld [vmem:[%s23899_s27 + $0x38] ss:$24 sps:$4 sm:$0xff]  }
 0xa07   :  { %11617 = vmatpush2.bf16.msra.mxu0 %v21008_v22 }
 0xa08   :  { %11618 = vmatprep.subr.bf16.mxu0 %v21013_v47 }
 0xa0b   :  { %11619 = vmatpush2.bf16.msra.mxu0 %v21011_v27 }
 0xa0c   :  { %11620 = vmatprep.subr.bf16.mxu0 %v21016_v54 }
 0xa0f   :  { %11621 = vmatpush2.bf16.msra.mxu0 %v21014_v28 }
 0xa10   :  { %11672 = vmatprep.subr.bf16.mxu0 %v21022_v59 }
 0xa12   :  { %v9545_v34 = vpop.f32.mrf.mxu0 }
 0xa13   :  { %v24010_v63 = vadd.f32 %v9545_v34, %v9504_v17  ;;  %v21109_v17 = vld [vmem:[%s23899_s27 + $0x484] ss:$24 sps:$4 sm:$0xff]  }
 0xa14   :  { %v9547_v55 = vpop.f32.mrf.mxu0  ;;  %11661 = vmatprep.subr.bf16.mxu1 %v21109_v17  ;;  %v21028_v34 = vld [vmem:[%s23899_s27 + $0x12c] ss:$24 sps:$4 sm:$0xff]  }
 0xa15   :  { %v24013_v6 = vadd.f32 %v9547_v55, %v9506_v21  ;;  %11662 = vmatpush2.bf16.msra.mxu1 %v21107_v57  ;;  %v21026_v55 = vld [vmem:[%s23899_s27 + $0x128] ss:$24 sps:$4 sm:$0xff]   ;;  %v21064_v17 = vld [vmem:[%s23899_s27 + $0xc] ss:$24 sps:$4 sm:$0xff]  }
 0xa16   :  { %v9549_v1 = vpop.f32.mrf.mxu0  ;;  %11713 = vmatprep.subr.bf16.mxu1 %v21115_v24  ;;  %v21062_v57 = vld [vmem:[%s23899_s27 + $0x8] ss:$24 sps:$4 sm:$0xff]   ;;  %v21070_v24 = vld [vmem:[%s23899_s27 + $0x2dc] ss:$24 sps:$4 sm:$0xff]  }
 0xa18   :  { %v9550_v7 = vpop.f32.mrf.mxu0 }
 0xa19   :  { %v21040_v7 = vld [vmem:[%s23899_s27 + $0xcc] ss:$24 sps:$4 sm:$0xff]  }
 0xa37   :  { %v10267_v25 = vpop.f32.mrf.mxu1 }
 0xa39   :  { %v10269_v29 = vpop.f32.mrf.mxu1 }
 0xa3b   :  { %v10271_v21 = vpop.f32.mrf.mxu1 }
 0xa3c   :  { %v21074_v21 = vld [vmem:[%s23899_s27 + $0x2a8] ss:$24 sps:$4 sm:$0xff]  }
 0xa3d   :  { %v10272_v38 = vpop.f32.mrf.mxu1 }
 0xa52   :  { %v10226_v33 = vpop.f32.mrf.mxu0 }
 0xa53   :  { %v10227_v16 = vadd.f32 %v10226_v33, %v23975_v50 }
 0xa54   :  { %v10228_v37 = vpop.f32.mrf.mxu0 }
 0xa55   :  { %v10268_v9 = vadd.f32 %v10267_v25, %v10227_v16  ;;  %v10229_v35 = vadd.f32 %v10228_v37, %v23982_v12  ;;  %v21068_v25 = vld [vmem:[%s23899_s27 + $0x2d8] ss:$24 sps:$4 sm:$0xff]   ;;  %v10369_v16 = vrot.slane %v24032_v48, %v22694_v2  ;;  %v21082_v37 = vld [vmem:[%s23899_s27 + $0x27c] ss:$24 sps:$4 sm:$0xff]  }
 0xa56   :  { %v10230_v43 = vpop.f32.mrf.mxu0 }
 0xa57   :  { %v10378_v44 = vadd.f32 %v10361_v32, %v10268_v9  ;;  %v10270_v22 = vadd.f32 %v10269_v29, %v10229_v35  ;;  %v21076_v29 = vld [vmem:[%s23899_s27 + $0x2ac] ss:$24 sps:$4 sm:$0xff]   ;;  %v21080_v43 = vld [vmem:[%s23899_s27 + $0x278] ss:$24 sps:$4 sm:$0xff]  }
 0xa58   :  { %v10231_v45 = vpop.f32.mrf.mxu0 }
 0xa59   :  { %v10386_v23 = vmul.f32 0.70710677, %v10378_v44  ;;  %v10379_v47 = vadd.f32 %v10365_v19, %v10270_v22  ;;  %v10382_v54 = vmul.f32 0.5, %v10378_v44  ;;  %v10373_v19 = vrot.slane %v24032_v48, %v22697_v3  ;;  %v21094_v48 = vld [vmem:[%s23899_s27 + $0x21c] ss:$24 sps:$4 sm:$0xff]  }
 0xa5b   :  { %22197 = verf.f32 %v10386_v23  ;;  %v10387_v50 = vmul.f32 0.70710677, %v10379_v47  ;;  %v10383_v12 = vmul.f32 0.5, %v10379_v47  ;;  %v21088_v23 = vld [vmem:[%s23899_s27 + $0x24c] ss:$24 sps:$4 sm:$0xff]  }
 0xa5d   :  { %22199 = verf.f32 %v10387_v50 }
 0xa68   :  { %v22198_v27 = vpop.eup %22197 }
 0xa69   :  { %v10394_v51 = vadd.f32 1.0, %v22198_v27 }
 0xa6a   :  { %v22200_v18 = vpop.eup %22199 }
 0xa6b   :  { %v10395_v28 = vadd.f32 1.0, %v22200_v18  ;;  %v10398_v56 = vmul.f32 %v10394_v51, %v10382_v54  ;;  %v21092_v51 = vld [vmem:[%s23899_s27 + $0x218] ss:$24 sps:$4 sm:$0xff]   ;;  %v21100_v18 = vld [vmem:[%s23899_s27 + $0x1ec] ss:$24 sps:$4 sm:$0xff]  }
 0xa6c   :  { %v21098_v54 = vld [vmem:[%s23899_s27 + $0x1e8] ss:$24 sps:$4 sm:$0xff]  }
 0xa6d   :  { %v10399_v58 = vmul.f32 %v10395_v28, %v10383_v12  ;;  %v24048_v61 = vpack.c.bf16 %v10398_v56, %v10398_v56  ;;  %v21106_v12 = vld [vmem:[%s23899_s27 + $0x1bc] ss:$24 sps:$4 sm:$0xff]   ;;  %v21104_v28 = vld [vmem:[%s23899_s27 + $0x1b8] ss:$24 sps:$4 sm:$0xff]  }
 0xa6f   :  { %v24045_v59 = vpack.c.bf16 %v10399_v58, %v10399_v58  ;;  %v21112_v58 = vld [vmem:[%s23899_s27 + $0x18c] ss:$24 sps:$4 sm:$0xff]  }
 0xa71   :  { %11622 = vmatprep.mubr.bf16.mxu0 %v24045_v59 }
 0xa72   :  { %11623 = vmatmul.mubr.bf16.vlgmr.msra.gmra.mxu0 %v24048_v61 }
 0xa73   :  { %11673 = vmatpush1.bf16.msra.mxu0 %v21020_v60  ;;  %11704 = vmatprep.mubr.bf16.mxu0 %v24045_v59 }
 0xa74   :  { %11674 = vmatprep.subr.bf16.mxu0 %v21028_v34 }
 0xa77   :  { %11675 = vmatpush1.bf16.msra.mxu0 %v21026_v55  ;;  %v10349_v1 = vpop.f32.mrf.mxu1  ;;  %v21110_v55 = vld [vmem:[%s23899_s27 + $0x188] ss:$24 sps:$4 sm:$0xff]  }
 0xa78   :  { %11676 = vmatprep.subr.bf16.mxu0 %v21034_v41 }
 0xa79   :  { %v10351_v36 = vpop.f32.mrf.mxu1 }
 0xa7b   :  { %11677 = vmatpush1.bf16.msra.mxu0 %v21032_v0  ;;  %v10353_v10 = vpop.f32.mrf.mxu1 }
 0xa7c   :  { %11678 = vmatprep.subr.bf16.mxu0 %v21040_v7  ;;  %v21113_v10 = vld [vmem:[%s23899_s27 + $0x458] ss:$24 sps:$4 sm:$0xff]  }
 0xa7d   :  { %v10354_v26 = vpop.f32.mrf.mxu1 }
 0xa7f   :  { %11679 = vmatpush1.bf16.msra.mxu0 %v21038_v42 }
 0xa80   :  { %11680 = vmatprep.subr.bf16.mxu0 %v21046_v4  ;;  %v21116_v4 = vld [vmem:[%s23899_s27 + $0x160] ss:$24 sps:$4 sm:$0xff]  }
 0xa83   :  { %11681 = vmatpush1.bf16.msra.mxu0 %v21044_v5 }
 0xa84   :  { %11682 = vmatprep.subr.bf16.mxu0 %v21052_v11  ;;  %v21119_v11 = vld [vmem:[%s23899_s27 + $0x428] ss:$24 sps:$4 sm:$0xff]  }
 0xa87   :  { %11683 = vmatpush1.bf16.msra.mxu0 %v21050_v8  ;;  %v21121_v8 = vld [vmem:[%s23899_s27 + $0x42c] ss:$24 sps:$4 sm:$0xff]  }
 0xa88   :  { %11684 = vmatprep.subr.bf16.mxu0 %v21058_v30  ;;  %v21124_v30 = vld [vmem:[%s23899_s27 + $0x134] ss:$24 sps:$4 sm:$0xff]  }
 0xa8b   :  { %11685 = vmatpush1.bf16.msra.mxu0 %v21056_v14  ;;  %v21122_v14 = vld [vmem:[%s23899_s27 + $0x130] ss:$24 sps:$4 sm:$0xff]  }
 0xa8c   :  { %11686 = vmatprep.subr.bf16.mxu0 %v21064_v17  ;;  %v21127_v17 = vld [vmem:[%s23899_s27 + $0x3fc] ss:$24 sps:$4 sm:$0xff]  }
 0xa8f   :  { %11687 = vmatpush1.bf16.msra.mxu0 %v21062_v57  ;;  %v21130_v57 = vld [vmem:[%s23899_s27 + $0x104] ss:$24 sps:$4 sm:$0xff]  }
 0xa90   :  { %11688 = vmatprep.subr.bf16.mxu0 %v21070_v24  ;;  %v21125_v24 = vld [vmem:[%s23899_s27 + $0x3f8] ss:$24 sps:$4 sm:$0xff]  }
 0xa92   :  { %v10308_v38 = vpop.f32.mrf.mxu0 }
 0xa93   :  { %v10309_v33 = vadd.f32 %v10308_v38, %v24010_v63  ;;  %11689 = vmatpush2.bf16.msra.mxu0 %v21068_v25  ;;  %v21128_v25 = vld [vmem:[%s23899_s27 + $0x100] ss:$24 sps:$4 sm:$0xff]  }
 0xa94   :  { %v10310_v32 = vpop.f32.mrf.mxu0  ;;  %11690 = vmatprep.subr.bf16.mxu0 %v21076_v29  ;;  %v21133_v29 = vld [vmem:[%s23899_s27 + $0x3cc] ss:$24 sps:$4 sm:$0xff]   ;;  %v21131_v38 = vld [vmem:[%s23899_s27 + $0x3c8] ss:$24 sps:$4 sm:$0xff]  }
 0xa95   :  { %v10350_v9 = vadd.f32 %v10349_v1, %v10309_v33  ;;  %v10311_v35 = vadd.f32 %v10310_v32, %v24013_v6  ;;  %v21086_v6 = vld [vmem:[%s23899_s27 + $0x248] ss:$24 sps:$4 sm:$0xff]   ;;  %v21142_v32 = vld [vmem:[%s23899_s27 + $0xa4] ss:$24 sps:$4 sm:$0xff]  }
 0xa96   :  { %v10312_v44 = vpop.f32.mrf.mxu0  ;;  %v21134_v33 = vld [vmem:[%s23899_s27 + $0xd0] ss:$24 sps:$4 sm:$0xff]  }
 0xa97   :  { %v10380_v63 = vadd.f32 %v10369_v16, %v10350_v9  ;;  %v10352_v22 = vadd.f32 %v10351_v36, %v10311_v35  ;;  %11691 = vmatpush2.bf16.msra.mxu0 %v21074_v21  ;;  %v21118_v36 = vld [vmem:[%s23899_s27 + $0x164] ss:$24 sps:$4 sm:$0xff]   ;;  %v21136_v21 = vld [vmem:[%s23899_s27 + $0xd4] ss:$24 sps:$4 sm:$0xff]   ;;  %v21140_v9 = vld [vmem:[%s23899_s27 + $0xa0] ss:$24 sps:$4 sm:$0xff]  }
 0xa98   :  { %v10313_v45 = vpop.f32.mrf.mxu0  ;;  %11692 = vmatprep.subr.bf16.mxu0 %v21082_v37  ;;  %v21139_v16 = vld [vmem:[%s23899_s27 + $0x39c] ss:$24 sps:$4 sm:$0xff]   ;;  %v21137_v37 = vld [vmem:[%s23899_s27 + $0x398] ss:$24 sps:$4 sm:$0xff]   ;;  %v21145_v35 = vld [vmem:[%s23899_s27 + $0x36c] ss:$24 sps:$4 sm:$0xff]  }
 0xa99   :  { %v10388_v47 = vmul.f32 0.70710677, %v10380_v63  ;;  %v10381_v50 = vadd.f32 %v10373_v19, %v10352_v22  ;;  %v10384_v60 = vmul.f32 0.5, %v10380_v63  ;;  %v21148_v19 = vld [vmem:[%s23899_s27 + $0x74] ss:$24 sps:$4 sm:$0xff]  }
 0xa9a   :  { %v21146_v44 = vld [vmem:[%s23899_s27 + $0x70] ss:$24 sps:$4 sm:$0xff]   ;;  %v21151_v63 = vld [vmem:[%s23899_s27 + $0x33c] ss:$24 sps:$4 sm:$0xff]  }
 0xa9b   :  { %22201 = verf.f32 %v10388_v47  ;;  %v10389_v27 = vmul.f32 0.70710677, %v10381_v50  ;;  %11693 = vmatpush2.bf16.msra.mxu0 %v21080_v43  ;;  %v10385_v0 = vmul.f32 0.5, %v10381_v50  ;;  %v21143_v43 = vld [vmem:[%s23899_s27 + $0x368] ss:$24 sps:$4 sm:$0xff]  }
 0xa9c   :  { %11694 = vmatprep.subr.bf16.mxu0 %v21088_v23  ;;  %v21154_v22 = vld [vmem:[%s23899_s27 + $0x44] ss:$24 sps:$4 sm:$0xff]   ;;  %v21149_v45 = vld [vmem:[%s23899_s27 + $0x338] ss:$24 sps:$4 sm:$0xff]   ;;  %v21160_v50 = vld [vmem:[%s23899_s27 + $0x14] ss:$24 sps:$4 sm:$0xff]  }
 0xa9d   :  { %22203 = verf.f32 %v10389_v27  ;;  %v21152_v23 = vld [vmem:[%s23899_s27 + $0x40] ss:$24 sps:$4 sm:$0xff]   ;;  %v21157_v47 = vld [vmem:[%s23899_s27 + $0x30c] ss:$24 sps:$4 sm:$0xff]   ;;  %v21158_v27 = vld [vmem:[%s23899_s27 + $0x10] ss:$24 sps:$4 sm:$0xff]  }
 0xa9f   :  { %11695 = vmatpush2.bf16.msra.mxu0 %v21086_v6  ;;  %v21155_v6 = vld [vmem:[%s23899_s27 + $0x308] ss:$24 sps:$4 sm:$0xff]  }
 0xaa0   :  { %11696 = vmatprep.subr.bf16.mxu0 %v21094_v48  ;;  %v21163_v48 = vld [vmem:[%s23899_s27 + $0x5dc] ss:$24 sps:$4 sm:$0xff]  }
 0xaa3   :  { %11697 = vmatpush2.bf16.msra.mxu0 %v21092_v51  ;;  %v21166_v51 = vld [vmem:[%s23899_s27 + $0x2e4] ss:$24 sps:$4 sm:$0xff]  }
 0xaa4   :  { %11698 = vmatprep.subr.bf16.mxu0 %v21100_v18  ;;  %v21161_v18 = vld [vmem:[%s23899_s27 + $0x5d8] ss:$24 sps:$4 sm:$0xff]  }
 0xaa7   :  { %11699 = vmatpush2.bf16.msra.mxu0 %v21098_v54  ;;  %v21164_v54 = vld [vmem:[%s23899_s27 + $0x2e0] ss:$24 sps:$4 sm:$0xff]  }
 0xaa8   :  { %v22202_v56 = vpop.eup %22201  ;;  %11700 = vmatprep.subr.bf16.mxu0 %v21106_v12  ;;  %v21169_v12 = vld [vmem:[%s23899_s27 + $0x5ac] ss:$24 sps:$4 sm:$0xff]  }
 0xaa9   :  { %v10396_v34 = vadd.f32 1.0, %v22202_v56  ;;  %v21167_v56 = vld [vmem:[%s23899_s27 + $0x5a8] ss:$24 sps:$4 sm:$0xff]  }
 0xaaa   :  { %v22204_v41 = vpop.eup %22203 }
 0xaab   :  { %v10397_v1 = vadd.f32 1.0, %v22204_v41  ;;  %11701 = vmatpush2.bf16.msra.mxu0 %v21104_v28  ;;  %v10400_v7 = vmul.f32 %v10396_v34, %v10384_v60  ;;  %v21172_v28 = vld [vmem:[%s23899_s27 + $0x2b4] ss:$24 sps:$4 sm:$0xff]   ;;  %v21178_v34 = vld [vmem:[%s23899_s27 + $0x284] ss:$24 sps:$4 sm:$0xff]  }
 0xaac   :  { %11702 = vmatprep.subr.bf16.mxu0 %v21112_v58  ;;  %v21170_v58 = vld [vmem:[%s23899_s27 + $0x2b0] ss:$24 sps:$4 sm:$0xff]   ;;  %v21175_v60 = vld [vmem:[%s23899_s27 + $0x57c] ss:$24 sps:$4 sm:$0xff]   ;;  %v21176_v41 = vld [vmem:[%s23899_s27 + $0x280] ss:$24 sps:$4 sm:$0xff]  }
 0xaad   :  { %v10401_v42 = vmul.f32 %v10397_v1, %v10385_v0  ;;  %v24094_v5 = vpack.c.bf16 %v10400_v7, %v10400_v7  ;;  %v21181_v0 = vld [vmem:[%s23899_s27 + $0x54c] ss:$24 sps:$4 sm:$0xff]   ;;  %v21179_v7 = vld [vmem:[%s23899_s27 + $0x548] ss:$24 sps:$4 sm:$0xff]  }
 0xaae   :  { %v21184_v1 = vld [vmem:[%s23899_s27 + $0x254] ss:$24 sps:$4 sm:$0xff]  }
 0xaaf   :  { %v24092_v26 = vpack.c.bf16 %v10401_v42, %v10401_v42  ;;  %11703 = vmatpush2.bf16.msra.mxu0 %v21110_v55  ;;  %v21173_v55 = vld [vmem:[%s23899_s27 + $0x578] ss:$24 sps:$4 sm:$0xff]   ;;  %v21187_v42 = vld [vmem:[%s23899_s27 + $0x51c] ss:$24 sps:$4 sm:$0xff]  }
 0xab0   :  { %11754 = vmatprep.subr.bf16.mxu0 %v21118_v36  ;;  %v21182_v36 = vld [vmem:[%s23899_s27 + $0x250] ss:$24 sps:$4 sm:$0xff]  }
 0xab1   :  { %11663 = vmatprep.mubr.bf16.mxu1 %v24092_v26 }
 0xab2   :  { %11705 = vmatmul.mubr.bf16.vlgmr.msra.gmra.mxu0 %v24048_v61  ;;  %11664 = vmatmul.mubr.bf16.vlgmr.msra.gmra.mxu1 %v24094_v5 }
 0xab3   :  { %11714 = vmatpush1.bf16.msra.mxu1 %v21113_v10  ;;  %11755 = vmatpush1.bf16.msra.mxu0 %v21116_v4  ;;  %v21190_v10 = vld [vmem:[%s23899_s27 + $0x224] ss:$24 sps:$4 sm:$0xff]   ;;  %v21185_v4 = vld [vmem:[%s23899_s27 + $0x518] ss:$24 sps:$4 sm:$0xff]  }
 0xab4   :  { %11786 = vmatprep.mubr.bf16.mxu0 %v24045_v59  ;;  %11745 = vmatprep.mubr.bf16.mxu1 %v24092_v26 }
 0xab5   :  { %11715 = vmatprep.subr.bf16.mxu1 %v21121_v8  ;;  %11756 = vmatprep.subr.bf16.mxu0 %v21124_v30  ;;  %v21193_v8 = vld [vmem:[%s23899_s27 + $0x4ec] ss:$24 sps:$4 sm:$0xff]  }
 0xab6   :  { %v21196_v30 = vld [vmem:[%s23899_s27 + $0x1f4] ss:$24 sps:$4 sm:$0xff]  }
 0xab7   :  { %11716 = vmatpush1.bf16.msra.mxu1 %v21119_v11  ;;  %11757 = vmatpush1.bf16.msra.mxu0 %v21122_v14  ;;  %v21188_v11 = vld [vmem:[%s23899_s27 + $0x220] ss:$24 sps:$4 sm:$0xff]  }
 0xab8   :  { %11717 = vmatprep.subr.bf16.mxu1 %v21127_v17  ;;  %11758 = vmatprep.subr.bf16.mxu0 %v21130_v57  ;;  %v21191_v14 = vld [vmem:[%s23899_s27 + $0x4e8] ss:$24 sps:$4 sm:$0xff]   ;;  %v21199_v57 = vld [vmem:[%s23899_s27 + $0x4bc] ss:$24 sps:$4 sm:$0xff]  }
 0xab9   :  { %v21194_v17 = vld [vmem:[%s23899_s27 + $0x1f0] ss:$24 sps:$4 sm:$0xff]  }
 0xabb   :  { %11718 = vmatpush1.bf16.msra.mxu1 %v21125_v24  ;;  %11759 = vmatpush1.bf16.msra.mxu0 %v21128_v25  ;;  %v21202_v24 = vld [vmem:[%s23899_s27 + $0x1c4] ss:$24 sps:$4 sm:$0xff]   ;;  %v21197_v25 = vld [vmem:[%s23899_s27 + $0x4b8] ss:$24 sps:$4 sm:$0xff]  }
 0xabc   :  { %11719 = vmatprep.subr.bf16.mxu1 %v21133_v29  ;;  %11760 = vmatprep.subr.bf16.mxu0 %v21136_v21  ;;  %v21200_v29 = vld [vmem:[%s23899_s27 + $0x1c0] ss:$24 sps:$4 sm:$0xff]   ;;  %v21205_v21 = vld [vmem:[%s23899_s27 + $0x48c] ss:$24 sps:$4 sm:$0xff]  }
 0xabf   :  { %11720 = vmatpush1.bf16.msra.mxu1 %v21131_v38  ;;  %11761 = vmatpush1.bf16.msra.mxu0 %v21134_v33  ;;  %v21208_v38 = vld [vmem:[%s23899_s27 + $0x194] ss:$24 sps:$4 sm:$0xff]   ;;  %v21203_v33 = vld [vmem:[%s23899_s27 + $0x488] ss:$24 sps:$4 sm:$0xff]  }
 0xac0   :  { %11721 = vmatprep.subr.bf16.mxu1 %v21139_v16  ;;  %11762 = vmatprep.subr.bf16.mxu0 %v21142_v32  ;;  %v21206_v16 = vld [vmem:[%s23899_s27 + $0x190] ss:$24 sps:$4 sm:$0xff]   ;;  %v21211_v32 = vld [vmem:[%s23899_s27 + $0x464] ss:$24 sps:$4 sm:$0xff]  }
 0xac3   :  { %11722 = vmatpush1.bf16.msra.mxu1 %v21137_v37  ;;  %11763 = vmatpush1.bf16.msra.mxu0 %v21140_v9  ;;  %v21214_v37 = vld [vmem:[%s24043_s5 + $0x11c] ss:$20 sps:$4 sm:$0xff]   ;;  %v21209_v9 = vld [vmem:[%s23899_s27 + $0x460] ss:$24 sps:$4 sm:$0xff]  }
 0xac4   :  { %11723 = vmatprep.subr.bf16.mxu1 %v21145_v35  ;;  %11764 = vmatprep.subr.bf16.mxu0 %v21148_v19  ;;  %v21212_v35 = vld [vmem:[%s24043_s5 + $0x118] ss:$20 sps:$4 sm:$0xff]  }
 0xac5   :  { %v21217_v19 = vld [vmem:[%s23899_s27 + $0x434] ss:$24 sps:$4 sm:$0xff]  }
 0xac7   :  { %11724 = vmatpush1.bf16.msra.mxu1 %v21143_v43  ;;  %11765 = vmatpush1.bf16.msra.mxu0 %v21146_v44  ;;  %v21220_v43 = vld [vmem:[%s24043_s5 + $0xf4] ss:$20 sps:$4 sm:$0xff]  }
 0xac8   :  { %11725 = vmatprep.subr.bf16.mxu1 %v21151_v63  ;;  %11766 = vmatprep.subr.bf16.mxu0 %v21154_v22  ;;  %v21215_v44 = vld [vmem:[%s23899_s27 + $0x430] ss:$24 sps:$4 sm:$0xff]   ;;  %v21223_v22 = vld [vmem:[%s23899_s27 + $0x404] ss:$24 sps:$4 sm:$0xff]  }
 0xac9   :  { %v21218_v63 = vld [vmem:[%s24043_s5 + $0xf0] ss:$20 sps:$4 sm:$0xff]  }
 0xacb   :  { %11726 = vmatpush1.bf16.msra.mxu1 %v21149_v45  ;;  %11767 = vmatpush1.bf16.msra.mxu0 %v21152_v23  ;;  %v21226_v45 = vld [vmem:[%s24043_s5 + $0xcc] ss:$20 sps:$4 sm:$0xff]  }
 0xacc   :  { %11727 = vmatprep.subr.bf16.mxu1 %v21157_v47  ;;  %11768 = vmatprep.subr.bf16.mxu0 %v21160_v50  ;;  %v21221_v23 = vld [vmem:[%s23899_s27 + $0x400] ss:$24 sps:$4 sm:$0xff]   ;;  %v21224_v47 = vld [vmem:[%s24043_s5 + $0xc8] ss:$20 sps:$4 sm:$0xff]   ;;  %v21229_v50 = vld [vmem:[%s23899_s27 + $0x3d4] ss:$24 sps:$4 sm:$0xff]  }
 0xacf   :  { %11728 = vmatpush1.bf16.msra.mxu1 %v21155_v6  ;;  %11769 = vmatpush1.bf16.msra.mxu0 %v21158_v27  ;;  %v21232_v6 = vld [vmem:[%s24043_s5 + $0xa4] ss:$20 sps:$4 sm:$0xff]   ;;  %v21227_v27 = vld [vmem:[%s23899_s27 + $0x3d0] ss:$24 sps:$4 sm:$0xff]  }
 0xad0   :  { %11729 = vmatprep.subr.bf16.mxu1 %v21163_v48  ;;  %11770 = vmatprep.subr.bf16.mxu0 %v21166_v51  ;;  %v21230_v48 = vld [vmem:[%s24043_s5 + $0xa0] ss:$20 sps:$4 sm:$0xff]   ;;  %v21235_v51 = vld [vmem:[%s23899_s27 + $0x3a4] ss:$24 sps:$4 sm:$0xff]  }
 0xad3   :  { %11730 = vmatpush2.bf16.msra.mxu1 %v21161_v18  ;;  %11771 = vmatpush2.bf16.msra.mxu0 %v21164_v54  ;;  %v21238_v18 = vld [vmem:[%s24043_s5 + $0x7c] ss:$20 sps:$4 sm:$0xff]   ;;  %v21233_v54 = vld [vmem:[%s23899_s27 + $0x3a0] ss:$24 sps:$4 sm:$0xff]  }
 0xad4   :  { %11731 = vmatprep.subr.bf16.mxu1 %v21169_v12  ;;  %11772 = vmatprep.subr.bf16.mxu0 %v21172_v28  ;;  %v21236_v12 = vld [vmem:[%s24043_s5 + $0x78] ss:$20 sps:$4 sm:$0xff]  }
 0xad5   :  { %v21241_v28 = vld [vmem:[%s23899_s27 + $0x374] ss:$24 sps:$4 sm:$0xff]  }
 0xad7   :  { %11732 = vmatpush2.bf16.msra.mxu1 %v21167_v56  ;;  %11773 = vmatpush2.bf16.msra.mxu0 %v21170_v58  ;;  %v21244_v56 = vld [vmem:[%s24043_s5 + $0x54] ss:$20 sps:$4 sm:$0xff]  }
 0xad8   :  { %11733 = vmatprep.subr.bf16.mxu1 %v21175_v60  ;;  %11774 = vmatprep.subr.bf16.mxu0 %v21178_v34  ;;  %v21239_v58 = vld [vmem:[%s23899_s27 + $0x370] ss:$24 sps:$4 sm:$0xff]   ;;  %v21247_v34 = vld [vmem:[%s23899_s27 + $0x344] ss:$24 sps:$4 sm:$0xff]  }
 0xad9   :  { %v21242_v60 = vld [vmem:[%s24043_s5 + $0x50] ss:$20 sps:$4 sm:$0xff]  }
 0xadb   :  { %11734 = vmatpush2.bf16.msra.mxu1 %v21173_v55  ;;  %11775 = vmatpush2.bf16.msra.mxu0 %v21176_v41  ;;  %v21250_v55 = vld [vmem:[%s24043_s5 + $0x2c] ss:$20 sps:$4 sm:$0xff]  }
 0xadc   :  { %11735 = vmatprep.subr.bf16.mxu1 %v21181_v0  ;;  %11776 = vmatprep.subr.bf16.mxu0 %v21184_v1  ;;  %v21245_v41 = vld [vmem:[%s23899_s27 + $0x340] ss:$24 sps:$4 sm:$0xff]   ;;  %v21248_v0 = vld [vmem:[%s24043_s5 + $0x28] ss:$20 sps:$4 sm:$0xff]   ;;  %v21253_v1 = vld [vmem:[%s23899_s27 + $0x314] ss:$24 sps:$4 sm:$0xff]  }
 0xadf   :  { %11736 = vmatpush2.bf16.msra.mxu1 %v21179_v7  ;;  %11777 = vmatpush2.bf16.msra.mxu0 %v21182_v36  ;;  %v21256_v7 = vld [vmem:[%s24043_s5 + $0x4] ss:$20 sps:$4 sm:$0xff]   ;;  %v21251_v36 = vld [vmem:[%s23899_s27 + $0x310] ss:$24 sps:$4 sm:$0xff]  }
 0xae0   :  { %11737 = vmatprep.subr.bf16.mxu1 %v21187_v42  ;;  %11778 = vmatprep.subr.bf16.mxu0 %v21190_v10  ;;  %v21254_v42 = vld [vmem:[%s24043_s5] ss:$20 sps:$4 sm:$0xff]   ;;  %v21259_v10 = vld [vmem:[%s23899_s27 + $0x5e4] ss:$24 sps:$4 sm:$0xff]  }
 0xae3   :  { %11738 = vmatpush2.bf16.msra.mxu1 %v21185_v4  ;;  %11779 = vmatpush2.bf16.msra.mxu0 %v21188_v11  ;;  %v21262_v4 = vld [vmem:[%s24043_s5 + $0x25c] ss:$20 sps:$4 sm:$0xff]   ;;  %v21257_v11 = vld [vmem:[%s23899_s27 + $0x5e0] ss:$24 sps:$4 sm:$0xff]  }
 0xae4   :  { %11739 = vmatprep.subr.bf16.mxu1 %v21193_v8  ;;  %11780 = vmatprep.subr.bf16.mxu0 %v21196_v30  ;;  %v21260_v8 = vld [vmem:[%s24043_s5 + $0x258] ss:$20 sps:$4 sm:$0xff]  }
 0xae5   :  { %v21265_v30 = vld [vmem:[%s23899_s27 + $0x5b4] ss:$24 sps:$4 sm:$0xff]  }
 0xae7   :  { %11740 = vmatpush2.bf16.msra.mxu1 %v21191_v14  ;;  %11781 = vmatpush2.bf16.msra.mxu0 %v21194_v17  ;;  %v21268_v14 = vld [vmem:[%s24043_s5 + $0x234] ss:$20 sps:$4 sm:$0xff]  }
 0xae8   :  { %11741 = vmatprep.subr.bf16.mxu1 %v21199_v57  ;;  %11782 = vmatprep.subr.bf16.mxu0 %v21202_v24  ;;  %v21263_v17 = vld [vmem:[%s23899_s27 + $0x5b0] ss:$24 sps:$4 sm:$0xff]   ;;  %v21271_v24 = vld [vmem:[%s23899_s27 + $0x584] ss:$24 sps:$4 sm:$0xff]  }
 0xae9   :  { %v21266_v57 = vld [vmem:[%s24043_s5 + $0x230] ss:$20 sps:$4 sm:$0xff]  }
 0xaeb   :  { %11742 = vmatpush2.bf16.msra.mxu1 %v21197_v25  ;;  %11783 = vmatpush2.bf16.msra.mxu0 %v21200_v29  ;;  %v21269_v25 = vld [vmem:[%s23899_s27 + $0x580] ss:$24 sps:$4 sm:$0xff]  }
 0xaec   :  { %11743 = vmatprep.subr.bf16.mxu1 %v21205_v21  ;;  %11784 = vmatprep.subr.bf16.mxu0 %v21208_v38  ;;  %v21274_v29 = vld [vmem:[%s24043_s5 + $0x20c] ss:$20 sps:$4 sm:$0xff]   ;;  %v21272_v21 = vld [vmem:[%s24043_s5 + $0x208] ss:$20 sps:$4 sm:$0xff]  }
 0xaed   :  { %v21277_v38 = vld [vmem:[%s23899_s27 + $0x554] ss:$24 sps:$4 sm:$0xff]  }
 0xaef   :  { %11744 = vmatpush2.bf16.msra.mxu1 %v21203_v33  ;;  %11785 = vmatpush2.bf16.msra.mxu0 %v21206_v16  ;;  %v21275_v33 = vld [vmem:[%s23899_s27 + $0x550] ss:$24 sps:$4 sm:$0xff]   ;;  %v21280_v16 = vld [vmem:[%s24043_s5 + $0x1e4] ss:$20 sps:$4 sm:$0xff]  }
 0xaf0   :  { %11795 = vmatprep.subr.bf16.mxu1 %v21211_v32  ;;  %13136 = vmatprep.subr.bf16.mxu0 %v21214_v37  ;;  %v21278_v32 = vld [vmem:[%s24043_s5 + $0x1e0] ss:$20 sps:$4 sm:$0xff]   ;;  %v21283_v37 = vld [vmem:[%s23899_s27 + $0x524] ss:$24 sps:$4 sm:$0xff]  }
 0xaf2   :  { %11746 = vmatmul.mubr.bf16.vlgmr.msra.gmra.mxu1 %v24094_v5  ;;  %11787 = vmatmul.mubr.bf16.vlgmr.msra.gmra.mxu0 %v24048_v61 }
 0xaf3   :  { %11796 = vmatpush1.bf16.msra.mxu1 %v21209_v9  ;;  %11827 = vmatprep.mubr.bf16.mxu1 %v24092_v26  ;;  %v21281_v9 = vld [vmem:[%s23899_s27 + $0x520] ss:$24 sps:$4 sm:$0xff]  }
 0xaf4   :  { %13137 = vmatpush1.bf16.msra.mxu0 %v21212_v35  ;;  %13168 = vmatprep.mubr.bf16.mxu0 %v24045_v59  ;;  %v21286_v35 = vld [vmem:[%s24043_s5 + $0x1bc] ss:$20 sps:$4 sm:$0xff]  }
 0xaf5   :  { %11797 = vmatprep.subr.bf16.mxu1 %v21217_v19  ;;  %13138 = vmatprep.subr.bf16.mxu0 %v21220_v43  ;;  %v21284_v19 = vld [vmem:[%s24043_s5 + $0x1b8] ss:$20 sps:$4 sm:$0xff]  }
 0xaf6   :  { %v21289_v43 = vld [vmem:[%s23899_s27 + $0x4f4] ss:$24 sps:$4 sm:$0xff]  }
 0xaf7   :  { %11798 = vmatpush1.bf16.msra.mxu1 %v21215_v44  ;;  %v21287_v44 = vld [vmem:[%s23899_s27 + $0x4f0] ss:$24 sps:$4 sm:$0xff]  }
 0xaf8   :  { %13139 = vmatpush1.bf16.msra.mxu0 %v21218_v63  ;;  %11799 = vmatprep.subr.bf16.mxu1 %v21223_v22  ;;  %v21292_v63 = vld [vmem:[%s24043_s5 + $0x194] ss:$20 sps:$4 sm:$0xff]   ;;  %v21290_v22 = vld [vmem:[%s24043_s5 + $0x190] ss:$20 sps:$4 sm:$0xff]  }
 0xaf9   :  { %13140 = vmatprep.subr.bf16.mxu0 %v21226_v45  ;;  %v21295_v45 = vld [vmem:[%s23899_s27 + $0x4c4] ss:$24 sps:$4 sm:$0xff]  }
 0xafb   :  { %11800 = vmatpush1.bf16.msra.mxu1 %v21221_v23  ;;  %v21293_v23 = vld [vmem:[%s23899_s27 + $0x4c0] ss:$24 sps:$4 sm:$0xff]  }
 0xafc   :  { %13141 = vmatpush1.bf16.msra.mxu0 %v21224_v47  ;;  %11801 = vmatprep.subr.bf16.mxu1 %v21229_v50  ;;  %v21298_v47 = vld [vmem:[%s24043_s5 + $0x16c] ss:$20 sps:$4 sm:$0xff]   ;;  %v21296_v50 = vld [vmem:[%s24043_s5 + $0x168] ss:$20 sps:$4 sm:$0xff]  }
 0xafd   :  { %13142 = vmatprep.subr.bf16.mxu0 %v21232_v6  ;;  %v21301_v6 = vld [vmem:[%s23899_s27 + $0x494] ss:$24 sps:$4 sm:$0xff]  }
 0xaff   :  { %11802 = vmatpush1.bf16.msra.mxu1 %v21227_v27  ;;  %v21299_v27 = vld [vmem:[%s23899_s27 + $0x490] ss:$24 sps:$4 sm:$0xff]  }
 0xb00   :  { %13143 = vmatpush1.bf16.msra.mxu0 %v21230_v48  ;;  %11803 = vmatprep.subr.bf16.mxu1 %v21235_v51  ;;  %v21304_v48 = vld [vmem:[%s24043_s5 + $0x144] ss:$20 sps:$4 sm:$0xff]   ;;  %v21302_v51 = vld [vmem:[%s24043_s5 + $0x140] ss:$20 sps:$4 sm:$0xff]  }
 0xb01   :  { %13144 = vmatprep.subr.bf16.mxu0 %v21238_v18  ;;  %v21307_v18 = vld [vmem:[%s24043_s5 + $0x39c] ss:$20 sps:$4 sm:$0xff]  }
 0xb03   :  { %11804 = vmatpush1.bf16.msra.mxu1 %v21233_v54  ;;  %v21310_v54 = vld [vmem:[%s24043_s5 + $0x124] ss:$20 sps:$4 sm:$0xff]  }
 0xb04   :  { %13145 = vmatpush1.bf16.msra.mxu0 %v21236_v12  ;;  %11805 = vmatprep.subr.bf16.mxu1 %v21241_v28  ;;  %v21305_v12 = vld [vmem:[%s24043_s5 + $0x398] ss:$20 sps:$4 sm:$0xff]   ;;  %v21308_v28 = vld [vmem:[%s24043_s5 + $0x120] ss:$20 sps:$4 sm:$0xff]  }
 0xb05   :  { %13146 = vmatprep.subr.bf16.mxu0 %v21244_v56  ;;  %v21313_v56 = vld [vmem:[%s24043_s5 + $0x374] ss:$20 sps:$4 sm:$0xff]  }
 0xb07   :  { %11806 = vmatpush1.bf16.msra.mxu1 %v21239_v58  ;;  %v21311_v58 = vld [vmem:[%s24043_s5 + $0x370] ss:$20 sps:$4 sm:$0xff]  }
 0xb08   :  { %13147 = vmatpush1.bf16.msra.mxu0 %v21242_v60  ;;  %11807 = vmatprep.subr.bf16.mxu1 %v21247_v34  ;;  %v21314_v34 = vld [vmem:[%s24043_s5 + $0xf8] ss:$20 sps:$4 sm:$0xff]  }
 0xb09   :  { %13148 = vmatprep.subr.bf16.mxu0 %v21250_v55  ;;  %v21316_v55 = vld [vmem:[%s24043_s5 + $0xfc] ss:$20 sps:$4 sm:$0xff]  }
 0xb0b   :  { %11808 = vmatpush1.bf16.msra.mxu1 %v21245_v41  ;;  %v21319_v41 = vld [vmem:[%s24043_s5 + $0x34c] ss:$20 sps:$4 sm:$0xff]  }
 0xb0c   :  { %13149 = vmatpush1.bf16.msra.mxu0 %v21248_v0  ;;  %11809 = vmatprep.subr.bf16.mxu1 %v21253_v1  ;;  %v21322_v0 = vld [vmem:[%s24043_s5 + $0xd4] ss:$20 sps:$4 sm:$0xff]  }
 0xb0d   :  { %13150 = vmatprep.subr.bf16.mxu0 %v21256_v7 }
 0xb0f   :  { %11810 = vmatpush1.bf16.msra.mxu1 %v21251_v36  ;;  %v21317_v36 = vld [vmem:[%s24043_s5 + $0x348] ss:$20 sps:$4 sm:$0xff]  }
 0xb10   :  { %13151 = vmatpush1.bf16.msra.mxu0 %v21254_v42  ;;  %11811 = vmatprep.subr.bf16.mxu1 %v21259_v10  ;;  %v21320_v42 = vld [vmem:[%s24043_s5 + $0xd0] ss:$20 sps:$4 sm:$0xff]  }
 0xb11   :  { %13152 = vmatprep.subr.bf16.mxu0 %v21262_v4  ;;  %v21325_v10 = vld [vmem:[%s24043_s5 + $0x324] ss:$20 sps:$4 sm:$0xff]   ;;  %v21328_v4 = vld [vmem:[%s24043_s5 + $0xac] ss:$20 sps:$4 sm:$0xff]  }
 0xb13   :  { %11812 = vmatpush2.bf16.msra.mxu1 %v21257_v11 }
 0xb14   :  { %13153 = vmatpush2.bf16.msra.mxu0 %v21260_v8  ;;  %11813 = vmatprep.subr.bf16.mxu1 %v21265_v30  ;;  %v21323_v8 = vld [vmem:[%s24043_s5 + $0x320] ss:$20 sps:$4 sm:$0xff]   ;;  %v21326_v30 = vld [vmem:[%s24043_s5 + $0xa8] ss:$20 sps:$4 sm:$0xff]  }
 0xb15   :  { %13154 = vmatprep.subr.bf16.mxu0 %v21268_v14  ;;  %v21331_v14 = vld [vmem:[%s24043_s5 + $0x2fc] ss:$20 sps:$4 sm:$0xff]  }
 0xb17   :  { %11814 = vmatpush2.bf16.msra.mxu1 %v21263_v17  ;;  %v21334_v17 = vld [vmem:[%s24043_s5 + $0x84] ss:$20 sps:$4 sm:$0xff]  }
 0xb18   :  { %13155 = vmatpush2.bf16.msra.mxu0 %v21266_v57  ;;  %11815 = vmatprep.subr.bf16.mxu1 %v21271_v24  ;;  %v21329_v57 = vld [vmem:[%s24043_s5 + $0x2f8] ss:$20 sps:$4 sm:$0xff]   ;;  %v21332_v24 = vld [vmem:[%s24043_s5 + $0x80] ss:$20 sps:$4 sm:$0xff]  }
 0xb19   :  { %13156 = vmatprep.subr.bf16.mxu0 %v21274_v29  ;;  %v21340_v29 = vld [vmem:[%s24043_s5 + $0x5c] ss:$20 sps:$4 sm:$0xff]  }
 0xb1b   :  { %11816 = vmatpush2.bf16.msra.mxu1 %v21269_v25  ;;  %v21337_v25 = vld [vmem:[%s24043_s5 + $0x2d4] ss:$20 sps:$4 sm:$0xff]  }
 0xb1c   :  { %13157 = vmatpush2.bf16.msra.mxu0 %v21272_v21  ;;  %11817 = vmatprep.subr.bf16.mxu1 %v21277_v38  ;;  %v21335_v21 = vld [vmem:[%s24043_s5 + $0x2d0] ss:$20 sps:$4 sm:$0xff]   ;;  %v21338_v38 = vld [vmem:[%s24043_s5 + $0x58] ss:$20 sps:$4 sm:$0xff]  }
 0xb1d   :  { %13158 = vmatprep.subr.bf16.mxu0 %v21280_v16  ;;  %v21346_v16 = vld [vmem:[%s24043_s5 + $0x34] ss:$20 sps:$4 sm:$0xff]  }
 0xb1f   :  { %11818 = vmatpush2.bf16.msra.mxu1 %v21275_v33  ;;  %v21343_v33 = vld [vmem:[%s24043_s5 + $0x2ac] ss:$20 sps:$4 sm:$0xff]  }
 0xb20   :  { %13159 = vmatpush2.bf16.msra.mxu0 %v21278_v32  ;;  %11819 = vmatprep.subr.bf16.mxu1 %v21283_v37  ;;  %v21341_v32 = vld [vmem:[%s24043_s5 + $0x2a8] ss:$20 sps:$4 sm:$0xff]   ;;  %v21344_v37 = vld [vmem:[%s24043_s5 + $0x30] ss:$20 sps:$4 sm:$0xff]  }
 0xb21   :  { %13160 = vmatprep.subr.bf16.mxu0 %v21286_v35  ;;  %v21352_v35 = vld [vmem:[%s24043_s5 + $0xc] ss:$20 sps:$4 sm:$0xff]  }
 0xb23   :  { %11820 = vmatpush2.bf16.msra.mxu1 %v21281_v9  ;;  %v21349_v9 = vld [vmem:[%s24043_s5 + $0x284] ss:$20 sps:$4 sm:$0xff]  }
 0xb24   :  { %13161 = vmatpush2.bf16.msra.mxu0 %v21284_v19  ;;  %11821 = vmatprep.subr.bf16.mxu1 %v21289_v43  ;;  %v21347_v19 = vld [vmem:[%s24043_s5 + $0x280] ss:$20 sps:$4 sm:$0xff]   ;;  %v21350_v43 = vld [vmem:[%s24043_s5 + $0x8] ss:$20 sps:$4 sm:$0xff]  }
 0xb25   :  { %13162 = vmatprep.subr.bf16.mxu0 %v21292_v63  ;;  %v21353_v63 = vld [vmem:[%s24043_s5 + $0x4d8] ss:$20 sps:$4 sm:$0xff]  }
 0xb27   :  { %11822 = vmatpush2.bf16.msra.mxu1 %v21287_v44  ;;  %v21355_v44 = vld [vmem:[%s24043_s5 + $0x4dc] ss:$20 sps:$4 sm:$0xff]  }
 0xb28   :  { %13163 = vmatpush2.bf16.msra.mxu0 %v21290_v22  ;;  %11823 = vmatprep.subr.bf16.mxu1 %v21295_v45  ;;  %v21358_v22 = vld [vmem:[%s24043_s5 + $0x264] ss:$20 sps:$4 sm:$0xff]   ;;  %v21356_v45 = vld [vmem:[%s24043_s5 + $0x260] ss:$20 sps:$4 sm:$0xff]  }
 0xb29   :  { %13164 = vmatprep.subr.bf16.mxu0 %v21298_v47  ;;  %v21364_v47 = vld [vmem:[%s24043_s5 + $0x23c] ss:$20 sps:$4 sm:$0xff]  }
 0xb2b   :  { %11824 = vmatpush2.bf16.msra.mxu1 %v21293_v23  ;;  %v21361_v23 = vld [vmem:[%s24043_s5 + $0x4b4] ss:$20 sps:$4 sm:$0xff]  }
 0xb2c   :  { %13165 = vmatpush2.bf16.msra.mxu0 %v21296_v50  ;;  %11825 = vmatprep.subr.bf16.mxu1 %v21301_v6  ;;  %v21359_v50 = vld [vmem:[%s24043_s5 + $0x4b0] ss:$20 sps:$4 sm:$0xff]   ;;  %v21362_v6 = vld [vmem:[%s24043_s5 + $0x238] ss:$20 sps:$4 sm:$0xff]  }
 0xb2d   :  { %13166 = vmatprep.subr.bf16.mxu0 %v21304_v48  ;;  %v21365_v48 = vld [vmem:[%s24043_s5 + $0x488] ss:$20 sps:$4 sm:$0xff]  }
 0xb2f   :  { %11826 = vmatpush2.bf16.msra.mxu1 %v21299_v27  ;;  %v21367_v27 = vld [vmem:[%s24043_s5 + $0x48c] ss:$20 sps:$4 sm:$0xff]  }
 0xb30   :  { %13167 = vmatpush2.bf16.msra.mxu0 %v21302_v51  ;;  %13177 = vmatprep.subr.bf16.mxu1 %v21307_v18  ;;  %v21370_v51 = vld [vmem:[%s24043_s5 + $0x214] ss:$20 sps:$4 sm:$0xff]   ;;  %v21368_v18 = vld [vmem:[%s24043_s5 + $0x210] ss:$20 sps:$4 sm:$0xff]  }
 0xb31   :  { %13218 = vmatprep.subr.bf16.mxu0 %v21310_v54  ;;  %v21373_v54 = vld [vmem:[%s24043_s5 + $0x464] ss:$20 sps:$4 sm:$0xff]  }
 0xb32   :  { %11828 = vmatmul.mubr.bf16.vlgmr.msra.gmra.mxu1 %v24094_v5  ;;  %v24241_v60 = vpop.f32.mrf.mxu0 }
 0xb33   :  { %13169 = vmatmul.mubr.bf16.vlgmr.msra.gmra.mxu0 %v24048_v61  ;;  %13178 = vmatpush1.bf16.msra.mxu1 %v21305_v12  ;;  %v21371_v12 = vld [vmem:[%s24043_s5 + $0x460] ss:$20 sps:$4 sm:$0xff]  }
 0xb34   :  { %13209 = vmatprep.mubr.bf16.mxu1 %v24092_v26  ;;  %13219 = vmatpush1.bf16.msra.mxu0 %v21308_v28  ;;  %v24249_v1 = vpop.f32.mrf.mxu0  ;;  %v21376_v28 = vld [vmem:[%s24043_s5 + $0x1ec] ss:$20 sps:$4 sm:$0xff]  }
 0xb35   :  { %13250 = vmatprep.mubr.bf16.mxu0 %v24045_v59  ;;  %13179 = vmatprep.subr.bf16.mxu1 %v21313_v56  ;;  %v21374_v56 = vld [vmem:[%s24043_s5 + $0x1e8] ss:$20 sps:$4 sm:$0xff]  }
 0xb36   :  { %13220 = vmatprep.subr.bf16.mxu0 %v21316_v55  ;;  %v11628_v7 = vpop.f32.mrf.mxu0  ;;  %v21382_v55 = vld [vmem:[%s24043_s5 + $0x1c4] ss:$20 sps:$4 sm:$0xff]  }
 0xb37   :  { %13180 = vmatpush1.bf16.msra.mxu1 %v21311_v58  ;;  %v21379_v58 = vld [vmem:[%s24043_s5 + $0x43c] ss:$20 sps:$4 sm:$0xff]  }
 0xb38   :  { %13221 = vmatpush1.bf16.msra.mxu0 %v21314_v34  ;;  %v11629_v11 = vpop.f32.mrf.mxu0  ;;  %13181 = vmatprep.subr.bf16.mxu1 %v21319_v41  ;;  %v21377_v34 = vld [vmem:[%s24043_s5 + $0x438] ss:$20 sps:$4 sm:$0xff]   ;;  %v21380_v41 = vld [vmem:[%s24043_s5 + $0x1c0] ss:$20 sps:$4 sm:$0xff]   ;;  %v21383_v7 = vld [vmem:[%s24043_s5 + $0x410] ss:$20 sps:$4 sm:$0xff]  }
 0xb39   :  { %13222 = vmatprep.subr.bf16.mxu0 %v21322_v0  ;;  %v21385_v0 = vld [vmem:[%s24043_s5 + $0x414] ss:$20 sps:$4 sm:$0xff]  }
 0xb3a   :  { %v21394_v11 = vld [vmem:[%s24043_s5 + $0x174] ss:$20 sps:$4 sm:$0xff]  }
 0xb3b   :  { %13182 = vmatpush1.bf16.msra.mxu1 %v21317_v36  ;;  %v21388_v36 = vld [vmem:[%s24043_s5 + $0x19c] ss:$20 sps:$4 sm:$0xff]  }
 0xb3c   :  { %13223 = vmatpush1.bf16.msra.mxu0 %v21320_v42  ;;  %13183 = vmatprep.subr.bf16.mxu1 %v21325_v10  ;;  %v21386_v42 = vld [vmem:[%s24043_s5 + $0x198] ss:$20 sps:$4 sm:$0xff]  }
 0xb3d   :  { %13224 = vmatprep.subr.bf16.mxu0 %v21328_v4  ;;  %v21391_v10 = vld [vmem:[%s24043_s5 + $0x3ec] ss:$20 sps:$4 sm:$0xff]   ;;  %v21389_v4 = vld [vmem:[%s24043_s5 + $0x3e8] ss:$20 sps:$4 sm:$0xff]  }
 0xb3f   :  { %13184 = vmatpush1.bf16.msra.mxu1 %v21323_v8  ;;  %v24304_v8 = vld [vmem:[%s16773_s13] sm:$0x3f] }
 0xb40   :  { %13225 = vmatpush1.bf16.msra.mxu0 %v21326_v30  ;;  %13185 = vmatprep.subr.bf16.mxu1 %v21331_v14  ;;  %v21392_v30 = vld [vmem:[%s24043_s5 + $0x170] ss:$20 sps:$4 sm:$0xff]  }
 0xb41   :  { %13226 = vmatprep.subr.bf16.mxu0 %v21334_v17  ;;  %v21397_v14 = vld [vmem:[%s24043_s5 + $0x3c4] ss:$20 sps:$4 sm:$0xff]   ;;  %v21395_v17 = vld [vmem:[%s24043_s5 + $0x3c0] ss:$20 sps:$4 sm:$0xff]  }
 0xb43   :  { %13186 = vmatpush1.bf16.msra.mxu1 %v21329_v57  ;;  %v21400_v57 = vld [vmem:[%s24043_s5 + $0x14c] ss:$20 sps:$4 sm:$0xff]  }
 0xb44   :  { %13227 = vmatpush1.bf16.msra.mxu0 %v21332_v24  ;;  %13187 = vmatprep.subr.bf16.mxu1 %v21337_v25  ;;  %v21398_v24 = vld [vmem:[%s24043_s5 + $0x148] ss:$20 sps:$4 sm:$0xff]   ;;  %v21403_v25 = vld [vmem:[%s24043_s5 + $0x3a4] ss:$20 sps:$4 sm:$0xff]  }
 0xb45   :  { %13228 = vmatprep.subr.bf16.mxu0 %v21340_v29  ;;  %v21404_v29 = vld [vmem:[%s24043_s5 + $0x268] ss:$20 sps:$4 sm:$0xff]  }
 0xb47   :  { %13188 = vmatpush1.bf16.msra.mxu1 %v21335_v21  ;;  %v10603_v21 = vrot.slane %v24304_v8, %v22650_v13 }
 0xb48   :  { %13229 = vmatpush1.bf16.msra.mxu0 %v21338_v38  ;;  %13189 = vmatprep.subr.bf16.mxu1 %v21343_v33  ;;  %v21401_v38 = vld [vmem:[%s24043_s5 + $0x3a0] ss:$20 sps:$4 sm:$0xff]   ;;  %v21405_v33 = vld [vmem:[%s24043_s5 + $0x128] ss:$20 sps:$4 sm:$0xff]  }
 0xb49   :  { %13230 = vmatprep.subr.bf16.mxu0 %v21346_v16  ;;  %v10607_v16 = vrot.slane %v24304_v8, %v22655_v15 }
 0xb4b   :  { %13190 = vmatpush1.bf16.msra.mxu1 %v21341_v32  ;;  %v21408_v32 = vld [vmem:[%s24043_s5 + $0x37c] ss:$20 sps:$4 sm:$0xff]  }
 0xb4c   :  { %13231 = vmatpush1.bf16.msra.mxu0 %v21344_v37  ;;  %13191 = vmatprep.subr.bf16.mxu1 %v21349_v9  ;;  %v21409_v37 = vld [vmem:[%s24043_s5 + $0x240] ss:$20 sps:$4 sm:$0xff]   ;;  %v11625_v9 = vadd.f32 %v24241_v60, %v10603_v21 }
 0xb4d   :  { %13232 = vmatprep.subr.bf16.mxu0 %v21352_v35 }
 0xb4f   :  { %13192 = vmatpush1.bf16.msra.mxu1 %v21347_v19 }
 0xb50   :  { %13233 = vmatpush1.bf16.msra.mxu0 %v21350_v43  ;;  %13193 = vmatprep.subr.bf16.mxu1 %v21355_v44  ;;  %v21406_v43 = vld [vmem:[%s24043_s5 + $0x378] ss:$20 sps:$4 sm:$0xff]   ;;  %v21410_v44 = vld [vmem:[%s24043_s5 + $0x100] ss:$20 sps:$4 sm:$0xff]  }
 0xb51   :  { %13234 = vmatprep.subr.bf16.mxu0 %v21358_v22 }
 0xb53   :  { %13194 = vmatpush2.bf16.msra.mxu1 %v21353_v63  ;;  %v11627_v63 = vadd.f32 %v24249_v1, %v10607_v16  ;;  %v21439_v16 = vld [vmem:[%s24043_s5 + $0x150] ss:$20 sps:$4 sm:$0xff]  }
 0xb54   :  { %13235 = vmatpush2.bf16.msra.mxu0 %v21356_v45  ;;  %13195 = vmatprep.subr.bf16.mxu1 %v21361_v23  ;;  %v21413_v45 = vld [vmem:[%s24043_s5 + $0x354] ss:$20 sps:$4 sm:$0xff]   ;;  %v21414_v23 = vld [vmem:[%s24043_s5 + $0x218] ss:$20 sps:$4 sm:$0xff]  }
 0xb55   :  { %13236 = vmatprep.subr.bf16.mxu0 %v21364_v47 }
 0xb57   :  { %13196 = vmatpush2.bf16.msra.mxu1 %v21359_v50 }
 0xb58   :  { %13237 = vmatpush2.bf16.msra.mxu0 %v21362_v6  ;;  %13197 = vmatprep.subr.bf16.mxu1 %v21367_v27 }
 0xb59   :  { %13238 = vmatprep.subr.bf16.mxu0 %v21370_v51  ;;  %v21415_v51 = vld [vmem:[%s24043_s5 + $0xd8] ss:$20 sps:$4 sm:$0xff]  }
 0xb5b   :  { %13198 = vmatpush2.bf16.msra.mxu1 %v21365_v48  ;;  %v21411_v48 = vld [vmem:[%s24043_s5 + $0x350] ss:$20 sps:$4 sm:$0xff]  }
 0xb5c   :  { %13239 = vmatpush2.bf16.msra.mxu0 %v21368_v18  ;;  %13199 = vmatprep.subr.bf16.mxu1 %v21373_v54  ;;  %v21418_v54 = vld [vmem:[%s24043_s5 + $0x32c] ss:$20 sps:$4 sm:$0xff]  }
 0xb5d   :  { %13240 = vmatprep.subr.bf16.mxu0 %v21376_v28  ;;  %v21419_v28 = vld [vmem:[%s24043_s5 + $0x1f0] ss:$20 sps:$4 sm:$0xff]  }
 0xb5f   :  { %13200 = vmatpush2.bf16.msra.mxu1 %v21371_v12 }
 0xb60   :  { %13241 = vmatpush2.bf16.msra.mxu0 %v21374_v56  ;;  %13201 = vmatprep.subr.bf16.mxu1 %v21379_v58  ;;  %v21416_v56 = vld [vmem:[%s24043_s5 + $0x328] ss:$20 sps:$4 sm:$0xff]   ;;  %v21420_v58 = vld [vmem:[%s24043_s5 + $0xb0] ss:$20 sps:$4 sm:$0xff]  }
 0xb61   :  { %13242 = vmatprep.subr.bf16.mxu0 %v21382_v55  ;;  %v21424_v55 = vld [vmem:[%s24043_s5 + $0x1c8] ss:$20 sps:$4 sm:$0xff]  }
 0xb63   :  { %13202 = vmatpush2.bf16.msra.mxu1 %v21377_v34  ;;  %v21423_v34 = vld [vmem:[%s24043_s5 + $0x304] ss:$20 sps:$4 sm:$0xff]  }
 0xb64   :  { %13243 = vmatpush2.bf16.msra.mxu0 %v21380_v41  ;;  %13203 = vmatprep.subr.bf16.mxu1 %v21385_v0  ;;  %v21421_v41 = vld [vmem:[%s24043_s5 + $0x300] ss:$20 sps:$4 sm:$0xff]   ;;  %v21425_v0 = vld [vmem:[%s24043_s5 + $0x88] ss:$20 sps:$4 sm:$0xff]  }
 0xb65   :  { %13244 = vmatprep.subr.bf16.mxu0 %v21388_v36  ;;  %v21429_v36 = vld [vmem:[%s24043_s5 + $0x1a0] ss:$20 sps:$4 sm:$0xff]  }
 0xb67   :  { %13204 = vmatpush2.bf16.msra.mxu1 %v21383_v7  ;;  %v21428_v7 = vld [vmem:[%s24043_s5 + $0x2dc] ss:$20 sps:$4 sm:$0xff]  }
 0xb68   :  { %13245 = vmatpush2.bf16.msra.mxu0 %v21386_v42  ;;  %13205 = vmatprep.subr.bf16.mxu1 %v21391_v10  ;;  %v21426_v42 = vld [vmem:[%s24043_s5 + $0x2d8] ss:$20 sps:$4 sm:$0xff]   ;;  %v21430_v10 = vld [vmem:[%s24043_s5 + $0x60] ss:$20 sps:$4 sm:$0xff]  }
 0xb69   :  { %13246 = vmatprep.subr.bf16.mxu0 %v21394_v11  ;;  %v21434_v11 = vld [vmem:[%s24043_s5 + $0x178] ss:$20 sps:$4 sm:$0xff]  }
 0xb6b   :  { %13206 = vmatpush2.bf16.msra.mxu1 %v21389_v4  ;;  %v21433_v4 = vld [vmem:[%s24043_s5 + $0x2b4] ss:$20 sps:$4 sm:$0xff]  }
 0xb6c   :  { %13247 = vmatpush2.bf16.msra.mxu0 %v21392_v30  ;;  %13207 = vmatprep.subr.bf16.mxu1 %v21397_v14 }
 0xb6d   :  { %13248 = vmatprep.subr.bf16.mxu0 %v21400_v57 }
 0xb6f   :  { %13208 = vmatpush2.bf16.msra.mxu1 %v21395_v17 }
 0xb70   :  { %13249 = vmatpush2.bf16.msra.mxu0 %v21398_v24  ;;  %13259 = vmatprep.subr.bf16.mxu1 %v21403_v25  ;;  %v21431_v24 = vld [vmem:[%s24043_s5 + $0x2b0] ss:$20 sps:$4 sm:$0xff]   ;;  %v21435_v25 = vld [vmem:[%s24043_s5 + $0x38] ss:$20 sps:$4 sm:$0xff]  }
 0xb71   :  { %19000 = vmatprep.subr.bf16.mxu0 %v21404_v29 }
 0xb72   :  { %v24322_v35 = vpop.f32.mrf.mxu0  ;;  %13210 = vmatmul.mubr.bf16.vlgmr.msra.gmra.mxu1 %v24094_v5  ;;  %v11665_v19 = vpop.f32.mrf.mxu1 }
 0xb73   :  { %13251 = vmatmul.mubr.bf16.vlgmr.msra.gmra.mxu0 %v24048_v61  ;;  %v11666_v22 = vadd.f32 %v11665_v19, %v11625_v9  ;;  %13260 = vmatpush1.bf16.msra.mxu1 %v21401_v38  ;;  %v21440_v9 = vld [vmem:[%s24043_s5 + $0x10] ss:$20 sps:$4 sm:$0xff]  }
 0xb74   :  { %13291 = vmatprep.mubr.bf16.mxu1 %v24092_v26  ;;  %19001 = vmatpush3.bf16.msra.mxu0 %v21405_v33  ;;  %v24332_v60 = vpop.f32.mrf.mxu0  ;;  %v11667_v47 = vpop.f32.mrf.mxu1  ;;  %v21438_v33 = vld [vmem:[%s24043_s5 + $0x28c] ss:$20 sps:$4 sm:$0xff]   ;;  %v21443_v19 = vld [vmem:[%s24043_s5 + $0x4e4] ss:$20 sps:$4 sm:$0xff]  }
 0xb75   :  { %v11842_v50 = vmul.f32 0.70710677, %v11666_v22  ;;  %13332 = vmatprep.mubr.bf16.mxu0 %v24045_v59  ;;  %v11668_v1 = vadd.f32 %v11667_v47, %v11627_v63  ;;  %13261 = vmatprep.subr.bf16.mxu1 %v21408_v32  ;;  %v11836_v14 = vmul.f32 0.5, %v11666_v22  ;;  %v21444_v63 = vld [vmem:[%s24201_s9 + $0x118] ss:$20 sps:$4 sm:$0xff]  }
 0xb76   :  { %v11710_v6 = vpop.f32.mrf.mxu0  ;;  %19002 = vmatprep.subr.bf16.mxu0 %v21409_v37  ;;  %v11669_v27 = vpop.f32.mrf.mxu1  ;;  %v21436_v37 = vld [vmem:[%s24043_s5 + $0x288] ss:$20 sps:$4 sm:$0xff]   ;;  %v21450_v47 = vld [vmem:[%s24201_s9 + $0xf0] ss:$20 sps:$4 sm:$0xff]  }
 0xb77   :  { %22205 = verf.f32 %v11842_v50  ;;  %v11843_v18 = vmul.f32 0.70710677, %v11668_v1  ;;  %13262 = vmatpush1.bf16.msra.mxu1 %v21406_v43  ;;  %v11837_v21 = vmul.f32 0.5, %v11668_v1  ;;  %v21446_v43 = vld [vmem:[%s24201_s9 + $0x11c] ss:$20 sps:$4 sm:$0xff]  }
 0xb78   :  { %19003 = vmatpush3.bf16.msra.mxu0 %v21410_v44  ;;  %v11711_v59 = vpop.f32.mrf.mxu0  ;;  %v11670_v12 = vpop.f32.mrf.mxu1  ;;  %13263 = vmatprep.subr.bf16.mxu1 %v21413_v45  ;;  %v21441_v44 = vld [vmem:[%s24043_s5 + $0x4e0] ss:$20 sps:$4 sm:$0xff]   ;;  %v21449_v22 = vld [vmem:[%s24043_s5 + $0x4bc] ss:$20 sps:$4 sm:$0xff]  }
 0xb79   :  { %22207 = verf.f32 %v11843_v18  ;;  %19004 = vmatprep.subr.bf16.mxu0 %v21414_v23  ;;  %v21452_v45 = vld [vmem:[%s24201_s9 + $0xf4] ss:$20 sps:$4 sm:$0xff]   ;;  %v21447_v23 = vld [vmem:[%s24043_s5 + $0x4b8] ss:$20 sps:$4 sm:$0xff]   ;;  %v21453_v6 = vld [vmem:[%s24043_s5 + $0x490] ss:$20 sps:$4 sm:$0xff]  }
 0xb7a   :  { %v21455_v50 = vld [vmem:[%s24043_s5 + $0x494] ss:$20 sps:$4 sm:$0xff]   ;;  %v21458_v1 = vld [vmem:[%s24201_s9 + $0xcc] ss:$20 sps:$4 sm:$0xff]   ;;  %v21470_v59 = vld [vmem:[%s24201_s9 + $0x7c] ss:$20 sps:$4 sm:$0xff]  }
 0xb7b   :  { %13264 = vmatpush1.bf16.msra.mxu1 %v21411_v48  ;;  %v21461_v27 = vld [vmem:[%s24043_s5 + $0x46c] ss:$20 sps:$4 sm:$0xff]   ;;  %v21464_v48 = vld [vmem:[%s24201_s9 + $0xa4] ss:$20 sps:$4 sm:$0xff]  }
 0xb7c   :  { %19005 = vmatpush3.bf16.msra.mxu0 %v21415_v51  ;;  %13265 = vmatprep.subr.bf16.mxu1 %v21418_v54  ;;  %v21459_v51 = vld [vmem:[%s24043_s5 + $0x468] ss:$20 sps:$4 sm:$0xff]   ;;  %v21462_v18 = vld [vmem:[%s24201_s9 + $0xa0] ss:$20 sps:$4 sm:$0xff]   ;;  %v21467_v54 = vld [vmem:[%s24043_s5 + $0x444] ss:$20 sps:$4 sm:$0xff]  }
 0xb7d   :  { %19006 = vmatprep.subr.bf16.mxu0 %v21419_v28  ;;  %v21465_v12 = vld [vmem:[%s24043_s5 + $0x440] ss:$20 sps:$4 sm:$0xff]   ;;  %v21468_v28 = vld [vmem:[%s24201_s9 + $0x78] ss:$20 sps:$4 sm:$0xff]  }
 0xb7f   :  { %13266 = vmatpush1.bf16.msra.mxu1 %v21416_v56  ;;  %v21473_v56 = vld [vmem:[%s24043_s5 + $0x41c] ss:$20 sps:$4 sm:$0xff]  }
 0xb80   :  { %19007 = vmatpush3.bf16.msra.mxu0 %v21420_v58  ;;  %13267 = vmatprep.subr.bf16.mxu1 %v21423_v34  ;;  %v21476_v58 = vld [vmem:[%s24201_s9 + $0x54] ss:$20 sps:$4 sm:$0xff]   ;;  %v21471_v34 = vld [vmem:[%s24043_s5 + $0x418] ss:$20 sps:$4 sm:$0xff]  }
 0xb81   :  { %19008 = vmatprep.subr.bf16.mxu0 %v21424_v55  ;;  %v21474_v55 = vld [vmem:[%s24201_s9 + $0x50] ss:$20 sps:$4 sm:$0xff]  }
 0xb83   :  { %13268 = vmatpush1.bf16.msra.mxu1 %v21421_v41  ;;  %v21479_v41 = vld [vmem:[%s24043_s5 + $0x3f4] ss:$20 sps:$4 sm:$0xff]  }
 0xb84   :  { %v22206_v30 = vpop.eup %22205  ;;  %19009 = vmatpush3.bf16.msra.mxu0 %v21425_v0  ;;  %13269 = vmatprep.subr.bf16.mxu1 %v21428_v7  ;;  %v21482_v0 = vld [vmem:[%s24201_s9 + $0x2c] ss:$20 sps:$4 sm:$0xff]   ;;  %v21477_v7 = vld [vmem:[%s24043_s5 + $0x3f0] ss:$20 sps:$4 sm:$0xff]  }
 0xb85   :  { %v11854_v17 = vadd.f32 1.0, %v22206_v30  ;;  %19010 = vmatprep.subr.bf16.mxu0 %v21429_v36  ;;  %v21480_v36 = vld [vmem:[%s24201_s9 + $0x28] ss:$20 sps:$4 sm:$0xff]  }
 0xb86   :  { %v22208_v57 = vpop.eup %22207  ;;  %v21489_v30 = vld [vmem:[%s24043_s5 + $0x4e8] ss:$20 sps:$4 sm:$0xff]  }
 0xb87   :  { %v11860_v29 = vmul.f32 %v11854_v17, %v11836_v14  ;;  %v11855_v38 = vadd.f32 1.0, %v22208_v57  ;;  %13270 = vmatpush1.bf16.msra.mxu1 %v21426_v42  ;;  %v21485_v42 = vld [vmem:[%s24043_s5 + $0x3cc] ss:$20 sps:$4 sm:$0xff]   ;;  %v10611_v14 = vrot.slane %v24304_v8, %v22694_v2  ;;  %v21492_v17 = vld [vmem:[%s24201_s9 + $0x25c] ss:$20 sps:$4 sm:$0xff]   ;;  %v10615_v57 = vrot.slane %v24304_v8, %v22697_v3 }
 0xb88   :  { %19011 = vmatpush3.bf16.msra.mxu0 %v21430_v10  ;;  %13271 = vmatprep.subr.bf16.mxu1 %v21433_v4  ;;  %v21488_v10 = vld [vmem:[%s24201_s9 + $0x4] ss:$20 sps:$4 sm:$0xff]   ;;  %v21483_v4 = vld [vmem:[%s24043_s5 + $0x3c8] ss:$20 sps:$4 sm:$0xff]  }
 0xb89   :  { %11866 = vst [vmem:[%s24350_s17] sm:$0xff] %v11860_v29  ;;  %v11861_v32 = vmul.f32 %v11855_v38, %v11837_v21  ;;  %19012 = vmatprep.subr.bf16.mxu0 %v21434_v11  ;;  %v21486_v11 = vld [vmem:[%s24201_s9] ss:$20 sps:$4 sm:$0xff]   ;;  %v11707_v21 = vadd.f32 %v24322_v35, %v10611_v14  ;;  %v21520_v14 = vld [vmem:[%s24201_s9 + $0x168] ss:$20 sps:$4 sm:$0xff]  }
 0xb8a   :  { %v21494_v29 = vld [vmem:[%s24043_s5 + $0x4c0] ss:$20 sps:$4 sm:$0xff]  }
 0xb8b   :  { %11867 = vst [vmem:[%s24350_s17 + $0x8] sm:$0xff] %v11861_v32  ;;  %13272 = vmatpush1.bf16.msra.mxu1 %v21431_v24  ;;  %v21493_v24 = vld [vmem:[%s24043_s5 + $0x3a8] ss:$20 sps:$4 sm:$0xff]   ;;  %v11709_v32 = vadd.f32 %v24332_v60, %v10615_v57  ;;  %v21502_v60 = vld [vmem:[%s24201_s9 + $0x20c] ss:$20 sps:$4 sm:$0xff]  }
 0xb8c   :  { %19013 = vmatpush3.bf16.msra.mxu0 %v21435_v25  ;;  %13273 = vmatprep.subr.bf16.mxu1 %v21438_v33  ;;  %v21490_v25 = vld [vmem:[%s24201_s9 + $0x258] ss:$20 sps:$4 sm:$0xff]   ;;  %v21497_v38 = vld [vmem:[%s24201_s9 + $0x234] ss:$20 sps:$4 sm:$0xff]  }
 0xb8d   :  { %19014 = vmatprep.subr.bf16.mxu0 %v21439_v16 }
 0xb8f   :  { %13274 = vmatpush1.bf16.msra.mxu1 %v21436_v37 }
 0xb90   :  { %19015 = vmatpush3.bf16.msra.mxu0 %v21440_v9  ;;  %13275 = vmatprep.subr.bf16.mxu1 %v21443_v19  ;;  %v21498_v9 = vld [vmem:[%s24043_s5 + $0x380] ss:$20 sps:$4 sm:$0xff]  }
 0xb91   :  { %14420 = vmatprep.subr.bf16.mxu0 %v21446_v43  ;;  %v21495_v43 = vld [vmem:[%s24201_s9 + $0x230] ss:$20 sps:$4 sm:$0xff]  }
 0xb93   :  { %13333 = vmatmul.mubr.bf16.vlgmr.msra.gmra.mxu0 %v24048_v61  ;;  %13276 = vmatpush2.bf16.msra.mxu1 %v21441_v44  ;;  %v21456_v61 = vld [vmem:[%s24201_s9 + $0xc8] ss:$20 sps:$4 sm:$0xff]   ;;  %v21499_v44 = vld [vmem:[%s24043_s5 + $0x498] ss:$20 sps:$4 sm:$0xff]  }
 0xb94   :  { %14421 = vmatpush1.bf16.msra.mxu0 %v21444_v63  ;;  %14452 = vmatprep.mubr.bf16.mxu0 %v22670_v46 }
 0xb95   :  { %13277 = vmatprep.subr.bf16.mxu1 %v21449_v22  ;;  %14422 = vmatprep.subr.bf16.mxu0 %v21452_v45 }
 0xb97   :  { %13278 = vmatpush2.bf16.msra.mxu1 %v21447_v23 }
 0xb98   :  { %14423 = vmatpush1.bf16.msra.mxu0 %v21450_v47  ;;  %13279 = vmatprep.subr.bf16.mxu1 %v21455_v50  ;;  %v21503_v47 = vld [vmem:[%s24043_s5 + $0x358] ss:$20 sps:$4 sm:$0xff]  }
 0xb99   :  { %14424 = vmatprep.subr.bf16.mxu0 %v21458_v1 }
 0xb9b   :  { %13280 = vmatpush2.bf16.msra.mxu1 %v21453_v6  ;;  %v21500_v6 = vld [vmem:[%s24201_s9 + $0x208] ss:$20 sps:$4 sm:$0xff]  }
 0xb9c   :  { %14425 = vmatpush1.bf16.msra.mxu0 %v21456_v61  ;;  %13281 = vmatprep.subr.bf16.mxu1 %v21461_v27  ;;  %v21504_v61 = vld [vmem:[%s24043_s5 + $0x470] ss:$20 sps:$4 sm:$0xff]  }
 0xb9d   :  { %14426 = vmatprep.subr.bf16.mxu0 %v21464_v48  ;;  %v21507_v27 = vld [vmem:[%s24201_s9 + $0x1e4] ss:$20 sps:$4 sm:$0xff]  }
 0xb9e   :  { %v21508_v48 = vld [vmem:[%s24043_s5 + $0x330] ss:$20 sps:$4 sm:$0xff]  }
 0xb9f   :  { %13282 = vmatpush2.bf16.msra.mxu1 %v21459_v51  ;;  %v21505_v51 = vld [vmem:[%s24201_s9 + $0x1e0] ss:$20 sps:$4 sm:$0xff]  }
 0xba0   :  { %14427 = vmatpush1.bf16.msra.mxu0 %v21462_v18  ;;  %13283 = vmatprep.subr.bf16.mxu1 %v21467_v54  ;;  %v21509_v18 = vld [vmem:[%s24043_s5 + $0x448] ss:$20 sps:$4 sm:$0xff]  }
 0xba1   :  { %14428 = vmatprep.subr.bf16.mxu0 %v21470_v59  ;;  %v21512_v54 = vld [vmem:[%s24201_s9 + $0x1bc] ss:$20 sps:$4 sm:$0xff]  }
 0xba2   :  { %v21513_v59 = vld [vmem:[%s24043_s5 + $0x308] ss:$20 sps:$4 sm:$0xff]  }
 0xba3   :  { %13284 = vmatpush2.bf16.msra.mxu1 %v21465_v12  ;;  %v21510_v12 = vld [vmem:[%s24201_s9 + $0x1b8] ss:$20 sps:$4 sm:$0xff]  }
 0xba4   :  { %14429 = vmatpush1.bf16.msra.mxu0 %v21468_v28  ;;  %13285 = vmatprep.subr.bf16.mxu1 %v21473_v56  ;;  %v21514_v28 = vld [vmem:[%s24043_s5 + $0x420] ss:$20 sps:$4 sm:$0xff]  }
 0xba5   :  { %14430 = vmatprep.subr.bf16.mxu0 %v21476_v58  ;;  %v21517_v56 = vld [vmem:[%s24201_s9 + $0x194] ss:$20 sps:$4 sm:$0xff]  }
 0xba6   :  { %v21518_v58 = vld [vmem:[%s24043_s5 + $0x2e0] ss:$20 sps:$4 sm:$0xff]  }
 0xba7   :  { %13286 = vmatpush2.bf16.msra.mxu1 %v21471_v34 }
 0xba8   :  { %14431 = vmatpush1.bf16.msra.mxu0 %v21474_v55  ;;  %13287 = vmatprep.subr.bf16.mxu1 %v21479_v41  ;;  %v21515_v55 = vld [vmem:[%s24201_s9 + $0x190] ss:$20 sps:$4 sm:$0xff]   ;;  %v21519_v41 = vld [vmem:[%s24043_s5 + $0x3f8] ss:$20 sps:$4 sm:$0xff]  }
 0xba9   :  { %14432 = vmatprep.subr.bf16.mxu0 %v21482_v0 }
 0xbab   :  { %13288 = vmatpush2.bf16.msra.mxu1 %v21477_v7 }
 0xbac   :  { %14433 = vmatpush1.bf16.msra.mxu0 %v21480_v36  ;;  %13289 = vmatprep.subr.bf16.mxu1 %v21485_v42  ;;  %v21522_v36 = vld [vmem:[%s24201_s9 + $0x16c] ss:$20 sps:$4 sm:$0xff]  }
 0xbad   :  { %14434 = vmatprep.subr.bf16.mxu0 %v21488_v10 }
 0xbaf   :  { %13290 = vmatpush2.bf16.msra.mxu1 %v21483_v4 }
 0xbb0   :  { %14435 = vmatpush1.bf16.msra.mxu0 %v21486_v11  ;;  %19022 = vmatprep.subr.bf16.mxu1 %v21489_v30  ;;  %v21523_v30 = vld [vmem:[%s24043_s5 + $0x2b8] ss:$20 sps:$4 sm:$0xff]  }
 0xbb1   :  { %14436 = vmatprep.subr.bf16.mxu0 %v21492_v17  ;;  %v21524_v17 = vld [vmem:[%s24043_s5 + $0x3d0] ss:$20 sps:$4 sm:$0xff]  }
 0xbb2   :  { %v11747_v33 = vpop.f32.mrf.mxu1  ;;  %v24409_v16 = vpop.f32.mrf.mxu0  ;;  %13292 = vmatmul.mubr.bf16.vlgmr.msra.gmra.mxu1 %v24094_v5 }
 0xbb3   :  { %v11748_v37 = vadd.f32 %v11747_v33, %v11707_v21  ;;  %19023 = vmatpush3.bf16.msra.mxu1 %v21493_v24  ;;  %13372 = vmatprep.mubr.bf16.mxu1 %v24092_v26  ;;  %v21527_v24 = vld [vmem:[%s24201_s9 + $0x144] ss:$20 sps:$4 sm:$0xff]   ;;  %v21531_v21 = vld [vmem:[%s24201_s9 + $0x39c] ss:$20 sps:$4 sm:$0xff]  }
 0xbb4   :  { %14437 = vmatpush2.bf16.msra.mxu0 %v21490_v25  ;;  %v11749_v19 = vpop.f32.mrf.mxu1  ;;  %v24415_v35 = vpop.f32.mrf.mxu0  ;;  %19024 = vmatprep.subr.bf16.mxu1 %v21494_v29  ;;  %v21528_v25 = vld [vmem:[%s24043_s5 + $0x290] ss:$20 sps:$4 sm:$0xff]   ;;  %v21525_v29 = vld [vmem:[%s24201_s9 + $0x140] ss:$20 sps:$4 sm:$0xff]   ;;  %v21529_v33 = vld [vmem:[%s24201_s9 + $0x398] ss:$20 sps:$4 sm:$0xff]  }
 0xbb5   :  { %v11844_v63 = vmul.f32 0.70710677, %v11748_v37  ;;  %v11750_v22 = vadd.f32 %v11749_v19, %v11709_v32  ;;  %14438 = vmatprep.subr.bf16.mxu0 %v21497_v38  ;;  %v11838_v0 = vmul.f32 0.5, %v11748_v37  ;;  %v21534_v38 = vld [vmem:[%s24201_s9 + $0x61c] ss:$20 sps:$4 sm:$0xff]  }
 0xbb6   :  { %v11751_v45 = vpop.f32.mrf.mxu1  ;;  %v11792_v23 = vpop.f32.mrf.mxu0  ;;  %v21532_v32 = vld [vmem:[%s24201_s9 + $0x618] ss:$20 sps:$4 sm:$0xff]   ;;  %v21537_v37 = vld [vmem:[%s24201_s9 + $0x374] ss:$20 sps:$4 sm:$0xff]   ;;  %v21535_v19 = vld [vmem:[%s24201_s9 + $0x370] ss:$20 sps:$4 sm:$0xff]  }
 0xbb7   :  { %22209 = verf.f32 %v11844_v63  ;;  %v11845_v26 = vmul.f32 0.70710677, %v11750_v22  ;;  %19025 = vmatpush3.bf16.msra.mxu1 %v21498_v9  ;;  %v11839_v4 = vmul.f32 0.5, %v11750_v22  ;;  %v21540_v9 = vld [vmem:[%s24201_s9 + $0x5f4] ss:$20 sps:$4 sm:$0xff]  }
 0xbb8   :  { %14439 = vmatpush2.bf16.msra.mxu0 %v21495_v43  ;;  %v11752_v50 = vpop.f32.mrf.mxu1  ;;  %v11793_v1 = vpop.f32.mrf.mxu0  ;;  %19026 = vmatprep.subr.bf16.mxu1 %v21499_v44  ;;  %v21538_v43 = vld [vmem:[%s24201_s9 + $0x5f0] ss:$20 sps:$4 sm:$0xff]   ;;  %v21543_v44 = vld [vmem:[%s24201_s9 + $0x34c] ss:$20 sps:$4 sm:$0xff]   ;;  %v21544_v22 = vld [vmem:[%s24201_s9 + $0x5c8] ss:$20 sps:$4 sm:$0xff]  }
 0xbb9   :  { %22211 = verf.f32 %v11845_v26  ;;  %14440 = vmatprep.subr.bf16.mxu0 %v21502_v60  ;;  %v21546_v63 = vld [vmem:[%s24201_s9 + $0x5cc] ss:$20 sps:$4 sm:$0xff]   ;;  %v21549_v60 = vld [vmem:[%s24201_s9 + $0x324] ss:$20 sps:$4 sm:$0xff]   ;;  %v21558_v50 = vld [vmem:[%s24201_s9 + $0x57c] ss:$20 sps:$4 sm:$0xff]  }
 0xbba   :  { %v21552_v45 = vld [vmem:[%s24201_s9 + $0x5a4] ss:$20 sps:$4 sm:$0xff]   ;;  %v21547_v23 = vld [vmem:[%s24201_s9 + $0x320] ss:$20 sps:$4 sm:$0xff]  }
 0xbbb   :  { %19027 = vmatpush3.bf16.msra.mxu1 %v21503_v47  ;;  %v21550_v26 = vld [vmem:[%s24201_s9 + $0x5a0] ss:$20 sps:$4 sm:$0xff]   ;;  %v21555_v47 = vld [vmem:[%s24201_s9 + $0x2fc] ss:$20 sps:$4 sm:$0xff]   ;;  %v21553_v1 = vld [vmem:[%s24201_s9 + $0x2f8] ss:$20 sps:$4 sm:$0xff]  }
 0xbbc   :  { %14441 = vmatpush2.bf16.msra.mxu0 %v21500_v6  ;;  %19028 = vmatprep.subr.bf16.mxu1 %v21504_v61  ;;  %v21556_v6 = vld [vmem:[%s24201_s9 + $0x578] ss:$20 sps:$4 sm:$0xff]   ;;  %v21561_v61 = vld [vmem:[%s24201_s9 + $0x2d4] ss:$20 sps:$4 sm:$0xff]  }
 0xbbd   :  { %14442 = vmatprep.subr.bf16.mxu0 %v21507_v27  ;;  %v21564_v27 = vld [vmem:[%s24201_s9 + $0x554] ss:$20 sps:$4 sm:$0xff]  }
 0xbbf   :  { %19029 = vmatpush3.bf16.msra.mxu1 %v21508_v48  ;;  %v21559_v48 = vld [vmem:[%s24201_s9 + $0x2d0] ss:$20 sps:$4 sm:$0xff]  }
 0xbc0   :  { %14443 = vmatpush2.bf16.msra.mxu0 %v21505_v51  ;;  %19030 = vmatprep.subr.bf16.mxu1 %v21509_v18  ;;  %v21562_v51 = vld [vmem:[%s24201_s9 + $0x550] ss:$20 sps:$4 sm:$0xff]   ;;  %v21567_v18 = vld [vmem:[%s24201_s9 + $0x2ac] ss:$20 sps:$4 sm:$0xff]  }
 0xbc1   :  { %14444 = vmatprep.subr.bf16.mxu0 %v21512_v54  ;;  %v21570_v54 = vld [vmem:[%s24201_s9 + $0x52c] ss:$20 sps:$4 sm:$0xff]  }
 0xbc3   :  { %19031 = vmatpush3.bf16.msra.mxu1 %v21513_v59  ;;  %v21565_v59 = vld [vmem:[%s24201_s9 + $0x2a8] ss:$20 sps:$4 sm:$0xff]  }
 0xbc4   :  { %v22210_v34 = vpop.eup %22209  ;;  %14445 = vmatpush2.bf16.msra.mxu0 %v21510_v12  ;;  %19032 = vmatprep.subr.bf16.mxu1 %v21514_v28  ;;  %v21568_v12 = vld [vmem:[%s24201_s9 + $0x528] ss:$20 sps:$4 sm:$0xff]   ;;  %v21573_v28 = vld [vmem:[%s24201_s9 + $0x284] ss:$20 sps:$4 sm:$0xff]  }
 0xbc5   :  { %v11856_v7 = vadd.f32 1.0, %v22210_v34  ;;  %14446 = vmatprep.subr.bf16.mxu0 %v21517_v56  ;;  %v21576_v56 = vld [vmem:[%s24201_s9 + $0x504] ss:$20 sps:$4 sm:$0xff]   ;;  %v21574_v34 = vld [vmem:[%s24201_s9 + $0x500] ss:$20 sps:$4 sm:$0xff]  }
 0xbc6   :  { %v22212_v42 = vpop.eup %22211 }
 0xbc7   :  { %v11862_v10 = vmul.f32 %v11856_v7, %v11838_v0  ;;  %v11857_v11 = vadd.f32 1.0, %v22212_v42  ;;  %19033 = vmatpush3.bf16.msra.mxu1 %v21518_v58  ;;  %v21571_v58 = vld [vmem:[%s24201_s9 + $0x280] ss:$20 sps:$4 sm:$0xff]   ;;  %v21582_v0 = vld [vmem:[%s24201_s9 + $0x3a4] ss:$20 sps:$4 sm:$0xff]   ;;  %v10623_v7 = vrot.slane %v24304_v8, %v23245_v20 }
 0xbc8   :  { %14447 = vmatpush2.bf16.msra.mxu0 %v21515_v55  ;;  %19034 = vmatprep.subr.bf16.mxu1 %v21519_v41  ;;  %v21579_v55 = vld [vmem:[%s24201_s9 + $0x4dc] ss:$20 sps:$4 sm:$0xff]   ;;  %v10619_v41 = vrot.slane %v24304_v8, %v22725_v62  ;;  %v21580_v42 = vld [vmem:[%s24201_s9 + $0x3a0] ss:$20 sps:$4 sm:$0xff]  }
 0xbc9   :  { %11868 = vst [vmem:[%s24350_s17 + $0x10] sm:$0xff] %v11862_v10  ;;  %v11863_v57 = vmul.f32 %v11857_v11, %v11839_v4  ;;  %14448 = vmatprep.subr.bf16.mxu0 %v21522_v36  ;;  %v21577_v36 = vld [vmem:[%s24201_s9 + $0x4d8] ss:$20 sps:$4 sm:$0xff]   ;;  %v21585_v4 = vld [vmem:[%s24201_s9 + $0x4b4] ss:$20 sps:$4 sm:$0xff]  }
 0xbca   :  { %v11789_v10 = vadd.f32 %v24409_v16, %v10619_v41  ;;  %v21588_v11 = vld [vmem:[%s24201_s9 + $0x37c] ss:$20 sps:$4 sm:$0xff]   ;;  %v21586_v16 = vld [vmem:[%s24201_s9 + $0x378] ss:$20 sps:$4 sm:$0xff]  }
 0xbcb   :  { %11869 = vst [vmem:[%s24350_s17 + $0x18] sm:$0xff] %v11863_v57  ;;  %19035 = vmatpush3.bf16.msra.mxu1 %v21523_v30  ;;  %v21583_v8 = vld [vmem:[%s24201_s9 + $0x4b0] ss:$20 sps:$4 sm:$0xff]  }
 0xbcc   :  { %14449 = vmatpush2.bf16.msra.mxu0 %v21520_v14  ;;  %19036 = vmatprep.subr.bf16.mxu1 %v21524_v17  ;;  %v11791_v14 = vadd.f32 %v24415_v35, %v10623_v7  ;;  %v21619_v7 = vld [vmem:[%s24201_s9 + $0x3c0] ss:$20 sps:$4 sm:$0xff]  }
 0xbcd   :  { %14450 = vmatprep.subr.bf16.mxu0 %v21527_v24 }
 0xbcf   :  { %19037 = vmatpush3.bf16.msra.mxu1 %v21528_v25  ;;  %v21591_v25 = vld [vmem:[%s24201_s9 + $0x48c] ss:$20 sps:$4 sm:$0xff]  }
 0xbd0   :  { %14451 = vmatpush2.bf16.msra.mxu0 %v21525_v29  ;;  %14461 = vmatprep.subr.bf16.mxu1 %v21531_v21 }
 0xbd1   :  { %14502 = vmatprep.subr.bf16.mxu0 %v21534_v38  ;;  %v21594_v38 = vld [vmem:[%s24201_s9 + $0x354] ss:$20 sps:$4 sm:$0xff]  }
 0xbd2   :  { %13373 = vmatmul.mubr.bf16.vlgmr.msra.gmra.mxu1 %v24094_v5  ;;  %v21541_v5 = vld [vmem:[%s24201_s9 + $0x348] ss:$20 sps:$4 sm:$0xff]  }
 0xbd3   :  { %14453 = vmatmul.mubr.bf16.vlgmr.msra.gmra.mxu0 %v22673_v49  ;;  %14462 = vmatpush1.bf16.msra.mxu1 %v21529_v33 }
 0xbd4   :  { %14493 = vmatprep.mubr.bf16.mxu1 %v22703_v52  ;;  %14503 = vmatpush1.bf16.msra.mxu0 %v21532_v32 }
 0xbd5   :  { %14463 = vmatprep.subr.bf16.mxu1 %v21537_v37  ;;  %14504 = vmatprep.subr.bf16.mxu0 %v21540_v9  ;;  %v21589_v9 = vld [vmem:[%s24201_s9 + $0x488] ss:$20 sps:$4 sm:$0xff]  }
 0xbd6   :  { %14534 = vmatprep.mubr.bf16.mxu0 %v22242_v53 }
 0xbd7   :  { %14464 = vmatpush1.bf16.msra.mxu1 %v21535_v19 }
 0xbd8   :  { %14505 = vmatpush1.bf16.msra.mxu0 %v21538_v43  ;;  %14465 = vmatprep.subr.bf16.mxu1 %v21543_v44  ;;  %v21592_v43 = vld [vmem:[%s24201_s9 + $0x350] ss:$20 sps:$4 sm:$0xff]  }
 0xbd9   :  { %14506 = vmatprep.subr.bf16.mxu0 %v21546_v63  ;;  %v21597_v44 = vld [vmem:[%s24201_s9 + $0x464] ss:$20 sps:$4 sm:$0xff]  }
 0xbdb   :  { %14466 = vmatpush1.bf16.msra.mxu1 %v21541_v5  ;;  %v21600_v5 = vld [vmem:[%s24201_s9 + $0x32c] ss:$20 sps:$4 sm:$0xff]  }
 0xbdc   :  { %14507 = vmatpush1.bf16.msra.mxu0 %v21544_v22  ;;  %14467 = vmatprep.subr.bf16.mxu1 %v21549_v60  ;;  %v21595_v22 = vld [vmem:[%s24201_s9 + $0x460] ss:$20 sps:$4 sm:$0xff]   ;;  %v21598_v60 = vld [vmem:[%s24201_s9 + $0x328] ss:$20 sps:$4 sm:$0xff]  }
 0xbdd   :  { %14508 = vmatprep.subr.bf16.mxu0 %v21552_v45  ;;  %v21603_v45 = vld [vmem:[%s24201_s9 + $0x43c] ss:$20 sps:$4 sm:$0xff]  }
 0xbdf   :  { %14468 = vmatpush1.bf16.msra.mxu1 %v21547_v23  ;;  %v21606_v23 = vld [vmem:[%s24201_s9 + $0x304] ss:$20 sps:$4 sm:$0xff]  }
 0xbe0   :  { %14509 = vmatpush1.bf16.msra.mxu0 %v21550_v26  ;;  %14469 = vmatprep.subr.bf16.mxu1 %v21555_v47  ;;  %v21601_v26 = vld [vmem:[%s24201_s9 + $0x438] ss:$20 sps:$4 sm:$0xff]   ;;  %v21604_v47 = vld [vmem:[%s24201_s9 + $0x300] ss:$20 sps:$4 sm:$0xff]  }
 0xbe1   :  { %14510 = vmatprep.subr.bf16.mxu0 %v21558_v50  ;;  %v21609_v50 = vld [vmem:[%s24201_s9 + $0x414] ss:$20 sps:$4 sm:$0xff]  }
 0xbe3   :  { %14470 = vmatpush1.bf16.msra.mxu1 %v21553_v1  ;;  %v21612_v1 = vld [vmem:[%s24201_s9 + $0x2dc] ss:$20 sps:$4 sm:$0xff]  }
 0xbe4   :  { %14511 = vmatpush1.bf16.msra.mxu0 %v21556_v6  ;;  %14471 = vmatprep.subr.bf16.mxu1 %v21561_v61  ;;  %v21607_v6 = vld [vmem:[%s24201_s9 + $0x410] ss:$20 sps:$4 sm:$0xff]  }
 0xbe5   :  { %14512 = vmatprep.subr.bf16.mxu0 %v21564_v27  ;;  %v21610_v27 = vld [vmem:[%s24201_s9 + $0x2d8] ss:$20 sps:$4 sm:$0xff]  }
 0xbe7   :  { %14472 = vmatpush1.bf16.msra.mxu1 %v21559_v48  ;;  %v21615_v48 = vld [vmem:[%s24201_s9 + $0x3ec] ss:$20 sps:$4 sm:$0xff]  }
 0xbe8   :  { %14513 = vmatpush1.bf16.msra.mxu0 %v21562_v51  ;;  %14473 = vmatprep.subr.bf16.mxu1 %v21567_v18 }
 0xbe9   :  { %14514 = vmatprep.subr.bf16.mxu0 %v21570_v54  ;;  %v21618_v54 = vld [vmem:[%s24201_s9 + $0x2b4] ss:$20 sps:$4 sm:$0xff]  }
 0xbeb   :  { %14474 = vmatpush1.bf16.msra.mxu1 %v21565_v59 }
 0xbec   :  { %14515 = vmatpush1.bf16.msra.mxu0 %v21568_v12  ;;  %14475 = vmatprep.subr.bf16.mxu1 %v21573_v28 }
 0xbed   :  { %14516 = vmatprep.subr.bf16.mxu0 %v21576_v56 }
 0xbef   :  { %14476 = vmatpush1.bf16.msra.mxu1 %v21571_v58  ;;  %v21613_v58 = vld [vmem:[%s24201_s9 + $0x3e8] ss:$20 sps:$4 sm:$0xff]  }
 0xbf0   :  { %14517 = vmatpush1.bf16.msra.mxu0 %v21574_v34  ;;  %14477 = vmatprep.subr.bf16.mxu1 %v21579_v55  ;;  %v21616_v34 = vld [vmem:[%s24201_s9 + $0x2b0] ss:$20 sps:$4 sm:$0xff]  }
 0xbf1   :  { %14584 = vmatprep.subr.bf16.mxu0 %v21582_v0  ;;  %v21621_v55 = vld [vmem:[%s24201_s9 + $0x3c4] ss:$20 sps:$4 sm:$0xff]   ;;  %v21624_v0 = vld [vmem:[%s24201_s9 + $0x28c] ss:$20 sps:$4 sm:$0xff]  }
 0xbf2   :  { %v11829_v30 = vpop.f32.mrf.mxu1 }
 0xbf3   :  { %v11830_v17 = vadd.f32 %v11829_v30, %v11789_v10  ;;  %v24492_v57 = vpop.f32.mrf.mxu0  ;;  %14535 = vmatmul.mubr.bf16.vlgmr.msra.gmra.mxu0 %v22748_v40  ;;  %14478 = vmatpush2.bf16.msra.mxu1 %v21577_v36  ;;  %v21622_v36 = vld [vmem:[%s24201_s9 + $0x288] ss:$20 sps:$4 sm:$0xff]   ;;  %v21630_v10 = vld [vmem:[%s24201_s9 + $0x4e4] ss:$20 sps:$4 sm:$0xff]  }
 0xbf4   :  { %14585 = vmatpush1.bf16.msra.mxu0 %v21580_v42  ;;  %14616 = vmatprep.mubr.bf16.mxu0 %v22703_v52  ;;  %v11831_v24 = vpop.f32.mrf.mxu1  ;;  %v21627_v42 = vld [vmem:[%s24201_s9 + $0x124] ss:$20 sps:$4 sm:$0xff]   ;;  %v21633_v30 = vld [vmem:[%s24201_s9 + $0xfc] ss:$20 sps:$4 sm:$0xff]  }
 0xbf5   :  { %v11846_v29 = vmul.f32 0.70710677, %v11830_v17  ;;  %v11832_v21 = vadd.f32 %v11831_v24, %v11791_v14  ;;  %v24499_v35 = vpop.f32.mrf.mxu0  ;;  %14479 = vmatprep.subr.bf16.mxu1 %v21585_v4  ;;  %14586 = vmatprep.subr.bf16.mxu0 %v21588_v11  ;;  %v11840_v51 = vmul.f32 0.5, %v11830_v17  ;;  %v21625_v4 = vld [vmem:[%s24201_s9 + $0x120] ss:$20 sps:$4 sm:$0xff]  }
 0xbf6   :  { %v11833_v33 = vpop.f32.mrf.mxu1  ;;  %v21628_v11 = vld [vmem:[%s24201_s9 + $0x4e0] ss:$20 sps:$4 sm:$0xff]   ;;  %v21636_v14 = vld [vmem:[%s24201_s9 + $0x4bc] ss:$20 sps:$4 sm:$0xff]   ;;  %v21631_v17 = vld [vmem:[%s24201_s9 + $0xf8] ss:$20 sps:$4 sm:$0xff]  }
 0xbf7   :  { %22213 = verf.f32 %v11846_v29  ;;  %v11847_v32 = vmul.f32 0.70710677, %v11832_v21  ;;  %v13174_v37 = vpop.f32.mrf.mxu0  ;;  %14480 = vmatpush2.bf16.msra.mxu1 %v21583_v8  ;;  %v11841_v28 = vmul.f32 0.5, %v11832_v21  ;;  %v21634_v8 = vld [vmem:[%s24201_s9 + $0x4b8] ss:$20 sps:$4 sm:$0xff]  }
 0xbf8   :  { %14587 = vmatpush1.bf16.msra.mxu0 %v21586_v16  ;;  %v11834_v19 = vpop.f32.mrf.mxu1  ;;  %14481 = vmatprep.subr.bf16.mxu1 %v21591_v25  ;;  %v21639_v24 = vld [vmem:[%s24201_s9 + $0xd4] ss:$20 sps:$4 sm:$0xff]   ;;  %v21637_v25 = vld [vmem:[%s24201_s9 + $0xd0] ss:$20 sps:$4 sm:$0xff]   ;;  %v21645_v21 = vld [vmem:[%s24201_s9 + $0xac] ss:$20 sps:$4 sm:$0xff]  }
 0xbf9   :  { %22215 = verf.f32 %v11847_v32  ;;  %v13175_v63 = vpop.f32.mrf.mxu0  ;;  %14588 = vmatprep.subr.bf16.mxu0 %v21594_v38  ;;  %v21642_v16 = vld [vmem:[%s24201_s9 + $0x494] ss:$20 sps:$4 sm:$0xff]   ;;  %v21640_v29 = vld [vmem:[%s24201_s9 + $0x490] ss:$20 sps:$4 sm:$0xff]   ;;  %v21648_v38 = vld [vmem:[%s24201_s9 + $0x46c] ss:$20 sps:$4 sm:$0xff]  }
 0xbfa   :  { %v21643_v33 = vld [vmem:[%s24201_s9 + $0xa8] ss:$20 sps:$4 sm:$0xff]   ;;  %v21651_v37 = vld [vmem:[%s24201_s9 + $0x84] ss:$20 sps:$4 sm:$0xff]   ;;  %v21649_v19 = vld [vmem:[%s24201_s9 + $0x80] ss:$20 sps:$4 sm:$0xff]  }
 0xbfb   :  { %14482 = vmatpush2.bf16.msra.mxu1 %v21589_v9  ;;  %v21646_v32 = vld [vmem:[%s24201_s9 + $0x468] ss:$20 sps:$4 sm:$0xff]   ;;  %v21654_v9 = vld [vmem:[%s24201_s9 + $0x444] ss:$20 sps:$4 sm:$0xff]  }
 0xbfc   :  { %14589 = vmatpush1.bf16.msra.mxu0 %v21592_v43  ;;  %14483 = vmatprep.subr.bf16.mxu1 %v21597_v44  ;;  %v21652_v43 = vld [vmem:[%s24201_s9 + $0x440] ss:$20 sps:$4 sm:$0xff]   ;;  %v21657_v44 = vld [vmem:[%s24201_s9 + $0x5c] ss:$20 sps:$4 sm:$0xff]  }
 0xbfd   :  { %14590 = vmatprep.subr.bf16.mxu0 %v21600_v5  ;;  %v21660_v63 = vld [vmem:[%s24201_s9 + $0x41c] ss:$20 sps:$4 sm:$0xff]   ;;  %v21655_v5 = vld [vmem:[%s24201_s9 + $0x58] ss:$20 sps:$4 sm:$0xff]  }
 0xbff   :  { %14484 = vmatpush2.bf16.msra.mxu1 %v21595_v22  ;;  %v21658_v22 = vld [vmem:[%s24201_s9 + $0x418] ss:$20 sps:$4 sm:$0xff]  }
 0xc00   :  { %14591 = vmatpush1.bf16.msra.mxu0 %v21598_v60  ;;  %14485 = vmatprep.subr.bf16.mxu1 %v21603_v45  ;;  %v21663_v60 = vld [vmem:[%s24201_s9 + $0x34] ss:$20 sps:$4 sm:$0xff]  }
 0xc01   :  { %14592 = vmatprep.subr.bf16.mxu0 %v21606_v23  ;;  %v21666_v45 = vld [vmem:[%s24201_s9 + $0x3f4] ss:$20 sps:$4 sm:$0xff]   ;;  %v21661_v23 = vld [vmem:[%s24201_s9 + $0x30] ss:$20 sps:$4 sm:$0xff]  }
 0xc03   :  { %14486 = vmatpush2.bf16.msra.mxu1 %v21601_v26  ;;  %v21664_v26 = vld [vmem:[%s24201_s9 + $0x3f0] ss:$20 sps:$4 sm:$0xff]  }
 0xc04   :  { %v22214_v61 = vpop.eup %22213  ;;  %14593 = vmatpush1.bf16.msra.mxu0 %v21604_v47  ;;  %14487 = vmatprep.subr.bf16.mxu1 %v21609_v50  ;;  %v21669_v47 = vld [vmem:[%s24201_s9 + $0xc] ss:$20 sps:$4 sm:$0xff]  }
 0xc05   :  { %v11858_v18 = vadd.f32 1.0, %v22214_v61  ;;  %14594 = vmatprep.subr.bf16.mxu0 %v21612_v1  ;;  %v21672_v50 = vld [vmem:[%s24201_s9 + $0x3cc] ss:$20 sps:$4 sm:$0xff]   ;;  %v21667_v1 = vld [vmem:[%s24201_s9 + $0x8] ss:$20 sps:$4 sm:$0xff]  }
 0xc06   :  { %v22216_v59 = vpop.eup %22215  ;;  %v21675_v61 = vld [vmem:[%s24201_s9 + $0x264] ss:$20 sps:$4 sm:$0xff]  }
 0xc07   :  { %v11864_v12 = vmul.f32 %v11858_v18, %v11840_v51  ;;  %v11859_v56 = vadd.f32 1.0, %v22216_v59  ;;  %14488 = vmatpush2.bf16.msra.mxu1 %v21607_v6  ;;  %v21670_v6 = vld [vmem:[%s24201_s9 + $0x3c8] ss:$20 sps:$4 sm:$0xff]   ;;  %v21678_v18 = vld [vmem:[%s24201_s9 + $0x238] ss:$20 sps:$4 sm:$0xff]  }
 0xc08   :  { %14595 = vmatpush1.bf16.msra.mxu0 %v21610_v27  ;;  %14489 = vmatprep.subr.bf16.mxu1 %v21615_v48  ;;  %v21676_v27 = vld [vmem:[%s24201_s9 + $0x268] ss:$20 sps:$4 sm:$0xff]   ;;  %v21673_v48 = vld [vmem:[%s24201_s9 + $0x260] ss:$20 sps:$4 sm:$0xff]  }
 0xc09   :  { %11870 = vst [vmem:[%s24350_s17 + $0x20] sm:$0xff] %v11864_v12  ;;  %v11865_v41 = vmul.f32 %v11859_v56, %v11841_v28  ;;  %14596 = vmatprep.subr.bf16.mxu0 %v21618_v54  ;;  %v21677_v51 = vld [vmem:[%s24201_s9 + $0x128] ss:$20 sps:$4 sm:$0xff]   ;;  %v21681_v59 = vld [vmem:[%s24201_s9 + $0x240] ss:$20 sps:$4 sm:$0xff]  }
 0xc0a   :  { %v21680_v54 = vld [vmem:[%s24201_s9 + $0x23c] ss:$20 sps:$4 sm:$0xff]   ;;  %v21682_v28 = vld [vmem:[%s24201_s9 + $0x100] ss:$20 sps:$4 sm:$0xff]  }
 0xc0b   :  { %11871 = vst [vmem:[%s24350_s17 + $0x28] sm:$0xff] %v11865_v41  ;;  %14490 = vmatpush2.bf16.msra.mxu1 %v21613_v58  ;;  %v21685_v56 = vld [vmem:[%s24201_s9 + $0x214] ss:$20 sps:$4 sm:$0xff]  }
 0xc0c   :  { %14597 = vmatpush1.bf16.msra.mxu0 %v21616_v34  ;;  %14491 = vmatprep.subr.bf16.mxu1 %v21621_v55  ;;  %v21686_v55 = vld [vmem:[%s24201_s9 + $0x218] ss:$20 sps:$4 sm:$0xff]  }
 0xc0d   :  { %14598 = vmatprep.subr.bf16.mxu0 %v21624_v0 }
 0xc0f   :  { %14492 = vmatpush2.bf16.msra.mxu1 %v21619_v7 }
 0xc10   :  { %14599 = vmatpush1.bf16.msra.mxu0 %v21622_v36  ;;  %14543 = vmatprep.subr.bf16.mxu1 %v21627_v42  ;;  %v21687_v42 = vld [vmem:[%s24201_s9 + $0xd8] ss:$20 sps:$4 sm:$0xff]  }
 0xc11   :  { %14600 = vmatprep.subr.bf16.mxu0 %v21630_v10 }
 0xc12   :  { %14494 = vmatmul.mubr.bf16.vlgmr.msra.gmra.mxu1 %v22706_v31 }
 0xc13   :  { %14544 = vmatpush1.bf16.msra.mxu1 %v21625_v4  ;;  %14575 = vmatprep.mubr.bf16.mxu1 %v22670_v46 }
 0xc14   :  { %14601 = vmatpush2.bf16.msra.mxu0 %v21628_v11  ;;  %14545 = vmatprep.subr.bf16.mxu1 %v21633_v30  ;;  %v21691_v11 = vld [vmem:[%s24201_s9 + $0x1f0] ss:$20 sps:$4 sm:$0xff]   ;;  %v21688_v30 = vld [vmem:[%s24201_s9 + $0x1e8] ss:$20 sps:$4 sm:$0xff]  }
 0xc15   :  { %14602 = vmatprep.subr.bf16.mxu0 %v21636_v14  ;;  %v21692_v14 = vld [vmem:[%s24201_s9 + $0xb0] ss:$20 sps:$4 sm:$0xff]  }
 0xc17   :  { %14546 = vmatpush1.bf16.msra.mxu1 %v21631_v17  ;;  %v21695_v17 = vld [vmem:[%s24201_s9 + $0x1c4] ss:$20 sps:$4 sm:$0xff]  }
 0xc18   :  { %14603 = vmatpush2.bf16.msra.mxu0 %v21634_v8  ;;  %14547 = vmatprep.subr.bf16.mxu1 %v21639_v24  ;;  %v21696_v8 = vld [vmem:[%s24201_s9 + $0x1c8] ss:$20 sps:$4 sm:$0xff]   ;;  %v21693_v24 = vld [vmem:[%s24201_s9 + $0x1c0] ss:$20 sps:$4 sm:$0xff]  }
 0xc19   :  { %14604 = vmatprep.subr.bf16.mxu0 %v21642_v16  ;;  %v21697_v16 = vld [vmem:[%s24201_s9 + $0x88] ss:$20 sps:$4 sm:$0xff]  }
 0xc1b   :  { %14548 = vmatpush1.bf16.msra.mxu1 %v21637_v25  ;;  %v21700_v25 = vld [vmem:[%s24201_s9 + $0x19c] ss:$20 sps:$4 sm:$0xff]  }
 0xc1c   :  { %14605 = vmatpush2.bf16.msra.mxu0 %v21640_v29  ;;  %14549 = vmatprep.subr.bf16.mxu1 %v21645_v21  ;;  %v21701_v29 = vld [vmem:[%s24201_s9 + $0x1a0] ss:$20 sps:$4 sm:$0xff]   ;;  %v21698_v21 = vld [vmem:[%s24201_s9 + $0x198] ss:$20 sps:$4 sm:$0xff]  }
 0xc1d   :  { %14606 = vmatprep.subr.bf16.mxu0 %v21648_v38  ;;  %v21702_v38 = vld [vmem:[%s24201_s9 + $0x60] ss:$20 sps:$4 sm:$0xff]  }
 0xc1f   :  { %14550 = vmatpush1.bf16.msra.mxu1 %v21643_v33  ;;  %v21705_v33 = vld [vmem:[%s24201_s9 + $0x174] ss:$20 sps:$4 sm:$0xff]  }
 0xc20   :  { %14607 = vmatpush2.bf16.msra.mxu0 %v21646_v32  ;;  %14551 = vmatprep.subr.bf16.mxu1 %v21651_v37  ;;  %v21706_v32 = vld [vmem:[%s24201_s9 + $0x178] ss:$20 sps:$4 sm:$0xff]   ;;  %v21703_v37 = vld [vmem:[%s24201_s9 + $0x170] ss:$20 sps:$4 sm:$0xff]  }
 0xc21   :  { %14608 = vmatprep.subr.bf16.mxu0 %v21654_v9  ;;  %v21707_v9 = vld [vmem:[%s24201_s9 + $0x38] ss:$20 sps:$4 sm:$0xff]  }
 0xc23   :  { %14552 = vmatpush1.bf16.msra.mxu1 %v21649_v19  ;;  %v21710_v19 = vld [vmem:[%s24201_s9 + $0x14c] ss:$20 sps:$4 sm:$0xff]  }
 0xc24   :  { %14609 = vmatpush2.bf16.msra.mxu0 %v21652_v43  ;;  %14553 = vmatprep.subr.bf16.mxu1 %v21657_v44  ;;  %v21711_v43 = vld [vmem:[%s24201_s9 + $0x150] ss:$20 sps:$4 sm:$0xff]   ;;  %v21708_v44 = vld [vmem:[%s24201_s9 + $0x148] ss:$20 sps:$4 sm:$0xff]  }
 0xc25   :  { %14610 = vmatprep.subr.bf16.mxu0 %v21660_v63  ;;  %v21712_v63 = vld [vmem:[%s24201_s9 + $0x10] ss:$20 sps:$4 sm:$0xff]  }
 0xc27   :  { %14554 = vmatpush1.bf16.msra.mxu1 %v21655_v5  ;;  %v21715_v5 = vld [vmem:[%s24201_s9 + $0x624] ss:$20 sps:$4 sm:$0xff]  }
 0xc28   :  { %14611 = vmatpush2.bf16.msra.mxu0 %v21658_v22  ;;  %14555 = vmatprep.subr.bf16.mxu1 %v21663_v60  ;;  %v21713_v22 = vld [vmem:[%s24201_s9 + $0x620] ss:$20 sps:$4 sm:$0xff]   ;;  %v21716_v60 = vld [vmem:[%s24201_s9 + $0x628] ss:$20 sps:$4 sm:$0xff]  }
 0xc29   :  { %14612 = vmatprep.subr.bf16.mxu0 %v21666_v45  ;;  %v21719_v45 = vld [vmem:[%s24201_s9 + $0x5fc] ss:$20 sps:$4 sm:$0xff]  }
 0xc2b   :  { %14556 = vmatpush1.bf16.msra.mxu1 %v21661_v23  ;;  %v21717_v23 = vld [vmem:[%s24201_s9 + $0x5f8] ss:$20 sps:$4 sm:$0xff]  }
 0xc2c   :  { %14613 = vmatpush2.bf16.msra.mxu0 %v21664_v26  ;;  %14557 = vmatprep.subr.bf16.mxu1 %v21669_v47  ;;  %v21720_v26 = vld [vmem:[%s24201_s9 + $0x600] ss:$20 sps:$4 sm:$0xff]  }
 0xc2d   :  { %14614 = vmatprep.subr.bf16.mxu0 %v21672_v50  ;;  %v21723_v50 = vld [vmem:[%s24201_s9 + $0x5d4] ss:$20 sps:$4 sm:$0xff]  }
 0xc2f   :  { %14558 = vmatpush1.bf16.msra.mxu1 %v21667_v1 }
 0xc30   :  { %14615 = vmatpush2.bf16.msra.mxu0 %v21670_v6  ;;  %14559 = vmatprep.subr.bf16.mxu1 %v21675_v61  ;;  %v21721_v6 = vld [vmem:[%s24201_s9 + $0x5d0] ss:$20 sps:$4 sm:$0xff]  }
 0xc31   :  { %19044 = vmatprep.subr.bf16.mxu0 %v21676_v27  ;;  %v21724_v27 = vld [vmem:[%s24201_s9 + $0x5d8] ss:$20 sps:$4 sm:$0xff]  }
 0xc32   :  { %v13211_v12 = vpop.f32.mrf.mxu1 }
 0xc33   :  { %v24575_v58 = vadd.f32 %v13211_v12, %v24492_v57  ;;  %v24577_v34 = vpop.f32.mrf.mxu0  ;;  %14617 = vmatmul.mubr.bf16.vlgmr.msra.gmra.mxu0 %v22706_v31  ;;  %14560 = vmatpush2.bf16.msra.mxu1 %v21673_v48  ;;  %v21683_v57 = vld [vmem:[%s24201_s9 + $0x210] ss:$20 sps:$4 sm:$0xff]   ;;  %v21727_v48 = vld [vmem:[%s24201_s9 + $0x5ac] ss:$20 sps:$4 sm:$0xff]  }
 0xc34   :  { %19045 = vmatpush3.bf16.msra.mxu0 %v21677_v51  ;;  %14698 = vmatprep.mubr.bf16.mxu0 %v22670_v46  ;;  %v13213_v41 = vpop.f32.mrf.mxu1  ;;  %v21690_v46 = vld [vmem:[%s24201_s9 + $0x1ec] ss:$20 sps:$4 sm:$0xff]  }
 0xc35   :  { %v24583_v0 = vadd.f32 %v13213_v41, %v24499_v35  ;;  %v24585_v7 = vpop.f32.mrf.mxu0  ;;  %14561 = vmatprep.subr.bf16.mxu1 %v21680_v54  ;;  %19046 = vmatprep.subr.bf16.mxu0 %v21681_v59  ;;  %v21728_v54 = vld [vmem:[%s24201_s9 + $0x5b0] ss:$20 sps:$4 sm:$0xff]   ;;  %v21729_v12 = vld [vmem:[%s24201_s9 + $0x580] ss:$20 sps:$4 sm:$0xff]  }
 0xc36   :  { %v13215_v36 = vpop.f32.mrf.mxu1  ;;  %v21731_v59 = vld [vmem:[%s24201_s9 + $0x584] ss:$20 sps:$4 sm:$0xff]   ;;  %v21736_v41 = vld [vmem:[%s24201_s9 + $0x560] ss:$20 sps:$4 sm:$0xff]  }
 0xc37   :  { %v13256_v10 = vpop.f32.mrf.mxu0  ;;  %14562 = vmatpush2.bf16.msra.mxu1 %v21678_v18  ;;  %v21725_v18 = vld [vmem:[%s24201_s9 + $0x5a8] ss:$20 sps:$4 sm:$0xff]   ;;  %v21737_v36 = vld [vmem:[%s24201_s9 + $0x530] ss:$20 sps:$4 sm:$0xff]  }
 0xc38   :  { %19047 = vmatpush3.bf16.msra.mxu0 %v21682_v28  ;;  %v13216_v35 = vpop.f32.mrf.mxu1  ;;  %14563 = vmatprep.subr.bf16.mxu1 %v21685_v56  ;;  %v21732_v28 = vld [vmem:[%s24201_s9 + $0x588] ss:$20 sps:$4 sm:$0xff]   ;;  %v21743_v10 = vld [vmem:[%s24201_s9 + $0x50c] ss:$20 sps:$4 sm:$0xff]  }
 0xc39   :  { %v13257_v4 = vpop.f32.mrf.mxu0  ;;  %19048 = vmatprep.subr.bf16.mxu0 %v21686_v55  ;;  %v21735_v56 = vld [vmem:[%s24201_s9 + $0x55c] ss:$20 sps:$4 sm:$0xff]   ;;  %v21733_v55 = vld [vmem:[%s24201_s9 + $0x558] ss:$20 sps:$4 sm:$0xff]  }
 0xc3a   :  { %v21744_v35 = vld [vmem:[%s24201_s9 + $0x510] ss:$20 sps:$4 sm:$0xff]   ;;  %v21745_v4 = vld [vmem:[%s24201_s9 + $0x4e8] ss:$20 sps:$4 sm:$0xff]  }
 0xc3b   :  { %14564 = vmatpush2.bf16.msra.mxu1 %v21683_v57  ;;  %v21739_v57 = vld [vmem:[%s24201_s9 + $0x534] ss:$20 sps:$4 sm:$0xff]  }
 0xc3c   :  { %19049 = vmatpush3.bf16.msra.mxu0 %v21687_v42  ;;  %14565 = vmatprep.subr.bf16.mxu1 %v21690_v46  ;;  %v21740_v42 = vld [vmem:[%s24201_s9 + $0x538] ss:$20 sps:$4 sm:$0xff]   ;;  %v21741_v46 = vld [vmem:[%s24201_s9 + $0x508] ss:$20 sps:$4 sm:$0xff]  }
 0xc3d   :  { %19050 = vmatprep.subr.bf16.mxu0 %v21691_v11  ;;  %v21746_v11 = vld [vmem:[%s24201_s9 + $0x3a8] ss:$20 sps:$4 sm:$0xff]  }
 0xc3f   :  { %14566 = vmatpush2.bf16.msra.mxu1 %v21688_v30  ;;  %v21747_v30 = vld [vmem:[%s24201_s9 + $0x4c0] ss:$20 sps:$4 sm:$0xff]  }
 0xc40   :  { %19051 = vmatpush3.bf16.msra.mxu0 %v21692_v14  ;;  %14567 = vmatprep.subr.bf16.mxu1 %v21695_v17  ;;  %v21748_v14 = vld [vmem:[%s24201_s9 + $0x380] ss:$20 sps:$4 sm:$0xff]  }
 0xc41   :  { %19052 = vmatprep.subr.bf16.mxu0 %v21696_v8  ;;  %v21749_v8 = vld [vmem:[%s24201_s9 + $0x498] ss:$20 sps:$4 sm:$0xff]  }
 0xc43   :  { %14568 = vmatpush2.bf16.msra.mxu1 %v21693_v24 }
 0xc44   :  { %19053 = vmatpush3.bf16.msra.mxu0 %v21697_v16  ;;  %14569 = vmatprep.subr.bf16.mxu1 %v21700_v25  ;;  %v21750_v25 = vld [vmem:[%s24201_s9 + $0x358] ss:$20 sps:$4 sm:$0xff]  }
 0xc45   :  { %19054 = vmatprep.subr.bf16.mxu0 %v21701_v29 }
 0xc47   :  { %14570 = vmatpush2.bf16.msra.mxu1 %v21698_v21  ;;  %v21751_v21 = vld [vmem:[%s24201_s9 + $0x470] ss:$20 sps:$4 sm:$0xff]  }
 0xc48   :  { %19055 = vmatpush3.bf16.msra.mxu0 %v21702_v38  ;;  %14571 = vmatprep.subr.bf16.mxu1 %v21705_v33  ;;  %v21752_v38 = vld [vmem:[%s24201_s9 + $0x330] ss:$20 sps:$4 sm:$0xff]   ;;  %v21753_v33 = vld [vmem:[%s24201_s9 + $0x448] ss:$20 sps:$4 sm:$0xff]  }
 0xc49   :  { %19056 = vmatprep.subr.bf16.mxu0 %v21706_v32  ;;  %v21755_v32 = vld [vmem:[%s24201_s9 + $0x420] ss:$20 sps:$4 sm:$0xff]  }
 0xc4b   :  { %14572 = vmatpush2.bf16.msra.mxu1 %v21703_v37  ;;  %v21756_v37 = vld [vmem:[%s24201_s9 + $0x2e0] ss:$20 sps:$4 sm:$0xff]  }
 0xc4c   :  { %19057 = vmatpush3.bf16.msra.mxu0 %v21707_v9  ;;  %14573 = vmatprep.subr.bf16.mxu1 %v21710_v19  ;;  %v21757_v9 = vld [vmem:[%s24201_s9 + $0x3f8] ss:$20 sps:$4 sm:$0xff]  }
 0xc4d   :  { %19058 = vmatprep.subr.bf16.mxu0 %v21711_v43  ;;  %v21758_v19 = vld [vmem:[%s24201_s9 + $0x2b8] ss:$20 sps:$4 sm:$0xff]   ;;  %v21759_v43 = vld [vmem:[%s24201_s9 + $0x3d0] ss:$20 sps:$4 sm:$0xff]  }
 0xc4f   :  { %14574 = vmatpush2.bf16.msra.mxu1 %v21708_v44  ;;  %v21760_v44 = vld [vmem:[%s24201_s9 + $0x290] ss:$20 sps:$4 sm:$0xff]  }
 0xc50   :  { %19059 = vmatpush3.bf16.msra.mxu0 %v21712_v63  ;;  %14625 = vmatprep.subr.bf16.mxu1 %v21715_v5  ;;  %v21763_v63 = vld [vmem:[%s24564_s21 + $0x154] ss:$24 sps:$4 sm:$0xff]   ;;  %v21761_v5 = vld [vmem:[%s24564_s21 + $0x150] ss:$24 sps:$4 sm:$0xff]  }
 0xc51   :  { %19117 = vmatprep.subr.bf16.mxu0 %v22259_v39 }
 0xc52   :  { %14576 = vmatmul.mubr.bf16.vlgmr.msra.gmra.mxu1 %v22673_v49 }
 0xc53   :  { %v19016_v47 = vpop.f32.mrf.mxu0  ;;  %14699 = vmatmul.mubr.bf16.vlgmr.msra.gmra.mxu0 %v22673_v49  ;;  %14626 = vmatpush1.bf16.msra.mxu1 %v21713_v22  ;;  %v21766_v22 = vld [vmem:[%s24564_s21 + $0x124] ss:$24 sps:$4 sm:$0xff]  }
 0xc54   :  { %19118 = vmatpush3.bf16.msra.mxu0 %v21716_v60  ;;  %14627 = vmatprep.subr.bf16.mxu1 %v21719_v45 }
 0xc55   :  { %v19017_v1 = vpop.f32.mrf.mxu0  ;;  %19119 = vmatprep.subr.bf16.mxu0 %v22259_v39  ;;  %14657 = vmatprep.mubr.bf16.mxu1 %v22242_v53 }
 0xc56   :  { %v24622_v61 = vadd.f32 %v19017_v1, %v19016_v47  ;;  %19133 = vmatprep.mubr.msk.bf16.mxu0 %vm22260_vm0, %v22259_v39  ;;  %v21814_v47 = vld [vmem:[%s24564_s21 + $0x424] ss:$24 sps:$4 sm:$0xff]  }
 0xc57   :  { %v19019_v49 = vpop.f32.mrf.mxu0  ;;  %14628 = vmatpush1.bf16.msra.mxu1 %v21717_v23  ;;  %v21764_v23 = vld [vmem:[%s24564_s21 + $0x120] ss:$24 sps:$4 sm:$0xff]  }
 0xc58   :  { %19120 = vmatpush3.bf16.msra.mxu0 %v21720_v26  ;;  %14629 = vmatprep.subr.bf16.mxu1 %v21723_v50  ;;  %v21812_v26 = vld [vmem:[%s24564_s21 + $0x420] ss:$24 sps:$4 sm:$0xff]  }
 0xc59   :  { %v19020_v51 = vpop.f32.mrf.mxu0  ;;  %19121 = vmatprep.subr.bf16.mxu0 %v22259_v39 }
 0xc5b   :  { %14630 = vmatpush1.bf16.msra.mxu1 %v21721_v6  ;;  %v21769_v6 = vld [vmem:[%s24564_s21 + $0xf4] ss:$24 sps:$4 sm:$0xff]  }
 0xc5c   :  { %19122 = vmatpush3.bf16.msra.mxu0 %v21724_v27  ;;  %14631 = vmatprep.subr.bf16.mxu1 %v21727_v48 }
 0xc5d   :  { %19123 = vmatprep.subr.bf16.mxu0 %v22259_v39 }
 0xc5f   :  { %14632 = vmatpush1.bf16.msra.mxu1 %v21725_v18  ;;  %v21817_v18 = vld [vmem:[%s24564_s21 + $0x3f4] ss:$24 sps:$4 sm:$0xff]  }
 0xc60   :  { %19124 = vmatpush3.bf16.msra.mxu0 %v21728_v54  ;;  %14633 = vmatprep.subr.bf16.mxu1 %v21731_v59  ;;  %v21772_v59 = vld [vmem:[%s24564_s21 + $0xc4] ss:$24 sps:$4 sm:$0xff]  }
 0xc61   :  { %19125 = vmatprep.subr.bf16.mxu0 %v22259_v39 }
 0xc63   :  { %14634 = vmatpush1.bf16.msra.mxu1 %v21729_v12  ;;  %v21815_v12 = vld [vmem:[%s24564_s21 + $0x3f0] ss:$24 sps:$4 sm:$0xff]  }
 0xc64   :  { %19126 = vmatpush3.bf16.msra.mxu0 %v21732_v28  ;;  %14635 = vmatprep.subr.bf16.mxu1 %v21735_v56  ;;  %v21820_v56 = vld [vmem:[%s24564_s21 + $0x3c4] ss:$24 sps:$4 sm:$0xff]  }
 0xc65   :  { %19127 = vmatprep.subr.bf16.mxu0 %v22259_v39 }
 0xc67   :  { %14636 = vmatpush1.bf16.msra.mxu1 %v21733_v55  ;;  %v21770_v55 = vld [vmem:[%s24564_s21 + $0xc0] ss:$24 sps:$4 sm:$0xff]  }
 0xc68   :  { %19128 = vmatpush3.bf16.msra.mxu0 %v21736_v41  ;;  %14637 = vmatprep.subr.bf16.mxu1 %v21739_v57  ;;  %v21823_v41 = vld [vmem:[%s24564_s21 + $0x394] ss:$24 sps:$4 sm:$0xff]  }
 0xc69   :  { %19129 = vmatprep.subr.bf16.mxu0 %v22259_v39  ;;  %v21775_v57 = vld [vmem:[%s24564_s21 + $0x94] ss:$24 sps:$4 sm:$0xff]  }
 0xc6b   :  { %14638 = vmatpush1.bf16.msra.mxu1 %v21737_v36  ;;  %v21821_v36 = vld [vmem:[%s24564_s21 + $0x390] ss:$24 sps:$4 sm:$0xff]  }
 0xc6c   :  { %19130 = vmatpush3.bf16.msra.mxu0 %v21740_v42  ;;  %14639 = vmatprep.subr.bf16.mxu1 %v21743_v10  ;;  %v21773_v42 = vld [vmem:[%s24564_s21 + $0x90] ss:$24 sps:$4 sm:$0xff]   ;;  %v21826_v10 = vld [vmem:[%s24564_s21 + $0x364] ss:$24 sps:$4 sm:$0xff]  }
 0xc6d   :  { %19131 = vmatprep.subr.bf16.mxu0 %v22259_v39 }
 0xc6f   :  { %14640 = vmatpush1.bf16.msra.mxu1 %v21741_v46  ;;  %v21778_v46 = vld [vmem:[%s24564_s21 + $0x64] ss:$24 sps:$4 sm:$0xff]  }
 0xc70   :  { %19132 = vmatpush3.bf16.msra.mxu0 %v21744_v35  ;;  %19066 = vmatprep.subr.bf16.mxu1 %v21745_v4  ;;  %v21824_v35 = vld [vmem:[%s24564_s21 + $0x360] ss:$24 sps:$4 sm:$0xff]  }
 0xc71   :  { %v21776_v4 = vld [vmem:[%s24564_s21 + $0x60] ss:$24 sps:$4 sm:$0xff]  }
 0xc72   :  { %v13293_v17 = vpop.f32.mrf.mxu1  ;;  %14658 = vmatmul.mubr.bf16.vlgmr.msra.gmra.mxu1 %v22748_v40 }
 0xc73   :  { %v24655_v24 = vadd.f32 %v13293_v17, %v24577_v34  ;;  %19134 = vmatmul.mubr.bf16.vlgmr.msra.gmra.mxu0 %v22748_v40  ;;  %19067 = vmatpush3.bf16.msra.mxu1 %v21746_v11  ;;  %v21809_v40 = vld [vmem:[%s24564_s21 + $0x450] ss:$24 sps:$4 sm:$0xff]   ;;  %v21829_v11 = vld [vmem:[%s24564_s21 + $0x334] ss:$24 sps:$4 sm:$0xff]  }
 0xc74   :  { %14738 = vmatprep.mubr.bf16.mxu1 %v22703_v52  ;;  %v13295_v39 = vpop.f32.mrf.mxu1  ;;  %19068 = vmatprep.subr.bf16.mxu1 %v21747_v30  ;;  %v21811_v52 = vld [vmem:[%s24564_s21 + $0x454] ss:$24 sps:$4 sm:$0xff]   ;;  %v21779_v17 = vld [vmem:[%s24564_s21 + $0x30] ss:$24 sps:$4 sm:$0xff]  }
 0xc75   :  { %v24660_v16 = vadd.f32 %v13295_v39, %v24585_v7  ;;  %16361 = vmatprep.subr.bf16.mxu0 %v21811_v52  ;;  %v21754_v7 = vld [vmem:[%s24201_s9 + $0x308] ss:$20 sps:$4 sm:$0xff]   ;;  %v21781_v30 = vld [vmem:[%s24564_s21 + $0x34] ss:$24 sps:$4 sm:$0xff]  }
 0xc76   :  { %v13297_v29 = vpop.f32.mrf.mxu1  ;;  %16362 = vmatpush1.bf16.msra.mxu0 %v21809_v40  ;;  %v21784_v39 = vld [vmem:[%s24564_s21 + $0x4] ss:$24 sps:$4 sm:$0xff]   ;;  %v21785_v40 = vld [vmem:[%s24564_s21 + $0x2d0] ss:$24 sps:$4 sm:$0xff]  }
 0xc77   :  { %19069 = vmatpush3.bf16.msra.mxu1 %v21748_v14  ;;  %16363 = vmatprep.subr.bf16.mxu0 %v21814_v47  ;;  %v21827_v14 = vld [vmem:[%s24564_s21 + $0x330] ss:$24 sps:$4 sm:$0xff]   ;;  %v21782_v29 = vld [vmem:[%s24564_s21] ss:$24 sps:$4 sm:$0xff]   ;;  %v21790_v52 = vld [vmem:[%s24564_s21 + $0x2a4] ss:$24 sps:$4 sm:$0xff]  }
 0xc78   :  { %v13298_v34 = vpop.f32.mrf.mxu1  ;;  %19070 = vmatprep.subr.bf16.mxu1 %v21749_v8  ;;  %v21832_v8 = vld [vmem:[%s24564_s21 + $0x304] ss:$24 sps:$4 sm:$0xff]   ;;  %v21842_v47 = vld [vmem:[%s24564_s21 + $0x540] ss:$24 sps:$4 sm:$0xff]  }
 0xc79   :  { %v21787_v34 = vld [vmem:[%s24564_s21 + $0x2d4] ss:$24 sps:$4 sm:$0xff]  }
 0xc7a   :  { %16364 = vmatpush1.bf16.msra.mxu0 %v21812_v26  ;;  %v21799_v26 = vld [vmem:[%s24564_s21 + $0x214] ss:$24 sps:$4 sm:$0xff]  }
 0xc7b   :  { %19071 = vmatpush3.bf16.msra.mxu1 %v21750_v25  ;;  %16365 = vmatprep.subr.bf16.mxu0 %v21817_v18  ;;  %v21830_v25 = vld [vmem:[%s24564_s21 + $0x300] ss:$24 sps:$4 sm:$0xff]   ;;  %v21805_v18 = vld [vmem:[%s24564_s21 + $0x1b4] ss:$24 sps:$4 sm:$0xff]  }
 0xc7c   :  { %19072 = vmatprep.subr.bf16.mxu1 %v21751_v21  ;;  %v21835_v21 = vld [vmem:[%s24564_s21 + $0x5d4] ss:$24 sps:$4 sm:$0xff]  }
 0xc7e   :  { %16366 = vmatpush1.bf16.msra.mxu0 %v21815_v12  ;;  %v21853_v12 = vld [vmem:[%s24564_s21 + $0x4b4] ss:$24 sps:$4 sm:$0xff]  }
 0xc7f   :  { %19073 = vmatpush3.bf16.msra.mxu1 %v21752_v38  ;;  %16367 = vmatprep.subr.bf16.mxu0 %v21820_v56  ;;  %v21833_v38 = vld [vmem:[%s24564_s21 + $0x5d0] ss:$24 sps:$4 sm:$0xff]  }
 0xc80   :  { %19074 = vmatprep.subr.bf16.mxu1 %v21753_v33  ;;  %v21851_v56 = vld [vmem:[%s24564_s21 + $0x4b0] ss:$24 sps:$4 sm:$0xff]  }
 0xc83   :  { %19075 = vmatpush3.bf16.msra.mxu1 %v21754_v7  ;;  %v21788_v7 = vld [vmem:[%s24564_s21 + $0x2a0] ss:$24 sps:$4 sm:$0xff]  }
 0xc84   :  { %19076 = vmatprep.subr.bf16.mxu1 %v21755_v32  ;;  %v21838_v32 = vld [vmem:[%s24564_s21 + $0x5a4] ss:$24 sps:$4 sm:$0xff]  }
 0xc87   :  { %19077 = vmatpush3.bf16.msra.mxu1 %v21756_v37  ;;  %v21793_v37 = vld [vmem:[%s24564_s21 + $0x274] ss:$24 sps:$4 sm:$0xff]  }
 0xc88   :  { %19078 = vmatprep.subr.bf16.mxu1 %v21757_v9  ;;  %v21836_v9 = vld [vmem:[%s24564_s21 + $0x5a0] ss:$24 sps:$4 sm:$0xff]  }
 0xc8b   :  { %19079 = vmatpush3.bf16.msra.mxu1 %v21758_v19 }
 0xc8c   :  { %19080 = vmatprep.subr.bf16.mxu1 %v21759_v43 }
 0xc8f   :  { %19081 = vmatpush3.bf16.msra.mxu1 %v21760_v44  ;;  %v21791_v44 = vld [vmem:[%s24564_s21 + $0x270] ss:$24 sps:$4 sm:$0xff]  }
 0xc90   :  { %16320 = vmatprep.subr.bf16.mxu1 %v21763_v63  ;;  %v21841_v63 = vld [vmem:[%s24564_s21 + $0x574] ss:$24 sps:$4 sm:$0xff]  }
 0xc92   :  { %v19038_v60 = vpop.f32.mrf.mxu1  ;;  %14739 = vmatmul.mubr.bf16.vlgmr.msra.gmra.mxu1 %v22706_v31 }
 0xc93   :  { %v14454_v45 = vpop.f32.mrf.mxu0  ;;  %16321 = vmatpush1.bf16.msra.mxu1 %v21761_v5  ;;  %v21796_v5 = vld [vmem:[%s24564_s21 + $0x244] ss:$24 sps:$4 sm:$0xff]  }
 0xc94   :  { %v24683_v50 = vadd.f32 %v14454_v45, %v24575_v58  ;;  %v19039_v1 = vpop.f32.mrf.mxu1  ;;  %16322 = vmatprep.subr.bf16.mxu1 %v21766_v22  ;;  %v21767_v58 = vld [vmem:[%s24564_s21 + $0xf0] ss:$24 sps:$4 sm:$0xff]   ;;  %v21794_v45 = vld [vmem:[%s24564_s21 + $0x240] ss:$24 sps:$4 sm:$0xff]  }
 0xc95   :  { %v19040_v27 = vadd.f32 %v19039_v1, %v19038_v60  ;;  %v24686_v49 = vpop.f32.mrf.mxu0  ;;  %v21839_v22 = vld [vmem:[%s24564_s21 + $0x570] ss:$24 sps:$4 sm:$0xff]  }
 0xc96   :  { %v19041_v31 = vpop.f32.mrf.mxu1  ;;  %v21797_v1 = vld [vmem:[%s24564_s21 + $0x210] ss:$24 sps:$4 sm:$0xff]  }
 0xc97   :  { %v24689_v48 = vadd.f32 %v19040_v27, %v24622_v61  ;;  %v14458_v51 = vpop.f32.mrf.mxu0  ;;  %16323 = vmatpush1.bf16.msra.mxu1 %v21764_v23  ;;  %v21818_v61 = vld [vmem:[%s24564_s21 + $0x3c0] ss:$24 sps:$4 sm:$0xff]   ;;  %v21844_v23 = vld [vmem:[%s24564_s21 + $0x544] ss:$24 sps:$4 sm:$0xff]   ;;  %v21845_v31 = vld [vmem:[%s24564_s21 + $0x510] ss:$24 sps:$4 sm:$0xff]  }
 0xc98   :  { %v19042_v54 = vpop.f32.mrf.mxu1  ;;  %16324 = vmatprep.subr.bf16.mxu1 %v21769_v6  ;;  %16368 = vmatpush1.bf16.msra.mxu0 %v21818_v61  ;;  %v21847_v6 = vld [vmem:[%s24564_s21 + $0x514] ss:$24 sps:$4 sm:$0xff]   ;;  %v21802_v27 = vld [vmem:[%s24564_s21 + $0x1e4] ss:$24 sps:$4 sm:$0xff]   ;;  %v21800_v51 = vld [vmem:[%s24564_s21 + $0x1e0] ss:$24 sps:$4 sm:$0xff]  }
 0xc99   :  { %v14459_v28 = vpop.f32.mrf.mxu0  ;;  %16369 = vmatprep.subr.bf16.mxu0 %v21823_v41  ;;  %v21848_v54 = vld [vmem:[%s24564_s21 + $0x4e0] ss:$24 sps:$4 sm:$0xff]   ;;  %v21856_v41 = vld [vmem:[%s24564_s21 + $0x484] ss:$24 sps:$4 sm:$0xff]  }
 0xc9a   :  { %v21808_v28 = vld [vmem:[%s24564_s21 + $0x184] ss:$24 sps:$4 sm:$0xff]   ;;  %v21806_v61 = vld [vmem:[%s24564_s21 + $0x180] ss:$24 sps:$4 sm:$0xff]  }
 0xc9b   :  { %16325 = vmatpush1.bf16.msra.mxu1 %v21767_v58  ;;  %v21850_v58 = vld [vmem:[%s24564_s21 + $0x4e4] ss:$24 sps:$4 sm:$0xff]  }
 0xc9c   :  { %16326 = vmatprep.subr.bf16.mxu1 %v21772_v59  ;;  %16370 = vmatpush1.bf16.msra.mxu0 %v21821_v36  ;;  %v21803_v59 = vld [vmem:[%s24564_s21 + $0x1b0] ss:$24 sps:$4 sm:$0xff]   ;;  %v24754_v36 = vld [vmem:[%s16771_s25] sm:$0x1f] }
 0xc9d   :  { %16371 = vmatprep.subr.bf16.mxu0 %v21826_v10  ;;  %v21862_v10 = vld [vmem:[%s24564_s21 + $0x754] ss:$24 sps:$4 sm:$0xff]  }
 0xc9f   :  { %16327 = vmatpush1.bf16.msra.mxu1 %v21770_v55  ;;  %v21854_v55 = vld [vmem:[%s24564_s21 + $0x480] ss:$24 sps:$4 sm:$0xff]  }
 0xca0   :  { %16328 = vmatprep.subr.bf16.mxu1 %v21775_v57  ;;  %16372 = vmatpush1.bf16.msra.mxu0 %v21824_v35  ;;  %v21859_v57 = vld [vmem:[%s24564_s21 + $0x15c] ss:$24 sps:$4 sm:$0xff]  }
 0xca1   :  { %16373 = vmatprep.subr.bf16.mxu0 %v21829_v11 }
 0xca3   :  { %16329 = vmatpush1.bf16.msra.mxu1 %v21773_v42 }
 0xca4   :  { %16330 = vmatprep.subr.bf16.mxu1 %v21778_v46  ;;  %16374 = vmatpush1.bf16.msra.mxu0 %v21827_v14  ;;  %v14457_v46 = vadd.f32 %v24686_v49, %v24583_v0 }
 0xca5   :  { %16375 = vmatprep.subr.bf16.mxu0 %v21832_v8 }
 0xca7   :  { %16331 = vmatpush1.bf16.msra.mxu1 %v21776_v4  ;;  %v14791_v4 = vrot.slane %v24754_v36, %v22650_v13 }
 0xca8   :  { %16332 = vmatprep.subr.bf16.mxu1 %v21781_v30  ;;  %16376 = vmatpush1.bf16.msra.mxu0 %v21830_v25 }
 0xca9   :  { %16377 = vmatprep.subr.bf16.mxu0 %v21835_v21 }
 0xcab   :  { %16333 = vmatpush1.bf16.msra.mxu1 %v21779_v17  ;;  %v14795_v17 = vrot.slane %v24754_v36, %v22655_v15 }
 0xcac   :  { %16334 = vmatprep.subr.bf16.mxu1 %v21784_v39  ;;  %16378 = vmatpush2.bf16.msra.mxu0 %v21833_v38 }
 0xcad   :  { %16379 = vmatprep.subr.bf16.mxu0 %v21838_v32 }
 0xcaf   :  { %16335 = vmatpush1.bf16.msra.mxu1 %v21782_v29 }
 0xcb0   :  { %16336 = vmatprep.subr.bf16.mxu1 %v21787_v34  ;;  %16380 = vmatpush2.bf16.msra.mxu0 %v21836_v9  ;;  %v21860_v9 = vld [vmem:[%s24564_s21 + $0x750] ss:$24 sps:$4 sm:$0xff]  }
 0xcb1   :  { %16381 = vmatprep.subr.bf16.mxu0 %v21841_v63  ;;  %v21866_v63 = vld [vmem:[%s24564_s21 + $0x720] ss:$24 sps:$4 sm:$0xff]  }
 0xcb3   :  { %v24719_v33 = vpop.f32.mrf.mxu0  ;;  %16337 = vmatpush2.bf16.msra.mxu1 %v21785_v40 }
 0xcb4   :  { %16338 = vmatprep.subr.bf16.mxu1 %v21790_v52  ;;  %16382 = vmatpush2.bf16.msra.mxu0 %v21839_v22 }
 0xcb5   :  { %v24725_v19 = vpop.f32.mrf.mxu0  ;;  %16383 = vmatprep.subr.bf16.mxu0 %v21844_v23  ;;  %v21880_v23 = vld [vmem:[%s24564_s21 + $0x6c4] ss:$24 sps:$4 sm:$0xff]  }
 0xcb7   :  { %v14540_v43 = vpop.f32.mrf.mxu0  ;;  %16339 = vmatpush2.bf16.msra.mxu1 %v21788_v7 }
 0xcb8   :  { %16340 = vmatprep.subr.bf16.mxu1 %v21793_v37  ;;  %16384 = vmatpush2.bf16.msra.mxu0 %v21842_v47  ;;  %v21868_v43 = vld [vmem:[%s24564_s21 + $0x724] ss:$24 sps:$4 sm:$0xff]   ;;  %v21878_v47 = vld [vmem:[%s24564_s21 + $0x6c0] ss:$24 sps:$4 sm:$0xff]  }
 0xcb9   :  { %v14541_v60 = vpop.f32.mrf.mxu0  ;;  %16385 = vmatprep.subr.bf16.mxu0 %v21847_v6  ;;  %v21884_v6 = vld [vmem:[%s24564_s21 + $0x690] ss:$24 sps:$4 sm:$0xff]  }
 0xcbb   :  { %16341 = vmatpush2.bf16.msra.mxu1 %v21791_v44 }
 0xcbc   :  { %16342 = vmatprep.subr.bf16.mxu1 %v21796_v5  ;;  %16386 = vmatpush2.bf16.msra.mxu0 %v21845_v31  ;;  %v21874_v5 = vld [vmem:[%s24564_s21 + $0x6f4] ss:$24 sps:$4 sm:$0xff]   ;;  %v21890_v31 = vld [vmem:[%s24564_s21 + $0x660] ss:$24 sps:$4 sm:$0xff]  }
 0xcbd   :  { %16387 = vmatprep.subr.bf16.mxu0 %v21850_v58  ;;  %v21896_v58 = vld [vmem:[%s24564_s21 + $0x630] ss:$24 sps:$4 sm:$0xff]  }
 0xcbf   :  { %16343 = vmatpush2.bf16.msra.mxu1 %v21794_v45  ;;  %v21872_v45 = vld [vmem:[%s24564_s21 + $0x6f0] ss:$24 sps:$4 sm:$0xff]  }
 0xcc0   :  { %16344 = vmatprep.subr.bf16.mxu1 %v21799_v26  ;;  %16388 = vmatpush2.bf16.msra.mxu0 %v21848_v54  ;;  %v21902_v54 = vld [vmem:[%s24564_s21 + $0x600] ss:$24 sps:$4 sm:$0xff]  }
 0xcc1   :  { %16389 = vmatprep.subr.bf16.mxu0 %v21853_v12 }
 0xcc3   :  { %16345 = vmatpush2.bf16.msra.mxu1 %v21797_v1  ;;  %v21886_v1 = vld [vmem:[%s24564_s21 + $0x694] ss:$24 sps:$4 sm:$0xff]  }
 0xcc4   :  { %16346 = vmatprep.subr.bf16.mxu1 %v21802_v27  ;;  %16390 = vmatpush2.bf16.msra.mxu0 %v21851_v56  ;;  %v21892_v27 = vld [vmem:[%s24564_s21 + $0x664] ss:$24 sps:$4 sm:$0xff]  }
 0xcc5   :  { %16391 = vmatprep.subr.bf16.mxu0 %v21856_v41 }
 0xcc7   :  { %16347 = vmatpush2.bf16.msra.mxu1 %v21800_v51  ;;  %v21898_v51 = vld [vmem:[%s24564_s21 + $0x634] ss:$24 sps:$4 sm:$0xff]  }
 0xcc8   :  { %16348 = vmatprep.subr.bf16.mxu1 %v21805_v18  ;;  %16392 = vmatpush2.bf16.msra.mxu0 %v21854_v55  ;;  %v21904_v18 = vld [vmem:[%s24564_s21 + $0x604] ss:$24 sps:$4 sm:$0xff]  }
 0xcc9   :  { %16443 = vmatprep.subr.bf16.mxu0 %v21859_v57 }
 0xccb   :  { %16349 = vmatpush2.bf16.msra.mxu1 %v21803_v59  ;;  %v21910_v59 = vld [vmem:[%s24564_s21 + $0x45c] ss:$24 sps:$4 sm:$0xff]  }
 0xccc   :  { %16350 = vmatprep.subr.bf16.mxu1 %v21808_v28 }
 0xccf   :  { %16351 = vmatpush2.bf16.msra.mxu1 %v21806_v61 }
 0xcd0   :  { %16402 = vmatprep.subr.bf16.mxu1 %v21862_v10 }
 0xcd2   :  { %v14495_v42 = vpop.f32.mrf.mxu1 }
 0xcd3   :  { %v14496_v35 = vadd.f32 %v14495_v42, %v24683_v50 }
 0xcd4   :  { %v14497_v11 = vpop.f32.mrf.mxu1 }
 0xcd5   :  { %v14537_v30 = vadd.f32 %v24719_v33, %v14496_v35  ;;  %v14498_v14 = vadd.f32 %v14497_v11, %v14457_v46 }
 0xcd6   :  { %v14499_v8 = vpop.f32.mrf.mxu1 }
 0xcd7   :  { %v14813_v39 = vadd.f32 %v14791_v4, %v14537_v30  ;;  %v14539_v25 = vadd.f32 %v24725_v19, %v14498_v14  ;;  %v14799_v4 = vrot.slane %v24754_v36, %v22694_v2 }
 0xcd8   :  { %v14500_v29 = vpop.f32.mrf.mxu1 }
 0xcd9   :  { %v14823_v0 = vmul.f32 0.70710677, %v14813_v39  ;;  %v14814_v50 = vadd.f32 %v14795_v17, %v14539_v25  ;;  %v14818_v40 = vmul.f32 0.5, %v14813_v39 }
 0xcdb   :  { %22217 = verf.f32 %v14823_v0  ;;  %v14824_v49 = vmul.f32 0.70710677, %v14814_v50  ;;  %v14819_v52 = vmul.f32 0.5, %v14814_v50 }
 0xcdd   :  { %22219 = verf.f32 %v14824_v49 }
 0xce8   :  { %v22218_v21 = vpop.eup %22217 }
 0xce9   :  { %v14833_v34 = vadd.f32 1.0, %v22218_v21 }
 0xcea   :  { %v22220_v38 = vpop.eup %22219 }
 0xceb   :  { %v14834_v33 = vadd.f32 1.0, %v22220_v38  ;;  %v14838_v7 = vmul.f32 %v14833_v34, %v14818_v40 }
 0xced   :  { %v14839_v32 = vmul.f32 %v14834_v33, %v14819_v52  ;;  %v24769_v19 = vpack.c.bf16 %v14838_v7, %v14838_v7 }
 0xcef   :  { %v24766_v37 = vpack.c.bf16 %v14839_v32, %v14839_v32 }
 0xcf1   :  { %16352 = vmatprep.mubr.bf16.mxu1 %v24766_v37 }
 0xcf2   :  { %16353 = vmatmul.mubr.bf16.vlgmr.msra.gmra.mxu1 %v24769_v19 }
 0xcf3   :  { %v14618_v44 = vpop.f32.mrf.mxu0  ;;  %16403 = vmatpush1.bf16.msra.mxu1 %v21860_v9  ;;  %16434 = vmatprep.mubr.bf16.mxu1 %v22242_v53 }
 0xcf4   :  { %16404 = vmatprep.subr.bf16.mxu1 %v21868_v43 }
 0xcf5   :  { %v14620_v22 = vpop.f32.mrf.mxu0 }
 0xcf7   :  { %v14622_v60 = vpop.f32.mrf.mxu0  ;;  %16405 = vmatpush1.bf16.msra.mxu1 %v21866_v63 }
 0xcf8   :  { %16406 = vmatprep.subr.bf16.mxu1 %v21874_v5  ;;  %v21857_v5 = vld [vmem:[%s24564_s21 + $0x158] ss:$24 sps:$4 sm:$0xff]   ;;  %v21865_v60 = vld [vmem:[%s24564_s21 + $0x12c] ss:$24 sps:$4 sm:$0xff]  }
 0xcf9   :  { %v14623_v26 = vpop.f32.mrf.mxu0 }
 0xcfb   :  { %16407 = vmatpush1.bf16.msra.mxu1 %v21872_v45 }
 0xcfc   :  { %16408 = vmatprep.subr.bf16.mxu1 %v21880_v23  ;;  %v21863_v23 = vld [vmem:[%s24564_s21 + $0x128] ss:$24 sps:$4 sm:$0xff]  }
 0xcff   :  { %16409 = vmatpush1.bf16.msra.mxu1 %v21878_v47  ;;  %v21871_v47 = vld [vmem:[%s24564_s21 + $0xfc] ss:$24 sps:$4 sm:$0xff]  }
 0xd00   :  { %16410 = vmatprep.subr.bf16.mxu1 %v21886_v1 }
 0xd03   :  { %16411 = vmatpush1.bf16.msra.mxu1 %v21884_v6 }
 0xd04   :  { %16412 = vmatprep.subr.bf16.mxu1 %v21892_v27 }
 0xd07   :  { %16413 = vmatpush1.bf16.msra.mxu1 %v21890_v31  ;;  %v21869_v31 = vld [vmem:[%s24564_s21 + $0xf8] ss:$24 sps:$4 sm:$0xff]  }
 0xd08   :  { %16414 = vmatprep.subr.bf16.mxu1 %v21898_v51 }
 0xd0b   :  { %16415 = vmatpush1.bf16.msra.mxu1 %v21896_v58  ;;  %v21877_v58 = vld [vmem:[%s24564_s21 + $0xcc] ss:$24 sps:$4 sm:$0xff]  }
 0xd0c   :  { %16416 = vmatprep.subr.bf16.mxu1 %v21904_v18 }
 0xd0f   :  { %16417 = vmatpush1.bf16.msra.mxu1 %v21902_v54  ;;  %v14807_v54 = vrot.slane %v24754_v36, %v22725_v62 }
 0xd10   :  { %16484 = vmatprep.subr.bf16.mxu1 %v21910_v59 }
 0xd12   :  { %v14577_v12 = vpop.f32.mrf.mxu1 }
 0xd13   :  { %v14578_v28 = vadd.f32 %v14577_v12, %v24655_v24  ;;  %v19060_v56 = vpop.f32.mrf.mxu0  ;;  %v14803_v24 = vrot.slane %v24754_v36, %v22697_v3  ;;  %v21887_v36 = vld [vmem:[%s24564_s21 + $0x68] ss:$24 sps:$4 sm:$0xff]  }
 0xd14   :  { %v14579_v61 = vpop.f32.mrf.mxu1 }
 0xd15   :  { %v19061_v55 = vpop.f32.mrf.mxu0  ;;  %v14619_v41 = vadd.f32 %v14618_v44, %v14578_v28  ;;  %v14580_v35 = vadd.f32 %v14579_v61, %v24660_v16  ;;  %v21875_v28 = vld [vmem:[%s24564_s21 + $0xc8] ss:$24 sps:$4 sm:$0xff]  }
 0xd16   :  { %v14581_v57 = vpop.f32.mrf.mxu1  ;;  %v19062_v45 = vadd.f32 %v19061_v55, %v19060_v56  ;;  %v21881_v55 = vld [vmem:[%s24564_s21 + $0x98] ss:$24 sps:$4 sm:$0xff]  }
 0xd17   :  { %v19063_v42 = vpop.f32.mrf.mxu0  ;;  %v14621_v17 = vadd.f32 %v14620_v22, %v14580_v35  ;;  %v21895_v57 = vld [vmem:[%s24564_s21 + $0x3c] ss:$24 sps:$4 sm:$0xff]  }
 0xd18   :  { %v14582_v10 = vpop.f32.mrf.mxu1  ;;  %v14701_v6 = vadd.f32 %v19062_v45, %v24689_v48  ;;  %v21883_v48 = vld [vmem:[%s24564_s21 + $0x9c] ss:$24 sps:$4 sm:$0xff]   ;;  %v21893_v42 = vld [vmem:[%s24564_s21 + $0x38] ss:$24 sps:$4 sm:$0xff]   ;;  %v21938_v45 = vld [vmem:[%s24564_s21 + $0x368] ss:$24 sps:$4 sm:$0xff]  }
 0xd19   :  { %v19064_v46 = vpop.f32.mrf.mxu0  ;;  %v21901_v10 = vld [vmem:[%s24564_s21 + $0xc] ss:$24 sps:$4 sm:$0xff]   ;;  %v21907_v35 = vld [vmem:[%s24564_s21 + $0x2dc] ss:$24 sps:$4 sm:$0xff]  }
 0xd1a   :  { %v21899_v46 = vld [vmem:[%s24564_s21 + $0x8] ss:$24 sps:$4 sm:$0xff]  }
 0xd32   :  { %v14659_v11 = vpop.f32.mrf.mxu1 }
 0xd33   :  { %v14660_v30 = vadd.f32 %v14659_v11, %v14619_v41  ;;  %v14780_v14 = vpop.f32.mrf.mxu0  ;;  %v21889_v41 = vld [vmem:[%s24564_s21 + $0x6c] ss:$24 sps:$4 sm:$0xff]  }
 0xd34   :  { %v14661_v8 = vpop.f32.mrf.mxu1 }
 0xd35   :  { %v14815_v39 = vadd.f32 %v14799_v4, %v14660_v30  ;;  %v14662_v25 = vadd.f32 %v14661_v8, %v14621_v17  ;;  %v19135_v29 = vpop.f32.mrf.mxu0  ;;  %v21913_v17 = vld [vmem:[%s24564_s21 + $0x2ac] ss:$24 sps:$4 sm:$0xff]   ;;  %v21908_v8 = vld [vmem:[%s24564_s21 + $0x458] ss:$24 sps:$4 sm:$0xff]  }
 0xd36   :  { %v14663_v0 = vpop.f32.mrf.mxu1  ;;  %v21916_v29 = vld [vmem:[%s24564_s21 + $0x42c] ss:$24 sps:$4 sm:$0xff]  }
 0xd37   :  { %v14825_v50 = vmul.f32 0.70710677, %v14815_v39  ;;  %v14816_v49 = vadd.f32 %v14803_v24, %v14662_v25  ;;  %v14783_v21 = vpop.f32.mrf.mxu0  ;;  %v14820_v7 = vmul.f32 0.5, %v14815_v39  ;;  %v21911_v25 = vld [vmem:[%s24564_s21 + $0x2a8] ss:$24 sps:$4 sm:$0xff]  }
 0xd38   :  { %v14664_v16 = vpop.f32.mrf.mxu1  ;;  %v21919_v0 = vld [vmem:[%s24564_s21 + $0x27c] ss:$24 sps:$4 sm:$0xff]  }
 0xd39   :  { %22221 = verf.f32 %v14825_v50  ;;  %v14826_v34 = vmul.f32 0.70710677, %v14816_v49  ;;  %v19136_v38 = vpop.f32.mrf.mxu0  ;;  %v14821_v32 = vmul.f32 0.5, %v14816_v49  ;;  %v21914_v50 = vld [vmem:[%s24564_s21 + $0x428] ss:$24 sps:$4 sm:$0xff]  }
 0xd3a   :  { %v21917_v49 = vld [vmem:[%s24564_s21 + $0x278] ss:$24 sps:$4 sm:$0xff]   ;;  %v21922_v21 = vld [vmem:[%s24564_s21 + $0x3fc] ss:$24 sps:$4 sm:$0xff]   ;;  %v21925_v16 = vld [vmem:[%s24564_s21 + $0x24c] ss:$24 sps:$4 sm:$0xff]  }
 0xd3b   :  { %22223 = verf.f32 %v14826_v34  ;;  %v21920_v34 = vld [vmem:[%s24564_s21 + $0x3f8] ss:$24 sps:$4 sm:$0xff]   ;;  %v21923_v38 = vld [vmem:[%s24564_s21 + $0x248] ss:$24 sps:$4 sm:$0xff]  }
 0xd46   :  { %v22222_v40 = vpop.eup %22221 }
 0xd47   :  { %v14835_v52 = vadd.f32 1.0, %v22222_v40  ;;  %v21928_v40 = vld [vmem:[%s24564_s21 + $0x3cc] ss:$24 sps:$4 sm:$0xff]  }
 0xd48   :  { %v22224_v33 = vpop.eup %22223 }
 0xd49   :  { %v14836_v9 = vadd.f32 1.0, %v22224_v33  ;;  %v14840_v43 = vmul.f32 %v14835_v52, %v14820_v7  ;;  %v21931_v52 = vld [vmem:[%s24564_s21 + $0x21c] ss:$24 sps:$4 sm:$0xff]   ;;  %v21926_v33 = vld [vmem:[%s24564_s21 + $0x3c8] ss:$24 sps:$4 sm:$0xff]  }
 0xd4a   :  { %v21929_v7 = vld [vmem:[%s24564_s21 + $0x218] ss:$24 sps:$4 sm:$0xff]  }
 0xd4b   :  { %v14841_v44 = vmul.f32 %v14836_v9, %v14821_v32  ;;  %v24798_v22 = vpack.c.bf16 %v14840_v43, %v14840_v43  ;;  %v21934_v32 = vld [vmem:[%s24564_s21 + $0x39c] ss:$24 sps:$4 sm:$0xff]   ;;  %v21937_v9 = vld [vmem:[%s24564_s21 + $0x1ec] ss:$24 sps:$4 sm:$0xff]   ;;  %v21932_v43 = vld [vmem:[%s24564_s21 + $0x398] ss:$24 sps:$4 sm:$0xff]  }
 0xd4d   :  { %v24795_v63 = vpack.c.bf16 %v14841_v44, %v14841_v44  ;;  %v21935_v44 = vld [vmem:[%s24564_s21 + $0x1e8] ss:$24 sps:$4 sm:$0xff]  }
 0xd4f   :  { %16393 = vmatprep.mubr.bf16.mxu0 %v24795_v63 }
 0xd50   :  { %16394 = vmatmul.mubr.bf16.vlgmr.msra.gmra.mxu0 %v24798_v22 }
 0xd51   :  { %16444 = vmatpush1.bf16.msra.mxu0 %v21857_v5  ;;  %16475 = vmatprep.mubr.bf16.mxu0 %v24766_v37  ;;  %v21940_v5 = vld [vmem:[%s24564_s21 + $0x36c] ss:$24 sps:$4 sm:$0xff]  }
 0xd52   :  { %v19082_v26 = vpop.f32.mrf.mxu1  ;;  %16445 = vmatprep.subr.bf16.mxu0 %v21865_v60  ;;  %v21943_v60 = vld [vmem:[%s24564_s21 + $0x1bc] ss:$24 sps:$4 sm:$0xff]  }
 0xd54   :  { %v19083_v1 = vpop.f32.mrf.mxu1 }
 0xd55   :  { %v19084_v27 = vadd.f32 %v19083_v1, %v19082_v26  ;;  %16446 = vmatpush1.bf16.msra.mxu0 %v21863_v23  ;;  %v21941_v23 = vld [vmem:[%s24564_s21 + $0x1b8] ss:$24 sps:$4 sm:$0xff]   ;;  %v21946_v26 = vld [vmem:[%s24564_s21 + $0x33c] ss:$24 sps:$4 sm:$0xff]  }
 0xd56   :  { %v19085_v51 = vpop.f32.mrf.mxu1  ;;  %16447 = vmatprep.subr.bf16.mxu0 %v21871_v47  ;;  %v21949_v47 = vld [vmem:[%s24564_s21 + $0x18c] ss:$24 sps:$4 sm:$0xff]   ;;  %v21944_v1 = vld [vmem:[%s24564_s21 + $0x338] ss:$24 sps:$4 sm:$0xff]  }
 0xd57   :  { %v14741_v18 = vadd.f32 %v19084_v27, %v14701_v6  ;;  %v21947_v6 = vld [vmem:[%s24564_s21 + $0x188] ss:$24 sps:$4 sm:$0xff]   ;;  %v21952_v27 = vld [vmem:[%s24564_s21 + $0x30c] ss:$24 sps:$4 sm:$0xff]  }
 0xd58   :  { %v19086_v59 = vpop.f32.mrf.mxu1  ;;  %v21950_v51 = vld [vmem:[%s24564_s21 + $0x308] ss:$24 sps:$4 sm:$0xff]  }
 0xd59   :  { %v14781_v12 = vadd.f32 %v14780_v14, %v14741_v18  ;;  %16448 = vmatpush1.bf16.msra.mxu0 %v21869_v31  ;;  %v21905_v14 = vld [vmem:[%s24564_s21 + $0x2d8] ss:$24 sps:$4 sm:$0xff]   ;;  %v21955_v31 = vld [vmem:[%s24564_s21 + $0x75c] ss:$24 sps:$4 sm:$0xff]  }
 0xd5a   :  { %16449 = vmatprep.subr.bf16.mxu0 %v21877_v58  ;;  %v21953_v58 = vld [vmem:[%s24564_s21 + $0x758] ss:$24 sps:$4 sm:$0xff]   ;;  %v21958_v18 = vld [vmem:[%s24564_s21 + $0x5dc] ss:$24 sps:$4 sm:$0xff]  }
 0xd5b   :  { %v14817_v56 = vadd.f32 %v14807_v54, %v14781_v12  ;;  %v21961_v54 = vld [vmem:[%s24564_s21 + $0x72c] ss:$24 sps:$4 sm:$0xff]   ;;  %v21956_v59 = vld [vmem:[%s24564_s21 + $0x5d8] ss:$24 sps:$4 sm:$0xff]   ;;  %v21959_v12 = vld [vmem:[%s24564_s21 + $0x728] ss:$24 sps:$4 sm:$0xff]  }
 0xd5d   :  { %v14827_v61 = vmul.f32 0.70710677, %v14817_v56  ;;  %16450 = vmatpush1.bf16.msra.mxu0 %v21875_v28  ;;  %v14822_v11 = vmul.f32 0.5, %v14817_v56  ;;  %v21964_v28 = vld [vmem:[%s24564_s21 + $0x5ac] ss:$24 sps:$4 sm:$0xff]  }
 0xd5e   :  { %16451 = vmatprep.subr.bf16.mxu0 %v21883_v48  ;;  %v21967_v48 = vld [vmem:[%s24564_s21 + $0x6fc] ss:$24 sps:$4 sm:$0xff]   ;;  %v21962_v56 = vld [vmem:[%s24564_s21 + $0x5a8] ss:$24 sps:$4 sm:$0xff]  }
 0xd5f   :  { %22225 = verf.f32 %v14827_v61  ;;  %v21965_v61 = vld [vmem:[%s24564_s21 + $0x6f8] ss:$24 sps:$4 sm:$0xff]  }
 0xd61   :  { %16452 = vmatpush1.bf16.msra.mxu0 %v21881_v55  ;;  %v21970_v55 = vld [vmem:[%s24564_s21 + $0x57c] ss:$24 sps:$4 sm:$0xff]  }
 0xd62   :  { %16453 = vmatprep.subr.bf16.mxu0 %v21889_v41  ;;  %v21973_v41 = vld [vmem:[%s24564_s21 + $0x6cc] ss:$24 sps:$4 sm:$0xff]  }
 0xd65   :  { %16454 = vmatpush1.bf16.msra.mxu0 %v21887_v36  ;;  %v21968_v36 = vld [vmem:[%s24564_s21 + $0x578] ss:$24 sps:$4 sm:$0xff]  }
 0xd66   :  { %16455 = vmatprep.subr.bf16.mxu0 %v21895_v57  ;;  %v21971_v57 = vld [vmem:[%s24564_s21 + $0x6c8] ss:$24 sps:$4 sm:$0xff]  }
 0xd69   :  { %16456 = vmatpush1.bf16.msra.mxu0 %v21893_v42  ;;  %v21976_v42 = vld [vmem:[%s24564_s21 + $0x54c] ss:$24 sps:$4 sm:$0xff]  }
 0xd6a   :  { %16457 = vmatprep.subr.bf16.mxu0 %v21901_v10  ;;  %v21979_v10 = vld [vmem:[%s24564_s21 + $0x69c] ss:$24 sps:$4 sm:$0xff]  }
 0xd6c   :  { %v22226_v4 = vpop.eup %22225 }
 0xd6d   :  { %v14837_v30 = vadd.f32 1.0, %v22226_v4  ;;  %16458 = vmatpush1.bf16.msra.mxu0 %v21899_v46  ;;  %v21974_v46 = vld [vmem:[%s24564_s21 + $0x548] ss:$24 sps:$4 sm:$0xff]   ;;  %v21982_v4 = vld [vmem:[%s24564_s21 + $0x51c] ss:$24 sps:$4 sm:$0xff]  }
 0xd6e   :  { %16459 = vmatprep.subr.bf16.mxu0 %v21907_v35  ;;  %v21977_v35 = vld [vmem:[%s24564_s21 + $0x698] ss:$24 sps:$4 sm:$0xff]  }
 0xd6f   :  { %v14842_v24 = vmul.f32 %v14837_v30, %v14822_v11  ;;  %v21985_v11 = vld [vmem:[%s24564_s21 + $0x66c] ss:$24 sps:$4 sm:$0xff]   ;;  %v21980_v30 = vld [vmem:[%s24564_s21 + $0x518] ss:$24 sps:$4 sm:$0xff]  }
 0xd71   :  { %v24824_v39 = vpack.c.bf16 %v14842_v24, %v14842_v24  ;;  %16460 = vmatpush2.bf16.msra.mxu0 %v21905_v14  ;;  %v21983_v14 = vld [vmem:[%s24564_s21 + $0x668] ss:$24 sps:$4 sm:$0xff]   ;;  %v21991_v24 = vld [vmem:[%s24564_s21 + $0x63c] ss:$24 sps:$4 sm:$0xff]  }
 0xd72   :  { %16461 = vmatprep.subr.bf16.mxu0 %v21913_v17  ;;  %v21988_v17 = vld [vmem:[%s24564_s21 + $0x4ec] ss:$24 sps:$4 sm:$0xff]  }
 0xd73   :  { %16435 = vmatmul.mubr.bf16.vlgmr.msra.gmra.mxu1 %v24824_v39 }
 0xd74   :  { %16485 = vmatpush1.bf16.msra.mxu1 %v21908_v8  ;;  %16516 = vmatprep.mubr.bf16.mxu1 %v24795_v63  ;;  %v21986_v8 = vld [vmem:[%s24564_s21 + $0x4e8] ss:$24 sps:$4 sm:$0xff]  }
 0xd75   :  { %16462 = vmatpush2.bf16.msra.mxu0 %v21911_v25  ;;  %16486 = vmatprep.subr.bf16.mxu1 %v21916_v29  ;;  %v21989_v25 = vld [vmem:[%s24564_s21 + $0x638] ss:$24 sps:$4 sm:$0xff]   ;;  %v21994_v29 = vld [vmem:[%s24564_s21 + $0x4bc] ss:$24 sps:$4 sm:$0xff]  }
 0xd76   :  { %16463 = vmatprep.subr.bf16.mxu0 %v21919_v0  ;;  %v21997_v0 = vld [vmem:[%s24564_s21 + $0x60c] ss:$24 sps:$4 sm:$0xff]  }
 0xd78   :  { %16487 = vmatpush1.bf16.msra.mxu1 %v21914_v50  ;;  %v21992_v50 = vld [vmem:[%s24564_s21 + $0x4b8] ss:$24 sps:$4 sm:$0xff]  }
 0xd79   :  { %16464 = vmatpush2.bf16.msra.mxu0 %v21917_v49  ;;  %16488 = vmatprep.subr.bf16.mxu1 %v21922_v21  ;;  %v21995_v49 = vld [vmem:[%s24564_s21 + $0x608] ss:$24 sps:$4 sm:$0xff]   ;;  %v22000_v21 = vld [vmem:[%s24564_s21 + $0x48c] ss:$24 sps:$4 sm:$0xff]  }
 0xd7a   :  { %16465 = vmatprep.subr.bf16.mxu0 %v21925_v16  ;;  %v22003_v16 = vld [vmem:[%s24564_s21 + $0x464] ss:$24 sps:$4 sm:$0xff]  }
 0xd7c   :  { %16489 = vmatpush1.bf16.msra.mxu1 %v21920_v34  ;;  %v21998_v34 = vld [vmem:[%s24564_s21 + $0x488] ss:$24 sps:$4 sm:$0xff]  }
 0xd7d   :  { %16466 = vmatpush2.bf16.msra.mxu0 %v21923_v38  ;;  %16490 = vmatprep.subr.bf16.mxu1 %v21928_v40  ;;  %v22001_v38 = vld [vmem:[%s24564_s21 + $0x460] ss:$24 sps:$4 sm:$0xff]   ;;  %v22006_v40 = vld [vmem:[%s24564_s21 + $0x164] ss:$24 sps:$4 sm:$0xff]  }
 0xd7e   :  { %16467 = vmatprep.subr.bf16.mxu0 %v21931_v52  ;;  %v22009_v52 = vld [vmem:[%s24564_s21 + $0x434] ss:$24 sps:$4 sm:$0xff]  }
 0xd80   :  { %16491 = vmatpush1.bf16.msra.mxu1 %v21926_v33  ;;  %v22004_v33 = vld [vmem:[%s24564_s21 + $0x160] ss:$24 sps:$4 sm:$0xff]  }
 0xd81   :  { %16468 = vmatpush2.bf16.msra.mxu0 %v21929_v7  ;;  %16492 = vmatprep.subr.bf16.mxu1 %v21934_v32  ;;  %v22007_v7 = vld [vmem:[%s24564_s21 + $0x430] ss:$24 sps:$4 sm:$0xff]   ;;  %v22012_v32 = vld [vmem:[%s24564_s21 + $0x134] ss:$24 sps:$4 sm:$0xff]  }
 0xd82   :  { %16469 = vmatprep.subr.bf16.mxu0 %v21937_v9 }
 0xd84   :  { %16493 = vmatpush1.bf16.msra.mxu1 %v21932_v43  ;;  %v22015_v43 = vld [vmem:[%s24564_s21 + $0x404] ss:$24 sps:$4 sm:$0xff]  }
 0xd85   :  { %16470 = vmatpush2.bf16.msra.mxu0 %v21935_v44  ;;  %16494 = vmatprep.subr.bf16.mxu1 %v21940_v5  ;;  %v22010_v5 = vld [vmem:[%s24564_s21 + $0x130] ss:$24 sps:$4 sm:$0xff]  }
 0xd86   :  { %16471 = vmatprep.subr.bf16.mxu0 %v21943_v60  ;;  %v22018_v60 = vld [vmem:[%s24564_s21 + $0x104] ss:$24 sps:$4 sm:$0xff]  }
 0xd88   :  { %16495 = vmatpush1.bf16.msra.mxu1 %v21938_v45 }
 0xd89   :  { %16472 = vmatpush2.bf16.msra.mxu0 %v21941_v23  ;;  %16496 = vmatprep.subr.bf16.mxu1 %v21946_v26  ;;  %v22021_v23 = vld [vmem:[%s24564_s21 + $0x3d4] ss:$24 sps:$4 sm:$0xff]  }
 0xd8a   :  { %16473 = vmatprep.subr.bf16.mxu0 %v21949_v47  ;;  %v22016_v47 = vld [vmem:[%s24564_s21 + $0x100] ss:$24 sps:$4 sm:$0xff]  }
 0xd8c   :  { %16497 = vmatpush1.bf16.msra.mxu1 %v21944_v1  ;;  %v22024_v1 = vld [vmem:[%s24564_s21 + $0xd4] ss:$24 sps:$4 sm:$0xff]  }
 0xd8d   :  { %16474 = vmatpush2.bf16.msra.mxu0 %v21947_v6  ;;  %16498 = vmatprep.subr.bf16.mxu1 %v21952_v27  ;;  %v22027_v6 = vld [vmem:[%s24564_s21 + $0x3a4] ss:$24 sps:$4 sm:$0xff]   ;;  %v22022_v27 = vld [vmem:[%s24564_s21 + $0xd0] ss:$24 sps:$4 sm:$0xff]  }
 0xd8e   :  { %16525 = vmatprep.subr.bf16.mxu0 %v21955_v31  ;;  %v22025_v31 = vld [vmem:[%s24564_s21 + $0x3a0] ss:$24 sps:$4 sm:$0xff]  }
 0xd90   :  { %16476 = vmatmul.mubr.bf16.vlgmr.msra.gmra.mxu0 %v24769_v19  ;;  %16499 = vmatpush1.bf16.msra.mxu1 %v21950_v51  ;;  %v22030_v51 = vld [vmem:[%s24564_s21 + $0xa4] ss:$24 sps:$4 sm:$0xff]  }
 0xd91   :  { %16526 = vmatpush1.bf16.msra.mxu0 %v21953_v58  ;;  %16500 = vmatprep.subr.bf16.mxu1 %v21958_v18  ;;  %v22033_v58 = vld [vmem:[%s24564_s21 + $0x374] ss:$24 sps:$4 sm:$0xff]   ;;  %v22028_v18 = vld [vmem:[%s24564_s21 + $0xa0] ss:$24 sps:$4 sm:$0xff]  }
 0xd92   :  { %16527 = vmatprep.subr.bf16.mxu0 %v21961_v54  ;;  %16557 = vmatprep.mubr.bf16.mxu0 %v22242_v53  ;;  %v22031_v54 = vld [vmem:[%s24564_s21 + $0x370] ss:$24 sps:$4 sm:$0xff]  }
 0xd94   :  { %16501 = vmatpush2.bf16.msra.mxu1 %v21956_v59  ;;  %v22036_v59 = vld [vmem:[%s24564_s21 + $0x74] ss:$24 sps:$4 sm:$0xff]  }
 0xd95   :  { %16528 = vmatpush1.bf16.msra.mxu0 %v21959_v12  ;;  %16502 = vmatprep.subr.bf16.mxu1 %v21964_v28  ;;  %v22039_v12 = vld [vmem:[%s24564_s21 + $0x344] ss:$24 sps:$4 sm:$0xff]   ;;  %v22034_v28 = vld [vmem:[%s24564_s21 + $0x70] ss:$24 sps:$4 sm:$0xff]  }
 0xd96   :  { %16529 = vmatprep.subr.bf16.mxu0 %v21967_v48  ;;  %v22037_v48 = vld [vmem:[%s24564_s21 + $0x340] ss:$24 sps:$4 sm:$0xff]  }
 0xd98   :  { %16503 = vmatpush2.bf16.msra.mxu1 %v21962_v56  ;;  %v22042_v56 = vld [vmem:[%s24564_s21 + $0x44] ss:$24 sps:$4 sm:$0xff]  }
 0xd99   :  { %16530 = vmatpush1.bf16.msra.mxu0 %v21965_v61  ;;  %16504 = vmatprep.subr.bf16.mxu1 %v21970_v55  ;;  %v22045_v61 = vld [vmem:[%s24564_s21 + $0x314] ss:$24 sps:$4 sm:$0xff]   ;;  %v22040_v55 = vld [vmem:[%s24564_s21 + $0x40] ss:$24 sps:$4 sm:$0xff]  }
 0xd9a   :  { %16531 = vmatprep.subr.bf16.mxu0 %v21973_v41  ;;  %v22043_v41 = vld [vmem:[%s24564_s21 + $0x310] ss:$24 sps:$4 sm:$0xff]  }
 0xd9c   :  { %16505 = vmatpush2.bf16.msra.mxu1 %v21968_v36  ;;  %v22048_v36 = vld [vmem:[%s24564_s21 + $0x14] ss:$24 sps:$4 sm:$0xff]  }
 0xd9d   :  { %16532 = vmatpush1.bf16.msra.mxu0 %v21971_v57  ;;  %16506 = vmatprep.subr.bf16.mxu1 %v21976_v42  ;;  %v22051_v57 = vld [vmem:[%s24564_s21 + $0x5e4] ss:$24 sps:$4 sm:$0xff]   ;;  %v22046_v42 = vld [vmem:[%s24564_s21 + $0x10] ss:$24 sps:$4 sm:$0xff]  }
 0xd9e   :  { %16533 = vmatprep.subr.bf16.mxu0 %v21979_v10  ;;  %v22049_v10 = vld [vmem:[%s24564_s21 + $0x5e0] ss:$24 sps:$4 sm:$0xff]  }
 0xda0   :  { %16507 = vmatpush2.bf16.msra.mxu1 %v21974_v46  ;;  %v22054_v46 = vld [vmem:[%s24564_s21 + $0x2e4] ss:$24 sps:$4 sm:$0xff]  }
 0xda1   :  { %16534 = vmatpush1.bf16.msra.mxu0 %v21977_v35  ;;  %16508 = vmatprep.subr.bf16.mxu1 %v21982_v4  ;;  %v22057_v35 = vld [vmem:[%s24564_s21 + $0x5b4] ss:$24 sps:$4 sm:$0xff]   ;;  %v22052_v4 = vld [vmem:[%s24564_s21 + $0x2e0] ss:$24 sps:$4 sm:$0xff]  }
 0xda2   :  { %16535 = vmatprep.subr.bf16.mxu0 %v21985_v11  ;;  %v22055_v11 = vld [vmem:[%s24564_s21 + $0x5b0] ss:$24 sps:$4 sm:$0xff]  }
 0xda4   :  { %16509 = vmatpush2.bf16.msra.mxu1 %v21980_v30  ;;  %v22060_v30 = vld [vmem:[%s24564_s21 + $0x2b4] ss:$24 sps:$4 sm:$0xff]  }
 0xda5   :  { %16536 = vmatpush1.bf16.msra.mxu0 %v21983_v14  ;;  %16510 = vmatprep.subr.bf16.mxu1 %v21988_v17  ;;  %v22063_v14 = vld [vmem:[%s24564_s21 + $0x584] ss:$24 sps:$4 sm:$0xff]   ;;  %v22058_v17 = vld [vmem:[%s24564_s21 + $0x2b0] ss:$24 sps:$4 sm:$0xff]  }
 0xda6   :  { %16537 = vmatprep.subr.bf16.mxu0 %v21991_v24  ;;  %v22061_v24 = vld [vmem:[%s24564_s21 + $0x580] ss:$24 sps:$4 sm:$0xff]  }
 0xda8   :  { %16511 = vmatpush2.bf16.msra.mxu1 %v21986_v8  ;;  %v22066_v8 = vld [vmem:[%s24564_s21 + $0x284] ss:$24 sps:$4 sm:$0xff]  }
 0xda9   :  { %16538 = vmatpush1.bf16.msra.mxu0 %v21989_v25  ;;  %16512 = vmatprep.subr.bf16.mxu1 %v21994_v29  ;;  %v22069_v25 = vld [vmem:[%s24564_s21 + $0x554] ss:$24 sps:$4 sm:$0xff]   ;;  %v22064_v29 = vld [vmem:[%s24564_s21 + $0x280] ss:$24 sps:$4 sm:$0xff]  }
 0xdaa   :  { %16539 = vmatprep.subr.bf16.mxu0 %v21997_v0  ;;  %v22067_v0 = vld [vmem:[%s24564_s21 + $0x550] ss:$24 sps:$4 sm:$0xff]  }
 0xdac   :  { %16513 = vmatpush2.bf16.msra.mxu1 %v21992_v50  ;;  %v22072_v50 = vld [vmem:[%s24564_s21 + $0x254] ss:$24 sps:$4 sm:$0xff]  }
 0xdad   :  { %16540 = vmatpush1.bf16.msra.mxu0 %v21995_v49  ;;  %16514 = vmatprep.subr.bf16.mxu1 %v22000_v21  ;;  %v22075_v49 = vld [vmem:[%s24564_s21 + $0x524] ss:$24 sps:$4 sm:$0xff]   ;;  %v22070_v21 = vld [vmem:[%s24564_s21 + $0x250] ss:$24 sps:$4 sm:$0xff]  }
 0xdae   :  { %16607 = vmatprep.subr.bf16.mxu0 %v22003_v16  ;;  %v22073_v16 = vld [vmem:[%s24564_s21 + $0x520] ss:$24 sps:$4 sm:$0xff]  }
 0xdb0   :  { %16515 = vmatpush2.bf16.msra.mxu1 %v21998_v34  ;;  %16558 = vmatmul.mubr.bf16.vlgmr.msra.gmra.mxu0 %v24824_v39  ;;  %v22078_v34 = vld [vmem:[%s24564_s21 + $0x224] ss:$24 sps:$4 sm:$0xff]  }
 0xdb1   :  { %16608 = vmatpush1.bf16.msra.mxu0 %v22001_v38  ;;  %16639 = vmatprep.mubr.bf16.mxu0 %v24795_v63  ;;  %v22013_v63 = vld [vmem:[%s24564_s21 + $0x400] ss:$24 sps:$4 sm:$0xff]   ;;  %v22081_v38 = vld [vmem:[%s24564_s21 + $0x4f4] ss:$24 sps:$4 sm:$0xff]  }
 0xdb2   :  { %v24898_v9 = vpop.f32.mrf.mxu1  ;;  %16566 = vmatprep.subr.bf16.mxu1 %v22006_v40  ;;  %16609 = vmatprep.subr.bf16.mxu0 %v22009_v52  ;;  %v22076_v40 = vld [vmem:[%s24564_s21 + $0x220] ss:$24 sps:$4 sm:$0xff]   ;;  %v22079_v52 = vld [vmem:[%s24564_s21 + $0x4f0] ss:$24 sps:$4 sm:$0xff]  }
 0xdb3   :  { %16517 = vmatmul.mubr.bf16.vlgmr.msra.gmra.mxu1 %v24798_v22 }
 0xdb4   :  { %16567 = vmatpush1.bf16.msra.mxu1 %v22004_v33  ;;  %16598 = vmatprep.mubr.bf16.mxu1 %v24766_v37  ;;  %v24903_v44 = vpop.f32.mrf.mxu1  ;;  %v22019_v37 = vld [vmem:[%s24564_s21 + $0x3d0] ss:$24 sps:$4 sm:$0xff]   ;;  %v22084_v33 = vld [vmem:[%s24564_s21 + $0x1f4] ss:$24 sps:$4 sm:$0xff]  }
 0xdb5   :  { %16610 = vmatpush1.bf16.msra.mxu0 %v22007_v7  ;;  %16568 = vmatprep.subr.bf16.mxu1 %v22012_v32  ;;  %v22087_v7 = vld [vmem:[%s24564_s21 + $0x4c4] ss:$24 sps:$4 sm:$0xff]   ;;  %v22082_v32 = vld [vmem:[%s24564_s21 + $0x1f0] ss:$24 sps:$4 sm:$0xff]  }
 0xdb6   :  { %v16358_v45 = vpop.f32.mrf.mxu1  ;;  %16611 = vmatprep.subr.bf16.mxu0 %v22015_v43  ;;  %v22085_v43 = vld [vmem:[%s24564_s21 + $0x4c0] ss:$24 sps:$4 sm:$0xff]  }
 0xdb7   :  { %v22091_v45 = vld [vmem:[%s24564_s21 + $0x490] ss:$24 sps:$4 sm:$0xff]  }
 0xdb8   :  { %16569 = vmatpush1.bf16.msra.mxu1 %v22010_v5  ;;  %v16359_v26 = vpop.f32.mrf.mxu1  ;;  %v22090_v5 = vld [vmem:[%s24564_s21 + $0x1c4] ss:$24 sps:$4 sm:$0xff]  }
 0xdb9   :  { %16612 = vmatpush1.bf16.msra.mxu0 %v22013_v63  ;;  %16570 = vmatprep.subr.bf16.mxu1 %v22018_v60  ;;  %v22093_v63 = vld [vmem:[%s24564_s21 + $0x494] ss:$24 sps:$4 sm:$0xff]   ;;  %v22088_v60 = vld [vmem:[%s24564_s21 + $0x1c0] ss:$24 sps:$4 sm:$0xff]   ;;  %v22094_v26 = vld [vmem:[%s24564_s21 + $0x190] ss:$24 sps:$4 sm:$0xff]  }
 0xdba   :  { %16613 = vmatprep.subr.bf16.mxu0 %v22021_v23  ;;  %v22096_v23 = vld [vmem:[%s24564_s21 + $0x194] ss:$24 sps:$4 sm:$0xff]  }
 0xdbc   :  { %16571 = vmatpush1.bf16.msra.mxu1 %v22016_v47  ;;  %v22099_v47 = vld [vmem:[%s24564_s21 + $0x764] ss:$24 sps:$4 sm:$0xff]  }
 0xdbd   :  { %16614 = vmatpush1.bf16.msra.mxu0 %v22019_v37  ;;  %16572 = vmatprep.subr.bf16.mxu1 %v22024_v1  ;;  %v22097_v37 = vld [vmem:[%s24564_s21 + $0x760] ss:$24 sps:$4 sm:$0xff]   ;;  %v22102_v1 = vld [vmem:[%s24564_s21 + $0x734] ss:$24 sps:$4 sm:$0xff]  }
 0xdbe   :  { %16615 = vmatprep.subr.bf16.mxu0 %v22027_v6  ;;  %v22100_v6 = vld [vmem:[%s24564_s21 + $0x730] ss:$24 sps:$4 sm:$0xff]  }
 0xdc0   :  { %16573 = vmatpush1.bf16.msra.mxu1 %v22022_v27  ;;  %v22105_v27 = vld [vmem:[%s24564_s21 + $0x704] ss:$24 sps:$4 sm:$0xff]  }
 0xdc1   :  { %16616 = vmatpush1.bf16.msra.mxu0 %v22025_v31  ;;  %16574 = vmatprep.subr.bf16.mxu1 %v22030_v51  ;;  %v22103_v31 = vld [vmem:[%s24564_s21 + $0x700] ss:$24 sps:$4 sm:$0xff]   ;;  %v22106_v51 = vld [vmem:[%s24564_s21 + $0x6d0] ss:$24 sps:$4 sm:$0xff]  }
 0xdc2   :  { %16617 = vmatprep.subr.bf16.mxu0 %v22033_v58  ;;  %v22109_v58 = vld [vmem:[%s24564_s21 + $0x6a0] ss:$24 sps:$4 sm:$0xff]  }
 0xdc4   :  { %16575 = vmatpush1.bf16.msra.mxu1 %v22028_v18  ;;  %v22114_v18 = vld [vmem:[%s24564_s21 + $0x674] ss:$24 sps:$4 sm:$0xff]  }
 0xdc5   :  { %16618 = vmatpush1.bf16.msra.mxu0 %v22031_v54  ;;  %16576 = vmatprep.subr.bf16.mxu1 %v22036_v59  ;;  %v22117_v54 = vld [vmem:[%s24564_s21 + $0x644] ss:$24 sps:$4 sm:$0xff]   ;;  %v22115_v59 = vld [vmem:[%s24564_s21 + $0x640] ss:$24 sps:$4 sm:$0xff]  }
 0xdc6   :  { %16619 = vmatprep.subr.bf16.mxu0 %v22039_v12  ;;  %v22120_v12 = vld [vmem:[%s24564_s21 + $0x614] ss:$24 sps:$4 sm:$0xff]  }
 0xdc8   :  { %16577 = vmatpush1.bf16.msra.mxu1 %v22034_v28  ;;  %v22118_v28 = vld [vmem:[%s24564_s21 + $0x610] ss:$24 sps:$4 sm:$0xff]  }
 0xdc9   :  { %16620 = vmatpush1.bf16.msra.mxu0 %v22037_v48  ;;  %16578 = vmatprep.subr.bf16.mxu1 %v22042_v56 }
 0xdca   :  { %16621 = vmatprep.subr.bf16.mxu0 %v22045_v61 }
 0xdcc   :  { %16579 = vmatpush1.bf16.msra.mxu1 %v22040_v55 }
 0xdcd   :  { %16622 = vmatpush1.bf16.msra.mxu0 %v22043_v41  ;;  %16580 = vmatprep.subr.bf16.mxu1 %v22048_v36  ;;  %v24984_v41 = vld [vmem:[%s16772_s29] sm:$0x3f] }
 0xdce   :  { %16623 = vmatprep.subr.bf16.mxu0 %v22051_v57  ;;  %v15093_v36 = vrot.slane %v24984_v41, %v22650_v13  ;;  %v15097_v57 = vrot.slane %v24984_v41, %v22655_v15 }
 0xdd0   :  { %16581 = vmatpush1.bf16.msra.mxu1 %v22046_v42  ;;  %v16355_v42 = vadd.f32 %v24898_v9, %v15093_v36  ;;  %v15113_v36 = vrot.slane %v24984_v41, %v23245_v20 }
 0xdd1   :  { %16624 = vmatpush2.bf16.msra.mxu0 %v22049_v10  ;;  %16582 = vmatprep.subr.bf16.mxu1 %v22054_v46  ;;  %v16357_v10 = vadd.f32 %v24903_v44, %v15097_v57 }
 0xdd2   :  { %16625 = vmatprep.subr.bf16.mxu0 %v22057_v35 }
 0xdd4   :  { %16583 = vmatpush2.bf16.msra.mxu1 %v22052_v4 }
 0xdd5   :  { %16626 = vmatpush2.bf16.msra.mxu0 %v22055_v11  ;;  %16584 = vmatprep.subr.bf16.mxu1 %v22060_v30 }
 0xdd6   :  { %16627 = vmatprep.subr.bf16.mxu0 %v22063_v14 }
 0xdd8   :  { %16585 = vmatpush2.bf16.msra.mxu1 %v22058_v17 }
 0xdd9   :  { %16628 = vmatpush2.bf16.msra.mxu0 %v22061_v24  ;;  %16586 = vmatprep.subr.bf16.mxu1 %v22066_v8 }
 0xdda   :  { %16629 = vmatprep.subr.bf16.mxu0 %v22069_v25 }
 0xddc   :  { %16587 = vmatpush2.bf16.msra.mxu1 %v22064_v29 }
 0xddd   :  { %16630 = vmatpush2.bf16.msra.mxu0 %v22067_v0  ;;  %16588 = vmatprep.subr.bf16.mxu1 %v22072_v50 }
 0xdde   :  { %16631 = vmatprep.subr.bf16.mxu0 %v22075_v49 }
 0xde0   :  { %16589 = vmatpush2.bf16.msra.mxu1 %v22070_v21 }
 0xde1   :  { %16632 = vmatpush2.bf16.msra.mxu0 %v22073_v16  ;;  %16590 = vmatprep.subr.bf16.mxu1 %v22078_v34 }
 0xde2   :  { %16633 = vmatprep.subr.bf16.mxu0 %v22081_v38  ;;  %v15101_v38 = vrot.slane %v24984_v41, %v22694_v2 }
 0xde4   :  { %16591 = vmatpush2.bf16.msra.mxu1 %v22076_v40  ;;  %v15105_v40 = vrot.slane %v24984_v41, %v22697_v3 }
 0xde5   :  { %16634 = vmatpush2.bf16.msra.mxu0 %v22079_v52  ;;  %16592 = vmatprep.subr.bf16.mxu1 %v22084_v33 }
 0xde6   :  { %16635 = vmatprep.subr.bf16.mxu0 %v22087_v7 }
 0xde8   :  { %16593 = vmatpush2.bf16.msra.mxu1 %v22082_v32 }
 0xde9   :  { %16636 = vmatpush2.bf16.msra.mxu0 %v22085_v43  ;;  %16594 = vmatprep.subr.bf16.mxu1 %v22090_v5 }
 0xdea   :  { %16637 = vmatprep.subr.bf16.mxu0 %v22093_v63 }
 0xdec   :  { %16595 = vmatpush2.bf16.msra.mxu1 %v22088_v60 }
 0xded   :  { %16638 = vmatpush2.bf16.msra.mxu0 %v22091_v45  ;;  %16596 = vmatprep.subr.bf16.mxu1 %v22096_v23 }
 0xdf0   :  { %16597 = vmatpush2.bf16.msra.mxu1 %v22094_v26  ;;  %16640 = vmatmul.mubr.bf16.vlgmr.msra.gmra.mxu0 %v24798_v22  ;;  %v22108_v22 = vld [vmem:[%s24564_s21 + $0x6d4] ss:$24 sps:$4 sm:$0xff]  }
 0xdf1   :  { %16648 = vmatprep.subr.bf16.mxu1 %v22099_v47 }
 0xdf3   :  { %16599 = vmatmul.mubr.bf16.vlgmr.msra.gmra.mxu1 %v24769_v19  ;;  %v22111_v19 = vld [vmem:[%s24564_s21 + $0x6a4] ss:$24 sps:$4 sm:$0xff]  }
 0xdf4   :  { %16649 = vmatpush1.bf16.msra.mxu1 %v22097_v37  ;;  %16680 = vmatprep.mubr.bf16.mxu1 %v22242_v53  ;;  %v22112_v53 = vld [vmem:[%s24564_s21 + $0x670] ss:$24 sps:$4 sm:$0xff]  }
 0xdf5   :  { %16650 = vmatprep.subr.bf16.mxu1 %v22102_v1 }
 0xdf8   :  { %16651 = vmatpush1.bf16.msra.mxu1 %v22100_v6 }
 0xdf9   :  { %16652 = vmatprep.subr.bf16.mxu1 %v22105_v27 }
 0xdfc   :  { %16653 = vmatpush1.bf16.msra.mxu1 %v22103_v31 }
 0xdfd   :  { %16654 = vmatprep.subr.bf16.mxu1 %v22108_v22 }
 0xe00   :  { %16655 = vmatpush1.bf16.msra.mxu1 %v22106_v51 }
 0xe01   :  { %16656 = vmatprep.subr.bf16.mxu1 %v22111_v19 }
 0xe04   :  { %16657 = vmatpush1.bf16.msra.mxu1 %v22109_v58 }
 0xe05   :  { %16658 = vmatprep.subr.bf16.mxu1 %v22114_v18 }
 0xe08   :  { %16659 = vmatpush1.bf16.msra.mxu1 %v22112_v53 }
 0xe09   :  { %16660 = vmatprep.subr.bf16.mxu1 %v22117_v54 }
 0xe0c   :  { %16661 = vmatpush1.bf16.msra.mxu1 %v22115_v59 }
 0xe0d   :  { %16662 = vmatprep.subr.bf16.mxu1 %v22120_v12 }
 0xe10   :  { %16663 = vmatpush1.bf16.msra.mxu1 %v22118_v28  ;;  %v16395_v48 = vpop.f32.mrf.mxu0 }
 0xe12   :  { %v16397_v56 = vpop.f32.mrf.mxu0 }
 0xe13   :  { %16681 = vmatmul.mubr.bf16.vlgmr.msra.gmra.mxu1 %v24824_v39  ;;  %v16396_v39 = vadd.f32 %v16395_v48, %v16355_v42  ;;  %v16398_v35 = vadd.f32 %v16397_v56, %v16357_v10 }
 0xe14   :  { %v16399_v61 = vpop.f32.mrf.mxu0 }
 0xe16   :  { %v16400_v55 = vpop.f32.mrf.mxu0 }
 0xe17   :  { %v15109_v55 = vrot.slane %v24984_v41, %v22725_v62 }
 0xe33   :  { %v16436_v46 = vpop.f32.mrf.mxu1 }
 0xe34   :  { %v16437_v4 = vadd.f32 %v16436_v46, %v16396_v39 }
 0xe35   :  { %v16438_v11 = vpop.f32.mrf.mxu1 }
 0xe36   :  { %v16695_v30 = vmul.f32 0.70710677, %v16437_v4  ;;  %v16439_v14 = vadd.f32 %v16438_v11, %v16398_v35  ;;  %v16689_v15 = vmul.f32 0.5, %v16437_v4 }
 0xe37   :  { %v16440_v17 = vpop.f32.mrf.mxu1 }
 0xe38   :  { %22227 = verf.f32 %v16695_v30  ;;  %v16696_v24 = vmul.f32 0.70710677, %v16439_v14  ;;  %v16690_v29 = vmul.f32 0.5, %v16439_v14 }
 0xe39   :  { %v16441_v8 = vpop.f32.mrf.mxu1 }
 0xe3a   :  { %22229 = verf.f32 %v16696_v24 }
 0xe45   :  { %v22228_v13 = vpop.eup %22227 }
 0xe46   :  { %v16707_v9 = vadd.f32 1.0, %v22228_v13 }
 0xe47   :  { %v22230_v44 = vpop.eup %22229 }
 0xe48   :  { %v16713_v25 = vmul.f32 %v16707_v9, %v16689_v15  ;;  %v16708_v0 = vadd.f32 1.0, %v22230_v44 }
 0xe4a   :  { %16719 = vst [vmem:[%s24995_s3] sm:$0xff] %v16713_v25  ;;  %v16714_v50 = vmul.f32 %v16708_v0, %v16690_v29 }
 0xe4c   :  { %16720 = vst [vmem:[%s24995_s3 + $0x8] sm:$0xff] %v16714_v50 }
 0xe50   :  { %v16477_v49 = vpop.f32.mrf.mxu0 }
 0xe51   :  { %v16478_v33 = vadd.f32 %v16477_v49, %v15101_v38 }
 0xe52   :  { %v16479_v21 = vpop.f32.mrf.mxu0 }
 0xe53   :  { %v16480_v43 = vadd.f32 %v16479_v21, %v15105_v40 }
 0xe54   :  { %v16481_v16 = vpop.f32.mrf.mxu0 }
 0xe56   :  { %v16482_v34 = vpop.f32.mrf.mxu0 }
 0xe70   :  { %v16559_v52 = vpop.f32.mrf.mxu0 }
 0xe72   :  { %v16561_v7 = vpop.f32.mrf.mxu0 }
 0xe73   :  { %v16518_v32 = vpop.f32.mrf.mxu1 }
 0xe74   :  { %v16519_v5 = vadd.f32 %v16518_v32, %v16478_v33  ;;  %v16563_v63 = vpop.f32.mrf.mxu0 }
 0xe75   :  { %v16520_v60 = vpop.f32.mrf.mxu1 }
 0xe76   :  { %v16560_v45 = vadd.f32 %v16559_v52, %v16519_v5  ;;  %v16521_v23 = vadd.f32 %v16520_v60, %v16480_v43  ;;  %v16564_v26 = vpop.f32.mrf.mxu0 }
 0xe77   :  { %v16522_v47 = vpop.f32.mrf.mxu1 }
 0xe78   :  { %v16697_v37 = vmul.f32 0.70710677, %v16560_v45  ;;  %v16562_v1 = vadd.f32 %v16561_v7, %v16521_v23  ;;  %v16691_v27 = vmul.f32 0.5, %v16560_v45 }
 0xe79   :  { %v16523_v2 = vpop.f32.mrf.mxu1 }
 0xe7a   :  { %22231 = verf.f32 %v16697_v37  ;;  %v16698_v6 = vmul.f32 0.70710677, %v16562_v1  ;;  %v16692_v19 = vmul.f32 0.5, %v16562_v1 }
 0xe7c   :  { %22233 = verf.f32 %v16698_v6 }
 0xe87   :  { %v22232_v3 = vpop.eup %22231 }
 0xe88   :  { %v16709_v31 = vadd.f32 1.0, %v22232_v3 }
 0xe89   :  { %v22234_v22 = vpop.eup %22233 }
 0xe8a   :  { %v16715_v51 = vmul.f32 %v16709_v31, %v16691_v27  ;;  %v16710_v58 = vadd.f32 1.0, %v22234_v22 }
 0xe8c   :  { %16721 = vst [vmem:[%s24995_s3 + $0x10] sm:$0xff] %v16715_v51  ;;  %v16716_v18 = vmul.f32 %v16710_v58, %v16692_v19 }
 0xe8e   :  { %16722 = vst [vmem:[%s24995_s3 + $0x18] sm:$0xff] %v16716_v18 }
 0xeb0   :  { %v16641_v53 = vpop.f32.mrf.mxu0 }
 0xeb2   :  { %v16643_v54 = vpop.f32.mrf.mxu0 }
 0xeb3   :  { %v16600_v59 = vpop.f32.mrf.mxu1 }
 0xeb4   :  { %v16645_v12 = vpop.f32.mrf.mxu0  ;;  %v16601_v57 = vadd.f32 %v16600_v59, %v15109_v55 }
 0xeb5   :  { %v16602_v28 = vpop.f32.mrf.mxu1 }
 0xeb6   :  { %v16646_v48 = vpop.f32.mrf.mxu0  ;;  %v16603_v42 = vadd.f32 %v16602_v28, %v15113_v36  ;;  %v16642_v10 = vadd.f32 %v16641_v53, %v16601_v57 }
 0xeb7   :  { %v16604_v56 = vpop.f32.mrf.mxu1 }
 0xeb8   :  { %v16644_v35 = vadd.f32 %v16643_v54, %v16603_v42 }
 0xeb9   :  { %v16605_v61 = vpop.f32.mrf.mxu1 }
 0xed3   :  { %v16682_v39 = vpop.f32.mrf.mxu1 }
 0xed4   :  { %v16683_v46 = vadd.f32 %v16682_v39, %v16642_v10 }
 0xed5   :  { %v16684_v4 = vpop.f32.mrf.mxu1 }
 0xed6   :  { %v16699_v11 = vmul.f32 0.70710677, %v16683_v46  ;;  %v16685_v30 = vadd.f32 %v16684_v4, %v16644_v35  ;;  %v16693_v8 = vmul.f32 0.5, %v16683_v46 }
 0xed7   :  { %v16686_v14 = vpop.f32.mrf.mxu1 }
 0xed8   :  { %22235 = verf.f32 %v16699_v11  ;;  %v16700_v17 = vmul.f32 0.70710677, %v16685_v30  ;;  %v16694_v15 = vmul.f32 0.5, %v16685_v30 }
 0xed9   :  { %v16687_v24 = vpop.f32.mrf.mxu1 }
 0xeda   :  { %22237 = verf.f32 %v16700_v17 }
 0xee5   :  { %v22236_v62 = vpop.eup %22235 }
 0xee6   :  { %v16711_v13 = vadd.f32 1.0, %v22236_v62 }
 0xee7   :  { %v22238_v20 = vpop.eup %22237 }
 0xee8   :  { %v16717_v41 = vmul.f32 %v16711_v13, %v16693_v8  ;;  %v16712_v9 = vadd.f32 1.0, %v22238_v20 }
 0xeea   :  { %16723 = vst [vmem:[%s24995_s3 + $0x20] sm:$0xff] %v16717_v41  ;;  %v16718_v44 = vmul.f32 %v16712_v9, %v16694_v15 }
 0xeec   :  { %16724 = vst [vmem:[%s24995_s3 + $0x28] sm:$0xff] %v16718_v44 }

</bundles_post_ra>
